<compile_context>
chip_gen: v5e
topology: v5e:2x2
jax: 0.10.0
libtpu: 0.0.40
codegen_flags: <defaults>
</compile_context>

<pallas_src>
import jax
import jax.numpy as jnp
import numpy as np
from jax import lax
from jax.experimental import pallas as pl
from jax.experimental.pallas import tpu as pltpu

_HID_PAD = 128      # FC hidden dim (100) padded to a full lane group
_NCLS = 10
_NEG = -1e30        # "-inf" bias for padded logit lanes (vanishes in log-softmax)


def _round_up(a, b):
    return ((a + b - 1) // b) * b


def _chip_defaults():
    """(num_tensorcores, batch_tile, vmem_limit_bytes) per TPU generation."""
    try:
        kind = jax.devices()[0].device_kind.lower()
    except Exception:
        kind = ""
    if "v7" in kind or "7x" in kind:
        # v7x: 64 MiB VMEM, 2 TensorCores -> smaller tiles, >=2 grid steps.
        return 2, 32, 48 * 1024 * 1024
    # v5e / v6e: 128 MiB VMEM, 1 TensorCore -> bigger tiles.
    return 1, 64, 96 * 1024 * 1024


def prepare_params(params, input_size):
    """One-time conversion of PyTorch-convention weights to the kernel layout."""
    w1, b1, w2, b2, wf1, bf1, wf2, bf2 = (np.asarray(p, np.float32) for p in params)
    C0, H, W = input_size
    C1, C2 = w1.shape[0], w2.shape[0]
    HID, NCLS = wf1.shape[0], wf2.shape[0]
    OH1, OW1 = H - 2, W - 2
    OH2, OW2 = OH1 - 2, OW1 - 2
    PH, PW = OH2 // 3, OW2 // 3
    RH, RW = OH2 - 2, OW2 - 2            # all 3-wide window start positions
    assert wf1.shape[1] == C2 * PH * PW

    w1_hwio = np.transpose(w1, (2, 3, 1, 0))      # (kh, kw, ci, co)
    w2_hwio = np.transpose(w2, (2, 3, 1, 0))

    # Block-Toeplitz-over-W conv weights: one (W*Cin, OW*Cout) matrix per kernel
    # row kh, so each conv is 3 accumulated matmuls with lane-dense outputs.
    w1t = np.zeros((3, W * C0, OW1 * C1), np.float32)
    for kh in range(3):
        for ow in range(OW1):
            for kw in range(3):
                wi = ow + kw
                w1t[kh, wi * C0:(wi + 1) * C0, ow * C1:(ow + 1) * C1] = w1_hwio[kh, kw]

    w2t = np.zeros((3, OW1 * C1, OW2 * C2), np.float32)
    for kh in range(3):
        for ow in range(OW2):
            for kw in range(3):
                wi = ow + kw
                w2t[kh, wi * C1:(wi + 1) * C1, ow * C2:(ow + 1) * C2] = w2_hwio[kh, kw]

    b1t = np.tile(b1, OW1)[None, :]               # (1, OW1*C1)
    b2t = np.tile(b2, OW2)[None, :]               # (1, OW2*C2)

    # FC1 acts on the kernel's flatten of ALL 3x3-max window starts
    # (r, g, c) -> r*(RW*C2) + g*C2 + c.  Only stride-3-aligned windows
    # (r = 3*ph, g = 3*pw) get nonzero rows: this simultaneously selects the
    # MaxPool grid and performs the PyTorch NCHW-flatten reorder.
    wf1k = np.zeros((RH * RW * C2, _HID_PAD), np.float32)
    for ph in range(PH):
        for pw in range(PW):
            row0 = (3 * ph) * (RW * C2) + (3 * pw) * C2
            cols = np.arange(C2) * (PH * PW) + ph * PW + pw
            wf1k[row0:row0 + C2, :HID] = wf1[:, cols].T
    bf1k = np.zeros((1, _HID_PAD), np.float32)
    bf1k[0, :HID] = bf1

    # FC2 padded to (128, 128); padded logit lanes get a very negative bias so
    # they contribute nothing to the 128-lane log-softmax.
    wf2k = np.zeros((_HID_PAD, _HID_PAD), np.float32)
    wf2k[:HID, :NCLS] = wf2.T
    bf2k = np.full((1, _HID_PAD), _NEG, np.float32)
    bf2k[0, :NCLS] = bf2

    return (jnp.asarray(w1t, jnp.bfloat16), jnp.asarray(b1t, jnp.float32),
            jnp.asarray(w2t, jnp.bfloat16), jnp.asarray(b2t, jnp.float32),
            jnp.asarray(wf1k, jnp.bfloat16), jnp.asarray(bf1k, jnp.float32),
            jnp.asarray(wf2k, jnp.bfloat16), jnp.asarray(bf2k, jnp.float32))


def network_forward(x_nchw, kparams, *, batch_tile=None, vmem_limit_bytes=None):
    """x_nchw: (N, 3, H, W) float32 (PyTorch layout). Returns (N, 10) log-probs."""
    w1t, b1t, w2t, b2t, wf1k, bf1k, wf2k, bf2k = kparams
    N, C0, H, W = x_nchw.shape
    WC0 = W * C0
    OW1C1 = w1t.shape[-1]
    OW2C2 = w2t.shape[-1]
    OH1, OW1 = H - 2, W - 2
    OH2, OW2 = OH1 - 2, OW1 - 2
    C2 = OW2C2 // OW2
    RH = OH2 - 2                      # H window starts
    LWC = OW2C2 - 2 * C2              # (W window starts) * C2 lanes
    FLAT = wf1k.shape[0]              # RH * RW * C2

    n_cores, bt_default, vmem_default = _chip_defaults()
    if batch_tile is None:
        batch_tile = bt_default
    if vmem_limit_bytes is None:
        vmem_limit_bytes = vmem_default

    # Lane-dense bf16 activations in HBM: (N, H, W*C0).
    x = jnp.transpose(x_nchw, (0, 2, 3, 1)).reshape(N, H, WC0).astype(jnp.bfloat16)

    # Batch tile: 8-aligned, capped per-chip; guarantee >= num_tensorcores grid
    # steps so the "parallel" batch axis can use both v7x TensorCores.
    tb = max(8, min(batch_tile, _round_up(pl.cdiv(N, n_cores), 8)))
    tb = _round_up(tb, 8)
    n_steps = max(pl.cdiv(N, tb), n_cores)
    n_pad = n_steps * tb
    if n_pad != N:
        x = jnp.pad(x, ((0, n_pad - N), (0, 0), (0, 0)))

    def kernel(x_ref, w1t_ref, b1t_ref, w2t_ref, b2t_ref,
               wf1_ref, bf1_ref, wf2_ref, bf2_ref, out_ref):
        xt = x_ref[...]                                        # (tb, H, W*C0) bf16

        # ---- Conv2d(3->32, 3) + ReLU: 3 accumulated MXU matmuls (one per kh)
        #      against block-Toeplitz-over-W weights; output lanes = (ow, c1).
        acc1 = jnp.dot(xt[:, 0:OH1, :].reshape(tb * OH1, WC0), w1t_ref[0],
                       preferred_element_type=jnp.float32)
        for kh in (1, 2):
            acc1 = acc1 + jnp.dot(xt[:, kh:kh + OH1, :].reshape(tb * OH1, WC0),
                                  w1t_ref[kh], preferred_element_type=jnp.float32)
        h1 = jnp.maximum(acc1 + b1t_ref[...], 0.0)
        h1 = h1.reshape(tb, OH1, OW1C1).astype(jnp.bfloat16)

        # ---- Conv2d(32->32, 3) + ReLU: same structure.
        acc2 = jnp.dot(h1[:, 0:OH2, :].reshape(tb * OH2, OW1C1), w2t_ref[0],
                       preferred_element_type=jnp.float32)
        for kh in (1, 2):
            acc2 = acc2 + jnp.dot(h1[:, kh:kh + OH2, :].reshape(tb * OH2, OW1C1),
                                  w2t_ref[kh], preferred_element_type=jnp.float32)
        h2 = jnp.maximum(acc2 + b2t_ref[...], 0.0).reshape(tb, OH2, OW2C2)

        # ---- MaxPool2d((3, 3)): shifted-slab maxes along H (sublane axis) and
        #      along the (W, C) lane axis. All window starts are kept; selecting
        #      the stride-3 pool grid is folded into zero rows of wf1.
        hmax = jnp.maximum(jnp.maximum(h2[:, 0:RH, :], h2[:, 1:RH + 1, :]),
                           h2[:, 2:RH + 2, :])                 # (tb, RH, OW2*C2)
        wmax = jnp.maximum(
            jnp.maximum(hmax[:, :, 0:LWC], hmax[:, :, C2:C2 + LWC]),
            hmax[:, :, 2 * C2:2 * C2 + LWC])                   # (tb, RH, RW*C2)

        # ---- Flatten + Linear(flat, 128-padded) + Dropout + ReLU ----
        # TODO(synk): Dropout(p=0.2) is treated as identity (eval/inference mode).
        flat = wmax.reshape(tb, FLAT).astype(jnp.bfloat16)
        z1 = jnp.dot(flat, wf1_ref[...],
                     preferred_element_type=jnp.float32) + bf1_ref[...]
        z1 = jnp.maximum(z1, 0.0).astype(jnp.bfloat16)

        # ---- Linear(128-padded, 128-padded) + LogSoftmax (lane-dense 128) ----
        logits = jnp.dot(z1, wf2_ref[...],
                         preferred_element_type=jnp.float32) + bf2_ref[...]
        m = jnp.max(logits, axis=-1, keepdims=True)
        s = logits - m
        lse = jnp.log(jnp.sum(jnp.exp(s), axis=-1, keepdims=True))
        out_ref[...] = s - lse

    flops_tile = (3 * 2 * (tb * OH1) * WC0 * OW1C1
                  + 3 * 2 * (tb * OH2) * OW1C1 * OW2C2
                  + 2 * tb * FLAT * _HID_PAD
                  + 2 * tb * _HID_PAD * _HID_PAD)
    bytes_accessed = int(x.size * x.dtype.itemsize
                         + sum(a.size * a.dtype.itemsize for a in kparams)
                         + n_pad * _HID_PAD * 4)
    cost = pl.CostEstimate(flops=int(flops_tile * n_steps),
                           transcendentals=int(n_pad * (_HID_PAD + 1)),
                           bytes_accessed=bytes_accessed)

    def whole(a):   # whole-array VMEM block, constant across the batch grid
        return pl.BlockSpec(a.shape, lambda i, _nd=a.ndim: (0,) * _nd)

    out = pl.pallas_call(
        kernel,
        out_shape=jax.ShapeDtypeStruct((n_pad, _HID_PAD), jnp.float32),
        grid=(n_steps,),
        in_specs=[
            pl.BlockSpec((tb, H, WC0), lambda i: (i, 0, 0)),
            whole(w1t), whole(b1t), whole(w2t), whole(b2t),
            whole(wf1k), whole(bf1k), whole(wf2k), whole(bf2k),
        ],
        out_specs=pl.BlockSpec((tb, _HID_PAD), lambda i: (i, 0)),
        compiler_params=pltpu.CompilerParams(
            dimension_semantics=("parallel",),          # shard batch tiles across TCs
            vmem_limit_bytes=vmem_limit_bytes),
        cost_estimate=cost,
    )(x, w1t, b1t, w2t, b2t, wf1k, bf1k, wf2k, bf2k)

    return out[:N, :_NCLS]


def _reference_forward(x_nchw, params):
    """Pure-JAX f32 reference mirroring the PyTorch module (eval mode)."""
    w1, b1, w2, b2, wf1, bf1, wf2, bf2 = params
    dn = ("NCHW", "OIHW", "NCHW")
    y = lax.conv_general_dilated(x_nchw, w1, (1, 1), "VALID", dimension_numbers=dn)
    y = jnp.maximum(y + b1[None, :, None, None], 0.0)
    y = lax.conv_general_dilated(y, w2, (1, 1), "VALID", dimension_numbers=dn)
    y = jnp.maximum(y + b2[None, :, None, None], 0.0)
    y = lax.reduce_window(y, -jnp.inf, lax.max, (1, 1, 3, 3), (1, 1, 3, 3), "VALID")
    f = y.reshape(y.shape[0], -1)
    z = jnp.maximum(f @ wf1.T + bf1, 0.0)
    logits = z @ wf2.T + bf2
    return jax.nn.log_softmax(logits, axis=-1)


def init_params(key, input_size=(3, 16, 16)):
    """Deterministic synthetic parameters, PyTorch-convention shapes."""
    C0, H, W = input_size
    C1, C2, HID, NCLS = 32, 32, 100, 10
    OH2, OW2 = H - 4, W - 4
    PH, PW = OH2 // 3, OW2 // 3
    flat_fts = C2 * PH * PW
    ks = jax.random.split(key, 8)
    s = 0.05
    w1 = jax.random.normal(ks[0], (C1, C0, 3, 3), jnp.float32) * s
    b1 = jax.random.normal(ks[1], (C1,), jnp.float32) * s
    w2 = jax.random.normal(ks[2], (C2, C1, 3, 3), jnp.float32) * s
    b2 = jax.random.normal(ks[3], (C2,), jnp.float32) * s
    wf1 = jax.random.normal(ks[4], (HID, flat_fts), jnp.float32) * s
    bf1 = jax.random.normal(ks[5], (HID,), jnp.float32) * s
    wf2 = jax.random.normal(ks[6], (NCLS, HID), jnp.float32) * s
    bf2 = jax.random.normal(ks[7], (NCLS,), jnp.float32) * s
    return (w1, b1, w2, b2, wf1, bf1, wf2, bf2)


if __name__ == "__main__":
    key = jax.random.PRNGKey(0)
    pkey, xkey = jax.random.split(key)
    input_size = (3, 16, 16)                 # Network(input_size=(3, 16, 16)), small shapes
    batch = 2
    params = init_params(pkey, input_size)
    kparams = prepare_params(params, input_size)      # one-time weight re-layout
    x = jax.random.normal(xkey, (batch, *input_size), jnp.float32)

    out = jax.jit(network_forward)(x, kparams)
    out = jax.block_until_ready(out)

    assert out.shape == (batch, _NCLS), out.shape
    assert out.dtype == jnp.float32
    assert bool(jnp.all(jnp.isfinite(out)))
    # log-softmax rows should sum to ~1 after exp
    assert jnp.allclose(jnp.sum(jnp.exp(out), axis=-1), 1.0, atol=1e-4)
    # parity with a pure-XLA f32 reference (bf16 matmuls -> loose tolerance)
    ref = _reference_forward(x, params)
    assert float(jnp.max(jnp.abs(out - ref))) < 0.15, float(jnp.max(jnp.abs(out - ref)))
    print("KERNEL_OK")
</pallas_src>

<mosaic_0001>
module attributes {stable_mosaic.version = 11 : i64} {
  func.func @kernel(%arg0: i32, %arg1: memref<8x16x48xbf16, #tpu.memory_space<vmem>>, %arg2: memref<3x48x448xbf16, #tpu.memory_space<vmem>>, %arg3: memref<1x448xf32, #tpu.memory_space<vmem>>, %arg4: memref<3x448x384xbf16, #tpu.memory_space<vmem>>, %arg5: memref<1x384xf32, #tpu.memory_space<vmem>>, %arg6: memref<3200x128xbf16, #tpu.memory_space<vmem>>, %arg7: memref<1x128xf32, #tpu.memory_space<vmem>>, %arg8: memref<128x128xbf16, #tpu.memory_space<vmem>>, %arg9: memref<1x128xf32, #tpu.memory_space<vmem>>, %arg10: memref<8x128xf32, #tpu.memory_space<vmem>>) attributes {dimension_semantics = [#tpu.dimension_semantics<parallel>], iteration_bounds = array<i64: 1>, scalar_prefetch = 0 : i64, scratch_operands = 0 : i64, tpu.core_type = #tpu.core_type<tc>, window_params = [{transform_indices = @transform_0, window_bounds = array<i64: 8, 16, 48>}, {pipeline_mode = #tpu.pipeline_mode<synchronous>, transform_indices = @transform_1, window_bounds = array<i64: 3, 48, 448>}, {pipeline_mode = #tpu.pipeline_mode<synchronous>, transform_indices = @transform_2, window_bounds = array<i64: 1, 448>}, {pipeline_mode = #tpu.pipeline_mode<synchronous>, transform_indices = @transform_3, window_bounds = array<i64: 3, 448, 384>}, {pipeline_mode = #tpu.pipeline_mode<synchronous>, transform_indices = @transform_4, window_bounds = array<i64: 1, 384>}, {pipeline_mode = #tpu.pipeline_mode<synchronous>, transform_indices = @transform_5, window_bounds = array<i64: 3200, 128>}, {pipeline_mode = #tpu.pipeline_mode<synchronous>, transform_indices = @transform_6, window_bounds = array<i64: 1, 128>}, {pipeline_mode = #tpu.pipeline_mode<synchronous>, transform_indices = @transform_7, window_bounds = array<i64: 128, 128>}, {pipeline_mode = #tpu.pipeline_mode<synchronous>, transform_indices = @transform_8, window_bounds = array<i64: 1, 128>}, {transform_indices = @transform_9, window_bounds = array<i64: 8, 128>}]} {
    %c0 = arith.constant 0 : index
    %c0_0 = arith.constant 0 : index
    %c0_1 = arith.constant 0 : index
    %0 = vector.load %arg1[%c0, %c0_0, %c0_1] : memref<8x16x48xbf16, #tpu.memory_space<vmem>>, vector<8x16x48xbf16>
    %1 = vector.extract_strided_slice %0 {offsets = [0, 0, 0], sizes = [8, 14, 48], strides = [1, 1, 1]} : vector<8x16x48xbf16> to vector<8x14x48xbf16>
    %2 = vector.shape_cast %1 : vector<8x14x48xbf16> to vector<112x48xbf16>
    %c0_2 = arith.constant 0 : index
    %c0_3 = arith.constant 0 : index
    %c0_4 = arith.constant 0 : index
    %3 = vector.load %arg2[%c0_2, %c0_3, %c0_4] : memref<3x48x448xbf16, #tpu.memory_space<vmem>>, vector<1x48x448xbf16>
    %4 = vector.shape_cast %3 : vector<1x48x448xbf16> to vector<48x448xbf16>
    %cst = arith.constant dense<0.000000e+00> : vector<112x448xf32>
    %5 = tpu.matmul %2, %4, %cst {dimension_numbers = #tpu.dot_dimension_numbers<[1], [0], [0], [1], [0, 0, 1, 1], [], []>} : vector<112x48xbf16>, vector<48x448xbf16>, vector<112x448xf32> -> vector<112x448xf32>
    %6 = vector.extract_strided_slice %0 {offsets = [0, 1, 0], sizes = [8, 14, 48], strides = [1, 1, 1]} : vector<8x16x48xbf16> to vector<8x14x48xbf16>
    %7 = vector.shape_cast %6 : vector<8x14x48xbf16> to vector<112x48xbf16>
    %c1 = arith.constant 1 : index
    %c0_5 = arith.constant 0 : index
    %c0_6 = arith.constant 0 : index
    %8 = vector.load %arg2[%c1, %c0_5, %c0_6] : memref<3x48x448xbf16, #tpu.memory_space<vmem>>, vector<1x48x448xbf16>
    %9 = vector.shape_cast %8 : vector<1x48x448xbf16> to vector<48x448xbf16>
    %cst_7 = arith.constant dense<0.000000e+00> : vector<112x448xf32>
    %10 = tpu.matmul %7, %9, %cst_7 {dimension_numbers = #tpu.dot_dimension_numbers<[1], [0], [0], [1], [0, 0, 1, 1], [], []>} : vector<112x48xbf16>, vector<48x448xbf16>, vector<112x448xf32> -> vector<112x448xf32>
    %11 = arith.addf %5, %10 : vector<112x448xf32>
    %12 = vector.extract_strided_slice %0 {offsets = [0, 2, 0], sizes = [8, 14, 48], strides = [1, 1, 1]} : vector<8x16x48xbf16> to vector<8x14x48xbf16>
    %13 = vector.shape_cast %12 : vector<8x14x48xbf16> to vector<112x48xbf16>
    %c2 = arith.constant 2 : index
    %c0_8 = arith.constant 0 : index
    %c0_9 = arith.constant 0 : index
    %14 = vector.load %arg2[%c2, %c0_8, %c0_9] : memref<3x48x448xbf16, #tpu.memory_space<vmem>>, vector<1x48x448xbf16>
    %15 = vector.shape_cast %14 : vector<1x48x448xbf16> to vector<48x448xbf16>
    %cst_10 = arith.constant dense<0.000000e+00> : vector<112x448xf32>
    %16 = tpu.matmul %13, %15, %cst_10 {dimension_numbers = #tpu.dot_dimension_numbers<[1], [0], [0], [1], [0, 0, 1, 1], [], []>} : vector<112x48xbf16>, vector<48x448xbf16>, vector<112x448xf32> -> vector<112x448xf32>
    %17 = arith.addf %11, %16 : vector<112x448xf32>
    %c0_11 = arith.constant 0 : index
    %c0_12 = arith.constant 0 : index
    %18 = vector.load %arg3[%c0_11, %c0_12] : memref<1x448xf32, #tpu.memory_space<vmem>>, vector<1x448xf32>
    %19 = vector.broadcast %18 : vector<1x448xf32> to vector<112x448xf32>
    %20 = arith.addf %17, %19 : vector<112x448xf32>
    %cst_13 = arith.constant 0.000000e+00 : f32
    %21 = vector.broadcast %cst_13 : f32 to vector<112x448xf32>
    %22 = arith.maximumf %20, %21 : vector<112x448xf32>
    %23 = vector.shape_cast %22 : vector<112x448xf32> to vector<8x14x448xf32>
    %24 = arith.truncf %23 : vector<8x14x448xf32> to vector<8x14x448xbf16>
    %25 = vector.extract_strided_slice %24 {offsets = [0, 0, 0], sizes = [8, 12, 448], strides = [1, 1, 1]} : vector<8x14x448xbf16> to vector<8x12x448xbf16>
    %26 = vector.shape_cast %25 : vector<8x12x448xbf16> to vector<96x448xbf16>
    %c0_14 = arith.constant 0 : index
    %c0_15 = arith.constant 0 : index
    %c0_16 = arith.constant 0 : index
    %27 = vector.load %arg4[%c0_14, %c0_15, %c0_16] : memref<3x448x384xbf16, #tpu.memory_space<vmem>>, vector<1x448x384xbf16>
    %28 = vector.shape_cast %27 : vector<1x448x384xbf16> to vector<448x384xbf16>
    %cst_17 = arith.constant dense<0.000000e+00> : vector<96x384xf32>
    %29 = tpu.matmul %26, %28, %cst_17 {dimension_numbers = #tpu.dot_dimension_numbers<[1], [0], [0], [1], [0, 0, 1, 1], [], []>} : vector<96x448xbf16>, vector<448x384xbf16>, vector<96x384xf32> -> vector<96x384xf32>
    %30 = vector.extract_strided_slice %24 {offsets = [0, 1, 0], sizes = [8, 12, 448], strides = [1, 1, 1]} : vector<8x14x448xbf16> to vector<8x12x448xbf16>
    %31 = vector.shape_cast %30 : vector<8x12x448xbf16> to vector<96x448xbf16>
    %c1_18 = arith.constant 1 : index
    %c0_19 = arith.constant 0 : index
    %c0_20 = arith.constant 0 : index
    %32 = vector.load %arg4[%c1_18, %c0_19, %c0_20] : memref<3x448x384xbf16, #tpu.memory_space<vmem>>, vector<1x448x384xbf16>
    %33 = vector.shape_cast %32 : vector<1x448x384xbf16> to vector<448x384xbf16>
    %cst_21 = arith.constant dense<0.000000e+00> : vector<96x384xf32>
    %34 = tpu.matmul %31, %33, %cst_21 {dimension_numbers = #tpu.dot_dimension_numbers<[1], [0], [0], [1], [0, 0, 1, 1], [], []>} : vector<96x448xbf16>, vector<448x384xbf16>, vector<96x384xf32> -> vector<96x384xf32>
    %35 = arith.addf %29, %34 : vector<96x384xf32>
    %36 = vector.extract_strided_slice %24 {offsets = [0, 2, 0], sizes = [8, 12, 448], strides = [1, 1, 1]} : vector<8x14x448xbf16> to vector<8x12x448xbf16>
    %37 = vector.shape_cast %36 : vector<8x12x448xbf16> to vector<96x448xbf16>
    %c2_22 = arith.constant 2 : index
    %c0_23 = arith.constant 0 : index
    %c0_24 = arith.constant 0 : index
    %38 = vector.load %arg4[%c2_22, %c0_23, %c0_24] : memref<3x448x384xbf16, #tpu.memory_space<vmem>>, vector<1x448x384xbf16>
    %39 = vector.shape_cast %38 : vector<1x448x384xbf16> to vector<448x384xbf16>
    %cst_25 = arith.constant dense<0.000000e+00> : vector<96x384xf32>
    %40 = tpu.matmul %37, %39, %cst_25 {dimension_numbers = #tpu.dot_dimension_numbers<[1], [0], [0], [1], [0, 0, 1, 1], [], []>} : vector<96x448xbf16>, vector<448x384xbf16>, vector<96x384xf32> -> vector<96x384xf32>
    %41 = arith.addf %35, %40 : vector<96x384xf32>
    %c0_26 = arith.constant 0 : index
    %c0_27 = arith.constant 0 : index
    %42 = vector.load %arg5[%c0_26, %c0_27] : memref<1x384xf32, #tpu.memory_space<vmem>>, vector<1x384xf32>
    %43 = vector.broadcast %42 : vector<1x384xf32> to vector<96x384xf32>
    %44 = arith.addf %41, %43 : vector<96x384xf32>
    %cst_28 = arith.constant 0.000000e+00 : f32
    %45 = vector.broadcast %cst_28 : f32 to vector<96x384xf32>
    %46 = arith.maximumf %44, %45 : vector<96x384xf32>
    %47 = vector.shape_cast %46 : vector<96x384xf32> to vector<8x12x384xf32>
    %48 = vector.extract_strided_slice %47 {offsets = [0, 0, 0], sizes = [8, 10, 384], strides = [1, 1, 1]} : vector<8x12x384xf32> to vector<8x10x384xf32>
    %49 = vector.extract_strided_slice %47 {offsets = [0, 1, 0], sizes = [8, 10, 384], strides = [1, 1, 1]} : vector<8x12x384xf32> to vector<8x10x384xf32>
    %50 = arith.maximumf %48, %49 : vector<8x10x384xf32>
    %51 = vector.extract_strided_slice %47 {offsets = [0, 2, 0], sizes = [8, 10, 384], strides = [1, 1, 1]} : vector<8x12x384xf32> to vector<8x10x384xf32>
    %52 = arith.maximumf %50, %51 : vector<8x10x384xf32>
    %53 = vector.extract_strided_slice %52 {offsets = [0, 0, 0], sizes = [8, 10, 320], strides = [1, 1, 1]} : vector<8x10x384xf32> to vector<8x10x320xf32>
    %54 = vector.extract_strided_slice %52 {offsets = [0, 0, 32], sizes = [8, 10, 320], strides = [1, 1, 1]} : vector<8x10x384xf32> to vector<8x10x320xf32>
    %55 = arith.maximumf %53, %54 : vector<8x10x320xf32>
    %56 = vector.extract_strided_slice %52 {offsets = [0, 0, 64], sizes = [8, 10, 320], strides = [1, 1, 1]} : vector<8x10x384xf32> to vector<8x10x320xf32>
    %57 = arith.maximumf %55, %56 : vector<8x10x320xf32>
    %58 = vector.shape_cast %57 : vector<8x10x320xf32> to vector<8x3200xf32>
    %59 = arith.truncf %58 : vector<8x3200xf32> to vector<8x3200xbf16>
    %c0_29 = arith.constant 0 : index
    %c0_30 = arith.constant 0 : index
    %60 = vector.load %arg6[%c0_29, %c0_30] : memref<3200x128xbf16, #tpu.memory_space<vmem>>, vector<3200x128xbf16>
    %cst_31 = arith.constant dense<0.000000e+00> : vector<8x128xf32>
    %61 = tpu.matmul %59, %60, %cst_31 {dimension_numbers = #tpu.dot_dimension_numbers<[1], [0], [0], [1], [0, 0, 1, 1], [], []>} : vector<8x3200xbf16>, vector<3200x128xbf16>, vector<8x128xf32> -> vector<8x128xf32>
    %c0_32 = arith.constant 0 : index
    %c0_33 = arith.constant 0 : index
    %62 = vector.load %arg7[%c0_32, %c0_33] : memref<1x128xf32, #tpu.memory_space<vmem>>, vector<1x128xf32>
    %63 = vector.broadcast %62 : vector<1x128xf32> to vector<8x128xf32>
    %64 = arith.addf %61, %63 : vector<8x128xf32>
    %cst_34 = arith.constant 0.000000e+00 : f32
    %65 = vector.broadcast %cst_34 : f32 to vector<8x128xf32>
    %66 = arith.maximumf %64, %65 : vector<8x128xf32>
    %67 = arith.truncf %66 : vector<8x128xf32> to vector<8x128xbf16>
    %c0_35 = arith.constant 0 : index
    %c0_36 = arith.constant 0 : index
    %68 = vector.load %arg8[%c0_35, %c0_36] : memref<128x128xbf16, #tpu.memory_space<vmem>>, vector<128x128xbf16>
    %cst_37 = arith.constant dense<0.000000e+00> : vector<8x128xf32>
    %69 = tpu.matmul %67, %68, %cst_37 {dimension_numbers = #tpu.dot_dimension_numbers<[1], [0], [0], [1], [0, 0, 1, 1], [], []>} : vector<8x128xbf16>, vector<128x128xbf16>, vector<8x128xf32> -> vector<8x128xf32>
    %c0_38 = arith.constant 0 : index
    %c0_39 = arith.constant 0 : index
    %70 = vector.load %arg9[%c0_38, %c0_39] : memref<1x128xf32, #tpu.memory_space<vmem>>, vector<1x128xf32>
    %71 = vector.broadcast %70 : vector<1x128xf32> to vector<8x128xf32>
    %72 = arith.addf %69, %71 : vector<8x128xf32>
    %cst_40 = arith.constant dense<0xFF800000> : vector<8xf32>
    %73 = vector.multi_reduction <maximumf>, %72, %cst_40 [1] : vector<8x128xf32> to vector<8xf32>
    %74 = vector.shape_cast %73 : vector<8xf32> to vector<8x1xf32>
    %75 = vector.broadcast %74 : vector<8x1xf32> to vector<8x128xf32>
    %76 = arith.subf %72, %75 : vector<8x128xf32>
    %77 = math.exp %76 : vector<8x128xf32>
    %cst_41 = arith.constant dense<0.000000e+00> : vector<8xf32>
    %78 = vector.multi_reduction <add>, %77, %cst_41 [1] : vector<8x128xf32> to vector<8xf32>
    %79 = vector.shape_cast %78 : vector<8xf32> to vector<8x1xf32>
    %80 = math.log %79 : vector<8x1xf32>
    %81 = vector.broadcast %80 : vector<8x1xf32> to vector<8x128xf32>
    %82 = arith.subf %76, %81 : vector<8x128xf32>
    %c0_42 = arith.constant 0 : index
    %c0_43 = arith.constant 0 : index
    %83 = vector.load %arg10[%c0_42, %c0_43] : memref<8x128xf32, #tpu.memory_space<vmem>>, vector<8x128xf32>
    tpu.vector_store %arg10[%c0_42, %c0_43], %82 {strides = array<i32>} : memref<8x128xf32, #tpu.memory_space<vmem>>, vector<8x128xf32>,
    return
  }
  func.func @transform_0(%arg0: i32) -> (i32, i32, i32) {
    %c0_i32 = arith.constant 0 : i32
    %c0_i32_0 = arith.constant 0 : i32
    %c0_i32_1 = arith.constant 0 : i32
    return %arg0, %c0_i32, %c0_i32_0 : i32, i32, i32
  }
  func.func @transform_1(%arg0: i32) -> (i32, i32, i32) {
    %c0_i32 = arith.constant 0 : i32
    %c0_i32_0 = arith.constant 0 : i32
    %c0_i32_1 = arith.constant 0 : i32
    %c0_i32_2 = arith.constant 0 : i32
    return %c0_i32, %c0_i32_0, %c0_i32_1 : i32, i32, i32
  }
  func.func @transform_2(%arg0: i32) -> (i32, i32) {
    %c0_i32 = arith.constant 0 : i32
    %c0_i32_0 = arith.constant 0 : i32
    %c0_i32_1 = arith.constant 0 : i32
    return %c0_i32, %c0_i32_0 : i32, i32
  }
  func.func @transform_3(%arg0: i32) -> (i32, i32, i32) {
    %c0_i32 = arith.constant 0 : i32
    %c0_i32_0 = arith.constant 0 : i32
    %c0_i32_1 = arith.constant 0 : i32
    %c0_i32_2 = arith.constant 0 : i32
    return %c0_i32, %c0_i32_0, %c0_i32_1 : i32, i32, i32
  }
  func.func @transform_4(%arg0: i32) -> (i32, i32) {
    %c0_i32 = arith.constant 0 : i32
    %c0_i32_0 = arith.constant 0 : i32
    %c0_i32_1 = arith.constant 0 : i32
    return %c0_i32, %c0_i32_0 : i32, i32
  }
  func.func @transform_5(%arg0: i32) -> (i32, i32) {
    %c0_i32 = arith.constant 0 : i32
    %c0_i32_0 = arith.constant 0 : i32
    %c0_i32_1 = arith.constant 0 : i32
    return %c0_i32, %c0_i32_0 : i32, i32
  }
  func.func @transform_6(%arg0: i32) -> (i32, i32) {
    %c0_i32 = arith.constant 0 : i32
    %c0_i32_0 = arith.constant 0 : i32
    %c0_i32_1 = arith.constant 0 : i32
    return %c0_i32, %c0_i32_0 : i32, i32
  }
  func.func @transform_7(%arg0: i32) -> (i32, i32) {
    %c0_i32 = arith.constant 0 : i32
    %c0_i32_0 = arith.constant 0 : i32
    %c0_i32_1 = arith.constant 0 : i32
    return %c0_i32, %c0_i32_0 : i32, i32
  }
  func.func @transform_8(%arg0: i32) -> (i32, i32) {
    %c0_i32 = arith.constant 0 : i32
    %c0_i32_0 = arith.constant 0 : i32
    %c0_i32_1 = arith.constant 0 : i32
    return %c0_i32, %c0_i32_0 : i32, i32
  }
  func.func @transform_9(%arg0: i32) -> (i32, i32) {
    %c0_i32 = arith.constant 0 : i32
    %c0_i32_0 = arith.constant 0 : i32
    return %arg0, %c0_i32 : i32, i32
  }
}

</mosaic_0001>

<bundles_post_ra>
// kernel: network_forward.1
= control target key start
LH: loop header
LB: loop body
LE: loop exit
PB: predicated region body
PF: predicated region fallthrough
CT: control target
= control target key end

     0   :  { %14 = vsyncpa [#allocation3], 0  ;;  %s18807_s0 = inlined_call_operand.vmem [shape: bf16[8,16,48], index: 0, kind: input, shape index: {}]   ;;  %s18808_s1 = inlined_call_operand.vmem [shape: bf16[3,48,448], index: 1, kind: input, shape index: {}]   ;;  %s18809_s2 = inlined_call_operand.vmem [shape: f32[1,448], index: 2, kind: input, shape index: {}]   ;;  %s18810_s3 = inlined_call_operand.hbm [shape: bf16[3,448,384], index: 3, kind: input, shape index: {}]   ;;  %s18811_s4 = inlined_call_operand.vmem [shape: f32[1,384], index: 4, kind: input, shape index: {}]   ;;  %s18812_s5 = inlined_call_operand.hbm [shape: bf16[3200,128], index: 5, kind: input, shape index: {}]   ;;  %s18813_s6 = inlined_call_operand.vmem [shape: f32[1,128], index: 6, kind: input, shape index: {}]   ;;  %s18814_s7 = inlined_call_operand.vmem [shape: bf16[128,128], index: 7, kind: input, shape index: {}]   ;;  %s18815_s8 = inlined_call_operand.vmem [shape: f32[1,128], index: 8, kind: input, shape index: {}]   ;;  %s18816_s9 = inlined_call_operand.vmem [shape: f32[8,128], index: 9, kind: output, shape index: {}]  }
   0x1   :  { %s26_s11 = sshll.u32 %s18810_s3, 4  ;;  %s27_s11 = int_to_ptr.hbm [resolvable:$true] %s26_s11 }
   0x2   :  { %15 = vsyncpa [#allocation5], 0  ;;  %s13522_s12 = smov [#allocation2]   ;;  %s41_s16 = sshll.u32 %s18812_s5, 4  ;;  %s42_s16 = int_to_ptr.hbm [resolvable:$true] %s41_s16 }
   0x3   :  { %s28_s13 = sshll.u32 %s13522_s12, 4  ;;  %s13523_s17 = smov 192   ;;  %s29_s13 = int_to_ptr.vmem [resolvable:$true] %s28_s13 }
   0x4   :  { %s13524_s18 = smov 12   ;;  %s13525_s19 = smov [#allocation4]  }
   0x5   :  { %34 = dma.hbm_to_vmem [thread:$0]  %s27_s11, 32256, %s29_s13, [#allocation3], %s13523_s17, %s13523_s17, %s13524_s18  }
   0x6   :  { %s43_s20 = sshll.u32 %s13525_s19, 4  ;;  %s13526_s21 = smov 64   ;;  %s44_s20 = int_to_ptr.vmem [resolvable:$true] %s43_s20 }
   0x7   :  { %s13527_s22 = smov 4  }
   0x8   :  { %49 = dma.hbm_to_vmem [thread:$0]  %s42_s16, 25600, %s44_s20, [#allocation5], %s13526_s21, %s13526_s21, %s13527_s22  }
   0x9   :  { %13518 = dma.done.wait [#allocation3], 32256  }
   0xa   :  { %13519 = vsyncadd [#allocation3], 4294935040 }
   0xb   :  { %13520 = dma.done.wait [#allocation5], 25600  }
   0xc   :  { %13521 = vsyncadd [#allocation5], 4294941696  ;;  %vm321_vm0 = vsmask.f32 256  ;;  %vm322_vm1 = vsmask.f32 1284 }
   0xd   :  { %vm324_vm2 = vsmask.f32 2312  ;;  %vm323_vm3 = vmor %vm321_vm0, %vm322_vm1  ;;  %vm326_vm4 = vsmask.f32 3340  ;;  %vm328_vm5 = vsmask.f32 4368 }
   0xe   :  { %vm325_vm6 = vmor %vm323_vm3, %vm324_vm2  ;;  %vm330_vm7 = vsmask.f32 5396  ;;  %vm113_vm9 = vcmask 1040384   ;;  %vm117_vm11 = vcmask 1041409   ;;  %vm121_vm12 = vcmask 1042434  }
   0xf   :  { %vm327_vm8 = vmor %vm325_vm6, %vm326_vm4  ;;  %vm125_vm13 = vcmask 1043459   ;;  %vm332_vm15 = vsmask.f32 6424  ;;  %v10793_v1 = vld [vmem:[%s18808_s1 + $0xa0] sm:$0xf]  ;;  %vm975_vm3 = vcmask 392192  }
  0x10   :  { %vm329_vm10 = vmor %vm327_vm8, %vm328_vm5  ;;  %v12955_v2 = vld [vmem:[%s18808_s1 + $0xac] sm:$0xf0]  ;;  %v12953_v3 = vld [vmem:[%s18808_s1 + $0xa4] sm:$0xf]  ;;  %vm334_vm0 = vsmask.f32 7452 }
  0x11   :  { %vm13589_vm14 = vmor %vm329_vm10, %vm330_vm7  ;;  %v10794_v4 = vor.u32 %v12955_v2, %v10793_v1  ;;  %v10795_v5 = vld [vmem:[%s18808_s1 + $0xb0] sm:$0xf0]  ;;  %v10777_v6 = vld [vmem:[%s18808_s1 + $0x80] sm:$0xf]  ;;  %vm2174_vm4 = vcmask 1041408   ;;  %vm2176_vm5 = vcmask 1045508  }
  0x12   :  { %v12951_v7 = vld [vmem:[%s18808_s1 + $0x8c] sm:$0xf0]  ;;  %v10798_v8 = vor.u32 %v12953_v3, %v10795_v5  ;;  %v12949_v9 = vld [vmem:[%s18808_s1 + $0x84] sm:$0xf]  ;;  %v10779_v10 = vld [vmem:[%s18808_s1 + $0x90] sm:$0xf0] }
  0x13   :  { %v10761_v11 = vld [vmem:[%s18808_s1 + $0x60] sm:$0xf]  ;;  %995 = vmatpush.bf16.msra.mxu0 %v10794_v4  ;;  %v10778_v12 = vor.u32 %v12951_v7, %v10777_v6  ;;  %v12947_v13 = vld [vmem:[%s18808_s1 + $0x6c] sm:$0xf0]  ;;  %v12945_v14 = vld [vmem:[%s18808_s1 + $0x64] sm:$0xf]  ;;  %13429 = vmatpush.bf16.msra.mxu2 %v10794_v4  ;;  %v10782_v16 = vor.u32 %v12949_v9, %v10779_v10 }
  0x14   :  { %v10763_v15 = vld [vmem:[%s18808_s1 + $0x70] sm:$0xf0]  ;;  %1039 = vmatpush.bf16.msra.mxu1 %v10798_v8  ;;  %v13632_v17 = vld [vmem:[%s18807_s0] sm:$0xf]  ;;  %v13637_v18 = vld [vmem:[%s18807_s0 + $0x4] sm:$0xf]  ;;  %13432 = vmatpush.bf16.msra.mxu3 %v10798_v8  ;;  %v10762_v24 = vor.u32 %v12947_v13, %v10761_v11 }
  0x15   :  { %19017 = vst [vmem:[#allocation8_spill] sm:$0xff] %v13632_v17  ;;  %v13642_v19 = vld [vmem:[%s18807_s0 + $0x8] sm:$0xf]  ;;  %v97_v20 = vrot.slane %v13632_v17, 3  ;;  %v98_v21 = vrot.slane %v13637_v18, 3  ;;  %v10766_v25 = vor.u32 %v12945_v14, %v10763_v15  ;;  %vm13670_vm1 = vmor %vm13589_vm14, %vm332_vm15  ;;  %vm2180_vm6 = vcmask 1043458  }
  0x16   :  { %19018 = vst [vmem:[#allocation9_spill] sm:$0xff] %v13637_v18  ;;  %v13647_v22 = vrot.slane %v13642_v19, 3  ;;  %v13652_v23 = vld [vmem:[%s18807_s0 + $0xc] sm:$0xf]  ;;  %vm13707_vm2 = vmor %vm13670_vm1, %vm334_vm0  ;;  %v13732_v61 = vld [vmem:[%s18807_s0 + $0x10] sm:$0xf] }
  0x17   :  { %19019 = vst [vmem:[#allocation10_spill] sm:$0xff] %v13642_v19  ;;  %v13655_v26 = vrot.slane %v13652_v23, 3  ;;  %996 = vmatpush.bf16.msra.mxu0 %v10778_v12  ;;  %v13659_v27 = vsel %vm113_vm9, %v13632_v17, %v97_v20  ;;  %v118_v28 = vsel %vm117_vm11, %v13632_v17, %v97_v20  ;;  %v122_v29 = vsel %vm121_vm12, %v13632_v17, %v97_v20  ;;  %v10785_v44 = vld [vmem:[%s18808_s1 + $0x88] sm:$0xf] }
  0x18   :  { %19020 = vst [vmem:[#allocation11_spill] sm:$0xff] %v13652_v23  ;;  %v126_v30 = vsel %vm125_vm13, %v13632_v17, %v97_v20  ;;  %1040 = vmatpush.bf16.msra.mxu1 %v10782_v16  ;;  %v13674_v32 = vrot.slane %v118_v28, 1  ;;  %v13676_v33 = vrot.slane %v122_v29, 2  ;;  %v13682_v35 = vsel %vm113_vm9, %v13637_v18, %v98_v21  ;;  %13430 = vmatpush.bf16.msra.mxu2 %v10778_v12 }
  0x19   :  { %v13678_v34 = vrot.slane %v126_v30, 3  ;;  %v132_v36 = vsel %vm117_vm11, %v13637_v18, %v98_v21  ;;  %v135_v37 = vsel %vm121_vm12, %v13637_v18, %v98_v21  ;;  %v13691_v38 = vsel %vm113_vm9, %v13642_v19, %v13647_v22  ;;  %13433 = vmatpush.bf16.msra.mxu3 %v10782_v16  ;;  %19025 = vst [vmem:[#allocation12_spill] sm:$0xff] %v13732_v61 }
  0x1a   :  { %v141_v39 = vsel %vm117_vm11, %v13642_v19, %v13647_v22  ;;  %v13696_v40 = vrot.slane %v132_v36, 1  ;;  %v13698_v41 = vrot.slane %v135_v37, 2  ;;  %v297_v43 = vsel %vm125_vm13, %v13637_v18, %v98_v21 }
  0x1b   :  { %v13700_v42 = vrot.slane %v141_v39, 1  ;;  %997 = vmatpush.bf16.msra.mxu0 %v10762_v24  ;;  %v299_v45 = vrot.slane %v297_v43, 3  ;;  %v336_v46 = vshrl.u32 %v13659_v27, 16  ;;  %v341_v47 = vshll.u32 %v13674_v32, 16 }
  0x1c   :  { %v344_v48 = vshrl.u32 %v13674_v32, 16  ;;  %1041 = vmatpush.bf16.msra.mxu1 %v10766_v25  ;;  %v349_v49 = vshll.u32 %v13676_v33, 16  ;;  %v352_v50 = vshrl.u32 %v13676_v33, 16  ;;  %v357_v51 = vshll.u32 %v13678_v34, 16  ;;  %13431 = vmatpush.bf16.msra.mxu2 %v10762_v24 }
  0x1d   :  { %v360_v52 = vshrl.u32 %v13678_v34, 16  ;;  %v343_v53 = vsel %vm13707_vm2, %v336_v46, %v341_v47  ;;  %v364_v54 = vshll.u32 %v13682_v35, 16  ;;  %v367_v55 = vshrl.u32 %v13682_v35, 16  ;;  %13434 = vmatpush.bf16.msra.mxu3 %v10766_v25  ;;  %v13799_v46 = vld [vmem:[%s18807_s0 + $0x14] sm:$0xf] }
  0x1e   :  { %v372_v56 = vshll.u32 %v13696_v40, 16  ;;  %v351_v57 = vsel %vm13707_vm2, %v344_v48, %v349_v49  ;;  %v359_v58 = vsel %vm13707_vm2, %v352_v50, %v357_v51  ;;  %v375_v59 = vshrl.u32 %v13696_v40, 16  ;;  %790 = vst [vmem:[#allocation1] ss:$9 sm:$0xff] %v343_v53 }
  0x1f   :  { %v380_v60 = vshll.u32 %v13698_v41, 16  ;;  %v366_v62 = vsel %vm13707_vm2, %v360_v52, %v364_v54  ;;  %v383_v0 = vshrl.u32 %v13698_v41, 16  ;;  %v388_v1 = vshll.u32 %v299_v45, 16  ;;  %793 = vst [vmem:[#allocation1 + $0x1] ss:$9 sm:$0xff] %v351_v57 }
  0x20   :  { %v374_v63 = vsel %vm13707_vm2, %v367_v55, %v372_v56  ;;  %v391_v3 = vshrl.u32 %v13691_v38, 16  ;;  %v396_v4 = vshll.u32 %v13700_v42, 16  ;;  %796 = vst [vmem:[#allocation1 + $0x2] ss:$9 sm:$0xff] %v359_v58  ;;  %v101_v6 = vrot.slane %v13732_v61, 3 }
  0x21   :  { %v382_v2 = vsel %vm13707_vm2, %v375_v59, %v380_v60  ;;  %v390_v5 = vsel %vm13707_vm2, %v383_v0, %v388_v1  ;;  %799 = vst [vmem:[#allocation1 + $0x3] ss:$9 sm:$0xff] %v366_v62  ;;  %v144_v7 = vsel %vm121_vm12, %v13642_v19, %v13647_v22  ;;  %v147_v8 = vsel %vm125_vm13, %v13642_v19, %v13647_v22  ;;  %v13817_v57 = vld [vmem:[%s18807_s0 + $0x18] sm:$0xf] }
  0x22   :  { %v398_v9 = vsel %vm13707_vm2, %v391_v3, %v396_v4  ;;  %802 = vst [vmem:[#allocation1 + $0x4] ss:$9 sm:$0xff] %v374_v63  ;;  %v13754_v10 = vrot.slane %v144_v7, 2  ;;  %v153_v11 = vsel %vm117_vm11, %v13652_v23, %v13655_v26  ;;  %v13759_v12 = vrot.slane %v147_v8, 3 }
  0x23   :  { %805 = vst [vmem:[#allocation1 + $0x5] ss:$9 sm:$0xff] %v382_v2  ;;  %v156_v13 = vsel %vm121_vm12, %v13652_v23, %v13655_v26  ;;  %v300_v14 = vsel %vm125_vm13, %v13652_v23, %v13655_v26  ;;  %v13770_v15 = vsel %vm113_vm9, %v13652_v23, %v13655_v26  ;;  %v13772_v16 = vrot.slane %v153_v11, 1 }
  0x24   :  { %808 = vst [vmem:[#allocation1 + $0x6] ss:$9 sm:$0xff] %v390_v5  ;;  %v162_v20 = vsel %vm117_vm11, %v13732_v61, %v101_v6  ;;  %v13776_v21 = vrot.slane %v156_v13, 2  ;;  %v165_v22 = vsel %vm121_vm12, %v13732_v61, %v101_v6  ;;  %v399_v24 = vshrl.u32 %v13700_v42, 16 }
  0x25   :  { %811 = vst [vmem:[#allocation1 + $0x7] ss:$9 sm:$0xff] %v398_v9  ;;  %v404_v25 = vshll.u32 %v13754_v10, 16  ;;  %v302_v28 = vrot.slane %v300_v14, 3  ;;  %v407_v29 = vshrl.u32 %v13754_v10, 16  ;;  %v412_v26 = vshll.u32 %v13759_v12, 16 }
  0x26   :  { %v13784_v30 = vrot.slane %v162_v20, 1  ;;  %v415_v31 = vshrl.u32 %v13759_v12, 16  ;;  %v419_v36 = vshll.u32 %v13770_v15, 16  ;;  %v13790_v37 = vsel %vm113_vm9, %v13732_v61, %v101_v6  ;;  %19026 = vst [vmem:[#allocation13_spill] sm:$0xff] %v13799_v46 }
  0x27   :  { %v13792_v39 = vrot.slane %v165_v22, 2  ;;  %v422_v43 = vshrl.u32 %v13770_v15, 16  ;;  %v427_v45 = vshll.u32 %v13772_v16, 16  ;;  %v406_v47 = vsel %vm13707_vm2, %v399_v24, %v404_v25  ;;  %19027 = vst [vmem:[#allocation14_spill] sm:$0xff] %v13817_v57 }
  0x28   :  { %v430_v48 = vshrl.u32 %v13772_v16, 16  ;;  %v435_v49 = vshll.u32 %v13776_v21, 16  ;;  %v414_v50 = vsel %vm13707_vm2, %v407_v29, %v412_v26  ;;  %v438_v51 = vshrl.u32 %v13776_v21, 16 }
  0x29   :  { %v443_v52 = vshll.u32 %v302_v28, 16  ;;  %v421_v54 = vsel %vm13707_vm2, %v415_v31, %v419_v36  ;;  %v446_v55 = vshrl.u32 %v13790_v37, 16  ;;  %v451_v56 = vshll.u32 %v13784_v30, 16 }
  0x2a   :  { %v102_v58 = vrot.slane %v13799_v46, 3  ;;  %v429_v59 = vsel %vm13707_vm2, %v422_v43, %v427_v45  ;;  %v454_v60 = vshrl.u32 %v13784_v30, 16  ;;  %v459_v62 = vshll.u32 %v13792_v39, 16 }
  0x2b   :  { %v437_v63 = vsel %vm13707_vm2, %v430_v48, %v435_v49  ;;  %v168_v0 = vsel %vm125_vm13, %v13732_v61, %v101_v6  ;;  %v445_v1 = vsel %vm13707_vm2, %v438_v51, %v443_v52  ;;  %v103_v2 = vrot.slane %v13817_v57, 3  ;;  %v13878_v48 = vld [vmem:[%s18807_s0 + $0x1c] sm:$0xf] }
  0x2c   :  { %v13808_v53 = vld [vmem:[#allocation1] sm:$0xff]  ;;  %v453_v3 = vsel %vm13707_vm2, %v446_v55, %v451_v56  ;;  %v174_v4 = vsel %vm117_vm11, %v13799_v46, %v102_v58  ;;  %v461_v5 = vsel %vm13707_vm2, %v454_v60, %v459_v62  ;;  %v13841_v7 = vrot.slane %v168_v0, 3  ;;  %19028 = vst [vmem:[#allocation15_spill] sm:$0xff] %v13878_v48 }
  0x2d   :  { %10807 = vmatmul.msk.bf16.vlgmr.msra.gmra.mxu0 %vm975_vm3, %v13808_v53  ;;  %10814 = vmatmul.msk.bf16.vlgmr.msra.gmra.mxu1 %vm975_vm3, %v13808_v53  ;;  %814 = vst [vmem:[#allocation1] ss:$9 sm:$0xff] %v406_v47  ;;  %v177_v6 = vsel %vm121_vm12, %v13799_v46, %v102_v58  ;;  %v303_v8 = vsel %vm125_vm13, %v13799_v46, %v102_v58  ;;  %v13851_v11 = vrot.slane %v174_v4, 1  ;;  %v462_v25 = vshrl.u32 %v13792_v39, 16  ;;  %v13894_v60 = vld [vmem:[%s18807_s0 + $0x20] sm:$0xf] }
  0x2e   :  { %816 = vst [vmem:[#allocation1 + $0x1] ss:$9 sm:$0xff] %v414_v50  ;;  %v13849_v9 = vsel %vm113_vm9, %v13799_v46, %v102_v58  ;;  %v183_v13 = vsel %vm117_vm11, %v13817_v57, %v103_v2  ;;  %v13855_v14 = vrot.slane %v177_v6, 2  ;;  %v186_v20 = vsel %vm121_vm12, %v13817_v57, %v103_v2 }
  0x2f   :  { %818 = vst [vmem:[#allocation1 + $0x2] ss:$9 sm:$0xff] %v421_v54  ;;  %v189_v22 = vsel %vm125_vm13, %v13817_v57, %v103_v2  ;;  %v305_v24 = vrot.slane %v303_v8, 3  ;;  %v467_v28 = vshll.u32 %v13841_v7, 16  ;;  %v13863_v29 = vrot.slane %v183_v13, 1 }
  0x30   :  { %820 = vst [vmem:[#allocation1 + $0x3] ss:$9 sm:$0xff] %v429_v59  ;;  %v470_v26 = vshrl.u32 %v13841_v7, 16  ;;  %v474_v31 = vshll.u32 %v13849_v9, 16  ;;  %v13869_v36 = vsel %vm113_vm9, %v13817_v57, %v103_v2  ;;  %v13871_v43 = vrot.slane %v186_v20, 2 }
  0x31   :  { %822 = vst [vmem:[#allocation1 + $0x4] ss:$9 sm:$0xff] %v437_v63  ;;  %v477_v45 = vshrl.u32 %v13849_v9, 16  ;;  %v482_v47 = vshll.u32 %v13851_v11, 16  ;;  %v13880_v49 = vrot.slane %v189_v22, 3  ;;  %v485_v50 = vshrl.u32 %v13851_v11, 16 }
  0x32   :  { %824 = vst [vmem:[#allocation1 + $0x5] ss:$9 sm:$0xff] %v445_v1  ;;  %v490_v51 = vshll.u32 %v13855_v14, 16  ;;  %v469_v52 = vsel %vm13707_vm2, %v462_v25, %v467_v28  ;;  %v493_v54 = vshrl.u32 %v13855_v14, 16  ;;  %v498_v55 = vshll.u32 %v305_v24, 16 }
  0x33   :  { %826 = vst [vmem:[#allocation1 + $0x6] ss:$9 sm:$0xff] %v453_v3  ;;  %v476_v56 = vsel %vm13707_vm2, %v470_v26, %v474_v31  ;;  %v501_v58 = vshrl.u32 %v13869_v36, 16  ;;  %v506_v59 = vshll.u32 %v13863_v29, 16  ;;  %v104_v62 = vrot.slane %v13878_v48, 3 }
  0x34   :  { %828 = vst [vmem:[#allocation1 + $0x7] ss:$9 sm:$0xff] %v461_v5  ;;  %v484_v0 = vsel %vm13707_vm2, %v477_v45, %v482_v47  ;;  %v509_v1 = vshrl.u32 %v13863_v29, 16  ;;  %v514_v2 = vshll.u32 %v13871_v43, 16  ;;  %v492_v3 = vsel %vm13707_vm2, %v485_v50, %v490_v51  ;;  %v13929_v26 = vld [vmem:[%s18807_s0 + $0x24] sm:$0xf] }
  0x35   :  { %19029 = vst [vmem:[#allocation16_spill] sm:$0xff] %v13894_v60  ;;  %v517_v4 = vshrl.u32 %v13871_v43, 16  ;;  %v522_v5 = vshll.u32 %v13880_v49, 16  ;;  %v500_v6 = vsel %vm13707_vm2, %v493_v54, %v498_v55  ;;  %v105_v8 = vrot.slane %v13894_v60, 3 }
  0x36   :  { %v508_v13 = vsel %vm13707_vm2, %v501_v58, %v506_v59  ;;  %v195_v20 = vsel %vm117_vm11, %v13878_v48, %v104_v62  ;;  %v516_v22 = vsel %vm13707_vm2, %v509_v1, %v514_v2  ;;  %v198_v24 = vsel %vm121_vm12, %v13878_v48, %v104_v62  ;;  %19030 = vst [vmem:[#allocation17_spill] sm:$0xff] %v13929_v26 }
  0x37   :  { %v524_v25 = vsel %vm13707_vm2, %v517_v4, %v522_v5  ;;  %v306_v28 = vsel %vm125_vm13, %v13878_v48, %v104_v62  ;;  %v13933_v31 = vsel %vm113_vm9, %v13878_v48, %v104_v62  ;;  %v13935_v45 = vrot.slane %v195_v20, 1 }
  0x38   :  { %v204_v47 = vsel %vm117_vm11, %v13894_v60, %v105_v8  ;;  %v13939_v50 = vrot.slane %v198_v24, 2  ;;  %v207_v51 = vsel %vm121_vm12, %v13894_v60, %v105_v8  ;;  %v308_v54 = vrot.slane %v306_v28, 3 }
  0x39   :  { %v106_v55 = vrot.slane %v13929_v26, 3  ;;  %v525_v58 = vshrl.u32 %v13880_v49, 16  ;;  %v529_v59 = vshll.u32 %v13933_v31, 16  ;;  %v13952_v62 = vsel %vm113_vm9, %v13894_v60, %v105_v8 }
  0x3a   :  { %v532_v1 = vshrl.u32 %v13933_v31, 16  ;;  %v537_v2 = vshll.u32 %v13935_v45, 16  ;;  %v540_v4 = vshrl.u32 %v13935_v45, 16  ;;  %v545_v5 = vshll.u32 %v13939_v50, 16 }
  0x3b   :  { %v13897_v63 = vld [vmem:[#allocation1] sm:$0xff]  ;;  %v13965_v20 = vsel %vm113_vm9, %v13929_v26, %v106_v55  ;;  %vm2182_vm7 = vcmask 1045504   ;;  %vm2178_vm8 = vcmask 1043456   ;;  %vm2184_vm10 = vcmask 1045506  }
  0x3c   :  { %831 = vst [vmem:[#allocation1] ss:$9 sm:$0xff] %v469_v52  ;;  %v210_v52 = vsel %vm125_vm13, %v13894_v60, %v105_v8  ;;  %v531_v8 = vsel %vm13707_vm2, %v525_v58, %v529_v59  ;;  %v539_v28 = vsel %vm13707_vm2, %v532_v1, %v537_v2  ;;  %v584_v1 = vshll.u32 %v13965_v20, 16 }
  0x3d   :  { %10808 = vmatmul.msk.bf16.gmra.mxu0 %vm975_vm3, %v13897_v63  ;;  %10815 = vmatmul.msk.bf16.gmra.mxu1 %vm975_vm3, %v13897_v63  ;;  %833 = vst [vmem:[#allocation1 + $0x1] ss:$9 sm:$0xff] %v476_v56  ;;  %v13946_v56 = vrot.slane %v204_v47, 1  ;;  %vm2999_vm15 = vsmask.f32 5392 }
  0x3e   :  { %835 = vst [vmem:[#allocation1 + $0x2] ss:$9 sm:$0xff] %v484_v0  ;;  %v13954_v0 = vrot.slane %v207_v51, 2  ;;  %vm3001_vm1 = vsmask.f32 7448 }
  0x3f   :  { %837 = vst [vmem:[#allocation1 + $0x3] ss:$9 sm:$0xff] %v492_v3  ;;  %v13958_v3 = vrot.slane %v210_v52, 3  ;;  %v561_v24 = vshll.u32 %v13946_v56, 16  ;;  %v564_v47 = vshrl.u32 %v13946_v56, 16 }
  0x40   :  { %839 = vst [vmem:[#allocation1 + $0x4] ss:$9 sm:$0xff] %v500_v6  ;;  %v548_v6 = vshrl.u32 %v13939_v50, 16  ;;  %v569_v51 = vshll.u32 %v13954_v0, 16  ;;  %v572_v58 = vshrl.u32 %v13954_v0, 16 }
  0x41   :  { %841 = vst [vmem:[#allocation1 + $0x5] ss:$9 sm:$0xff] %v508_v13  ;;  %v553_v13 = vshll.u32 %v308_v54, 16  ;;  %v547_v54 = vsel %vm13707_vm2, %v540_v4, %v545_v5  ;;  %v577_v59 = vshll.u32 %v13958_v3, 16  ;;  %v580_v57 = vshrl.u32 %v13958_v3, 16 }
  0x42   :  { %843 = vst [vmem:[#allocation1 + $0x6] ss:$9 sm:$0xff] %v516_v22  ;;  %v556_v22 = vshrl.u32 %v13952_v62, 16  ;;  %v13996_v4 = vld [vmem:[%s18807_s0 + $0x2c] sm:$0xf]  ;;  %v216_v5 = vsel %vm117_vm11, %v13929_v26, %v106_v55 }
  0x43   :  { %845 = vst [vmem:[#allocation1 + $0x7] ss:$9 sm:$0xff] %v524_v25  ;;  %v13974_v25 = vld [vmem:[%s18807_s0 + $0x28] sm:$0xf]  ;;  %v555_v60 = vsel %vm13707_vm2, %v548_v6, %v553_v13  ;;  %v571_v6 = vsel %vm13707_vm2, %v564_v47, %v569_v51  ;;  %v219_v13 = vsel %vm121_vm12, %v13929_v26, %v106_v55  ;;  %v14015_v48 = vrot.slane %v216_v5, 1 }
  0x44   :  { %19031 = vst [vmem:[#allocation18_spill] sm:$0xff] %v13974_v25  ;;  %v107_v2 = vrot.slane %v13974_v25, 3  ;;  %v563_v61 = vsel %vm13707_vm2, %v556_v22, %v561_v24  ;;  %v309_v22 = vsel %vm125_vm13, %v13929_v26, %v106_v55  ;;  %v586_v24 = vsel %vm13707_vm2, %v580_v57, %v584_v1 }
  0x45   :  { %19032 = vst [vmem:[#allocation19_spill] sm:$0xff] %v13996_v4  ;;  %v14019_v51 = vrot.slane %v219_v13, 2  ;;  %v587_v1 = vshrl.u32 %v13965_v20, 16  ;;  %v592_v5 = vshll.u32 %v14015_v48, 16  ;;  %v595_v13 = vshrl.u32 %v14015_v48, 16 }
  0x46   :  { %v225_v47 = vsel %vm117_vm11, %v13974_v25, %v107_v2  ;;  %v231_v55 = vsel %vm125_vm13, %v13974_v25, %v107_v2 }
  0x47   :  { %19033 = vst [vmem:[#allocation20_spill] sm:$0xff] %v14019_v51  ;;  %v14029_v57 = vrot.slane %v225_v47, 1  ;;  %v594_v26 = vsel %vm13707_vm2, %v587_v1, %v592_v5 }
  0x49   :  { %19035 = vst [vmem:[#allocation22_spill] sm:$0xff] %v14029_v57 }
  0x4a   :  { %v13980_v52 = vld [vmem:[#allocation1] sm:$0xff] }
  0x4b   :  { %848 = vst [vmem:[#allocation1] ss:$9 sm:$0xff] %v531_v8  ;;  %v579_v8 = vsel %vm13707_vm2, %v572_v58, %v577_v59 }
  0x4c   :  { %850 = vst [vmem:[#allocation1 + $0x1] ss:$9 sm:$0xff] %v539_v28  ;;  %v108_v28 = vrot.slane %v13996_v4, 3 }
  0x4d   :  { %10809 = vmatmul.msk.bf16.gmra.mxu0 %vm975_vm3, %v13980_v52  ;;  %10816 = vmatmul.msk.bf16.gmra.mxu1 %vm975_vm3, %v13980_v52  ;;  %852 = vst [vmem:[#allocation1 + $0x2] ss:$9 sm:$0xff] %v547_v54  ;;  %v311_v54 = vrot.slane %v309_v22, 3 }
  0x4e   :  { %854 = vst [vmem:[#allocation1 + $0x3] ss:$9 sm:$0xff] %v555_v60  ;;  %v228_v60 = vsel %vm121_vm12, %v13974_v25, %v107_v2  ;;  %v237_v59 = vsel %vm117_vm11, %v13996_v4, %v108_v28  ;;  %v14049_v47 = vsel %vm113_vm9, %v13996_v4, %v108_v28 }
  0x4f   :  { %856 = vst [vmem:[#allocation1 + $0x4] ss:$9 sm:$0xff] %v563_v61  ;;  %v14027_v61 = vsel %vm113_vm9, %v13974_v25, %v107_v2  ;;  %v14031_v58 = vrot.slane %v228_v60, 2  ;;  %v603_v2 = vshrl.u32 %v14019_v51, 16  ;;  %v608_v22 = vshll.u32 %v311_v54, 16 }
  0x50   :  { %858 = vst [vmem:[#allocation1 + $0x5] ss:$9 sm:$0xff] %v571_v6  ;;  %v14037_v6 = vrot.slane %v231_v55, 3  ;;  %v14051_v60 = vrot.slane %v237_v59, 1  ;;  %v611_v55 = vshrl.u32 %v14027_v61, 16  ;;  %v616_v25 = vshll.u32 %v14029_v57, 16 }
  0x51   :  { %860 = vst [vmem:[#allocation1 + $0x6] ss:$9 sm:$0xff] %v579_v8  ;;  %v600_v8 = vshll.u32 %v14019_v51, 16  ;;  %v619_v54 = vshrl.u32 %v14029_v57, 16  ;;  %v624_v19 = vshll.u32 %v14031_v58, 16  ;;  %v627_v17 = vshrl.u32 %v14031_v58, 16 }
  0x52   :  { %862 = vst [vmem:[#allocation1 + $0x7] ss:$9 sm:$0xff] %v586_v24  ;;  %v14045_v24 = vld [vmem:[%s18807_s0 + $0x30] sm:$0xf]  ;;  %v632_v23 = vshll.u32 %v14037_v6, 16  ;;  %v635_v1 = vshrl.u32 %v14037_v6, 16 }
  0x53   :  { %19034 = vst [vmem:[#allocation21_spill] sm:$0xff] %v14027_v61  ;;  %v602_v46 = vsel %vm13707_vm2, %v595_v13, %v600_v8  ;;  %v109_v18 = vrot.slane %v14045_v24, 3  ;;  %v610_v61 = vsel %vm13707_vm2, %v603_v2, %v608_v22  ;;  %v639_v5 = vshll.u32 %v14049_v47, 16  ;;  %v14073_v57 = vld [vmem:[%s18807_s0 + $0x34] sm:$0xf] }
  0x54   :  { %19036 = vst [vmem:[#allocation23_spill] sm:$0xff] %v14031_v58  ;;  %v618_v13 = vsel %vm13707_vm2, %v611_v55, %v616_v25  ;;  %v642_v8 = vshrl.u32 %v14049_v47, 16  ;;  %v647_v58 = vshll.u32 %v14051_v60, 16  ;;  %v240_v2 = vsel %vm121_vm12, %v13996_v4, %v108_v28 }
  0x55   :  { %19037 = vst [vmem:[#allocation24_spill] sm:$0xff] %v14037_v6  ;;  %v626_v22 = vsel %vm13707_vm2, %v619_v54, %v624_v19  ;;  %v312_v6 = vsel %vm125_vm13, %v13996_v4, %v108_v28  ;;  %v634_v51 = vsel %vm13707_vm2, %v627_v17, %v632_v23  ;;  %v110_v25 = vrot.slane %v14073_v57, 3 }
  0x56   :  { %19038 = vst [vmem:[#allocation25_spill] sm:$0xff] %v14045_v24  ;;  %v641_v55 = vsel %vm13707_vm2, %v635_v1, %v639_v5  ;;  %v14096_v19 = vrot.slane %v240_v2, 2  ;;  %v249_v17 = vsel %vm121_vm12, %v14045_v24, %v109_v18  ;;  %v649_v23 = vsel %vm13707_vm2, %v642_v8, %v647_v58 }
  0x57   :  { %19039 = vst [vmem:[#allocation26_spill] sm:$0xff] %v14049_v47  ;;  %v314_v28 = vrot.slane %v312_v6, 3  ;;  %v14108_v54 = vsel %vm113_vm9, %v14045_v24, %v109_v18  ;;  %v14110_v1 = vrot.slane %v249_v17, 2  ;;  %v258_v5 = vsel %vm117_vm11, %v14073_v57, %v110_v25 }
  0x58   :  { %19040 = vst [vmem:[#allocation27_spill] sm:$0xff] %v14051_v60  ;;  %v655_v6 = vshll.u32 %v14096_v19, 16  ;;  %v658_v8 = vshrl.u32 %v14096_v19, 16 }
  0x59   :  { %v14063_v59 = vld [vmem:[#allocation1] sm:$0xff]  ;;  %19042 = vst [vmem:[#allocation29_spill] sm:$0xff] %v14073_v57  ;;  %v663_v2 = vshll.u32 %v314_v28, 16  ;;  %v679_v28 = vshll.u32 %v14110_v1, 16  ;;  %v682_v4 = vshrl.u32 %v14110_v1, 16 }
  0x5a   :  { %19041 = vst [vmem:[#allocation28_spill] sm:$0xff] %v14063_v59 }
  0x5b   :  { %865 = vst [vmem:[#allocation1] ss:$9 sm:$0xff] %v594_v26  ;;  %v246_v26 = vsel %vm117_vm11, %v14045_v24, %v109_v18 }
  0x5c   :  { %867 = vst [vmem:[#allocation1 + $0x1] ss:$9 sm:$0xff] %v602_v46  ;;  %v252_v46 = vsel %vm125_vm13, %v14045_v24, %v109_v18  ;;  %v14124_v18 = vld [vmem:[%s18807_s0 + $0x38] sm:$0xf] }
  0x5d   :  { %869 = vst [vmem:[#allocation1 + $0x2] ss:$9 sm:$0xff] %v610_v61  ;;  %10810 = vmatmul.msk.bf16.gmra.mxu0 %vm975_vm3, %v14063_v59  ;;  %10817 = vmatmul.msk.bf16.gmra.mxu1 %vm975_vm3, %v14063_v59  ;;  %v14104_v61 = vrot.slane %v246_v26, 1  ;;  %v14114_v58 = vrot.slane %v252_v46, 3  ;;  %v14130_v26 = vrot.slane %v258_v5, 1  ;;  %v111_v5 = vrot.slane %v14124_v18, 3 }
  0x5e   :  { %871 = vst [vmem:[#allocation1 + $0x3] ss:$9 sm:$0xff] %v618_v13  ;;  %v261_v13 = vsel %vm121_vm12, %v14073_v57, %v110_v25  ;;  %v315_v59 = vsel %vm125_vm13, %v14073_v57, %v110_v25 }
  0x5f   :  { %19043 = vst [vmem:[#allocation30_spill] sm:$0xff] %v14096_v19  ;;  %v671_v17 = vshll.u32 %v14104_v61, 16  ;;  %v674_v46 = vshrl.u32 %v14104_v61, 16  ;;  %v687_v19 = vshll.u32 %v14114_v58, 16 }
  0x60   :  { %873 = vst [vmem:[#allocation1 + $0x4] ss:$9 sm:$0xff] %v626_v22  ;;  %v14128_v22 = vsel %vm113_vm9, %v14073_v57, %v110_v25  ;;  %v317_v25 = vrot.slane %v315_v59, 3 }
  0x61   :  { %875 = vst [vmem:[#allocation1 + $0x5] ss:$9 sm:$0xff] %v634_v51  ;;  %v650_v51 = vshrl.u32 %v14051_v60, 16  ;;  %v690_v60 = vshrl.u32 %v14114_v58, 16 }
  0x62   :  { %19044 = vst [vmem:[#allocation31_spill] sm:$0xff] %v14104_v61  ;;  %v14150_v61 = vld [vmem:[%s18807_s0 + $0x3c] sm:$0xf] }
  0x63   :  { %877 = vst [vmem:[#allocation1 + $0x6] ss:$9 sm:$0xff] %v641_v55  ;;  %v666_v55 = vshrl.u32 %v14108_v54, 16  ;;  %v657_v24 = vsel %vm13707_vm2, %v650_v51, %v655_v6  ;;  %v697_v6 = vshrl.u32 %v14128_v22, 16 }
  0x64   :  { %19045 = vst [vmem:[#allocation32_spill] sm:$0xff] %v14108_v54  ;;  %v665_v54 = vsel %vm13707_vm2, %v658_v8, %v663_v2  ;;  %v681_v8 = vsel %vm13707_vm2, %v674_v46, %v679_v28  ;;  %v705_v2 = vshrl.u32 %v14130_v26, 16  ;;  %v270_v28 = vsel %vm121_vm12, %v14124_v18, %v111_v5 }
  0x65   :  { %19046 = vst [vmem:[#allocation33_spill] sm:$0xff] %v14110_v1  ;;  %v673_v51 = vsel %vm13707_vm2, %v666_v55, %v671_v17  ;;  %v702_v1 = vshll.u32 %v14130_v26, 16  ;;  %v689_v55 = vsel %vm13707_vm2, %v682_v4, %v687_v19  ;;  %v112_v17 = vrot.slane %v14150_v61, 3 }
  0x66   :  { %879 = vst [vmem:[#allocation1 + $0x7] ss:$9 sm:$0xff] %v649_v23  ;;  %v14134_v23 = vrot.slane %v261_v13, 2  ;;  %v694_v13 = vshll.u32 %v14128_v22, 16  ;;  %v273_v4 = vsel %vm125_vm13, %v14124_v18, %v111_v5 }
  0x67   :  { %19047 = vst [vmem:[#allocation34_spill] sm:$0xff] %v14114_v58  ;;  %v279_v59 = vsel %vm117_vm11, %v14150_v61, %v112_v17 }
  0x68   :  { %19048 = vst [vmem:[#allocation35_spill] sm:$0xff] %v14124_v18  ;;  %v710_v58 = vshll.u32 %v14134_v23, 16  ;;  %v696_v46 = vsel %vm13707_vm2, %v690_v60, %v694_v13  ;;  %v282_v13 = vsel %vm121_vm12, %v14150_v61, %v112_v17 }
  0x69   :  { %19049 = vst [vmem:[#allocation36_spill] sm:$0xff] %v14128_v22  ;;  %v267_v22 = vsel %vm117_vm11, %v14124_v18, %v111_v5  ;;  %vm2996_vm11 = vsmask.f32 1280 }
  0x6a   :  { %19050 = vst [vmem:[#allocation37_spill] sm:$0xff] %v14150_v61  ;;  %v712_v19 = vsel %vm13707_vm2, %v705_v2, %v710_v58  ;;  %v14183_v60 = vrot.slane %v267_v22, 1  ;;  %v14193_v58 = vrot.slane %v273_v4, 3  ;;  %v318_v22 = vsel %vm125_vm13, %v14150_v61, %v112_v17 }
  0x6b   :  { %v320_v4 = vrot.slane %v318_v22, 3  ;;  %vm2997_vm13 = vsmask.f32 3336 }
  0x6c   :  { %19051 = vst [vmem:[#allocation38_spill] sm:$0xff] %v14183_v60  ;;  %vm15973_vm14 = vmor %vm2996_vm11, %vm2997_vm13  ;;  %vm5418_vm11 = vcmask 1044484   ;;  %vm5420_vm13 = vcmask 1046534  }
  0x6d   :  { %v14156_v47 = vld [vmem:[#allocation1] sm:$0xff]  ;;  %19054 = vst [vmem:[#allocation41_spill] sm:$0xff] %v14193_v58  ;;  %vm3000_vm0 = vmor %vm15973_vm14, %vm2999_vm15 }
  0x6e   :  { %882 = vst [vmem:[#allocation1] ss:$9 sm:$0xff] %v657_v24  ;;  %v704_v24 = vsel %vm13707_vm2, %v697_v6, %v702_v1  ;;  %10811 = vmatmul.msk.bf16.gmra.mxu0 %vm975_vm3, %v14156_v47  ;;  %10818 = vmatmul.msk.bf16.gmra.mxu1 %vm975_vm3, %v14156_v47  ;;  %v14189_v1 = vrot.slane %v270_v28, 2  ;;  %v718_v6 = vshll.u32 %v317_v25, 16  ;;  %v729_v28 = vshrl.u32 %v14183_v60, 16  ;;  %vm17138_vm14 = vmor %vm2174_vm4, %vm2176_vm5 }
  0x6f   :  { %884 = vst [vmem:[#allocation1 + $0x1] ss:$9 sm:$0xff] %v665_v54  ;;  %v14187_v54 = vsel %vm113_vm9, %v14124_v18, %v111_v5  ;;  %v14202_v5 = vsel %vm113_vm9, %v14150_v61, %v112_v17  ;;  %v742_v25 = vshll.u32 %v14193_v58, 16 }
  0x70   :  { %886 = vst [vmem:[#allocation1 + $0x2] ss:$9 sm:$0xff] %v673_v51  ;;  %v713_v51 = vshrl.u32 %v14134_v23, 16  ;;  %v721_v2 = vshrl.u32 %v14187_v54, 16  ;;  %v749_v18 = vshll.u32 %v14202_v5, 16  ;;  %v752_v61 = vshrl.u32 %v14202_v5, 16 }
  0x71   :  { %888 = vst [vmem:[#allocation1 + $0x3] ss:$9 sm:$0xff] %v681_v8  ;;  %v14204_v8 = vrot.slane %v279_v59, 1  ;;  %v745_v59 = vshrl.u32 %v14193_v58, 16  ;;  %v773_v58 = vshll.u32 %v320_v4, 16 }
  0x72   :  { %890 = vst [vmem:[#allocation1 + $0x4] ss:$9 sm:$0xff] %v689_v55  ;;  %v726_v55 = vshll.u32 %v14183_v60, 16  ;;  %v720_v17 = vsel %vm13707_vm2, %v713_v51, %v718_v6  ;;  %v12956_v4 = vld [vmem:[%s18808_s1 + $0xb4] sm:$0xf0] }
  0x73   :  { %892 = vst [vmem:[#allocation1 + $0x5] ss:$9 sm:$0xff] %v696_v46  ;;  %v14208_v46 = vrot.slane %v282_v13, 2  ;;  %v757_v57 = vshll.u32 %v14204_v8, 16 }
  0x74   :  { %19052 = vst [vmem:[#allocation39_spill] sm:$0xff] %v14187_v54  ;;  %v728_v13 = vsel %vm13707_vm2, %v721_v2, %v726_v55  ;;  %v751_v2 = vsel %vm13707_vm2, %v745_v59, %v749_v18 }
  0x75   :  { %19053 = vst [vmem:[#allocation40_spill] sm:$0xff] %v14189_v1  ;;  %v765_v60 = vshll.u32 %v14208_v46, 16  ;;  %v768_v6 = vshrl.u32 %v14208_v46, 16  ;;  %v759_v55 = vsel %vm13707_vm2, %v752_v61, %v757_v57  ;;  %v12954_v57 = vld [vmem:[%s18808_s1 + $0xac] sm:$0xf] }
  0x76   :  { %894 = vst [vmem:[#allocation1 + $0x6] ss:$9 sm:$0xff] %v704_v24  ;;  %v734_v24 = vshll.u32 %v14189_v1, 16  ;;  %v10803_v61 = vld [vmem:[%s18808_s1 + $0xb8] sm:$0xf0] }
  0x77   :  { %896 = vst [vmem:[#allocation1 + $0x7] ss:$9 sm:$0xff] %v712_v19  ;;  %v737_v19 = vshrl.u32 %v14189_v1, 16  ;;  %v760_v1 = vshrl.u32 %v14204_v8, 16  ;;  %v775_v18 = vsel %vm13707_vm2, %v768_v6, %v773_v58 }
  0x78   :  { %v736_v22 = vsel %vm13707_vm2, %v729_v28, %v734_v24  ;;  %v10801_v24 = vld [vmem:[%s18808_s1 + $0xa8] sm:$0xf] }
  0x79   :  { %v744_v51 = vsel %vm13707_vm2, %v737_v19, %v742_v25  ;;  %v767_v28 = vsel %vm13707_vm2, %v760_v1, %v765_v60  ;;  %v10802_v19 = vor.u32 %v12956_v4, %v10801_v24  ;;  %v10806_v60 = vor.u32 %v12954_v57, %v10803_v61  ;;  %v12952_v1 = vld [vmem:[%s18808_s1 + $0x94] sm:$0xf0]  ;;  %v12950_v25 = vld [vmem:[%s18808_s1 + $0x8c] sm:$0xf]  ;;  %v10839_v4 = vld [vmem:[%s18808_s1 + $0x10] sm:$0xf0] }
  0x7a   :  { %v10786_v58 = vor.u32 %v12952_v1, %v10785_v44  ;;  %v19074_v61 = vld [vmem:[#allocation36_spill] sm:$0xff]  ;;  %vm15986_vm2 = vmor %vm3000_vm0, %vm3001_vm1 }
  0x7b   :  { %1083 = vmatpush.bf16.msrb.mxu2 %v10802_v19  ;;  %1127 = vmatpush.bf16.msrb.mxu3 %v10806_v60  ;;  %v19077_v1 = vld [vmem:[#allocation39_spill] sm:$0xff] }
  0x7e   :  { %v14226_v54 = vld [vmem:[#allocation1] sm:$0xff] }
  0x7f   :  { %899 = vst [vmem:[#allocation1] ss:$9 sm:$0xff] %v720_v17  ;;  %10812 = vmatmul.msk.bf16.gmra.mxu0 %vm975_vm3, %v14226_v54  ;;  %10819 = vmatmul.msk.bf16.gmra.mxu1 %vm975_vm3, %v14226_v54  ;;  %v10787_v17 = vld [vmem:[%s18808_s1 + $0x98] sm:$0xf0] }
  0x80   :  { %901 = vst [vmem:[#allocation1 + $0x1] ss:$9 sm:$0xff] %v728_v13  ;;  %v10790_v59 = vor.u32 %v12950_v25, %v10787_v17  ;;  %1084 = vmatpush.bf16.msrb.mxu2 %v10786_v58  ;;  %v10769_v13 = vld [vmem:[%s18808_s1 + $0x68] sm:$0xf]  ;;  %v19078_v58 = vld [vmem:[#allocation38_spill] sm:$0xff] }
  0x81   :  { %903 = vst [vmem:[#allocation1 + $0x2] ss:$9 sm:$0xff] %v736_v22  ;;  %v12948_v22 = vld [vmem:[%s18808_s1 + $0x74] sm:$0xf0]  ;;  %v19079_v25 = vld [vmem:[#allocation40_spill] sm:$0xff] }
  0x82   :  { %905 = vst [vmem:[#allocation1 + $0x3] ss:$9 sm:$0xff] %v744_v51  ;;  %1128 = vmatpush.bf16.msrb.mxu3 %v10790_v59  ;;  %v12946_v51 = vld [vmem:[%s18808_s1 + $0x6c] sm:$0xf]  ;;  %v10770_v6 = vor.u32 %v12948_v22, %v10769_v13  ;;  %v10877_v17 = vld [vmem:[%s18808_s1 + $0x48] sm:$0xf] }
  0x83   :  { %907 = vst [vmem:[#allocation1 + $0x4] ss:$9 sm:$0xff] %v751_v2  ;;  %v10771_v2 = vld [vmem:[%s18808_s1 + $0x78] sm:$0xf0] }
  0x84   :  { %909 = vst [vmem:[#allocation1 + $0x5] ss:$9 sm:$0xff] %v759_v55  ;;  %v10774_v55 = vor.u32 %v12946_v51, %v10771_v2  ;;  %1085 = vmatpush.bf16.msrb.mxu2 %v10770_v6  ;;  %v10879_v13 = vld [vmem:[%s18808_s1 + $0x58] sm:$0xf0]  ;;  %v10861_v51 = vld [vmem:[%s18808_s1 + $0x28] sm:$0xf] }
  0x85   :  { %911 = vst [vmem:[#allocation1 + $0x6] ss:$9 sm:$0xff] %v767_v28  ;;  %v12940_v6 = vld [vmem:[%s18808_s1 + $0x34] sm:$0xf0]  ;;  %v12938_v2 = vld [vmem:[%s18808_s1 + $0x2c] sm:$0xf] }
  0x86   :  { %913 = vst [vmem:[#allocation1 + $0x7] ss:$9 sm:$0xff] %v775_v18  ;;  %1129 = vmatpush.bf16.msrb.mxu3 %v10774_v55 }
  0x8d   :  { %v14279_v28 = vld [vmem:[#allocation1] sm:$0xff] }
  0x8e   :  { %10813 = vmatmul.msk.bf16.vlgmr.msra.gmra.mxu2 %vm975_vm3, %v14279_v28  ;;  %1166 = vst [vmem:[#allocation1] ss:$9 sm:$0xff] %v13659_v27  ;;  %10820 = vmatmul.msk.bf16.vlgmr.msra.gmra.mxu3 %vm975_vm3, %v14279_v28  ;;  %v10869_v27 = vld [vmem:[%s18808_s1 + $0x40] sm:$0xf] }
  0x8f   :  { %1168 = vst [vmem:[#allocation1 + $0x1] ss:$9 sm:$0xff] %v13674_v32  ;;  %v12943_v32 = vld [vmem:[%s18808_s1 + $0x4c] sm:$0xf0] }
  0x90   :  { %1170 = vst [vmem:[#allocation1 + $0x2] ss:$9 sm:$0xff] %v13676_v33  ;;  %v10870_v33 = vor.u32 %v12943_v32, %v10869_v27 }
  0x91   :  { %1172 = vst [vmem:[#allocation1 + $0x3] ss:$9 sm:$0xff] %v13678_v34  ;;  %v12941_v34 = vld [vmem:[%s18808_s1 + $0x44] sm:$0xf] }
  0x92   :  { %1174 = vst [vmem:[#allocation1 + $0x4] ss:$9 sm:$0xff] %v13682_v35  ;;  %v10871_v35 = vld [vmem:[%s18808_s1 + $0x50] sm:$0xf0]  ;;  %1315 = vmatpush.bf16.msrb.mxu0 %v10870_v33  ;;  %v10862_v33 = vor.u32 %v12940_v6, %v10861_v51  ;;  %v12965_v51 = vld [vmem:[%s18808_s1 + $0x104] sm:$0xf] }
  0x93   :  { %1176 = vst [vmem:[#allocation1 + $0x5] ss:$9 sm:$0xff] %v13696_v40  ;;  %v10853_v40 = vld [vmem:[%s18808_s1 + $0x20] sm:$0xf]  ;;  %v10959_v6 = vld [vmem:[%s18808_s1 + $0x110] sm:$0xf0] }
  0x94   :  { %1178 = vst [vmem:[#allocation1 + $0x6] ss:$9 sm:$0xff] %v13698_v41  ;;  %v12939_v41 = vld [vmem:[%s18808_s1 + $0x2c] sm:$0xf0] }
  0x95   :  { %1180 = vst [vmem:[#allocation1 + $0x7] ss:$9 sm:$0xff] %v13691_v38  ;;  %v10874_v38 = vor.u32 %v12941_v34, %v10871_v35  ;;  %v10863_v35 = vld [vmem:[%s18808_s1 + $0x38] sm:$0xf0] }
  0x97   :  { %1359 = vmatpush.bf16.msrb.mxu1 %v10874_v38 }
  0x9c   :  { %v14293_v24 = vld [vmem:[#allocation1] sm:$0xff] }
  0x9d   :  { %1182 = vst [vmem:[#allocation1] ss:$9 sm:$0xff] %v13700_v42  ;;  %v12937_v42 = vld [vmem:[%s18808_s1 + $0x24] sm:$0xf] }
  0x9e   :  { %1183 = vst [vmem:[#allocation1 + $0x1] ss:$9 sm:$0xff] %v13754_v10  ;;  %10821 = vmatmul.msk.bf16.vlgmr.msrb.gmra.mxu2 %vm975_vm3, %v13808_v53  ;;  %10828 = vmatmul.msk.bf16.vlgmr.msrb.gmra.mxu3 %vm975_vm3, %v13808_v53  ;;  %v10854_v10 = vor.u32 %v12939_v41, %v10853_v40  ;;  %v19084_v40 = vld [vmem:[#allocation11_spill] sm:$0xff]  ;;  %v10866_v41 = vor.u32 %v12938_v2, %v10863_v35  ;;  %v19098_v2 = vld [vmem:[#allocation17_spill] sm:$0xff] }
  0x9f   :  { %1184 = vst [vmem:[#allocation1 + $0x2] ss:$9 sm:$0xff] %v13759_v12  ;;  %v10855_v12 = vld [vmem:[%s18808_s1 + $0x30] sm:$0xf0]  ;;  %v10957_v35 = vld [vmem:[%s18808_s1 + $0x100] sm:$0xf] }
  0xa0   :  { %1185 = vst [vmem:[#allocation1 + $0x3] ss:$9 sm:$0xff] %v13770_v15  ;;  %v10858_v15 = vor.u32 %v12937_v42, %v10855_v12  ;;  %1316 = vmatpush.bf16.msrb.mxu0 %v10854_v10  ;;  %v10845_v42 = vld [vmem:[%s18808_s1 + $0x8] sm:$0xf]  ;;  %v12936_v10 = vld [vmem:[%s18808_s1 + $0x14] sm:$0xf0] }
  0xa1   :  { %1186 = vst [vmem:[#allocation1 + $0x4] ss:$9 sm:$0xff] %v13772_v16  ;;  %v10837_v16 = vld [vmem:[%s18808_s1] sm:$0xf]  ;;  %v12934_v12 = vld [vmem:[%s18808_s1 + $0xc] sm:$0xf] }
  0xa2   :  { %1187 = vst [vmem:[#allocation1 + $0x5] ss:$9 sm:$0xff] %v13776_v21  ;;  %1360 = vmatpush.bf16.msrb.mxu1 %v10858_v15  ;;  %v12935_v21 = vld [vmem:[%s18808_s1 + $0xc] sm:$0xf0]  ;;  %v10846_v15 = vor.u32 %v12936_v10, %v10845_v42 }
  0xa3   :  { %1188 = vst [vmem:[#allocation1 + $0x6] ss:$9 sm:$0xff] %v13790_v37  ;;  %v10838_v53 = vor.u32 %v12935_v21, %v10837_v16  ;;  %v10847_v16 = vld [vmem:[%s18808_s1 + $0x18] sm:$0xf0]  ;;  %v19085_v21 = vld [vmem:[#allocation8_spill] sm:$0xff] }
  0xa4   :  { %1189 = vst [vmem:[#allocation1 + $0x7] ss:$9 sm:$0xff] %v13784_v30  ;;  %v12933_v30 = vld [vmem:[%s18808_s1 + $0x4] sm:$0xf] }
  0xa5   :  { %v10842_v18 = vor.u32 %v12933_v30, %v10839_v4  ;;  %1317 = vmatpush.bf16.msrb.mxu0 %v10838_v53  ;;  %v10850_v30 = vor.u32 %v12934_v12, %v10847_v16  ;;  %v10965_v16 = vld [vmem:[%s18808_s1 + $0x108] sm:$0xf] }
  0xa7   :  { %1361 = vmatpush.bf16.msrb.mxu1 %v10842_v18 }
  0xa8   :  { %10883 = vmatmul.msk.bf16.vlgmr.msrb.gmra.mxu0 %vm975_vm3, %v14293_v24 }
  0xaa   :  { %10890 = vmatmul.msk.bf16.vlgmr.msrb.gmra.mxu1 %vm975_vm3, %v14293_v24 }
  0xab   :  { %v14340_v37 = vld [vmem:[#allocation1] sm:$0xff] }
  0xac   :  { %1191 = vst [vmem:[#allocation1] ss:$9 sm:$0xff] %v13792_v39 }
  0xad   :  { %1192 = vst [vmem:[#allocation1 + $0x1] ss:$9 sm:$0xff] %v13841_v7 }
  0xae   :  { %1193 = vst [vmem:[#allocation1 + $0x2] ss:$9 sm:$0xff] %v13849_v9  ;;  %10822 = vmatmul.msk.bf16.gmra.mxu2 %vm975_vm3, %v13897_v63  ;;  %10829 = vmatmul.msk.bf16.gmra.mxu3 %vm975_vm3, %v13897_v63  ;;  %v19055_v9 = vld [vmem:[#allocation20_spill] sm:$0xff] }
  0xaf   :  { %1194 = vst [vmem:[#allocation1 + $0x3] ss:$9 sm:$0xff] %v13851_v11  ;;  %v19056_v11 = vld [vmem:[#allocation21_spill] sm:$0xff]  ;;  %v19062_v63 = vld [vmem:[#allocation24_spill] sm:$0xff] }
  0xb0   :  { %1195 = vst [vmem:[#allocation1 + $0x4] ss:$9 sm:$0xff] %v13855_v14  ;;  %v14385_v14 = vpop.f32.mrf.mxu0 }
  0xb1   :  { %1196 = vst [vmem:[#allocation1 + $0x5] ss:$9 sm:$0xff] %v13869_v36  ;;  %v19059_v36 = vld [vmem:[#allocation22_spill] sm:$0xff] }
  0xb2   :  { %1197 = vst [vmem:[#allocation1 + $0x6] ss:$9 sm:$0xff] %v13863_v29  ;;  %v14387_v29 = vpop.f32.mrf.mxu1 }
  0xb3   :  { %1198 = vst [vmem:[#allocation1 + $0x7] ss:$9 sm:$0xff] %v13871_v43  ;;  %v19060_v43 = vld [vmem:[#allocation28_spill] sm:$0xff] }
  0xb4   :  { %19057 = vst [vmem:[#allocation20_spill] sm:$0xff] %v14385_v14 }
  0xb5   :  { %19058 = vst [vmem:[#allocation21_spill] sm:$0xff] %v14387_v29 }
  0xb8   :  { %10884 = vmatmul.msk.bf16.gmra.mxu0 %vm975_vm3, %v14340_v37 }
  0xba   :  { %v14361_v39 = vld [vmem:[#allocation1] sm:$0xff]  ;;  %10891 = vmatmul.msk.bf16.gmra.mxu1 %vm975_vm3, %v14340_v37 }
  0xbb   :  { %1200 = vst [vmem:[#allocation1] ss:$9 sm:$0xff] %v13880_v49  ;;  %v19061_v49 = vld [vmem:[#allocation23_spill] sm:$0xff] }
  0xbc   :  { %1201 = vst [vmem:[#allocation1 + $0x1] ss:$9 sm:$0xff] %v13933_v31  ;;  %v14401_v31 = vpop.f32.mrf.mxu0 }
  0xbd   :  { %1202 = vst [vmem:[#allocation1 + $0x2] ss:$9 sm:$0xff] %v13935_v45  ;;  %v14403_v45 = vpop.f32.mrf.mxu1 }
  0xbe   :  { %1203 = vst [vmem:[#allocation1 + $0x3] ss:$9 sm:$0xff] %v13939_v50  ;;  %10823 = vmatmul.msk.bf16.gmra.mxu2 %vm975_vm3, %v13980_v52  ;;  %10830 = vmatmul.msk.bf16.gmra.mxu3 %vm975_vm3, %v13980_v52  ;;  %v19071_v52 = vld [vmem:[#allocation34_spill] sm:$0xff] }
  0xbf   :  { %1204 = vst [vmem:[#allocation1 + $0x4] ss:$9 sm:$0xff] %v13952_v62  ;;  %v19067_v62 = vld [vmem:[#allocation30_spill] sm:$0xff] }
  0xc0   :  { %1205 = vst [vmem:[#allocation1 + $0x5] ss:$9 sm:$0xff] %v13946_v56  ;;  %v19066_v56 = vld [vmem:[#allocation27_spill] sm:$0xff] }
  0xc1   :  { %1206 = vst [vmem:[#allocation1 + $0x6] ss:$9 sm:$0xff] %v13954_v0  ;;  %v19068_v0 = vld [vmem:[#allocation32_spill] sm:$0xff] }
  0xc2   :  { %1207 = vst [vmem:[#allocation1 + $0x7] ss:$9 sm:$0xff] %v13958_v3  ;;  %v19069_v3 = vld [vmem:[#allocation31_spill] sm:$0xff] }
  0xc3   :  { %19064 = vst [vmem:[#allocation22_spill] sm:$0xff] %v14401_v31 }
  0xc4   :  { %19065 = vst [vmem:[#allocation28_spill] sm:$0xff] %v14403_v45  ;;  %v14417_v19 = vpop.f32.mrf.mxu0 }
  0xc5   :  { %19072 = vst [vmem:[#allocation23_spill] sm:$0xff] %v14417_v19  ;;  %v14419_v57 = vpop.f32.mrf.mxu1 }
  0xc6   :  { %19073 = vst [vmem:[#allocation24_spill] sm:$0xff] %v14419_v57 }
  0xc8   :  { %10885 = vmatmul.msk.bf16.gmra.mxu0 %vm975_vm3, %v14361_v39 }
  0xc9   :  { %v14379_v7 = vld [vmem:[#allocation1] sm:$0xff] }
  0xca   :  { %1209 = vst [vmem:[#allocation1] ss:$9 sm:$0xff] %v13965_v20  ;;  %10892 = vmatmul.msk.bf16.gmra.mxu1 %vm975_vm3, %v14361_v39  ;;  %v19070_v20 = vld [vmem:[#allocation33_spill] sm:$0xff] }
  0xcb   :  { %1210 = vst [vmem:[#allocation1 + $0x1] ss:$9 sm:$0xff] %v14015_v48  ;;  %v19063_v48 = vld [vmem:[#allocation26_spill] sm:$0xff] }
  0xcc   :  { %1211 = vst [vmem:[#allocation1 + $0x2] ss:$9 sm:$0xff] %v19055_v9  ;;  %v14430_v44 = vpop.f32.mrf.mxu0 }
  0xcd   :  { %1212 = vst [vmem:[#allocation1 + $0x3] ss:$9 sm:$0xff] %v19056_v11 }
  0xce   :  { %1213 = vst [vmem:[#allocation1 + $0x4] ss:$9 sm:$0xff] %v19059_v36  ;;  %10824 = vmatmul.msk.bf16.gmra.mxu2 %vm975_vm3, %v19060_v43  ;;  %10831 = vmatmul.msk.bf16.gmra.mxu3 %vm975_vm3, %v19060_v43  ;;  %v19088_v43 = vld [vmem:[#allocation13_spill] sm:$0xff] }
  0xcf   :  { %1214 = vst [vmem:[#allocation1 + $0x5] ss:$9 sm:$0xff] %v19061_v49 }
  0xd0   :  { %1215 = vst [vmem:[#allocation1 + $0x6] ss:$9 sm:$0xff] %v19062_v63 }
  0xd1   :  { %1216 = vst [vmem:[#allocation1 + $0x7] ss:$9 sm:$0xff] %v19063_v48  ;;  %v19089_v48 = vld [vmem:[#allocation10_spill] sm:$0xff] }
  0xd2   :  { %19075 = vst [vmem:[#allocation26_spill] sm:$0xff] %v14430_v44 }
  0xd8   :  { %v14405_v50 = vld [vmem:[#allocation1] sm:$0xff]  ;;  %10886 = vmatmul.msk.bf16.gmra.mxu0 %vm975_vm3, %v14379_v7 }
  0xd9   :  { %1218 = vst [vmem:[#allocation1] ss:$9 sm:$0xff] %v19066_v56 }
  0xda   :  { %1219 = vst [vmem:[#allocation1 + $0x1] ss:$9 sm:$0xff] %v19067_v62  ;;  %10893 = vmatmul.msk.bf16.gmra.mxu1 %vm975_vm3, %v14379_v7 }
  0xdb   :  { %1220 = vst [vmem:[#allocation1 + $0x2] ss:$9 sm:$0xff] %v19068_v0 }
  0xdc   :  { %1221 = vst [vmem:[#allocation1 + $0x3] ss:$9 sm:$0xff] %v19069_v3 }
  0xdd   :  { %1222 = vst [vmem:[#allocation1 + $0x4] ss:$9 sm:$0xff] %v19070_v20 }
  0xde   :  { %1223 = vst [vmem:[#allocation1 + $0x5] ss:$9 sm:$0xff] %v19071_v52  ;;  %10825 = vmatmul.msk.bf16.gmra.mxu2 %vm975_vm3, %v14156_v47  ;;  %10832 = vmatmul.msk.bf16.gmra.mxu3 %vm975_vm3, %v14156_v47  ;;  %v14432_v47 = vpop.f32.mrf.mxu1 }
  0xdf   :  { %1224 = vst [vmem:[#allocation1 + $0x6] ss:$9 sm:$0xff] %v19074_v61  ;;  %v19092_v61 = vld [vmem:[#allocation15_spill] sm:$0xff] }
  0xe0   :  { %1225 = vst [vmem:[#allocation1 + $0x7] ss:$9 sm:$0xff] %v14130_v26  ;;  %v19080_v26 = vld [vmem:[#allocation41_spill] sm:$0xff] }
  0xe1   :  { %19076 = vst [vmem:[#allocation27_spill] sm:$0xff] %v14432_v47  ;;  %v12959_v47 = vld [vmem:[%s18808_s1 + $0xcc] sm:$0xf0] }
  0xe7   :  { %v14427_v60 = vld [vmem:[#allocation1] sm:$0xff] }
  0xe8   :  { %1227 = vst [vmem:[#allocation1] ss:$9 sm:$0xff] %v14134_v23  ;;  %v19081_v23 = vld [vmem:[#allocation9_spill] sm:$0xff]  ;;  %10887 = vmatmul.msk.bf16.gmra.mxu0 %vm975_vm3, %v14405_v50 }
  0xe9   :  { %1228 = vst [vmem:[#allocation1 + $0x1] ss:$9 sm:$0xff] %v19077_v1 }
  0xea   :  { %1229 = vst [vmem:[#allocation1 + $0x2] ss:$9 sm:$0xff] %v19078_v58  ;;  %10894 = vmatmul.msk.bf16.gmra.mxu1 %vm975_vm3, %v14405_v50 }
  0xeb   :  { %1230 = vst [vmem:[#allocation1 + $0x3] ss:$9 sm:$0xff] %v19079_v25 }
  0xec   :  { %1231 = vst [vmem:[#allocation1 + $0x4] ss:$9 sm:$0xff] %v19080_v26  ;;  %v19093_v26 = vld [vmem:[#allocation12_spill] sm:$0xff] }
  0xed   :  { %1232 = vst [vmem:[#allocation1 + $0x5] ss:$9 sm:$0xff] %v14202_v5  ;;  %v12944_v5 = vld [vmem:[%s18808_s1 + $0x54] sm:$0xf0] }
  0xee   :  { %1233 = vst [vmem:[#allocation1 + $0x6] ss:$9 sm:$0xff] %v14204_v8  ;;  %10826 = vmatmul.msk.bf16.gmra.mxu2 %vm975_vm3, %v14226_v54  ;;  %10833 = vmatmul.msk.bf16.gmra.mxu3 %vm975_vm3, %v14226_v54  ;;  %v12942_v8 = vld [vmem:[%s18808_s1 + $0x4c] sm:$0xf]  ;;  %v14457_v54 = vpop.f32.mrf.mxu0  ;;  %v10878_v59 = vor.u32 %v12944_v5, %v10877_v17 }
  0xef   :  { %1234 = vst [vmem:[#allocation1 + $0x7] ss:$9 sm:$0xff] %v14208_v46  ;;  %v14459_v46 = vpop.f32.mrf.mxu1  ;;  %v10882_v22 = vor.u32 %v12942_v8, %v10879_v13 }
  0xf0   :  { %1487 = vst [vmem:[#allocation1 + $0x20] sm:$0xff] %v19081_v23  ;;  %1403 = vmatpush.bf16.msra.mxu2 %v10878_v59 }
  0xf1   :  { %19082 = vst [vmem:[#allocation30_spill] sm:$0xff] %v14457_v54  ;;  %1447 = vmatpush.bf16.msra.mxu3 %v10882_v22  ;;  %v19122_v54 = vld [vmem:[#allocation35_spill] sm:$0xff] }
  0xf2   :  { %19083 = vst [vmem:[#allocation32_spill] sm:$0xff] %v14459_v46 }
  0xf4   :  { %1404 = vmatpush.bf16.msra.mxu2 %v10862_v33  ;;  %v10962_v33 = vor.u32 %v12965_v51, %v10959_v6 }
  0xf5   :  { %1448 = vmatpush.bf16.msra.mxu3 %v10866_v41 }
  0xf6   :  { %v14486_v38 = vld [vmem:[#allocation1] sm:$0xff]  ;;  %v14502_v53 = vpop.f32.mrf.mxu0  ;;  %1771 = vmatpush.bf16.msra.mxu1 %v10962_v33 }
  0xf7   :  { %v14475_v55 = vld [vmem:[#allocation1 + $0x20] ss:$4 sm:$0xff]  ;;  %v14477_v27 = vld [vmem:[#allocation1 + $0x21] ss:$4 sm:$0xff]  ;;  %v14479_v32 = vld [vmem:[#allocation1 + $0x22] ss:$4 sm:$0xff]  ;;  %v14504_v4 = vpop.f32.mrf.mxu1 }
  0xf8   :  { %v14481_v34 = vld [vmem:[#allocation1 + $0x23] ss:$4 sm:$0xff]  ;;  %1486 = vst [vmem:[#allocation1] sm:$0xff] %v19085_v21  ;;  %1405 = vmatpush.bf16.msra.mxu2 %v10846_v15  ;;  %10888 = vmatmul.msk.bf16.gmra.mxu0 %vm975_vm3, %v14427_v60 }
  0xf9   :  { %1503 = vst [vmem:[#allocation1 + $0x20] sm:$0xff] %v19084_v40  ;;  %1449 = vmatpush.bf16.msra.mxu3 %v10850_v30  ;;  %v12967_v40 = vld [vmem:[%s18808_s1 + $0x10c] sm:$0xf0]  ;;  %v19099_v15 = vld [vmem:[#allocation14_spill] sm:$0xff]  ;;  %v12966_v30 = vld [vmem:[%s18808_s1 + $0x10c] sm:$0xf] }
  0xfa   :  { %19086 = vst [vmem:[#allocation31_spill] sm:$0xff] %v14502_v53  ;;  %10895 = vmatmul.msk.bf16.gmra.mxu1 %vm975_vm3, %v14427_v60  ;;  %v10958_v41 = vor.u32 %v12967_v40, %v10957_v35  ;;  %v12968_v21 = vld [vmem:[%s18808_s1 + $0x114] sm:$0xf0]  ;;  %v10925_v53 = vld [vmem:[%s18808_s1 + $0xc0] sm:$0xf] }
  0xfb   :  { %19087 = vst [vmem:[#allocation33_spill] sm:$0xff] %v14504_v4  ;;  %v10926_v44 = vor.u32 %v12959_v47, %v10925_v53  ;;  %v19116_v47 = vld [vmem:[#allocation37_spill] sm:$0xff] }
  0xfc   :  { %1727 = vmatpush.bf16.msra.mxu0 %v10958_v41 }
  0xfe   :  { %10827 = vmatmul.msk.bf16.gmra.mxu2 %vm975_vm3, %v14279_v28  ;;  %10834 = vmatmul.msk.bf16.gmra.mxu3 %vm975_vm3, %v14279_v28  ;;  %v14530_v56 = vpop.f32.mrf.mxu0 }
  0xff   :  { %v14523_v49 = vld [vmem:[#allocation1 + $0x1] ss:$4 sm:$0xff]  ;;  %v14525_v28 = vld [vmem:[#allocation1 + $0x2] ss:$4 sm:$0xff]  ;;  %v14527_v63 = vld [vmem:[#allocation1 + $0x3] ss:$4 sm:$0xff]  ;;  %v14532_v62 = vpop.f32.mrf.mxu1 }
 0x100   :  { %v14510_v18 = vld [vmem:[#allocation1 + $0x20] ss:$4 sm:$0xff]  ;;  %v14512_v9 = vld [vmem:[#allocation1 + $0x21] ss:$4 sm:$0xff]  ;;  %v14514_v11 = vld [vmem:[#allocation1 + $0x22] ss:$4 sm:$0xff] }
 0x101   :  { %v14518_v36 = vld [vmem:[#allocation1 + $0x23] ss:$4 sm:$0xff]  ;;  %1502 = vst [vmem:[#allocation1] sm:$0xff] %v19089_v48 }
 0x102   :  { %1512 = vst [vmem:[#allocation1 + $0x20] sm:$0xff] %v19088_v43  ;;  %v10966_v43 = vor.u32 %v12968_v21, %v10965_v16  ;;  %v10967_v48 = vld [vmem:[%s18808_s1 + $0x118] sm:$0xf0] }
 0x103   :  { %19090 = vst [vmem:[#allocation34_spill] sm:$0xff] %v14530_v56 }
 0x104   :  { %19091 = vst [vmem:[#allocation36_spill] sm:$0xff] %v14532_v62  ;;  %1815 = vmatpush.bf16.msrb.mxu2 %v10966_v43  ;;  %v19105_v43 = vld [vmem:[#allocation16_spill] sm:$0xff] }
 0x106   :  { %v14554_v23 = vpop.f32.mrf.mxu0 }
 0x107   :  { %19094 = vst [vmem:[#allocation39_spill] sm:$0xff] %v14554_v23  ;;  %v14556_v17 = vpop.f32.mrf.mxu1  ;;  %v19111_v23 = vld [vmem:[#allocation18_spill] sm:$0xff] }
 0x108   :  { %v14543_v1 = vld [vmem:[#allocation1 + $0x1] ss:$4 sm:$0xff]  ;;  %v14545_v58 = vld [vmem:[#allocation1 + $0x2] ss:$4 sm:$0xff]  ;;  %v14547_v25 = vld [vmem:[#allocation1 + $0x3] ss:$4 sm:$0xff]  ;;  %10889 = vmatmul.msk.bf16.gmra.mxu0 %vm975_vm3, %v14486_v38 }
 0x109   :  { %v14534_v0 = vld [vmem:[#allocation1 + $0x20] ss:$4 sm:$0xff]  ;;  %v14536_v3 = vld [vmem:[#allocation1 + $0x21] ss:$4 sm:$0xff]  ;;  %v14538_v20 = vld [vmem:[#allocation1 + $0x22] ss:$4 sm:$0xff] }
 0x10a   :  { %v14540_v52 = vld [vmem:[#allocation1 + $0x23] ss:$4 sm:$0xff]  ;;  %1511 = vst [vmem:[#allocation1] sm:$0xff] %v19093_v26  ;;  %10896 = vmatmul.msk.bf16.gmra.mxu1 %vm975_vm3, %v14486_v38 }
 0x10b   :  { %1521 = vst [vmem:[#allocation1 + $0x20] sm:$0xff] %v19092_v61  ;;  %v10970_v61 = vor.u32 %v12966_v30, %v10967_v48 }
 0x10c   :  { %19095 = vst [vmem:[#allocation38_spill] sm:$0xff] %v14556_v17  ;;  %v12963_v17 = vld [vmem:[%s18808_s1 + $0xec] sm:$0xf0] }
 0x10d   :  { %1859 = vmatpush.bf16.msrb.mxu3 %v10970_v61 }
 0x10e   :  { %10897 = vmatmul.msk.bf16.vlgmr.msra.gmra.mxu2 %vm975_vm3, %v14293_v24  ;;  %10904 = vmatmul.msk.bf16.vlgmr.msra.gmra.mxu3 %vm975_vm3, %v14293_v24  ;;  %v14616_v35 = vpop.f32.mrf.mxu0 }
 0x10f   :  { %19102 = vst [vmem:[#allocation8_spill] sm:$0xff] %v14616_v35  ;;  %v14618_v40 = vpop.f32.mrf.mxu1  ;;  %v19110_v35 = vld [vmem:[#allocation29_spill] sm:$0xff] }
 0x110   :  { %19103 = vst [vmem:[#allocation13_spill] sm:$0xff] %v14618_v40 }
 0x111   :  { %v14560_v5 = vpop.f32.mrf.mxu2  ;;  %v14562_v8 = vpop.f32.mrf.mxu3  ;;  %v14587_v42 = vld [vmem:[#allocation1 + $0x1] ss:$4 sm:$0xff]  ;;  %v14589_v10 = vld [vmem:[#allocation1 + $0x2] ss:$4 sm:$0xff]  ;;  %v14591_v12 = vld [vmem:[#allocation1 + $0x3] ss:$4 sm:$0xff] }
 0x112   :  { %19096 = vst [vmem:[#allocation40_spill] sm:$0xff] %v14560_v5  ;;  %v14564_v59 = vld [vmem:[#allocation1 + $0x20] ss:$4 sm:$0xff]  ;;  %v14566_v13 = vld [vmem:[#allocation1 + $0x21] ss:$4 sm:$0xff] }
 0x113   :  { %19097 = vst [vmem:[#allocation41_spill] sm:$0xff] %v14562_v8  ;;  %v14568_v22 = vld [vmem:[#allocation1 + $0x22] ss:$4 sm:$0xff]  ;;  %v14572_v24 = vld [vmem:[#allocation1 + $0x23] ss:$4 sm:$0xff] }
 0x114   :  { %1530 = vst [vmem:[#allocation1 + $0x20] sm:$0xff] %v19098_v2 }
 0x115   :  { %1520 = vst [vmem:[#allocation1] sm:$0xff] %v19099_v15  ;;  %v19104_v15 = vld [vmem:[#allocation19_spill] sm:$0xff] }
 0x116   :  { %v14646_v5 = vpop.f32.mrf.mxu0 }
 0x117   :  { %19108 = vst [vmem:[#allocation12_spill] sm:$0xff] %v14646_v5  ;;  %v14648_v40 = vpop.f32.mrf.mxu1 }
 0x118   :  { %19109 = vst [vmem:[#allocation17_spill] sm:$0xff] %v14648_v40  ;;  %v10943_v40 = vld [vmem:[%s18808_s1 + $0xf0] sm:$0xf0] }
 0x119   :  { %v14606_v26 = vpop.f32.mrf.mxu2  ;;  %v14608_v51 = vpop.f32.mrf.mxu3 }
 0x11a   :  { %19100 = vst [vmem:[#allocation9_spill] sm:$0xff] %v14606_v26 }
 0x11b   :  { %19101 = vst [vmem:[#allocation11_spill] sm:$0xff] %v14608_v51  ;;  %v14610_v6 = vld [vmem:[#allocation1 + $0x20] ss:$4 sm:$0xff]  ;;  %v14612_v2 = vld [vmem:[#allocation1 + $0x21] ss:$4 sm:$0xff] }
 0x11c   :  { %v14614_v33 = vld [vmem:[#allocation1 + $0x22] ss:$4 sm:$0xff]  ;;  %v14620_v41 = vld [vmem:[#allocation1 + $0x23] ss:$4 sm:$0xff]  ;;  %v14623_v16 = vld [vmem:[#allocation1 + $0x1] ss:$4 sm:$0xff] }
 0x11d   :  { %1539 = vst [vmem:[#allocation1 + $0x20] sm:$0xff] %v19104_v15  ;;  %v14625_v21 = vld [vmem:[#allocation1 + $0x2] ss:$4 sm:$0xff]  ;;  %v14627_v30 = vld [vmem:[#allocation1 + $0x3] ss:$4 sm:$0xff] }
 0x11e   :  { %10898 = vmatmul.msk.bf16.gmra.mxu2 %vm975_vm3, %v14340_v37  ;;  %10905 = vmatmul.msk.bf16.gmra.mxu3 %vm975_vm3, %v14340_v37  ;;  %1529 = vst [vmem:[#allocation1] sm:$0xff] %v19105_v43  ;;  %v14692_v62 = vpop.f32.mrf.mxu0 }
 0x11f   :  { %19114 = vst [vmem:[#allocation16_spill] sm:$0xff] %v14692_v62  ;;  %v14694_v56 = vpop.f32.mrf.mxu1 }
 0x120   :  { %19115 = vst [vmem:[#allocation29_spill] sm:$0xff] %v14694_v56 }
 0x121   :  { %v14634_v48 = vpop.f32.mrf.mxu2  ;;  %v14636_v61 = vpop.f32.mrf.mxu3 }
 0x122   :  { %19106 = vst [vmem:[#allocation10_spill] sm:$0xff] %v14634_v48 }
 0x123   :  { %19107 = vst [vmem:[#allocation15_spill] sm:$0xff] %v14636_v61  ;;  %v10941_v61 = vld [vmem:[%s18808_s1 + $0xe0] sm:$0xf] }
 0x124   :  { %v14638_v51 = vld [vmem:[#allocation1 + $0x20] ss:$4 sm:$0xff]  ;;  %v14640_v15 = vld [vmem:[#allocation1 + $0x21] ss:$4 sm:$0xff]  ;;  %v14642_v26 = vld [vmem:[#allocation1 + $0x22] ss:$4 sm:$0xff]  ;;  %v10942_v5 = vor.u32 %v12963_v17, %v10941_v61 }
 0x125   :  { %v14644_v8 = vld [vmem:[#allocation1 + $0x23] ss:$4 sm:$0xff]  ;;  %v14651_v37 = vld [vmem:[#allocation1 + $0x1] ss:$4 sm:$0xff]  ;;  %v14653_v43 = vld [vmem:[#allocation1 + $0x2] ss:$4 sm:$0xff] }
 0x126   :  { %1548 = vst [vmem:[#allocation1 + $0x20] sm:$0xff] %v19110_v35  ;;  %v14655_v48 = vld [vmem:[#allocation1 + $0x3] ss:$4 sm:$0xff]  ;;  %1728 = vmatpush.bf16.msra.mxu0 %v10942_v5  ;;  %v14714_v56 = vpop.f32.mrf.mxu0 }
 0x127   :  { %1538 = vst [vmem:[#allocation1] sm:$0xff] %v19111_v23  ;;  %v12961_v35 = vld [vmem:[%s18808_s1 + $0xe4] sm:$0xf]  ;;  %v10927_v5 = vld [vmem:[%s18808_s1 + $0xd0] sm:$0xf0]  ;;  %v14716_v62 = vpop.f32.mrf.mxu1 }
 0x128   :  { %v10946_v4 = vor.u32 %v12961_v35, %v10943_v40  ;;  %v12957_v23 = vld [vmem:[%s18808_s1 + $0xc4] sm:$0xf]  ;;  %19121 = vst [vmem:[#allocation42_spill] sm:$0xff] %v14716_v62 }
 0x129   :  { %v14679_v17 = vpop.f32.mrf.mxu2  ;;  %v14681_v61 = vpop.f32.mrf.mxu3  ;;  %v10930_v40 = vor.u32 %v12957_v23, %v10927_v5 }
 0x12a   :  { %1772 = vmatpush.bf16.msra.mxu1 %v10946_v4  ;;  %19112 = vst [vmem:[#allocation14_spill] sm:$0xff] %v14679_v17  ;;  %1729 = vmatpush.bf16.msra.mxu0 %v10926_v44 }
 0x12b   :  { %19113 = vst [vmem:[#allocation19_spill] sm:$0xff] %v14681_v61  ;;  %v19117_v61 = vld [vmem:[#allocation25_spill] sm:$0xff] }
 0x12c   :  { %19120 = vst [vmem:[#allocation25_spill] sm:$0xff] %v14714_v56 }
 0x12d   :  { %v14686_v35 = vld [vmem:[#allocation1 + $0x20] ss:$4 sm:$0xff]  ;;  %v14688_v45 = vld [vmem:[#allocation1 + $0x21] ss:$4 sm:$0xff]  ;;  %v14690_v31 = vld [vmem:[#allocation1 + $0x22] ss:$4 sm:$0xff] }
 0x12e   :  { %v14696_v4 = vld [vmem:[#allocation1 + $0x23] ss:$4 sm:$0xff]  ;;  %10899 = vmatmul.msk.bf16.gmra.mxu2 %vm975_vm3, %v14361_v39  ;;  %v14701_v53 = vld [vmem:[#allocation1 + $0x1] ss:$4 sm:$0xff]  ;;  %v14703_v23 = vld [vmem:[#allocation1 + $0x2] ss:$4 sm:$0xff]  ;;  %1773 = vmatpush.bf16.msra.mxu1 %v10930_v40 }
 0x12f   :  { %1557 = vst [vmem:[#allocation1 + $0x20] sm:$0xff] %v19116_v47  ;;  %10906 = vmatmul.msk.bf16.gmra.mxu3 %vm975_vm3, %v14361_v39  ;;  %v14707_v5 = vld [vmem:[#allocation1 + $0x3] ss:$4 sm:$0xff]  ;;  %v14749_v19 = vpop.f32.mrf.mxu1 }
 0x130   :  { %1547 = vst [vmem:[#allocation1] sm:$0xff] %v19117_v61 }
 0x131   :  { %v14710_v17 = vpop.f32.mrf.mxu2  ;;  %v14712_v44 = vpop.f32.mrf.mxu3 }
 0x132   :  { %19118 = vst [vmem:[#allocation18_spill] sm:$0xff] %v14710_v17 }
 0x133   :  { %19119 = vst [vmem:[#allocation37_spill] sm:$0xff] %v14712_v44 }
 0x136   :  { %v14729_v61 = vld [vmem:[#allocation1 + $0x20] ss:$4 sm:$0xff]  ;;  %v14731_v17 = vld [vmem:[#allocation1 + $0x21] ss:$4 sm:$0xff]  ;;  %v14733_v44 = vld [vmem:[#allocation1 + $0x22] ss:$4 sm:$0xff] }
 0x137   :  { %v14718_v47 = vld [vmem:[#allocation1 + $0x1] ss:$4 sm:$0xff]  ;;  %v14720_v46 = vld [vmem:[#allocation1 + $0x2] ss:$4 sm:$0xff]  ;;  %v14722_v40 = vld [vmem:[#allocation1 + $0x3] ss:$4 sm:$0xff] }
 0x138   :  { %1556 = vst [vmem:[#allocation1] sm:$0xff] %v19122_v54  ;;  %v14735_v56 = vld [vmem:[#allocation1 + $0x23] ss:$4 sm:$0xff] }
 0x139   :  { %v14725_v39 = vpop.f32.mrf.mxu2  ;;  %v14727_v57 = vpop.f32.mrf.mxu3 }
 0x13a   :  { %19123 = vst [vmem:[#allocation35_spill] sm:$0xff] %v14725_v39 }
 0x13b   :  { %19124 = vst [vmem:[#allocation43_spill] sm:$0xff] %v14727_v57  ;;  %v14747_v57 = vpop.f32.mrf.mxu0 }
 0x13e   :  { %10900 = vmatmul.msk.bf16.gmra.mxu2 %vm975_vm3, %v14379_v7 }
 0x13f   :  { %10907 = vmatmul.msk.bf16.gmra.mxu3 %vm975_vm3, %v14379_v7  ;;  %v14741_v62 = vld [vmem:[#allocation1 + $0x1] ss:$4 sm:$0xff]  ;;  %v14743_v54 = vld [vmem:[#allocation1 + $0x2] ss:$4 sm:$0xff]  ;;  %v14745_v39 = vld [vmem:[#allocation1 + $0x3] ss:$4 sm:$0xff] }
 0x140   :  { %1578 = vst [vmem:[#allocation1] ss:$9 sm:$0xff] %v14523_v49  ;;  %v14765_v49 = vpop.f32.mrf.mxu1 }
 0x141   :  { %1580 = vst [vmem:[#allocation1 + $0x1] ss:$9 sm:$0xff] %v14525_v28  ;;  %v14754_v29 = vpop.f32.mrf.mxu2  ;;  %v14756_v14 = vpop.f32.mrf.mxu3 }
 0x142   :  { %1582 = vst [vmem:[#allocation1 + $0x2] ss:$9 sm:$0xff] %v14527_v63 }
 0x143   :  { %1584 = vst [vmem:[#allocation1 + $0x3] ss:$9 sm:$0xff] %v14475_v55  ;;  %v14763_v7 = vpop.f32.mrf.mxu0 }
 0x144   :  { %1586 = vst [vmem:[#allocation1 + $0x4] ss:$9 sm:$0xff] %v14477_v27 }
 0x145   :  { %1588 = vst [vmem:[#allocation1 + $0x5] ss:$9 sm:$0xff] %v14479_v32 }
 0x146   :  { %1590 = vst [vmem:[#allocation1 + $0x6] ss:$9 sm:$0xff] %v14481_v34 }
 0x147   :  { %1592 = vst [vmem:[#allocation1 + $0x7] ss:$9 sm:$0xff] %v14543_v1 }
 0x148   :  { %v14792_v34 = vpop.f32.mrf.mxu1 }
 0x149   :  { %v14767_v28 = vpop.f32.mrf.mxu2  ;;  %v14769_v63 = vpop.f32.mrf.mxu3 }
 0x14a   :  { %19125 = vst [vmem:[#allocation44_spill] sm:$0xff] %v14769_v63 }
 0x14e   :  { %10901 = vmatmul.msk.bf16.gmra.mxu2 %vm975_vm3, %v14405_v50  ;;  %v14773_v55 = vld [vmem:[#allocation1] sm:$0xff] }
 0x14f   :  { %10908 = vmatmul.msk.bf16.gmra.mxu3 %vm975_vm3, %v14405_v50  ;;  %1594 = vst [vmem:[#allocation1] ss:$9 sm:$0xff] %v14545_v58  ;;  %10971 = vmatmul.msk.bf16.vlgmr.msra.gmra.mxu0 %vm975_vm3, %v14773_v55  ;;  %v14790_v50 = vpop.f32.mrf.mxu0 }
 0x150   :  { %10978 = vmatmul.msk.bf16.vlgmr.msra.gmra.mxu1 %vm975_vm3, %v14773_v55  ;;  %1595 = vst [vmem:[#allocation1 + $0x1] ss:$9 sm:$0xff] %v14547_v25  ;;  %v14805_v25 = vpop.f32.mrf.mxu1 }
 0x151   :  { %1596 = vst [vmem:[#allocation1 + $0x2] ss:$9 sm:$0xff] %v14510_v18  ;;  %v14785_v27 = vpop.f32.mrf.mxu2  ;;  %v14787_v32 = vpop.f32.mrf.mxu3 }
 0x152   :  { %1597 = vst [vmem:[#allocation1 + $0x3] ss:$9 sm:$0xff] %v14512_v9 }
 0x153   :  { %19126 = vst [vmem:[#allocation45_spill] sm:$0xff] %v14785_v27 }
 0x154   :  { %19127 = vst [vmem:[#allocation46_spill] sm:$0xff] %v14787_v32 }
 0x155   :  { %1598 = vst [vmem:[#allocation1 + $0x4] ss:$9 sm:$0xff] %v14514_v11 }
 0x156   :  { %1599 = vst [vmem:[#allocation1 + $0x5] ss:$9 sm:$0xff] %v14518_v36 }
 0x157   :  { %1600 = vst [vmem:[#allocation1 + $0x6] ss:$9 sm:$0xff] %v14587_v42  ;;  %v14803_v58 = vpop.f32.mrf.mxu0 }
 0x158   :  { %1601 = vst [vmem:[#allocation1 + $0x7] ss:$9 sm:$0xff] %v14589_v10  ;;  %v10933_v10 = vld [vmem:[%s18808_s1 + $0xc8] sm:$0xf] }
 0x159   :  { %v14797_v1 = vpop.f32.mrf.mxu2  ;;  %v14799_v18 = vpop.f32.mrf.mxu3 }
 0x15a   :  { %19128 = vst [vmem:[#allocation47_spill] sm:$0xff] %v14797_v1 }
 0x15b   :  { %19129 = vst [vmem:[#allocation48_spill] sm:$0xff] %v14799_v18 }
 0x15e   :  { %10902 = vmatmul.msk.bf16.gmra.mxu2 %vm975_vm3, %v14427_v60 }
 0x15f   :  { %v14801_v9 = vld [vmem:[#allocation1] sm:$0xff]  ;;  %10909 = vmatmul.msk.bf16.gmra.mxu3 %vm975_vm3, %v14427_v60  ;;  %v10949_v60 = vld [vmem:[%s18808_s1 + $0xe8] sm:$0xf] }
 0x160   :  { %1603 = vst [vmem:[#allocation1] ss:$9 sm:$0xff] %v14591_v12  ;;  %10972 = vmatmul.msk.bf16.gmra.mxu0 %vm975_vm3, %v14801_v9  ;;  %10979 = vmatmul.msk.bf16.gmra.mxu1 %vm975_vm3, %v14801_v9  ;;  %v12960_v12 = vld [vmem:[%s18808_s1 + $0xd4] sm:$0xf0] }
 0x161   :  { %1604 = vst [vmem:[#allocation1 + $0x1] ss:$9 sm:$0xff] %v14534_v0  ;;  %v14820_v11 = vpop.f32.mrf.mxu2  ;;  %v14822_v36 = vpop.f32.mrf.mxu3  ;;  %v12964_v0 = vld [vmem:[%s18808_s1 + $0xf4] sm:$0xf0] }
 0x162   :  { %1605 = vst [vmem:[#allocation1 + $0x2] ss:$9 sm:$0xff] %v14536_v3  ;;  %v10950_v3 = vor.u32 %v12964_v0, %v10949_v60  ;;  %v10935_v60 = vld [vmem:[%s18808_s1 + $0xd8] sm:$0xf0]  ;;  %v14851_v0 = vpop.f32.mrf.mxu0 }
 0x163   :  { %1606 = vst [vmem:[#allocation1 + $0x3] ss:$9 sm:$0xff] %v14538_v20  ;;  %v12962_v20 = vld [vmem:[%s18808_s1 + $0xec] sm:$0xf] }
 0x164   :  { %1607 = vst [vmem:[#allocation1 + $0x4] ss:$9 sm:$0xff] %v14540_v52  ;;  %v10951_v52 = vld [vmem:[%s18808_s1 + $0xf8] sm:$0xf0]  ;;  %1816 = vmatpush.bf16.msrb.mxu2 %v10950_v3 }
 0x165   :  { %19130 = vst [vmem:[#allocation49_spill] sm:$0xff] %v14820_v11  ;;  %v10954_v42 = vor.u32 %v12962_v20, %v10951_v52  ;;  %v14853_v20 = vpop.f32.mrf.mxu1 }
 0x166   :  { %19131 = vst [vmem:[#allocation50_spill] sm:$0xff] %v14822_v36 }
 0x167   :  { %1608 = vst [vmem:[#allocation1 + $0x5] ss:$9 sm:$0xff] %v14623_v16  ;;  %v10934_v16 = vor.u32 %v12960_v12, %v10933_v10  ;;  %1860 = vmatpush.bf16.msrb.mxu3 %v10954_v42 }
 0x168   :  { %1609 = vst [vmem:[#allocation1 + $0x6] ss:$9 sm:$0xff] %v14625_v21  ;;  %v12958_v21 = vld [vmem:[%s18808_s1 + $0xcc] sm:$0xf] }
 0x169   :  { %1610 = vst [vmem:[#allocation1 + $0x7] ss:$9 sm:$0xff] %v14627_v30  ;;  %v10938_v30 = vor.u32 %v12958_v21, %v10935_v60  ;;  %1817 = vmatpush.bf16.msrb.mxu2 %v10934_v16  ;;  %v14855_v52 = vpop.f32.mrf.mxu2  ;;  %v14857_v36 = vpop.f32.mrf.mxu3 }
 0x16a   :  { %19132 = vst [vmem:[#allocation51_spill] sm:$0xff] %v14855_v52 }
 0x16b   :  { %19133 = vst [vmem:[#allocation52_spill] sm:$0xff] %v14857_v36  ;;  %1861 = vmatpush.bf16.msrb.mxu3 %v10938_v30 }
 0x16d   :  { %v14876_v42 = vpop.f32.mrf.mxu1 }
 0x16e   :  { %10903 = vmatmul.msk.bf16.gmra.mxu2 %vm975_vm3, %v14486_v38 }
 0x16f   :  { %10910 = vmatmul.msk.bf16.gmra.mxu3 %vm975_vm3, %v14486_v38 }
 0x170   :  { %v14859_v3 = vld [vmem:[#allocation1] sm:$0xff] }
 0x171   :  { %1612 = vst [vmem:[#allocation1] ss:$9 sm:$0xff] %v14564_v59  ;;  %10973 = vmatmul.msk.bf16.gmra.mxu0 %vm975_vm3, %v14859_v3  ;;  %10980 = vmatmul.msk.bf16.gmra.mxu1 %vm975_vm3, %v14859_v3  ;;  %v14874_v59 = vpop.f32.mrf.mxu0  ;;  %v14881_v38 = vpop.f32.mrf.mxu3 }
 0x172   :  { %1613 = vst [vmem:[#allocation1 + $0x1] ss:$9 sm:$0xff] %v14566_v13  ;;  %v14879_v13 = vpop.f32.mrf.mxu2 }
 0x173   :  { %1614 = vst [vmem:[#allocation1 + $0x2] ss:$9 sm:$0xff] %v14568_v22 }
 0x174   :  { %1615 = vst [vmem:[#allocation1 + $0x3] ss:$9 sm:$0xff] %v14572_v24 }
 0x175   :  { %1616 = vst [vmem:[#allocation1 + $0x4] ss:$9 sm:$0xff] %v14651_v37  ;;  %v14893_v12 = vpop.f32.mrf.mxu1 }
 0x176   :  { %1617 = vst [vmem:[#allocation1 + $0x5] ss:$9 sm:$0xff] %v14653_v43 }
 0x177   :  { %19134 = vst [vmem:[#allocation53_spill] sm:$0xff] %v14879_v13 }
 0x178   :  { %19135 = vst [vmem:[#allocation54_spill] sm:$0xff] %v14881_v38 }
 0x179   :  { %1618 = vst [vmem:[#allocation1 + $0x6] ss:$9 sm:$0xff] %v14655_v48  ;;  %v14887_v10 = vpop.f32.mrf.mxu3  ;;  %v14891_v37 = vpop.f32.mrf.mxu0 }
 0x17a   :  { %1619 = vst [vmem:[#allocation1 + $0x7] ss:$9 sm:$0xff] %v14610_v6  ;;  %v14885_v22 = vpop.f32.mrf.mxu2 }
 0x17b   :  { %19136 = vst [vmem:[#allocation55_spill] sm:$0xff] %v14885_v22 }
 0x17c   :  { %19137 = vst [vmem:[#allocation56_spill] sm:$0xff] %v14887_v10 }
 0x17e   :  { %10985 = vmatmul.msk.bf16.vlgmr.msrb.gmra.mxu2 %vm975_vm3, %v14773_v55 }
 0x17f   :  { %10992 = vmatmul.msk.bf16.vlgmr.msrb.gmra.mxu3 %vm975_vm3, %v14773_v55 }
 0x181   :  { %v14889_v24 = vld [vmem:[#allocation1] sm:$0xff] }
 0x182   :  { %1621 = vst [vmem:[#allocation1] ss:$9 sm:$0xff] %v14612_v2  ;;  %10974 = vmatmul.msk.bf16.gmra.mxu0 %vm975_vm3, %v14889_v24  ;;  %10981 = vmatmul.msk.bf16.gmra.mxu1 %vm975_vm3, %v14889_v24  ;;  %v14910_v6 = vpop.f32.mrf.mxu2  ;;  %v14912_v2 = vpop.f32.mrf.mxu3 }
 0x183   :  { %1622 = vst [vmem:[#allocation1 + $0x1] ss:$9 sm:$0xff] %v14614_v33  ;;  %v14915_v33 = vpop.f32.mrf.mxu0 }
 0x184   :  { %1623 = vst [vmem:[#allocation1 + $0x2] ss:$9 sm:$0xff] %v14620_v41  ;;  %v14917_v41 = vpop.f32.mrf.mxu1 }
 0x185   :  { %1624 = vst [vmem:[#allocation1 + $0x3] ss:$9 sm:$0xff] %v14701_v53 }
 0x186   :  { %1625 = vst [vmem:[#allocation1 + $0x4] ss:$9 sm:$0xff] %v14703_v23 }
 0x187   :  { %1626 = vst [vmem:[#allocation1 + $0x5] ss:$9 sm:$0xff] %v14707_v5 }
 0x188   :  { %1627 = vst [vmem:[#allocation1 + $0x6] ss:$9 sm:$0xff] %v14638_v51 }
 0x189   :  { %19138 = vst [vmem:[#allocation57_spill] sm:$0xff] %v14910_v6  ;;  %v19147_v6 = vld [vmem:[#allocation21_spill] sm:$0xff] }
 0x18a   :  { %19139 = vst [vmem:[#allocation58_spill] sm:$0xff] %v14912_v2  ;;  %v14919_v43 = vpop.f32.mrf.mxu2  ;;  %v14921_v53 = vpop.f32.mrf.mxu3  ;;  %v1364_v10 = vadd.f32 %v14749_v19, %v19147_v6 }
 0x18b   :  { %1628 = vst [vmem:[#allocation1 + $0x7] ss:$9 sm:$0xff] %v14640_v15  ;;  %v14934_v51 = vpop.f32.mrf.mxu0 }
 0x18c   :  { %19140 = vst [vmem:[#allocation59_spill] sm:$0xff] %v14919_v43  ;;  %v19146_v43 = vld [vmem:[#allocation20_spill] sm:$0xff] }
 0x18d   :  { %19141 = vst [vmem:[#allocation60_spill] sm:$0xff] %v14921_v53  ;;  %v15014_v53 = vld [vmem:[%s18809_s2] sm:$0xf]  ;;  %v1320_v2 = vadd.f32 %v14747_v57, %v19146_v43 }
 0x18e   :  { %10986 = vmatmul.msk.bf16.gmra.mxu2 %vm975_vm3, %v14801_v9  ;;  %v15024_v22 = vperm.slane %v15014_v53, 1 }
 0x18f   :  { %10993 = vmatmul.msk.bf16.gmra.mxu3 %vm975_vm3, %v14801_v9 }
 0x192   :  { %v1629_v48 = vld [vmem:[#allocation1] sm:$0xff] }
 0x193   :  { %1630 = vst [vmem:[#allocation1] ss:$9 sm:$0xff] %v14642_v26  ;;  %10975 = vmatmul.msk.bf16.gmra.mxu0 %vm975_vm3, %v1629_v48  ;;  %10982 = vmatmul.msk.bf16.gmra.mxu1 %vm975_vm3, %v1629_v48  ;;  %v14936_v26 = vpop.f32.mrf.mxu1  ;;  %v14945_v23 = vpop.f32.mrf.mxu0 }
 0x194   :  { %1631 = vst [vmem:[#allocation1 + $0x1] ss:$9 sm:$0xff] %v14644_v8  ;;  %v14943_v8 = vpop.f32.mrf.mxu3 }
 0x195   :  { %1632 = vst [vmem:[#allocation1 + $0x2] ss:$9 sm:$0xff] %v14718_v47 }
 0x196   :  { %1633 = vst [vmem:[#allocation1 + $0x3] ss:$9 sm:$0xff] %v14720_v46  ;;  %v14941_v46 = vpop.f32.mrf.mxu2 }
 0x197   :  { %1634 = vst [vmem:[#allocation1 + $0x4] ss:$9 sm:$0xff] %v14722_v40 }
 0x198   :  { %1635 = vst [vmem:[#allocation1 + $0x5] ss:$9 sm:$0xff] %v14686_v35 }
 0x199   :  { %1636 = vst [vmem:[#allocation1 + $0x6] ss:$9 sm:$0xff] %v14688_v45 }
 0x19a   :  { %1637 = vst [vmem:[#allocation1 + $0x7] ss:$9 sm:$0xff] %v14690_v31 }
 0x19b   :  { %v14947_v5 = vpop.f32.mrf.mxu1 }
 0x19c   :  { %v14952_v40 = vpop.f32.mrf.mxu3 }
 0x19e   :  { %v14950_v47 = vpop.f32.mrf.mxu2  ;;  %10987 = vmatmul.msk.bf16.gmra.mxu2 %vm975_vm3, %v14859_v3 }
 0x19f   :  { %10994 = vmatmul.msk.bf16.gmra.mxu3 %vm975_vm3, %v14859_v3 }
 0x1a1   :  { %v1638_v15 = vld [vmem:[#allocation1] sm:$0xff] }
 0x1a2   :  { %1639 = vst [vmem:[#allocation1] ss:$9 sm:$0xff] %v14696_v4 }
 0x1a3   :  { %1640 = vst [vmem:[#allocation1 + $0x1] ss:$9 sm:$0xff] %v14741_v62  ;;  %10976 = vmatmul.msk.bf16.gmra.mxu0 %vm975_vm3, %v1638_v15  ;;  %10983 = vmatmul.msk.bf16.gmra.mxu1 %vm975_vm3, %v1638_v15  ;;  %v14971_v62 = vpop.f32.mrf.mxu0  ;;  %v14973_v35 = vpop.f32.mrf.mxu1 }
 0x1a4   :  { %1641 = vst [vmem:[#allocation1 + $0x2] ss:$9 sm:$0xff] %v14743_v54  ;;  %v14969_v45 = vpop.f32.mrf.mxu3 }
 0x1a5   :  { %1642 = vst [vmem:[#allocation1 + $0x3] ss:$9 sm:$0xff] %v14745_v39 }
 0x1a6   :  { %1643 = vst [vmem:[#allocation1 + $0x4] ss:$9 sm:$0xff] %v14729_v61  ;;  %v14967_v31 = vpop.f32.mrf.mxu2 }
 0x1a7   :  { %1644 = vst [vmem:[#allocation1 + $0x5] ss:$9 sm:$0xff] %v14731_v17 }
 0x1a8   :  { %1645 = vst [vmem:[#allocation1 + $0x6] ss:$9 sm:$0xff] %v14733_v44 }
 0x1a9   :  { %1646 = vst [vmem:[#allocation1 + $0x7] ss:$9 sm:$0xff] %v14735_v56 }
 0x1ab   :  { %v14981_v17 = vpop.f32.mrf.mxu0  ;;  %v14983_v44 = vpop.f32.mrf.mxu1 }
 0x1ac   :  { %v14977_v39 = vpop.f32.mrf.mxu3 }
 0x1ae   :  { %v14975_v4 = vpop.f32.mrf.mxu2  ;;  %10988 = vmatmul.msk.bf16.gmra.mxu2 %vm975_vm3, %v14889_v24 }
 0x1af   :  { %10995 = vmatmul.msk.bf16.gmra.mxu3 %vm975_vm3, %v14889_v24 }
 0x1b0   :  { %v1647_v61 = vld [vmem:[#allocation1] sm:$0xff] }
 0x1b3   :  { %10977 = vmatmul.msk.bf16.gmra.mxu0 %vm975_vm3, %v1647_v61  ;;  %10984 = vmatmul.msk.bf16.gmra.mxu1 %vm975_vm3, %v1647_v61  ;;  %v14993_v55 = vpop.f32.mrf.mxu0  ;;  %v14995_v9 = vpop.f32.mrf.mxu1 }
 0x1b4   :  { %v14991_v54 = vpop.f32.mrf.mxu3 }
 0x1b6   :  { %v14989_v56 = vpop.f32.mrf.mxu2 }
 0x1bb   :  { %v15003_v60 = vpop.f32.mrf.mxu0  ;;  %v15005_v30 = vpop.f32.mrf.mxu1 }
 0x1bc   :  { %v14999_v21 = vpop.f32.mrf.mxu3 }
 0x1bd   :  { %19143 = vst [vmem:[#allocation62_spill] sm:$0xff] %v14999_v21 }
 0x1be   :  { %v14997_v16 = vpop.f32.mrf.mxu2  ;;  %10989 = vmatmul.msk.bf16.gmra.mxu2 %vm975_vm3, %v1629_v48 }
 0x1bf   :  { %19142 = vst [vmem:[#allocation61_spill] sm:$0xff] %v14997_v16  ;;  %10996 = vmatmul.msk.bf16.gmra.mxu3 %vm975_vm3, %v1629_v48  ;;  %v15021_v48 = vperm.slane %v15014_v53, 0 }
 0x1c4   :  { %v15009_v24 = vpop.f32.mrf.mxu3 }
 0x1c5   :  { %19145 = vst [vmem:[#allocation64_spill] sm:$0xff] %v15009_v24 }
 0x1c6   :  { %v15007_v3 = vpop.f32.mrf.mxu2 }
 0x1c7   :  { %19144 = vst [vmem:[#allocation63_spill] sm:$0xff] %v15007_v3 }
 0x1cc   :  { %v15028_v13 = vpop.f32.mrf.mxu3  ;;  %v1731_v36 = vpop.f32.mrf.mxu0 }
 0x1cd   :  { %19149 = vst [vmem:[#allocation21_spill] sm:$0xff] %v15028_v13  ;;  %v1775_v52 = vpop.f32.mrf.mxu1  ;;  %v1898_v11 = vadd.f32 %v1731_v36, %v1320_v2 }
 0x1ce   :  { %v15026_v38 = vpop.f32.mrf.mxu2  ;;  %v1899_v18 = vadd.f32 %v1775_v52, %v1364_v10  ;;  %10990 = vmatmul.msk.bf16.gmra.mxu2 %vm975_vm3, %v1638_v15 }
 0x1cf   :  { %19148 = vst [vmem:[#allocation20_spill] sm:$0xff] %v15026_v38  ;;  %10997 = vmatmul.msk.bf16.gmra.mxu3 %vm975_vm3, %v1638_v15  ;;  %v1964_v19 = vadd.f32 %v15021_v48, %v1898_v11  ;;  %v19152_v15 = vld [vmem:[#allocation23_spill] sm:$0xff] }
 0x1d0   :  { %v1965_v57 = vadd.f32 %v15024_v22, %v1899_v18 }
 0x1d1   :  { %v2020_v43 = vmax.f32 %v1964_v19, 0.0  ;;  %v1325_v19 = vadd.f32 %v14790_v50, %v19152_v15 }
 0x1d2   :  { %v2021_v6 = vmax.f32 %v1965_v57, 0.0  ;;  %v19153_v57 = vld [vmem:[#allocation24_spill] sm:$0xff] }
 0x1d4   :  { %v2132_v38 = vrot.slane %v2021_v6, 6  ;;  %v15036_v1 = vpop.f32.mrf.mxu3  ;;  %v15038_v36 = vpop.f32.mrf.mxu0  ;;  %v1369_v6 = vadd.f32 %v14792_v34, %v19153_v57 }
 0x1d5   :  { %19151 = vst [vmem:[#allocation66_spill] sm:$0xff] %v15036_v1  ;;  %v15040_v52 = vpop.f32.mrf.mxu1 }
 0x1d6   :  { %v15034_v13 = vpop.f32.mrf.mxu2  ;;  %v15043_v10 = vsel %vm2174_vm4, %v2020_v43, %v2132_v38  ;;  %v15046_v18 = vsel %vm2180_vm6, %v2020_v43, %v2132_v38  ;;  %v15049_v11 = vsel %vm2176_vm5, %v2020_v43, %v2132_v38  ;;  %v15052_v2 = vsel %vm2182_vm7, %v2132_v38, %v2020_v43 }
 0x1d7   :  { %19150 = vst [vmem:[#allocation65_spill] sm:$0xff] %v15034_v13 }
 0x1dc   :  { %v15060_v13 = vpop.f32.mrf.mxu3 }
 0x1dd   :  { %19155 = vst [vmem:[#allocation24_spill] sm:$0xff] %v15060_v13  ;;  %v1736_v24 = vpop.f32.mrf.mxu0  ;;  %v1780_v32 = vpop.f32.mrf.mxu1 }
 0x1de   :  { %v15058_v1 = vpop.f32.mrf.mxu2  ;;  %v1906_v3 = vadd.f32 %v1736_v24, %v1325_v19  ;;  %v1907_v27 = vadd.f32 %v1780_v32, %v1369_v6  ;;  %10991 = vmatmul.msk.bf16.gmra.mxu2 %vm975_vm3, %v1647_v61  ;;  %v19162_v24 = vld [vmem:[#allocation30_spill] sm:$0xff]  ;;  %v19163_v6 = vld [vmem:[#allocation32_spill] sm:$0xff] }
 0x1df   :  { %19154 = vst [vmem:[#allocation23_spill] sm:$0xff] %v15058_v1  ;;  %10998 = vmatmul.msk.bf16.gmra.mxu3 %vm975_vm3, %v1647_v61  ;;  %v1330_v19 = vadd.f32 %v14851_v0, %v19162_v24  ;;  %vm3917_vm3 = vcmask 523264  }
 0x1e0   :  { %v1972_v38 = vadd.f32 %v15021_v48, %v1906_v3  ;;  %v1973_v43 = vadd.f32 %v15024_v22, %v1907_v27 }
 0x1e2   :  { %v2029_v50 = vmax.f32 %v1973_v43, 0.0  ;;  %v2028_v15 = vmax.f32 %v1972_v38, 0.0  ;;  %v1374_v38 = vadd.f32 %v14853_v20, %v19163_v6 }
 0x1e4   :  { %v2138_v21 = vrot.slane %v2029_v50, 6  ;;  %v15068_v57 = vpop.f32.mrf.mxu3 }
 0x1e5   :  { %19157 = vst [vmem:[#allocation68_spill] sm:$0xff] %v15068_v57  ;;  %v15070_v13 = vpop.f32.mrf.mxu0  ;;  %v15072_v1 = vpop.f32.mrf.mxu1 }
 0x1e6   :  { %v15066_v34 = vpop.f32.mrf.mxu2  ;;  %v15075_v32 = vsel %vm2174_vm4, %v2028_v15, %v2138_v21  ;;  %v15078_v61 = vsel %vm2180_vm6, %v2028_v15, %v2138_v21  ;;  %v15081_v3 = vsel %vm2176_vm5, %v2028_v15, %v2138_v21  ;;  %v15084_v27 = vsel %vm2182_vm7, %v2138_v21, %v2028_v15 }
 0x1e7   :  { %19156 = vst [vmem:[#allocation67_spill] sm:$0xff] %v15066_v34 }
 0x1e8   :  { %19158 = vst [vmem:[#allocation69_spill] sm:$0xff] %v15075_v32 }
 0x1e9   :  { %19159 = vst [vmem:[#allocation70_spill] sm:$0xff] %v15078_v61 }
 0x1ea   :  { %19160 = vst [vmem:[#allocation71_spill] sm:$0xff] %v15081_v3 }
 0x1eb   :  { %19161 = vst [vmem:[#allocation72_spill] sm:$0xff] %v15084_v27 }
 0x1ec   :  { %v15092_v50 = vpop.f32.mrf.mxu3 }
 0x1ed   :  { %19164 = vst [vmem:[#allocation30_spill] sm:$0xff] %v15092_v50 }
 0x1ee   :  { %v15090_v43 = vpop.f32.mrf.mxu2  ;;  %v1741_v57 = vpop.f32.mrf.mxu0 }
 0x1ef   :  { %v1785_v34 = vpop.f32.mrf.mxu1  ;;  %v1914_v32 = vadd.f32 %v1741_v57, %v1330_v19 }
 0x1f0   :  { %v1915_v61 = vadd.f32 %v1785_v34, %v1374_v38 }
 0x1f1   :  { %v1980_v63 = vadd.f32 %v15021_v48, %v1914_v32  ;;  %v19171_v32 = vld [vmem:[#allocation34_spill] sm:$0xff] }
 0x1f2   :  { %v1981_v3 = vadd.f32 %v15024_v22, %v1915_v61  ;;  %v1335_v61 = vadd.f32 %v14891_v37, %v19171_v32  ;;  %v19177_v32 = vld [vmem:[#allocation26_spill] sm:$0xff] }
 0x1f3   :  { %v2036_v15 = vmax.f32 %v1980_v63, 0.0 }
 0x1f4   :  { %v2037_v21 = vmax.f32 %v1981_v3, 0.0  ;;  %v15098_v0 = vpop.f32.mrf.mxu3  ;;  %v19172_v3 = vld [vmem:[#allocation36_spill] sm:$0xff] }
 0x1f5   :  { %19166 = vst [vmem:[#allocation73_spill] sm:$0xff] %v15098_v0  ;;  %v1379_v19 = vadd.f32 %v14893_v12, %v19172_v3  ;;  %v15132_v12 = vadd.f32 %v14803_v58, %v19177_v32  ;;  %v19178_v3 = vld [vmem:[#allocation27_spill] sm:$0xff]  ;;  %v19185_v32 = vld [vmem:[#allocation8_spill] sm:$0xff] }
 0x1f6   :  { %v2144_v27 = vrot.slane %v2037_v21, 6  ;;  %v15096_v16 = vpop.f32.mrf.mxu2  ;;  %v15100_v20 = vpop.f32.mrf.mxu0 }
 0x1f7   :  { %19165 = vst [vmem:[#allocation32_spill] sm:$0xff] %v15096_v16  ;;  %v15102_v24 = vpop.f32.mrf.mxu1 }
 0x1f8   :  { %v15105_v6 = vsel %vm2174_vm4, %v2036_v15, %v2144_v27  ;;  %v15108_v34 = vsel %vm2180_vm6, %v2036_v15, %v2144_v27  ;;  %v15111_v57 = vsel %vm2176_vm5, %v2036_v15, %v2144_v27  ;;  %v15114_v63 = vsel %vm2182_vm7, %v2144_v27, %v2036_v15  ;;  %v19175_v27 = vld [vmem:[#allocation22_spill] sm:$0xff] }
 0x1f9   :  { %19167 = vst [vmem:[#allocation74_spill] sm:$0xff] %v15105_v6  ;;  %v1322_v15 = vadd.f32 %v14763_v7, %v19175_v27  ;;  %v19184_v27 = vld [vmem:[#allocation15_spill] sm:$0xff] }
 0x1fa   :  { %19168 = vst [vmem:[#allocation75_spill] sm:$0xff] %v15108_v34 }
 0x1fb   :  { %19169 = vst [vmem:[#allocation76_spill] sm:$0xff] %v15111_v57 }
 0x1fc   :  { %19170 = vst [vmem:[#allocation77_spill] sm:$0xff] %v15114_v63  ;;  %v15122_v21 = vpop.f32.mrf.mxu3  ;;  %v19176_v63 = vld [vmem:[#allocation28_spill] sm:$0xff] }
 0x1fd   :  { %19174 = vst [vmem:[#allocation36_spill] sm:$0xff] %v15122_v21  ;;  %v1366_v37 = vadd.f32 %v14765_v49, %v19176_v63  ;;  %v15136_v21 = vadd.f32 %v14805_v25, %v19178_v3  ;;  %v19182_v63 = vld [vmem:[#allocation38_spill] sm:$0xff]  ;;  %v1340_v3 = vadd.f32 %v14934_v51, %v19185_v32  ;;  %v19190_v32 = vld [vmem:[#allocation17_spill] sm:$0xff] }
 0x1fe   :  { %v15120_v38 = vpop.f32.mrf.mxu2  ;;  %v15152_v58 = vadd.f32 %v14917_v41, %v19182_v63  ;;  %v15166_v63 = vperm.slane %v15014_v53, 2 }
 0x1ff   :  { %19173 = vst [vmem:[#allocation34_spill] sm:$0xff] %v15120_v38  ;;  %v1746_v0 = vpop.f32.mrf.mxu0  ;;  %v1790_v16 = vpop.f32.mrf.mxu1 }
 0x200   :  { %v1922_v50 = vadd.f32 %v1746_v0, %v1335_v61  ;;  %v1923_v34 = vadd.f32 %v1790_v16, %v1379_v19  ;;  %v19179_v0 = vld [vmem:[#allocation31_spill] sm:$0xff]  ;;  %v19183_v19 = vld [vmem:[#allocation10_spill] sm:$0xff] }
 0x201   :  { %v15140_v16 = vadd.f32 %v14874_v59, %v19179_v0  ;;  %v19181_v61 = vld [vmem:[#allocation39_spill] sm:$0xff]  ;;  %v1408_v25 = vadd.f32 %v14941_v46, %v19183_v19  ;;  %v1452_v59 = vadd.f32 %v14943_v8, %v19184_v27  ;;  %v15169_v8 = vperm.slane %v15014_v53, 3 }
 0x202   :  { %v1988_v6 = vadd.f32 %v15021_v48, %v1922_v50  ;;  %v1989_v57 = vadd.f32 %v15024_v22, %v1923_v34  ;;  %v19180_v50 = vld [vmem:[#allocation33_spill] sm:$0xff]  ;;  %v15148_v49 = vadd.f32 %v14915_v33, %v19181_v61 }
 0x203   :  { %v15144_v34 = vadd.f32 %v14876_v42, %v19180_v50  ;;  %v1903_v42 = vadd.f32 %v15040_v52, %v1366_v37 }
 0x204   :  { %v2045_v7 = vmax.f32 %v1989_v57, 0.0  ;;  %v2044_v57 = vmax.f32 %v1988_v6, 0.0  ;;  %v1863_v33 = vpop.f32.mrf.mxu3 }
 0x205   :  { %v1901_v46 = vadd.f32 %v1863_v33, %v1452_v59  ;;  %v19191_v33 = vld [vmem:[#allocation16_spill] sm:$0xff] }
 0x206   :  { %v2150_v0 = vrot.slane %v2045_v7, 6  ;;  %v1819_v50 = vpop.f32.mrf.mxu2  ;;  %v19187_v7 = vld [vmem:[#allocation13_spill] sm:$0xff] }
 0x207   :  { %v15161_v61 = vpop.f32.mrf.mxu0  ;;  %v15163_v38 = vpop.f32.mrf.mxu1  ;;  %v1900_v41 = vadd.f32 %v1819_v50, %v1408_v25  ;;  %v1384_v19 = vadd.f32 %v14936_v26, %v19187_v7  ;;  %v19188_v25 = vld [vmem:[#allocation12_spill] sm:$0xff]  ;;  %v1967_v59 = vadd.f32 %v15169_v8, %v1901_v46  ;;  %v15193_v50 = vadd.f32 %v14947_v5, %v19190_v32  ;;  %v19193_v26 = vld [vmem:[#allocation25_spill] sm:$0xff]  ;;  %v19195_v7 = vld [vmem:[#allocation42_spill] sm:$0xff] }
 0x208   :  { %v15172_v51 = vsel %vm2174_vm4, %v2044_v57, %v2150_v0  ;;  %v15175_v52 = vsel %vm2180_vm6, %v2044_v57, %v2150_v0  ;;  %v15178_v6 = vsel %vm2176_vm5, %v2044_v57, %v2150_v0  ;;  %v15181_v37 = vsel %vm2182_vm7, %v2150_v0, %v2044_v57  ;;  %v19192_v57 = vld [vmem:[#allocation29_spill] sm:$0xff]  ;;  %v19196_v46 = vld [vmem:[#allocation14_spill] sm:$0xff] }
 0x209   :  { %19186 = vst [vmem:[#allocation22_spill] sm:$0xff] %v15178_v6  ;;  %v15187_v27 = vadd.f32 %v14945_v23, %v19188_v25  ;;  %v1966_v53 = vadd.f32 %v15166_v63, %v1900_v41  ;;  %v15197_v6 = vadd.f32 %v14971_v62, %v19191_v33  ;;  %v15201_v0 = vadd.f32 %v14973_v35, %v19192_v57  ;;  %v19198_v33 = vld [vmem:[#allocation40_spill] sm:$0xff] }
 0x20a   :  { %v15205_v23 = vadd.f32 %v14981_v17, %v19193_v26  ;;  %v15209_v41 = vadd.f32 %v14983_v44, %v19195_v7  ;;  %v1410_v5 = vadd.f32 %v14950_v47, %v19196_v46  ;;  %v2023_v32 = vmax.f32 %v1967_v59, 0.0  ;;  %v19199_v44 = vld [vmem:[#allocation41_spill] sm:$0xff] }
 0x20b   :  { %19189 = vst [vmem:[#allocation28_spill] sm:$0xff] %v15187_v27  ;;  %v2022_v25 = vmax.f32 %v1966_v53, 0.0  ;;  %v19197_v27 = vld [vmem:[#allocation19_spill] sm:$0xff]  ;;  %v15217_v35 = vadd.f32 %v14993_v55, %v19198_v33  ;;  %v1902_v57 = vadd.f32 %v15038_v36, %v1322_v15  ;;  %v1969_v17 = vadd.f32 %v15024_v22, %v1903_v42  ;;  %v19200_v53 = vld [vmem:[#allocation18_spill] sm:$0xff]  ;;  %v19202_v55 = vld [vmem:[#allocation9_spill] sm:$0xff] }
 0x20c   :  { %19194 = vst [vmem:[#allocation26_spill] sm:$0xff] %v15205_v23  ;;  %v1454_v62 = vadd.f32 %v14952_v40, %v19197_v27  ;;  %v2134_v23 = vrot.slane %v2023_v32, 2  ;;  %v15223_v47 = vadd.f32 %v14995_v9, %v19199_v44  ;;  %v1413_v59 = vadd.f32 %v14967_v31, %v19200_v53  ;;  %v19201_v40 = vld [vmem:[#allocation37_spill] sm:$0xff]  ;;  %v1865_v15 = vpop.f32.mrf.mxu3  ;;  %v19203_v42 = vld [vmem:[#allocation11_spill] sm:$0xff] }
 0x20d   :  { %v2133_v26 = vrot.slane %v2022_v25, 4  ;;  %v1457_v27 = vadd.f32 %v14969_v45, %v19201_v40  ;;  %v15231_v7 = vadd.f32 %v15003_v60, %v19202_v55  ;;  %v15235_v46 = vadd.f32 %v15005_v30, %v19203_v42  ;;  %v19205_v40 = vld [vmem:[#allocation35_spill] sm:$0xff] }
 0x20e   :  { %v1821_v36 = vpop.f32.mrf.mxu2  ;;  %v15246_v30 = vadd.f32 %v14975_v4, %v19205_v40  ;;  %v1968_v55 = vadd.f32 %v15021_v48, %v1902_v57  ;;  %v2025_v42 = vmax.f32 %v1969_v17, 0.0 }
 0x20f   :  { %19204 = vst [vmem:[#allocation27_spill] sm:$0xff] %v15235_v46  ;;  %v2177_v9 = vsel %vm2176_vm5, %v2133_v26, %v2134_v23  ;;  %v2183_v33 = vsel %vm2182_vm7, %v2134_v23, %v2133_v26  ;;  %v2188_v31 = vsel %vm2174_vm4, %v2133_v26, %v2134_v23  ;;  %v1911_v46 = vadd.f32 %v15072_v1, %v15136_v21 }
 0x210   :  { %v1751_v25 = vpop.f32.mrf.mxu0  ;;  %v1795_v32 = vpop.f32.mrf.mxu1  ;;  %v2179_v60 = vsel %vm2178_vm8, %v15043_v10, %v2177_v9  ;;  %v2185_v53 = vsel %vm2184_vm10, %v15046_v18, %v2183_v33  ;;  %v2189_v10 = vsel %vm2178_vm8, %v2188_v31, %v15049_v11  ;;  %v1904_v4 = vadd.f32 %v1821_v36, %v1410_v5  ;;  %v19206_v33 = vld [vmem:[#allocation43_spill] sm:$0xff] }
 0x211   :  { %v1930_v44 = vadd.f32 %v1751_v25, %v1340_v3  ;;  %v1931_v45 = vadd.f32 %v1795_v32, %v1384_v19  ;;  %2390 = vst [vmem:[#allocation1] ss:$4 sm:$0xff] %v2179_v60  ;;  %v2186_v25 = vrot.slane %v2185_v53, 2  ;;  %v2190_v18 = vrot.slane %v2189_v10, 4 }
 0x212   :  { %v2192_v32 = vsel %vm2180_vm6, %v2133_v26, %v2134_v23  ;;  %v1905_v9 = vadd.f32 %v1865_v15, %v1454_v62  ;;  %v15258_v57 = vadd.f32 %v14977_v39, %v19206_v33  ;;  %v1910_v1 = vadd.f32 %v15070_v13, %v15132_v12 }
 0x213   :  { %v1996_v3 = vadd.f32 %v15021_v48, %v1930_v44  ;;  %v1997_v19 = vadd.f32 %v15024_v22, %v1931_v45  ;;  %v2193_v17 = vsel %vm2184_vm10, %v2192_v32, %v15052_v2  ;;  %2392 = vst [vmem:[#allocation1 + $0x1] ss:$4 sm:$0xff] %v2186_v25  ;;  %v1977_v44 = vadd.f32 %v15024_v22, %v1911_v46 }
 0x214   :  { %v2194_v11 = vrot.slane %v2193_v17, 6  ;;  %2394 = vst [vmem:[#allocation1 + $0x2] ss:$4 sm:$0xff] %v2190_v18  ;;  %v1970_v23 = vadd.f32 %v15166_v63, %v1904_v4  ;;  %v1971_v5 = vadd.f32 %v15169_v8, %v1905_v9  ;;  %v15269_v39 = vadd.f32 %v14989_v56, %v14754_v29  ;;  %v1868_v36 = vpop.f32.mrf.mxu3 }
 0x215   :  { %v2053_v21 = vmax.f32 %v1997_v19, 0.0  ;;  %v2135_v62 = vrot.slane %v2025_v42, 6  ;;  %v2052_v26 = vmax.f32 %v1996_v3, 0.0  ;;  %v2024_v15 = vmax.f32 %v1968_v55, 0.0 }
 0x216   :  { %v1824_v12 = vpop.f32.mrf.mxu2  ;;  %2396 = vst [vmem:[#allocation1 + $0x3] ss:$4 sm:$0xff] %v2194_v11  ;;  %v2026_v46 = vmax.f32 %v1970_v23, 0.0  ;;  %v2027_v45 = vmax.f32 %v1971_v5, 0.0  ;;  %v1976_v55 = vadd.f32 %v15021_v48, %v1910_v1  ;;  %v2033_v42 = vmax.f32 %v1977_v44, 0.0 }
 0x217   :  { %v2156_v13 = vrot.slane %v2053_v21, 6  ;;  %v1908_v60 = vadd.f32 %v1824_v12, %v1413_v59  ;;  %v2195_v25 = vsel %vm2174_vm4, %v2024_v15, %v2135_v62  ;;  %v2198_v59 = vsel %vm2180_vm6, %v2024_v15, %v2135_v62 }
 0x218   :  { %v15271_v2 = vpop.f32.mrf.mxu0  ;;  %v15273_v31 = vpop.f32.mrf.mxu1  ;;  %v2136_v3 = vrot.slane %v2026_v46, 4  ;;  %v2137_v19 = vrot.slane %v2027_v45, 2  ;;  %v2202_v10 = vsel %vm2176_vm5, %v2024_v15, %v2135_v62  ;;  %v1909_v18 = vadd.f32 %v1868_v36, %v1457_v27 }
 0x219   :  { %v15276_v53 = vsel %vm2174_vm4, %v2052_v26, %v2156_v13  ;;  %v15279_v29 = vsel %vm2180_vm6, %v2052_v26, %v2156_v13  ;;  %v15282_v56 = vsel %vm2176_vm5, %v2052_v26, %v2156_v13  ;;  %v15285_v40 = vsel %vm2182_vm7, %v2156_v13, %v2052_v26  ;;  %v19207_v26 = vld [vmem:[#allocation61_spill] sm:$0xff] }
 0x21a   :  { %v2206_v32 = vsel %vm2182_vm7, %v2135_v62, %v2024_v15  ;;  %v2196_v4 = vsel %vm2176_vm5, %v2136_v3, %v2137_v19  ;;  %v2199_v9 = vsel %vm2182_vm7, %v2137_v19, %v2136_v3  ;;  %v1974_v33 = vadd.f32 %v15166_v63, %v1908_v60 }
 0x21b   :  { %v2197_v1 = vsel %vm2178_vm8, %v2195_v25, %v2196_v4  ;;  %v2200_v21 = vsel %vm2184_vm10, %v2198_v59, %v2199_v9  ;;  %v2203_v17 = vsel %vm2174_vm4, %v2136_v3, %v2137_v19  ;;  %v2207_v44 = vsel %vm2180_vm6, %v2136_v3, %v2137_v19  ;;  %v19211_v4 = vld [vmem:[#allocation44_spill] sm:$0xff]  ;;  %v19213_v9 = vld [vmem:[#allocation45_spill] sm:$0xff] }
 0x21c   :  { %v15299_v11 = vmax.f32 %v1976_v55, 0.0  ;;  %v15301_v23 = vrot.slane %v2033_v42, 6  ;;  %v2201_v27 = vrot.slane %v2200_v21, 2  ;;  %v2204_v5 = vsel %vm2178_vm8, %v2203_v17, %v2202_v10  ;;  %2398 = vst [vmem:[#allocation1 + $0x20] ss:$4 sm:$0xff] %v2197_v1  ;;  %v1870_v60 = vpop.f32.mrf.mxu3  ;;  %v19214_v1 = vld [vmem:[#allocation63_spill] sm:$0xff] }
 0x21d   :  { %v15306_v62 = vadd.f32 %v14991_v54, %v14756_v14  ;;  %v15310_v13 = vadd.f32 %v19207_v26, %v14767_v28  ;;  %v15312_v12 = vld.sshfl [vmem:[#allocation1] sm:$0xff pattern:$0x73625140]  ;;  %v15314_v36 = vld.sshfl [vmem:[#allocation1 + $0x8] sm:$0xff pattern:$0x73625140]  ;;  %v2208_v15 = vsel %vm2184_vm10, %v2207_v44, %v2206_v32  ;;  %v1975_v46 = vadd.f32 %v15169_v8, %v1909_v18 }
 0x21e   :  { %19208 = vst [vmem:[#allocation31_spill] sm:$0xff] %v15314_v36  ;;  %v1826_v45 = vpop.f32.mrf.mxu2  ;;  %v1919_v55 = vadd.f32 %v15102_v24, %v15144_v34  ;;  %v15320_v54 = vld.sshfl [vmem:[#allocation1 + $0x10] sm:$0xff pattern:$0x73625140]  ;;  %v2205_v3 = vrot.slane %v2204_v5, 4  ;;  %v2209_v28 = vrot.slane %v2208_v15, 6  ;;  %v1913_v32 = vadd.f32 %v1870_v60, %v15258_v57 }
 0x21f   :  { %19209 = vst [vmem:[#allocation33_spill] sm:$0xff] %v15320_v54  ;;  %v1912_v19 = vadd.f32 %v1826_v45, %v15246_v30  ;;  %v15325_v10 = vld.sshfl [vmem:[#allocation1 + $0x18] sm:$0xff pattern:$0x73625140]  ;;  %v2030_v18 = vmax.f32 %v1974_v33, 0.0  ;;  %v15334_v21 = vadd.f32 %v19214_v1, %v19213_v9  ;;  %v19216_v30 = vld [vmem:[#allocation64_spill] sm:$0xff] }
 0x220   :  { %v1756_v42 = vpop.f32.mrf.mxu0  ;;  %v1800_v14 = vpop.f32.mrf.mxu1  ;;  %19210 = vst [vmem:[#allocation39_spill] sm:$0xff] %v15325_v10  ;;  %v19212_v24 = vld [vmem:[#allocation62_spill] sm:$0xff]  ;;  %v11277_v33 = vld [vmem:[#allocation2 + $0x4c8] sm:$0xf]  ;;  %v2031_v45 = vmax.f32 %v1975_v46, 0.0 }
 0x221   :  { %v1938_v25 = vadd.f32 %v1756_v42, %v15197_v6  ;;  %v1939_v59 = vadd.f32 %v1800_v14, %v15201_v0  ;;  %2400 = vst [vmem:[#allocation1 + $0x21] ss:$4 sm:$0xff] %v2201_v27  ;;  %v15330_v34 = vadd.f32 %v19212_v24, %v19211_v4  ;;  %v19215_v17 = vld [vmem:[#allocation46_spill] sm:$0xff]  ;;  %v19217_v6 = vld [vmem:[#allocation47_spill] sm:$0xff]  ;;  %v19218_v0 = vld [vmem:[#allocation20_spill] sm:$0xff]  ;;  %v2139_v15 = vrot.slane %v2030_v18, 4 }
 0x222   :  { %v15338_v44 = vadd.f32 %v19216_v30, %v19215_v17  ;;  %v15342_v5 = vadd.f32 %v19218_v0, %v19217_v6  ;;  %2402 = vst [vmem:[#allocation1 + $0x22] ss:$4 sm:$0xff] %v2205_v3  ;;  %v13123_v27 = vld [vmem:[#allocation2 + $0x4d0] sm:$0xf0]  ;;  %v11325_v60 = vld [vmem:[#allocation2 + $0x528] sm:$0xf]  ;;  %v1978_v3 = vadd.f32 %v15166_v63, %v1912_v19  ;;  %v1979_v30 = vadd.f32 %v15169_v8, %v1913_v32 }
 0x223   :  { %v2004_v57 = vadd.f32 %v15021_v48, %v1938_v25  ;;  %v2005_v26 = vadd.f32 %v15024_v22, %v1939_v59  ;;  %2411 = vst [vmem:[#allocation1] ss:$4 sm:$0xff] %v2209_v28  ;;  %v19219_v42 = vld [vmem:[#allocation48_spill] sm:$0xff]  ;;  %v19220_v14 = vld [vmem:[#allocation21_spill] sm:$0xff]  ;;  %v11278_v24 = vor.u32 %v13123_v27, %v11277_v33  ;;  %v13135_v9 = vld [vmem:[#allocation2 + $0x530] sm:$0xf0]  ;;  %v15353_v25 = vadd.f32 %v15024_v22, %v1919_v55 }
 0x224   :  { %v15348_v4 = vadd.f32 %v19220_v14, %v19219_v42  ;;  %v11085_v1 = vld [vmem:[#allocation2 + $0x348] sm:$0xf]  ;;  %v13075_v17 = vld [vmem:[#allocation2 + $0x350] sm:$0xf0]  ;;  %v2140_v28 = vrot.slane %v2031_v45, 2  ;;  %v11326_v18 = vor.u32 %v13135_v9, %v11325_v60  ;;  %v2034_v0 = vmax.f32 %v1978_v3, 0.0  ;;  %v1873_v54 = vpop.f32.mrf.mxu3 }
 0x225   :  { %v2061_v59 = vmax.f32 %v2005_v26, 0.0  ;;  %v2060_v46 = vmax.f32 %v2004_v57, 0.0  ;;  %4008 = vmatpush.bf16.msra.mxu2 %v11278_v24  ;;  %v11086_v6 = vor.u32 %v13075_v17, %v11085_v1  ;;  %v2035_v42 = vmax.f32 %v1979_v30, 0.0  ;;  %v11181_v32 = vld [vmem:[#allocation2 + $0x408] sm:$0xf]  ;;  %v19222_v24 = vld [vmem:[#allocation70_spill] sm:$0xff] }
 0x226   :  { %v2211_v33 = vsel %vm2176_vm5, %v2139_v15, %v2140_v28  ;;  %v2214_v27 = vsel %vm2182_vm7, %v2140_v28, %v2139_v15  ;;  %v2218_v19 = vsel %vm2174_vm4, %v2139_v15, %v2140_v28  ;;  %4051 = vmatpush.bf16.msra.mxu3 %v11326_v18  ;;  %v13099_v10 = vld [vmem:[#allocation2 + $0x410] sm:$0xf0]  ;;  %v1829_v55 = vpop.f32.mrf.mxu2  ;;  %v19221_v57 = vld [vmem:[#allocation69_spill] sm:$0xff]  ;;  %v19223_v1 = vld [vmem:[#allocation71_spill] sm:$0xff]  ;;  %v2222_v3 = vsel %vm2180_vm6, %v2139_v15, %v2140_v28 }
 0x227   :  { %v2162_v14 = vrot.slane %v2061_v59, 6  ;;  %v2212_v60 = vsel %vm2178_vm8, %v19221_v57, %v2211_v33  ;;  %v2215_v9 = vsel %vm2184_vm10, %v19222_v24, %v2214_v27  ;;  %v2219_v17 = vsel %vm2178_vm8, %v2218_v19, %v19223_v1  ;;  %3930 = vmatpush.bf16.msrb.mxu0 %v11086_v6  ;;  %v19228_v57 = vld [vmem:[#allocation49_spill] sm:$0xff]  ;;  %v19230_v19 = vld [vmem:[#allocation50_spill] sm:$0xff] }
 0x228   :  { %v15358_v26 = vpop.f32.mrf.mxu0  ;;  %v15360_v45 = vpop.f32.mrf.mxu1  ;;  %v19229_v27 = vld [vmem:[#allocation65_spill] sm:$0xff]  ;;  %v19231_v1 = vld [vmem:[#allocation66_spill] sm:$0xff]  ;;  %v2220_v36 = vrot.slane %v2219_v17, 4  ;;  %2412 = vst [vmem:[#allocation1 + $0x1] ss:$4 sm:$0xff] %v2212_v60  ;;  %v1917_v17 = vadd.f32 %v1873_v54, %v15306_v62 }
 0x229   :  { %v15370_v30 = vsel %vm2174_vm4, %v2060_v46, %v2162_v14  ;;  %v15373_v59 = vsel %vm2180_vm6, %v2060_v46, %v2162_v14  ;;  %v15376_v18 = vsel %vm2176_vm5, %v2060_v46, %v2162_v14  ;;  %v15379_v33 = vsel %vm2182_vm7, %v2162_v14, %v2060_v46  ;;  %v15389_v28 = vld.sshfl [vmem:[#allocation1 + $0x20] sm:$0xff pattern:$0x73625140]  ;;  %v15391_v6 = vld.sshfl [vmem:[#allocation1 + $0x28] sm:$0xff pattern:$0x73625140] }
 0x22a   :  { %19224 = vst [vmem:[#allocation38_spill] sm:$0xff] %v15370_v30  ;;  %v15383_v24 = vadd.f32 %v19229_v27, %v19228_v57  ;;  %v15387_v15 = vadd.f32 %v19231_v1, %v19230_v19  ;;  %v15393_v30 = vld.sshfl [vmem:[#allocation1 + $0x30] sm:$0xff pattern:$0x73625140]  ;;  %v11182_v14 = vor.u32 %v13099_v10, %v11181_v32  ;;  %v2142_v27 = vrot.slane %v2034_v0, 4 }
 0x22b   :  { %19225 = vst [vmem:[#allocation10_spill] sm:$0xff] %v15373_v59  ;;  %v15395_v59 = vld.sshfl [vmem:[#allocation1 + $0x38] sm:$0xff pattern:$0x73625140]  ;;  %v2225_v19 = vsel %vm2174_vm4, %v15299_v11, %v15301_v23  ;;  %v2228_v1 = vsel %vm2180_vm6, %v15299_v11, %v15301_v23  ;;  %v2232_v10 = vsel %vm2176_vm5, %v15299_v11, %v15301_v23  ;;  %v2236_v0 = vsel %vm2182_vm7, %v15301_v23, %v15299_v11  ;;  %v13072_v54 = vld [vmem:[#allocation2 + $0x338] sm:$0xf0] }
 0x22c   :  { %19226 = vst [vmem:[#allocation15_spill] sm:$0xff] %v15376_v18  ;;  %v19236_v18 = vld [vmem:[#allocation72_spill] sm:$0xff]  ;;  %3969 = vmatpush.bf16.msrb.mxu1 %v11182_v14  ;;  %v1918_v32 = vadd.f32 %v15100_v20, %v15140_v16  ;;  %v11073_v16 = vld [vmem:[#allocation2 + $0x330] sm:$0xf] }
 0x22d   :  { %19227 = vst [vmem:[#allocation8_spill] sm:$0xff] %v15379_v33  ;;  %v2223_v46 = vsel %vm2184_vm10, %v2222_v3, %v19236_v18  ;;  %v2216_v33 = vrot.slane %v2215_v9, 2  ;;  %v13120_v3 = vld [vmem:[#allocation2 + $0x4b8] sm:$0xf0]  ;;  %v1916_v9 = vadd.f32 %v1829_v55, %v15269_v39 }
 0x22e   :  { %19232 = vst [vmem:[#allocation13_spill] sm:$0xff] %v15389_v28  ;;  %v2224_v57 = vrot.slane %v2223_v46, 6  ;;  %v1831_v23 = vpop.f32.mrf.mxu2  ;;  %v19237_v55 = vld [vmem:[#allocation51_spill] sm:$0xff] }
 0x22f   :  { %19233 = vst [vmem:[#allocation12_spill] sm:$0xff] %v15391_v6  ;;  %v11265_v6 = vld [vmem:[#allocation2 + $0x4b0] sm:$0xf] }
 0x230   :  { %19234 = vst [vmem:[#allocation17_spill] sm:$0xff] %v15393_v30  ;;  %v2041_v30 = vmax.f32 %v15353_v25, 0.0  ;;  %v11266_v60 = vor.u32 %v13120_v3, %v11265_v6  ;;  %v1761_v6 = vpop.f32.mrf.mxu0  ;;  %v1805_v14 = vpop.f32.mrf.mxu1 }
 0x231   :  { %19235 = vst [vmem:[#allocation16_spill] sm:$0xff] %v15395_v59  ;;  %v2143_v59 = vrot.slane %v2035_v42, 2 }
 0x232   :  { %2413 = vst [vmem:[#allocation1 + $0x2] ss:$4 sm:$0xff] %v2216_v33  ;;  %v15422_v33 = vrot.slane %v2041_v30, 6  ;;  %4009 = vmatpush.bf16.msra.mxu2 %v11266_v60  ;;  %v1946_v30 = vadd.f32 %v1761_v6, %v15217_v35  ;;  %v19242_v60 = vld [vmem:[#allocation67_spill] sm:$0xff]  ;;  %v1982_v35 = vadd.f32 %v15166_v63, %v1916_v9  ;;  %v11074_v6 = vor.u32 %v13072_v54, %v11073_v16 }
 0x233   :  { %2414 = vst [vmem:[#allocation1 + $0x3] ss:$4 sm:$0xff] %v2220_v36  ;;  %v2226_v25 = vsel %vm2176_vm5, %v2142_v27, %v2143_v59  ;;  %v2229_v42 = vsel %vm2182_vm7, %v2143_v59, %v2142_v27  ;;  %v2233_v11 = vsel %vm2174_vm4, %v2142_v27, %v2143_v59  ;;  %v2237_v20 = vsel %vm2180_vm6, %v2142_v27, %v2143_v59  ;;  %v1875_v36 = vpop.f32.mrf.mxu3  ;;  %v19239_v59 = vld [vmem:[#allocation52_spill] sm:$0xff] }
 0x234   :  { %2415 = vst [vmem:[#allocation1 + $0x20] ss:$4 sm:$0xff] %v2224_v57  ;;  %v2227_v18 = vsel %vm2178_vm8, %v2225_v19, %v2226_v25  ;;  %v2230_v46 = vsel %vm2184_vm10, %v2228_v1, %v2229_v42  ;;  %v2234_v39 = vsel %vm2178_vm8, %v2233_v11, %v2232_v10  ;;  %v2238_v62 = vsel %vm2184_vm10, %v2237_v20, %v2236_v0  ;;  %v19238_v57 = vld [vmem:[#allocation23_spill] sm:$0xff]  ;;  %v19240_v27 = vld [vmem:[#allocation24_spill] sm:$0xff]  ;;  %v11169_v42 = vld [vmem:[#allocation2 + $0x3f0] sm:$0xf] }
 0x235   :  { %v2231_v3 = vrot.slane %v2230_v46, 2  ;;  %2416 = vst [vmem:[#allocation1 + $0x21] ss:$4 sm:$0xff] %v2227_v18  ;;  %v15428_v19 = vadd.f32 %v19238_v57, %v19237_v55  ;;  %v15432_v1 = vadd.f32 %v19240_v27, %v19239_v59  ;;  %v1947_v25 = vadd.f32 %v1805_v14, %v15223_v47  ;;  %v13096_v46 = vld [vmem:[#allocation2 + $0x3f8] sm:$0xf0]  ;;  %v19241_v18 = vld [vmem:[#allocation53_spill] sm:$0xff]  ;;  %3931 = vmatpush.bf16.msrb.mxu0 %v11074_v6 }
 0x236   :  { %v11253_v10 = vld [vmem:[#allocation2 + $0x498] sm:$0xf]  ;;  %v1984_v0 = vadd.f32 %v15021_v48, %v1918_v32  ;;  %v15439_v11 = vadd.f32 %v19242_v60, %v19241_v18  ;;  %v2235_v20 = vrot.slane %v2234_v39, 4  ;;  %v2239_v55 = vrot.slane %v2238_v62, 6  ;;  %v13117_v57 = vld [vmem:[#allocation2 + $0x4a0] sm:$0xf0] }
 0x237   :  { %2417 = vst [vmem:[#allocation1 + $0x22] ss:$4 sm:$0xff] %v2231_v3  ;;  %v2012_v59 = vadd.f32 %v15021_v48, %v1946_v30  ;;  %v2013_v27 = vadd.f32 %v15024_v22, %v1947_v25  ;;  %v1983_v47 = vadd.f32 %v15169_v8, %v1917_v17  ;;  %v11170_v14 = vor.u32 %v13096_v46, %v11169_v42 }
 0x238   :  { %v1920_v32 = vadd.f32 %v1831_v23, %v15310_v13  ;;  %v1921_v28 = vadd.f32 %v1875_v36, %v15330_v34  ;;  %v2038_v3 = vmax.f32 %v1982_v35, 0.0  ;;  %v11254_v62 = vor.u32 %v13117_v57, %v11253_v10 }
 0x239   :  { %v2068_v18 = vmax.f32 %v2012_v59, 0.0  ;;  %v2069_v60 = vmax.f32 %v2013_v27, 0.0  ;;  %v1927_v30 = vadd.f32 %v15163_v38, %v15152_v58  ;;  %3970 = vmatpush.bf16.msrb.mxu1 %v11170_v14  ;;  %v1926_v34 = vadd.f32 %v15161_v61, %v15148_v49  ;;  %v1834_v38 = vpop.f32.mrf.mxu2 }
 0x23a   :  { %v15447_v39 = vld.sshfl [vmem:[#allocation1] sm:$0xff pattern:$0x73625140]  ;;  %v15451_v25 = vld.sshfl [vmem:[#allocation1 + $0x8] sm:$0xff pattern:$0x73625140]  ;;  %v1986_v17 = vadd.f32 %v15166_v63, %v1920_v32  ;;  %v1987_v13 = vadd.f32 %v15169_v8, %v1921_v28  ;;  %4010 = vmatpush.bf16.msra.mxu2 %v11254_v62  ;;  %v1924_v10 = vadd.f32 %v1834_v38, %v15334_v21 }
 0x23b   :  { %v15453_v9 = vld.sshfl [vmem:[#allocation1 + $0x10] sm:$0xff pattern:$0x73625140]  ;;  %v2168_v16 = vrot.slane %v2069_v60, 6  ;;  %v2145_v36 = vrot.slane %v2038_v3, 4  ;;  %v2039_v54 = vmax.f32 %v1983_v47, 0.0  ;;  %v1878_v58 = vpop.f32.mrf.mxu3 }
 0x23c   :  { %v15459_v23 = vld.sshfl [vmem:[#allocation1 + $0x18] sm:$0xff pattern:$0x73625140]  ;;  %v2042_v42 = vmax.f32 %v1986_v17, 0.0  ;;  %v2043_v46 = vmax.f32 %v1987_v13, 0.0  ;;  %v1925_v57 = vadd.f32 %v1878_v58, %v15338_v44  ;;  %v2040_v27 = vmax.f32 %v1984_v0, 0.0 }
 0x23d   :  { %2426 = vst [vmem:[#allocation1] ss:$4 sm:$0xff] %v2235_v20  ;;  %v15464_v28 = vsel %vm2174_vm4, %v2068_v18, %v2168_v16  ;;  %v15467_v49 = vsel %vm2180_vm6, %v2068_v18, %v2168_v16  ;;  %v15470_v61 = vsel %vm2176_vm5, %v2068_v18, %v2168_v16  ;;  %v15473_v59 = vsel %vm2182_vm7, %v2168_v16, %v2068_v18  ;;  %v19245_v44 = vld [vmem:[#allocation54_spill] sm:$0xff]  ;;  %v19246_v47 = vld [vmem:[#allocation68_spill] sm:$0xff]  ;;  %v19247_v0 = vld [vmem:[#allocation55_spill] sm:$0xff] }
 0x23e   :  { %19243 = vst [vmem:[#allocation29_spill] sm:$0xff] %v15470_v61  ;;  %v1993_v20 = vadd.f32 %v15024_v22, %v1927_v30  ;;  %v1990_v35 = vadd.f32 %v15166_v63, %v1924_v10  ;;  %v1991_v21 = vadd.f32 %v15169_v8, %v1925_v57  ;;  %v15480_v6 = vadd.f32 %v19246_v47, %v19245_v44  ;;  %v15489_v17 = vld.sshfl [vmem:[#allocation1 + $0x20] sm:$0xff pattern:$0x73625140]  ;;  %v19254_v47 = vld [vmem:[#allocation76_spill] sm:$0xff] }
 0x23f   :  { %19244 = vst [vmem:[#allocation25_spill] sm:$0xff] %v15473_v59  ;;  %v2146_v14 = vrot.slane %v2039_v54, 2  ;;  %v2148_v32 = vrot.slane %v2042_v42, 4  ;;  %v2149_v60 = vrot.slane %v2043_v46, 2  ;;  %v2255_v3 = vsel %vm2174_vm4, %v2040_v27, %v15422_v33  ;;  %v19252_v46 = vld [vmem:[#allocation75_spill] sm:$0xff] }
 0x240   :  { %2427 = vst [vmem:[#allocation1 + $0x1] ss:$4 sm:$0xff] %v2239_v55  ;;  %v1992_v18 = vadd.f32 %v15021_v48, %v1926_v34  ;;  %v15487_v62 = vadd.f32 %v15090_v43, %v19247_v0  ;;  %v2046_v30 = vmax.f32 %v1990_v35, 0.0  ;;  %v15491_v13 = vld.sshfl [vmem:[#allocation1 + $0x28] sm:$0xff pattern:$0x73625140] }
 0x241   :  { %19248 = vst [vmem:[#allocation42_spill] sm:$0xff] %v15489_v17  ;;  %v2241_v16 = vsel %vm2176_vm5, %v2145_v36, %v2146_v14  ;;  %v2244_v55 = vsel %vm2182_vm7, %v2146_v14, %v2145_v36  ;;  %v2248_v54 = vsel %vm2174_vm4, %v2145_v36, %v2146_v14  ;;  %v2252_v38 = vsel %vm2180_vm6, %v2145_v36, %v2146_v14  ;;  %v15497_v42 = vld.sshfl [vmem:[#allocation1 + $0x30] sm:$0xff pattern:$0x73625140]  ;;  %v19251_v34 = vld [vmem:[#allocation74_spill] sm:$0xff] }
 0x242   :  { %19249 = vst [vmem:[#allocation14_spill] sm:$0xff] %v15491_v13  ;;  %v2049_v58 = vmax.f32 %v1993_v20, 0.0  ;;  %v2242_v43 = vsel %vm2178_vm8, %v19251_v34, %v2241_v16  ;;  %v2245_v10 = vsel %vm2184_vm10, %v19252_v46, %v2244_v55  ;;  %v2047_v57 = vmax.f32 %v1991_v21, 0.0  ;;  %v15503_v35 = vld.sshfl [vmem:[#allocation1 + $0x38] sm:$0xff pattern:$0x73625140]  ;;  %v1836_v20 = vpop.f32.mrf.mxu2 }
 0x243   :  { %19250 = vst [vmem:[#allocation19_spill] sm:$0xff] %v15497_v42  ;;  %v2246_v44 = vrot.slane %v2245_v10, 2  ;;  %v2249_v0 = vsel %vm2178_vm8, %v2248_v54, %v19254_v47  ;;  %v19255_v13 = vld [vmem:[#allocation77_spill] sm:$0xff]  ;;  %v2256_v36 = vsel %vm2176_vm5, %v2148_v32, %v2149_v60  ;;  %v1880_v14 = vpop.f32.mrf.mxu3  ;;  %v19256_v42 = vld [vmem:[#allocation56_spill] sm:$0xff]  ;;  %v19257_v16 = vld [vmem:[#allocation30_spill] sm:$0xff]  ;;  %v2259_v54 = vsel %vm2182_vm7, %v2149_v60, %v2148_v32 }
 0x244   :  { %19253 = vst [vmem:[#allocation40_spill] sm:$0xff] %v15503_v35  ;;  %v2253_v17 = vsel %vm2184_vm10, %v2252_v38, %v19255_v13  ;;  %v15512_v34 = vadd.f32 %v19257_v16, %v19256_v42  ;;  %v2250_v55 = vrot.slane %v2249_v0, 4  ;;  %v2257_v46 = vsel %vm2178_vm8, %v2255_v3, %v2256_v36  ;;  %v11313_v10 = vld [vmem:[#allocation2 + $0x510] sm:$0xf]  ;;  %v13069_v36 = vld [vmem:[#allocation2 + $0x320] sm:$0xf0] }
 0x245   :  { %2428 = vst [vmem:[#allocation1 + $0x2] ss:$4 sm:$0xff] %v2242_v43  ;;  %v2254_v21 = vrot.slane %v2253_v17, 6  ;;  %v2263_v47 = vsel %vm2174_vm4, %v2148_v32, %v2149_v60  ;;  %v2267_v13 = vsel %vm2180_vm6, %v2148_v32, %v2149_v60  ;;  %v2151_v38 = vrot.slane %v2046_v30, 4  ;;  %v13132_v43 = vld [vmem:[#allocation2 + $0x518] sm:$0xf0] }
 0x246   :  { %2429 = vst [vmem:[#allocation1 + $0x3] ss:$4 sm:$0xff] %v2246_v44  ;;  %v2258_v35 = vsel %vm2180_vm6, %v2040_v27, %v15422_v33  ;;  %v2262_v42 = vsel %vm2176_vm5, %v2040_v27, %v15422_v33  ;;  %v2266_v17 = vsel %vm2182_vm7, %v15422_v33, %v2040_v27  ;;  %v15524_v3 = vmax.f32 %v1992_v18, 0.0  ;;  %v11061_v44 = vld [vmem:[#allocation2 + $0x318] sm:$0xf] }
 0x247   :  { %2430 = vst [vmem:[#allocation1 + $0x20] ss:$4 sm:$0xff] %v2250_v55  ;;  %v15526_v0 = vrot.slane %v2049_v58, 6  ;;  %v1935_v32 = vadd.f32 %v15273_v31, %v15193_v50  ;;  %v2260_v60 = vsel %vm2184_vm10, %v2258_v35, %v2259_v54  ;;  %v2152_v30 = vrot.slane %v2047_v57, 2  ;;  %v11157_v27 = vld [vmem:[#allocation2 + $0x3d8] sm:$0xf] }
 0x248   :  { %2431 = vst [vmem:[#allocation1 + $0x21] ss:$4 sm:$0xff] %v2254_v21  ;;  %v2261_v16 = vrot.slane %v2260_v60, 2  ;;  %v2264_v59 = vsel %vm2178_vm8, %v2263_v47, %v2262_v42  ;;  %v15533_v61 = vsel %vm2184_vm10, %v2267_v13, %v2266_v17  ;;  %v11314_v33 = vor.u32 %v13132_v43, %v11313_v10  ;;  %v13093_v35 = vld [vmem:[#allocation2 + $0x3e0] sm:$0xf0] }
 0x249   :  { %2432 = vst [vmem:[#allocation1 + $0x22] ss:$4 sm:$0xff] %v2257_v46  ;;  %v2271_v18 = vsel %vm2176_vm5, %v2151_v38, %v2152_v30  ;;  %v2274_v58 = vsel %vm2182_vm7, %v2152_v30, %v2151_v38  ;;  %v2278_v50 = vsel %vm2174_vm4, %v2151_v38, %v2152_v30  ;;  %v2282_v31 = vsel %vm2180_vm6, %v2151_v38, %v2152_v30  ;;  %v11241_v57 = vld [vmem:[#allocation2 + $0x480] sm:$0xf]  ;;  %v13114_v55 = vld [vmem:[#allocation2 + $0x488] sm:$0xf0] }
 0x24a   :  { %v2272_v21 = vsel %vm2178_vm8, %v15172_v51, %v2271_v18  ;;  %v15543_v54 = vsel %vm2184_vm10, %v15175_v52, %v2274_v58  ;;  %v19258_v46 = vld [vmem:[#allocation22_spill] sm:$0xff]  ;;  %v15551_v47 = vsel %vm2184_vm10, %v2282_v31, %v15181_v37  ;;  %4052 = vmatpush.bf16.msra.mxu3 %v11314_v33  ;;  %v2001_v13 = vadd.f32 %v15024_v22, %v1935_v32  ;;  %v1839_v51 = vpop.f32.mrf.mxu2  ;;  %v13066_v31 = vld [vmem:[#allocation2 + $0x308] sm:$0xf0] }
 0x24b   :  { %v15547_v10 = vsel %vm2178_vm8, %v2278_v50, %v19258_v46  ;;  %v2265_v38 = vrot.slane %v2264_v59, 4  ;;  %v2269_v43 = vrot.slane %v15533_v61, 6  ;;  %v11062_v42 = vor.u32 %v13069_v36, %v11061_v44  ;;  %v1883_v17 = vpop.f32.mrf.mxu3  ;;  %v19259_v59 = vld [vmem:[#allocation57_spill] sm:$0xff]  ;;  %v19260_v61 = vld [vmem:[#allocation32_spill] sm:$0xff] }
 0x24c   :  { %v11158_v30 = vor.u32 %v13093_v35, %v11157_v27  ;;  %v1928_v18 = vadd.f32 %v1836_v20, %v15342_v5  ;;  %v1929_v58 = vadd.f32 %v1880_v14, %v15348_v4  ;;  %v11242_v37 = vor.u32 %v13114_v55, %v11241_v57  ;;  %v11049_v50 = vld [vmem:[#allocation2 + $0x300] sm:$0xf] }
 0x24d   :  { %v15555_v60 = vld.sshfl [vmem:[#allocation1] sm:$0xff pattern:$0x73625140]  ;;  %v15557_v52 = vld.sshfl [vmem:[#allocation1 + $0x8] sm:$0xff pattern:$0x73625140]  ;;  %v15564_v32 = vsel %vm2174_vm4, %v15524_v3, %v15526_v0  ;;  %v15568_v44 = vadd.f32 %v19260_v61, %v19259_v59  ;;  %3932 = vmatpush.bf16.msrb.mxu0 %v11062_v42  ;;  %v1932_v27 = vadd.f32 %v1839_v51, %v15383_v24  ;;  %v1933_v5 = vadd.f32 %v1883_v17, %v15387_v15 }
 0x24e   :  { %v15570_v36 = vld.sshfl [vmem:[#allocation1 + $0x10] sm:$0xff pattern:$0x73625140]  ;;  %v15572_v33 = vld.sshfl [vmem:[#allocation1 + $0x18] sm:$0xff pattern:$0x73625140]  ;;  %v1943_v4 = vadd.f32 %v15360_v45, %v15209_v41  ;;  %3971 = vmatpush.bf16.msrb.mxu1 %v11158_v30  ;;  %v1994_v20 = vadd.f32 %v15166_v63, %v1928_v18  ;;  %v1995_v14 = vadd.f32 %v15169_v8, %v1929_v58  ;;  %4011 = vmatpush.bf16.msra.mxu2 %v11242_v37 }
 0x24f   :  { %2441 = vst [vmem:[#allocation1] ss:$4 sm:$0xff] %v2261_v16  ;;  %v19261_v35 = vld [vmem:[#allocation28_spill] sm:$0xff]  ;;  %v1998_v55 = vadd.f32 %v15166_v63, %v1932_v27  ;;  %v1999_v24 = vadd.f32 %v15169_v8, %v1933_v5  ;;  %v11050_v15 = vor.u32 %v13066_v31, %v11049_v50  ;;  %v2057_v46 = vmax.f32 %v2001_v13, 0.0  ;;  %v13090_v59 = vld [vmem:[#allocation2 + $0x3c8] sm:$0xf0] }
 0x250   :  { %v1934_v57 = vadd.f32 %v15271_v2, %v19261_v35  ;;  %v2276_v41 = vrot.slane %v15543_v54, 2  ;;  %v2280_v45 = vrot.slane %v15547_v10, 4  ;;  %v2284_v16 = vrot.slane %v15551_v47, 6  ;;  %v15587_v42 = vld.sshfl [vmem:[#allocation1 + $0x20] sm:$0xff pattern:$0x73625140] }
 0x251   :  { %v15589_v51 = vld.sshfl [vmem:[#allocation1 + $0x28] sm:$0xff pattern:$0x73625140]  ;;  %v15591_v17 = vld.sshfl [vmem:[#allocation1 + $0x30] sm:$0xff pattern:$0x73625140]  ;;  %3933 = vmatpush.bf16.msrb.mxu0 %v11050_v15  ;;  %v2288_v54 = vsel %vm2180_vm6, %v15524_v3, %v15526_v0  ;;  %v2292_v10 = vsel %vm2176_vm5, %v15524_v3, %v15526_v0  ;;  %v2296_v47 = vsel %vm2182_vm7, %v15526_v0, %v15524_v3  ;;  %v15605_v13 = vadd.f32 %v15024_v22, %v1943_v4 }
 0x252   :  { %v15593_v30 = vld.sshfl [vmem:[#allocation1 + $0x38] sm:$0xff pattern:$0x73625140]  ;;  %2442 = vst [vmem:[#allocation1 + $0x1] ss:$4 sm:$0xff] %v2265_v38  ;;  %v2050_v2 = vmax.f32 %v1994_v20, 0.0  ;;  %v2000_v31 = vadd.f32 %v15021_v48, %v1934_v57 }
 0x253   :  { %v2051_v18 = vmax.f32 %v1995_v14, 0.0  ;;  %v2054_v58 = vmax.f32 %v1998_v55, 0.0  ;;  %v2055_v37 = vmax.f32 %v1999_v24, 0.0  ;;  %2443 = vst [vmem:[#allocation1 + $0x2] ss:$4 sm:$0xff] %v2269_v43  ;;  %v1841_v14 = vpop.f32.mrf.mxu2  ;;  %v1885_v50 = vpop.f32.mrf.mxu3  ;;  %v15608_v35 = vrot.slane %v2057_v46, 6 }
 0x254   :  { %v11145_v38 = vld [vmem:[#allocation2 + $0x3c0] sm:$0xf]  ;;  %2444 = vst [vmem:[#allocation1 + $0x3] ss:$4 sm:$0xff] %v2272_v21  ;;  %v2154_v61 = vrot.slane %v2050_v2, 4  ;;  %v19262_v55 = vld [vmem:[#allocation26_spill] sm:$0xff]  ;;  %v1936_v24 = vadd.f32 %v1841_v14, %v15428_v19 }
 0x255   :  { %v2155_v27 = vrot.slane %v2051_v18, 2  ;;  %v2157_v5 = vrot.slane %v2054_v58, 4  ;;  %v2158_v20 = vrot.slane %v2055_v37, 2  ;;  %v15612_v3 = vadd.f32 %v15358_v26, %v19262_v55  ;;  %2445 = vst [vmem:[#allocation1 + $0x20] ss:$4 sm:$0xff] %v2276_v41 }
 0x256   :  { %v11146_v0 = vor.u32 %v13090_v59, %v11145_v38  ;;  %2446 = vst [vmem:[#allocation1 + $0x21] ss:$4 sm:$0xff] %v2280_v45  ;;  %v2065_v15 = vmax.f32 %v15605_v13, 0.0  ;;  %v1937_v26 = vadd.f32 %v1885_v50, %v15432_v1  ;;  %v11229_v58 = vld [vmem:[#allocation2 + $0x468] sm:$0xf]  ;;  %v1763_v38 = vpop.f32.mrf.mxu0 }
 0x257   :  { %v2286_v43 = vsel %vm2176_vm5, %v2154_v61, %v2155_v27  ;;  %v2289_v21 = vsel %vm2182_vm7, %v2155_v27, %v2154_v61  ;;  %v2293_v4 = vsel %vm2174_vm4, %v2154_v61, %v2155_v27  ;;  %2447 = vst [vmem:[#allocation1 + $0x22] ss:$4 sm:$0xff] %v2284_v16  ;;  %v2297_v46 = vsel %vm2180_vm6, %v2154_v61, %v2155_v27  ;;  %v11301_v13 = vld [vmem:[#allocation2 + $0x4f8] sm:$0xf]  ;;  %v11037_v27 = vld [vmem:[#allocation2 + $0x2e8] sm:$0xf] }
 0x258   :  { %v2290_v57 = vsel %vm2184_vm10, %v2288_v54, %v2289_v21  ;;  %v2287_v41 = vsel %vm2178_vm8, %v15564_v32, %v2286_v43  ;;  %v2294_v2 = vsel %vm2178_vm8, %v2293_v4, %v2292_v10  ;;  %v2301_v18 = vsel %vm2176_vm5, %v2157_v5, %v2158_v20  ;;  %3972 = vmatpush.bf16.msrb.mxu1 %v11146_v0  ;;  %v13111_v54 = vld [vmem:[#allocation2 + $0x470] sm:$0xf0]  ;;  %v13129_v32 = vld [vmem:[#allocation2 + $0x500] sm:$0xf0]  ;;  %v19265_v21 = vld [vmem:[#allocation73_spill] sm:$0xff] }
 0x259   :  { %v2291_v45 = vrot.slane %v2290_v57, 2  ;;  %v15628_v19 = vsel %vm2178_vm8, %v15276_v53, %v2301_v18  ;;  %v2304_v16 = vsel %vm2182_vm7, %v2158_v20, %v2157_v5  ;;  %v2308_v37 = vsel %vm2174_vm4, %v2157_v5, %v2158_v20  ;;  %v19267_v57 = vld [vmem:[#allocation34_spill] sm:$0xff] }
 0x25a   :  { %v2312_v1 = vsel %vm2180_vm6, %v2157_v5, %v2158_v20  ;;  %v15635_v10 = vsel %vm2184_vm10, %v15279_v29, %v2304_v16  ;;  %v15639_v59 = vsel %vm2178_vm8, %v2308_v37, %v15282_v56  ;;  %v2002_v61 = vadd.f32 %v15166_v63, %v1936_v24  ;;  %v13063_v5 = vld [vmem:[#allocation2 + $0x2f0] sm:$0xf0]  ;;  %v1807_v20 = vpop.f32.mrf.mxu1  ;;  %v19268_v24 = vld [vmem:[#allocation60_spill] sm:$0xff] }
 0x25b   :  { %v15643_v53 = vsel %vm2184_vm10, %v2312_v1, %v15285_v40  ;;  %v15646_v14 = vld.sshfl [vmem:[#allocation1] sm:$0xff pattern:$0x73625140]  ;;  %v15648_v50 = vld.sshfl [vmem:[#allocation1 + $0x8] sm:$0xff pattern:$0x73625140]  ;;  %v2298_v29 = vsel %vm2184_vm10, %v2297_v46, %v2296_v47  ;;  %v11230_v55 = vor.u32 %v13111_v54, %v11229_v58  ;;  %v11302_v0 = vor.u32 %v13129_v32, %v11301_v13  ;;  %v1844_v46 = vpop.f32.mrf.mxu2  ;;  %v1888_v58 = vpop.f32.mrf.mxu3 }
 0x25c   :  { %19263 = vst [vmem:[#allocation41_spill] sm:$0xff] %v15648_v50  ;;  %v11038_v43 = vor.u32 %v13063_v5, %v11037_v27  ;;  %v19264_v56 = vld [vmem:[#allocation58_spill] sm:$0xff]  ;;  %v19266_v40 = vld [vmem:[#allocation59_spill] sm:$0xff]  ;;  %v19269_v16 = vld [vmem:[#allocation36_spill] sm:$0xff]  ;;  %v2003_v47 = vadd.f32 %v15169_v8, %v1937_v26  ;;  %v2056_v54 = vmax.f32 %v2000_v31, 0.0  ;;  %v1950_v13 = vadd.f32 %v1763_v38, %v15231_v7 }
 0x25d   :  { %v15653_v4 = vadd.f32 %v19265_v21, %v19264_v56  ;;  %v15657_v18 = vadd.f32 %v19267_v57, %v19266_v40  ;;  %v15661_v37 = vadd.f32 %v19269_v16, %v19268_v24  ;;  %v15663_v1 = vld.sshfl [vmem:[#allocation1 + $0x10] sm:$0xff pattern:$0x73625140]  ;;  %v15665_v50 = vld.sshfl [vmem:[#allocation1 + $0x18] sm:$0xff pattern:$0x73625140]  ;;  %4012 = vmatpush.bf16.msra.mxu2 %v11230_v55  ;;  %4053 = vmatpush.bf16.msra.mxu3 %v11302_v0 }
 0x25e   :  { %v2295_v32 = vrot.slane %v2294_v2, 4  ;;  %2456 = vst [vmem:[#allocation1] ss:$4 sm:$0xff] %v2287_v41  ;;  %v2058_v27 = vmax.f32 %v2002_v61, 0.0  ;;  %v19270_v5 = vld [vmem:[#allocation27_spill] sm:$0xff]  ;;  %v2299_v21 = vrot.slane %v2298_v29, 6  ;;  %3934 = vmatpush.bf16.msrb.mxu0 %v11038_v43  ;;  %v1940_v57 = vadd.f32 %v1844_v46, %v15439_v11 }
 0x25f   :  { %v1951_v56 = vadd.f32 %v1807_v20, %v19270_v5  ;;  %v11133_v40 = vld [vmem:[#allocation2 + $0x3a8] sm:$0xf]  ;;  %v1941_v24 = vadd.f32 %v1888_v58, %v15480_v6  ;;  %v2315_v26 = vsel %vm2174_vm4, %v2056_v54, %v15608_v35  ;;  %v2008_v7 = vadd.f32 %v15021_v48, %v15612_v3  ;;  %v15679_v2 = vld.sshfl [vmem:[#allocation1 + $0x20] sm:$0xff pattern:$0x73625140] }
 0x260   :  { %v15676_v31 = vrot.slane %v2065_v15, 6  ;;  %v2306_v41 = vrot.slane %v15635_v10, 2  ;;  %v15681_v38 = vld.sshfl [vmem:[#allocation1 + $0x28] sm:$0xff pattern:$0x73625140]  ;;  %v2160_v11 = vrot.slane %v2058_v27, 4  ;;  %v2006_v29 = vadd.f32 %v15166_v63, %v1940_v57 }
 0x261   :  { %v15683_v61 = vld.sshfl [vmem:[#allocation1 + $0x30] sm:$0xff pattern:$0x73625140]  ;;  %2457 = vst [vmem:[#allocation1 + $0x1] ss:$4 sm:$0xff] %v2291_v45  ;;  %v2059_v20 = vmax.f32 %v2003_v47, 0.0  ;;  %v2007_v55 = vadd.f32 %v15169_v8, %v1941_v24  ;;  %v2318_v3 = vsel %vm2180_vm6, %v2056_v54, %v15608_v35  ;;  %v2322_v15 = vsel %vm2176_vm5, %v2056_v54, %v15608_v35 }
 0x262   :  { %19271 = vst [vmem:[#allocation18_spill] sm:$0xff] %v15683_v61  ;;  %v13087_v6 = vld [vmem:[#allocation2 + $0x3b0] sm:$0xf0]  ;;  %v2310_v0 = vrot.slane %v15639_v59, 4  ;;  %v2016_v45 = vadd.f32 %v15021_v48, %v1950_v13  ;;  %v15696_v16 = vadd.f32 %v15024_v22, %v1951_v56  ;;  %v2062_v46 = vmax.f32 %v2006_v29, 0.0  ;;  %v19273_v59 = vld [vmem:[#allocation31_spill] sm:$0xff] }
 0x263   :  { %v15691_v10 = vld.sshfl [vmem:[#allocation1 + $0x38] sm:$0xff pattern:$0x73625140]  ;;  %2458 = vst [vmem:[#allocation1 + $0x2] ss:$4 sm:$0xff] %v2295_v32  ;;  %v11134_v43 = vor.u32 %v13087_v6, %v11133_v40  ;;  %v2161_v47 = vrot.slane %v2059_v20, 2  ;;  %v2326_v58 = vsel %vm2182_vm7, %v15608_v35, %v2056_v54  ;;  %v15705_v5 = vpack.c.bf16 %v19273_v59, %v15312_v12  ;;  %v1846_v13 = vpop.f32.mrf.mxu2  ;;  %v1890_v56 = vpop.f32.mrf.mxu3 }
 0x264   :  { %19272 = vst [vmem:[#allocation37_spill] sm:$0xff] %v15691_v10  ;;  %v15700_v27 = vmax.f32 %v2008_v7, 0.0  ;;  %v2063_v32 = vmax.f32 %v2007_v55, 0.0  ;;  %v19275_v40 = vld [vmem:[#allocation39_spill] sm:$0xff]  ;;  %v19276_v54 = vld [vmem:[#allocation13_spill] sm:$0xff]  ;;  %v19277_v57 = vld [vmem:[#allocation12_spill] sm:$0xff] }
 0x265   :  { %2459 = vst [vmem:[#allocation1 + $0x3] ss:$4 sm:$0xff] %v2299_v21  ;;  %3973 = vmatpush.bf16.msrb.mxu1 %v11134_v43  ;;  %v2316_v22 = vsel %vm2176_vm5, %v2160_v11, %v2161_v47  ;;  %v2319_v48 = vsel %vm2182_vm7, %v2161_v47, %v2160_v11  ;;  %v19274_v21 = vld [vmem:[#allocation33_spill] sm:$0xff]  ;;  %v2323_v24 = vsel %vm2174_vm4, %v2160_v11, %v2161_v47  ;;  %v19279_v20 = vld [vmem:[#allocation16_spill] sm:$0xff]  ;;  %v15728_v29 = vmax.f32 %v2016_v45, 0.0 }
 0x266   :  { %2460 = vst [vmem:[#allocation1 + $0x20] ss:$4 sm:$0xff] %v15628_v19  ;;  %v15711_v35 = vpack.c.bf16 %v19275_v40, %v19274_v21  ;;  %v15715_v19 = vpack.c.bf16 %v19277_v57, %v19276_v54  ;;  %v15720_v12 = vsel %vm2174_vm4, %v15700_v27, %v15676_v31  ;;  %v2327_v7 = vsel %vm2180_vm6, %v2160_v11, %v2161_v47  ;;  %v11217_v21 = vld [vmem:[#allocation2 + $0x450] sm:$0xf]  ;;  %v13108_v11 = vld [vmem:[#allocation2 + $0x458] sm:$0xf0] }
 0x267   :  { %2461 = vst [vmem:[#allocation1 + $0x21] ss:$4 sm:$0xff] %v2306_v41  ;;  %v19278_v41 = vld [vmem:[#allocation17_spill] sm:$0xff]  ;;  %v2073_v55 = vmax.f32 %v15696_v16, 0.0  ;;  %v2314_v43 = vrot.slane %v15643_v53, 6  ;;  %v2163_v59 = vrot.slane %v2062_v46, 4  ;;  %v2317_v40 = vsel %vm2178_vm8, %v2315_v26, %v2316_v22 }
 0x268   :  { %2462 = vst [vmem:[#allocation1 + $0x22] ss:$4 sm:$0xff] %v2310_v0  ;;  %v15726_v6 = vpack.c.bf16 %v19279_v20, %v19278_v41  ;;  %v2320_v0 = vsel %vm2184_vm10, %v2318_v3, %v2319_v48  ;;  %v2164_v54 = vrot.slane %v2063_v32, 2  ;;  %v1944_v57 = vadd.f32 %v1846_v13, %v15487_v62  ;;  %v11025_v47 = vld [vmem:[#allocation2 + $0x2d0] sm:$0xf] }
 0x269   :  { %v2324_v41 = vsel %vm2178_vm8, %v2323_v24, %v2322_v15  ;;  %v2328_v45 = vsel %vm2184_vm10, %v2327_v7, %v2326_v58  ;;  %v1945_v20 = vadd.f32 %v1890_v56, %v15512_v34  ;;  %v11218_v16 = vor.u32 %v13108_v11, %v11217_v21  ;;  %v13060_v10 = vld [vmem:[#allocation2 + $0x2d8] sm:$0xf0]  ;;  %v11121_v53 = vld [vmem:[#allocation2 + $0x390] sm:$0xf]  ;;  %v19285_v21 = vld [vmem:[#allocation8_spill] sm:$0xff] }
 0x26a   :  { %v13084_v46 = vld [vmem:[#allocation2 + $0x398] sm:$0xf0]  ;;  %v2331_v3 = vsel %vm2176_vm5, %v2163_v59, %v2164_v54  ;;  %v2334_v62 = vsel %vm2182_vm7, %v2164_v54, %v2163_v59  ;;  %v2338_v32 = vsel %vm2174_vm4, %v2163_v59, %v2164_v54  ;;  %v2342_v15 = vsel %vm2180_vm6, %v2163_v59, %v2164_v54  ;;  %v19282_v34 = vld [vmem:[#allocation38_spill] sm:$0xff] }
 0x26b   :  { %v2332_v48 = vsel %vm2178_vm8, %v19282_v34, %v2331_v3  ;;  %v19283_v13 = vld [vmem:[#allocation10_spill] sm:$0xff]  ;;  %v19284_v24 = vld [vmem:[#allocation15_spill] sm:$0xff]  ;;  %v15760_v11 = vsel %vm2184_vm10, %v2342_v15, %v19285_v21  ;;  %4013 = vmatpush.bf16.msra.mxu2 %v11218_v16  ;;  %v2321_v59 = vrot.slane %v2320_v0, 2  ;;  %v2325_v54 = vrot.slane %v2324_v41, 4  ;;  %v1893_v16 = vpop.f32.mrf.mxu3 }
 0x26c   :  { %v15738_v61 = vld.sshfl [vmem:[#allocation1] sm:$0xff pattern:$0x73625140]  ;;  %v15740_v26 = vld.sshfl [vmem:[#allocation1 + $0x8] sm:$0xff pattern:$0x73625140]  ;;  %v2335_v56 = vsel %vm2184_vm10, %v19283_v13, %v2334_v62  ;;  %v15756_v7 = vsel %vm2178_vm8, %v2338_v32, %v19284_v24  ;;  %v2348_v3 = vsel %vm2180_vm6, %v15700_v27, %v15676_v31  ;;  %v2011_v32 = vadd.f32 %v15169_v8, %v1945_v20  ;;  %v1849_v24 = vpop.f32.mrf.mxu2 }
 0x26d   :  { %v15746_v22 = vld.sshfl [vmem:[#allocation1 + $0x10] sm:$0xff pattern:$0x73625140]  ;;  %v15748_v58 = vld.sshfl [vmem:[#allocation1 + $0x18] sm:$0xff pattern:$0x73625140]  ;;  %v11026_v13 = vor.u32 %v13060_v10, %v11025_v47  ;;  %v11122_v15 = vor.u32 %v13084_v46, %v11121_v53  ;;  %v2356_v0 = vsel %vm2182_vm7, %v15676_v31, %v15700_v27  ;;  %v1949_v20 = vadd.f32 %v1893_v16, %v15653_v4 }
 0x26e   :  { %19280 = vst [vmem:[#allocation9_spill] sm:$0xff] %v15746_v22  ;;  %v2329_v22 = vrot.slane %v2328_v45, 6  ;;  %v1948_v45 = vadd.f32 %v1849_v24, %v15568_v44  ;;  %v2067_v47 = vmax.f32 %v2011_v32, 0.0  ;;  %v11205_v53 = vld [vmem:[#allocation2 + $0x438] sm:$0xf]  ;;  %v15785_v46 = vpack.c.bf16 %v15451_v25, %v15447_v39 }
 0x26f   :  { %19281 = vst [vmem:[#allocation11_spill] sm:$0xff] %v15748_v58  ;;  %v2010_v58 = vadd.f32 %v15166_v63, %v1944_v57  ;;  %v15766_v62 = vld.sshfl [vmem:[#allocation1 + $0x20] sm:$0xff pattern:$0x73625140]  ;;  %3935 = vmatpush.bf16.msrb.mxu0 %v11026_v13  ;;  %3974 = vmatpush.bf16.msrb.mxu1 %v11122_v15  ;;  %v2336_v44 = vrot.slane %v2335_v56, 2  ;;  %v2644_v39 = vrot.slane %v15705_v5, 2 }
 0x270   :  { %2471 = vst [vmem:[#allocation1] ss:$4 sm:$0xff] %v2314_v43  ;;  %v15768_v34 = vld.sshfl [vmem:[#allocation1 + $0x28] sm:$0xff pattern:$0x73625140]  ;;  %v2352_v43 = vsel %vm2176_vm5, %v15700_v27, %v15676_v31  ;;  %v15789_v31 = vpack.c.bf16 %v15459_v23, %v15453_v9  ;;  %v15791_v27 = vrot.slane %v2073_v55, 6  ;;  %v2014_v4 = vadd.f32 %v15166_v63, %v1948_v45 }
 0x271   :  { %v15777_v57 = vld.sshfl [vmem:[#allocation1 + $0x30] sm:$0xff pattern:$0x73625140]  ;;  %v15779_v41 = vld.sshfl [vmem:[#allocation1 + $0x38] sm:$0xff pattern:$0x73625140] }
 0x272   :  { %2472 = vst [vmem:[#allocation1 + $0x1] ss:$4 sm:$0xff] %v2317_v40  ;;  %v2066_v10 = vmax.f32 %v2010_v58, 0.0  ;;  %v2015_v40 = vadd.f32 %v15169_v8, %v1949_v20  ;;  %v13105_v58 = vld [vmem:[#allocation2 + $0x440] sm:$0xf0]  ;;  %v2167_v32 = vrot.slane %v2067_v47, 2 }
 0x273   :  { %2473 = vst [vmem:[#allocation1 + $0x2] ss:$4 sm:$0xff] %v2321_v59  ;;  %v11206_v13 = vor.u32 %v13105_v58, %v11205_v53  ;;  %v2070_v25 = vmax.f32 %v2014_v4, 0.0  ;;  %v2340_v20 = vrot.slane %v15756_v7, 4  ;;  %v1895_v53 = vpop.f32.mrf.mxu3  ;;  %v11289_v4 = vld [vmem:[#allocation2 + $0x4e0] sm:$0xf] }
 0x274   :  { %2474 = vst [vmem:[#allocation1 + $0x3] ss:$4 sm:$0xff] %v2325_v54  ;;  %v2166_v21 = vrot.slane %v2066_v10, 4  ;;  %v2071_v15 = vmax.f32 %v2015_v40, 0.0  ;;  %v1851_v47 = vpop.f32.mrf.mxu2  ;;  %v13126_v54 = vld [vmem:[#allocation2 + $0x4e8] sm:$0xf0] }
 0x275   :  { %2475 = vst [vmem:[#allocation1 + $0x20] ss:$4 sm:$0xff] %v2329_v22  ;;  %v2169_v10 = vrot.slane %v2070_v25, 4  ;;  %4014 = vmatpush.bf16.msra.mxu2 %v11206_v13  ;;  %v1952_v16 = vadd.f32 %v1851_v47, %v15657_v18  ;;  %v11013_v45 = vld [vmem:[#allocation2 + $0x2b8] sm:$0xf]  ;;  %v1953_v13 = vadd.f32 %v1895_v53, %v15661_v37  ;;  %v11290_v25 = vor.u32 %v13126_v54, %v11289_v4  ;;  %v19286_v54 = vld [vmem:[#allocation29_spill] sm:$0xff] }
 0x276   :  { %2476 = vst [vmem:[#allocation1 + $0x21] ss:$4 sm:$0xff] %v2332_v48  ;;  %v2349_v55 = vsel %vm2182_vm7, %v2167_v32, %v2166_v21  ;;  %v2353_v24 = vsel %vm2174_vm4, %v2166_v21, %v2167_v32  ;;  %v2357_v22 = vsel %vm2180_vm6, %v2166_v21, %v2167_v32  ;;  %v2344_v48 = vrot.slane %v15760_v11, 6  ;;  %v13057_v56 = vld [vmem:[#allocation2 + $0x2c0] sm:$0xf0] }
 0x277   :  { %2477 = vst [vmem:[#allocation1 + $0x22] ss:$4 sm:$0xff] %v2336_v44  ;;  %v2346_v44 = vsel %vm2176_vm5, %v2166_v21, %v2167_v32  ;;  %v2350_v58 = vsel %vm2184_vm10, %v2348_v3, %v2349_v55  ;;  %v2170_v59 = vrot.slane %v2071_v15, 2  ;;  %v2354_v7 = vsel %vm2178_vm8, %v2353_v24, %v2352_v43  ;;  %v11109_v23 = vld [vmem:[#allocation2 + $0x378] sm:$0xf]  ;;  %4054 = vmatpush.bf16.msra.mxu3 %v11290_v25 }
 0x278   :  { %v2358_v11 = vsel %vm2184_vm10, %v2357_v22, %v2356_v0  ;;  %v13081_v9 = vld [vmem:[#allocation2 + $0x380] sm:$0xf0]  ;;  %v19287_v22 = vld [vmem:[#allocation25_spill] sm:$0xff]  ;;  %v2018_v4 = vadd.f32 %v15166_v63, %v1952_v16  ;;  %v2699_v63 = vsel %vm2180_vm6, %v15705_v5, %v2644_v39  ;;  %v19288_v16 = vrot.slane %v15711_v35, 4 }
 0x279   :  { %v2361_v3 = vsel %vm2176_vm5, %v2169_v10, %v2170_v59  ;;  %v2364_v18 = vsel %vm2182_vm7, %v2170_v59, %v2169_v10  ;;  %v2368_v32 = vsel %vm2174_vm4, %v2169_v10, %v2170_v59  ;;  %v2372_v43 = vsel %vm2180_vm6, %v2169_v10, %v2170_v59 }
 0x27a   :  { %v2362_v37 = vsel %vm2178_vm8, %v15464_v28, %v2361_v3  ;;  %v15831_v55 = vsel %vm2184_vm10, %v15467_v49, %v2364_v18  ;;  %v15835_v24 = vsel %vm2178_vm8, %v2368_v32, %v19286_v54  ;;  %v15839_v47 = vsel %vm2184_vm10, %v2372_v43, %v19287_v22 }
 0x27b   :  { %v15815_v40 = vld.sshfl [vmem:[#allocation1] sm:$0xff pattern:$0x73625140]  ;;  %v15817_v21 = vld.sshfl [vmem:[#allocation1 + $0x8] sm:$0xff pattern:$0x73625140]  ;;  %v2347_v49 = vsel %vm2178_vm8, %v15720_v12, %v2346_v44  ;;  %v2019_v18 = vadd.f32 %v15169_v8, %v1953_v13  ;;  %v11014_v32 = vor.u32 %v13057_v56, %v11013_v45  ;;  %v11110_v54 = vor.u32 %v13081_v9, %v11109_v23 }
 0x27c   :  { %v15823_v15 = vld.sshfl [vmem:[#allocation1 + $0x10] sm:$0xff pattern:$0x73625140]  ;;  %v15825_v0 = vld.sshfl [vmem:[#allocation1 + $0x18] sm:$0xff pattern:$0x73625140]  ;;  %v2694_v23 = vsel %vm2174_vm4, %v15705_v5, %v2644_v39  ;;  %v19291_v45 = vmov %v19288_v16  ;;  %v2382_v39 = vsel %vm2176_vm5, %v15728_v29, %v15791_v27 }
 0x27d   :  { %2486 = vst [vmem:[#allocation1] ss:$4 sm:$0xff] %v2340_v20  ;;  %v2351_v59 = vrot.slane %v2350_v58, 2  ;;  %v2355_v10 = vrot.slane %v2354_v7, 4  ;;  %v2359_v53 = vrot.slane %v2358_v11, 6  ;;  %v19289_v20 = vrot.slane %v15711_v35, 6  ;;  %3936 = vmatpush.bf16.msrb.mxu0 %v11014_v32  ;;  %3975 = vmatpush.bf16.msrb.mxu1 %v11110_v54 }
 0x27e   :  { %v15842_v28 = vld.sshfl [vmem:[#allocation1 + $0x20] sm:$0xff pattern:$0x73625140]  ;;  %v15844_v3 = vld.sshfl [vmem:[#allocation1 + $0x28] sm:$0xff pattern:$0x73625140]  ;;  %v2378_v35 = vsel %vm2180_vm6, %v15728_v29, %v15791_v27 }
 0x27f   :  { %v15849_v43 = vld.sshfl [vmem:[#allocation1 + $0x30] sm:$0xff pattern:$0x73625140]  ;;  %v15851_v25 = vld.sshfl [vmem:[#allocation1 + $0x38] sm:$0xff pattern:$0x73625140]  ;;  %v2700_v58 = vsel %vm2182_vm7, %v19289_v20, %v19288_v16  ;;  %v19290_v56 = vmov %v19289_v20 }
 0x280   :  { %2487 = vst [vmem:[#allocation1 + $0x1] ss:$4 sm:$0xff] %v2344_v48  ;;  %v2074_v12 = vmax.f32 %v2018_v4, 0.0  ;;  %v2075_v8 = vmax.f32 %v2019_v18, 0.0  ;;  %v11193_v9 = vld [vmem:[#allocation2 + $0x420] sm:$0xf]  ;;  %v2697_v44 = vsel %vm2176_vm5, %v19291_v45, %v19290_v56  ;;  %v2375_v48 = vsel %vm2174_vm4, %v15728_v29, %v15791_v27 }
 0x281   :  { %2488 = vst [vmem:[#allocation1 + $0x2] ss:$4 sm:$0xff] %v2347_v49  ;;  %v13102_v7 = vld [vmem:[#allocation2 + $0x428] sm:$0xf0]  ;;  %v11001_v11 = vld [vmem:[#allocation2 + $0x2a0] sm:$0xf]  ;;  %v2701_v5 = vsel %vm2184_vm10, %v2699_v63, %v2700_v58 }
 0x282   :  { %2489 = vst [vmem:[#allocation1 + $0x3] ss:$4 sm:$0xff] %v2351_v59  ;;  %v2172_v13 = vrot.slane %v2074_v12, 4  ;;  %v2173_v22 = vrot.slane %v2075_v8, 2  ;;  %v11194_v4 = vor.u32 %v13102_v7, %v11193_v9  ;;  %v13054_v18 = vld [vmem:[#allocation2 + $0x2a8] sm:$0xf0]  ;;  %v15882_v59 = vsel %vm2178_vm8, %v2694_v23, %v2697_v44 }
 0x283   :  { %2490 = vst [vmem:[#allocation1 + $0x20] ss:$4 sm:$0xff] %v2355_v10  ;;  %v11002_v32 = vor.u32 %v13054_v18, %v11001_v11  ;;  %v11097_v49 = vld [vmem:[#allocation2 + $0x360] sm:$0xf]  ;;  %v13078_v54 = vld [vmem:[#allocation2 + $0x368] sm:$0xf0] }
 0x284   :  { %19292 = vst [vmem:[#allocation35_spill] sm:$0xff] %v15882_v59  ;;  %v19293_v16 = vrot.slane %v15715_v19, 2  ;;  %v19294_v20 = vrot.slane %v15726_v6, 6  ;;  %v19295_v58 = vrot.slane %v15726_v6, 4  ;;  %v19296_v10 = vrot.slane %v15785_v46, 2  ;;  %4015 = vmatpush.bf16.msra.mxu2 %v11194_v4 }
 0x285   :  { %2491 = vst [vmem:[#allocation1 + $0x21] ss:$4 sm:$0xff] %v2359_v53  ;;  %v19297_v9 = vrot.slane %v15789_v31, 6  ;;  %v19298_v53 = vrot.slane %v15789_v31, 4  ;;  %v15902_v56 = vrot.slane %v2701_v5, 2  ;;  %v2370_v5 = vrot.slane %v15835_v24, 4  ;;  %3937 = vmatpush.bf16.msrb.mxu0 %v11002_v32 }
 0x286   :  { %v2706_v63 = vsel %vm2174_vm4, %v15715_v19, %v19293_v16  ;;  %v2709_v12 = vsel %vm2176_vm5, %v19295_v58, %v19294_v20  ;;  %v2713_v8 = vsel %vm2174_vm4, %v15785_v46, %v19296_v10  ;;  %2492 = vst [vmem:[#allocation1 + $0x22] ss:$4 sm:$0xff] %v2362_v37  ;;  %v19300_v45 = vmov %v19296_v10 }
 0x287   :  { %v2716_v23 = vsel %vm2176_vm5, %v19298_v53, %v19297_v9  ;;  %19299 = vst [vmem:[#allocation43_spill] sm:$0xff] %v15902_v56  ;;  %v2718_v44 = vsel %vm2180_vm6, %v15785_v46, %v19300_v45  ;;  %v19301_v7 = vmov %v19293_v16  ;;  %v19302_v18 = vmov %v19295_v58 }
 0x288   :  { %v2956_v11 = vsel %vm2180_vm6, %v15715_v19, %v19301_v7  ;;  %v19303_v16 = vmov %v19294_v20  ;;  %v2366_v37 = vrot.slane %v15831_v55, 2  ;;  %v11098_v58 = vor.u32 %v13078_v54, %v11097_v49  ;;  %v13122_v19 = vld [vmem:[#allocation2 + $0x4cc] sm:$0xf] }
 0x289   :  { %v2957_v20 = vsel %vm2182_vm7, %v19303_v16, %v19302_v18  ;;  %v19304_v46 = vmov %v19298_v53  ;;  %v19305_v10 = vmov %v19297_v9  ;;  %v11279_v53 = vld [vmem:[#allocation2 + $0x4d4] sm:$0xf0]  ;;  %v2374_v45 = vrot.slane %v15839_v47, 6  ;;  %v15939_v54 = vld.sshfl [vmem:[#allocation1 + $0x8] sm:$0xff pattern:$0x73625140] }
 0x28a   :  { %v2719_v9 = vsel %vm2182_vm7, %v19305_v10, %v19304_v46  ;;  %v2379_v6 = vsel %vm2182_vm7, %v2173_v22, %v2172_v13  ;;  %v2383_v7 = vsel %vm2174_vm4, %v2172_v13, %v2173_v22  ;;  %v2387_v55 = vsel %vm2180_vm6, %v2172_v13, %v2173_v22  ;;  %3976 = vmatpush.bf16.msrb.mxu1 %v11098_v58  ;;  %v15937_v49 = vld.sshfl [vmem:[#allocation1] sm:$0xff pattern:$0x73625140]  ;;  %v15949_v16 = vld.sshfl [vmem:[#allocation1 + $0x18] sm:$0xff pattern:$0x73625140] }
 0x28b   :  { %v2376_v24 = vsel %vm2176_vm5, %v2172_v13, %v2173_v22  ;;  %v15930_v4 = vsel %vm2184_vm10, %v2956_v11, %v2957_v20  ;;  %v3003_v31 = vshrl.u32 %v15882_v59, 16  ;;  %v3006_v32 = vshll.u32 %v15882_v59, 16  ;;  %v15947_v11 = vld.sshfl [vmem:[#allocation1 + $0x10] sm:$0xff pattern:$0x73625140] }
 0x28c   :  { %19306 = vst [vmem:[#allocation61_spill] sm:$0xff] %v15930_v4  ;;  %v2386_v47 = vsel %vm2182_vm7, %v15791_v27, %v15728_v29  ;;  %v15942_v18 = vsel %vm2178_vm8, %v2706_v63, %v2709_v12  ;;  %v15945_v13 = vsel %vm2178_vm8, %v2713_v8, %v2716_v23  ;;  %v11282_v22 = vor.u32 %v13122_v19, %v11279_v53 }
 0x28d   :  { %19307 = vst [vmem:[#allocation44_spill] sm:$0xff] %v15942_v18  ;;  %v2380_v20 = vsel %vm2184_vm10, %v2378_v35, %v2379_v6  ;;  %v2384_v58 = vsel %vm2178_vm8, %v2383_v7, %v2382_v39  ;;  %v2388_v29 = vsel %vm2184_vm10, %v2387_v55, %v2386_v47  ;;  %v2720_v27 = vsel %vm2184_vm10, %v2718_v44, %v2719_v9  ;;  %v15961_v44 = vld.sshfl [vmem:[#allocation1 + $0x20] sm:$0xff pattern:$0x73625140] }
 0x28e   :  { %19308 = vst [vmem:[#allocation62_spill] sm:$0xff] %v15945_v13  ;;  %v2377_v63 = vsel %vm2178_vm8, %v2375_v48, %v2376_v24  ;;  %v18854_v12 = vrot.slane %v15930_v4, 2  ;;  %v3012_v8 = vshll.u32 %v15902_v56, 16  ;;  %v3016_v23 = vshrl.u32 %v15902_v56, 16  ;;  %4164 = vmatpush.bf16.msrb.mxu2 %v11282_v22  ;;  %v13098_v56 = vld [vmem:[#allocation2 + $0x40c] sm:$0xf] }
 0x28f   :  { %2501 = vst [vmem:[#allocation1] ss:$4 sm:$0xff] %v2366_v37  ;;  %v3005_v46 = vrot.slane %v3003_v31, 6  ;;  %v3008_v35 = vrot.slane %v3006_v32, 7  ;;  %v2381_v10 = vrot.slane %v2380_v20, 2  ;;  %v2385_v39 = vrot.slane %v2384_v58, 4 }
 0x290   :  { %v2389_v19 = vrot.slane %v2388_v29, 6  ;;  %v15959_v53 = vrot.slane %v2720_v27, 2  ;;  %v15963_v37 = vld.sshfl [vmem:[#allocation1 + $0x28] sm:$0xff pattern:$0x73625140]  ;;  %v3014_v6 = vrot.slane %v3012_v8, 7 }
 0x291   :  { %v15965_v48 = vld.sshfl [vmem:[#allocation1 + $0x30] sm:$0xff pattern:$0x73625140]  ;;  %v15967_v9 = vld.sshfl [vmem:[#allocation1 + $0x38] sm:$0xff pattern:$0x73625140] }
 0x292   :  { %19309 = vst [vmem:[#allocation45_spill] sm:$0xff] %v15959_v53  ;;  %v3018_v7 = vrot.slane %v3016_v23, 6  ;;  %v3021_v55 = vshll.u32 %v15942_v18, 16  ;;  %v3025_v24 = vshrl.u32 %v15942_v18, 16  ;;  %v3035_v32 = vshrl.u32 %v15945_v13, 16 }
 0x293   :  { %2502 = vst [vmem:[#allocation1 + $0x1] ss:$4 sm:$0xff] %v2370_v5  ;;  %v3038_v47 = vshll.u32 %v15945_v13, 16  ;;  %v3009_v5 = vor.u32 %v3008_v35, %v3005_v46  ;;  %v3031_v58 = vshll.u32 %v18854_v12, 16  ;;  %v3044_v8 = vshll.u32 %v15959_v53, 16  ;;  %v19312_v13 = vld [vmem:[#allocation42_spill] sm:$0xff] }
 0x294   :  { %2503 = vst [vmem:[#allocation1 + $0x2] ss:$4 sm:$0xff] %v2374_v45  ;;  %v3023_v22 = vrot.slane %v3021_v55, 7  ;;  %v3027_v20 = vrot.slane %v3025_v24, 6  ;;  %v3019_v45 = vor.u32 %v3018_v7, %v3014_v6  ;;  %v3037_v29 = vrot.slane %v3035_v32, 6 }
 0x295   :  { %2504 = vst [vmem:[#allocation1 + $0x3] ss:$4 sm:$0xff] %v2377_v63  ;;  %v3040_v27 = vrot.slane %v3038_v47, 7  ;;  %v19313_v63 = vld [vmem:[#allocation14_spill] sm:$0xff]  ;;  %v13134_v55 = vld [vmem:[#allocation2 + $0x52c] sm:$0xf] }
 0x296   :  { %2505 = vst [vmem:[#allocation1 + $0x20] ss:$4 sm:$0xff] %v2381_v10  ;;  %v3028_v23 = vor.u32 %v3027_v20, %v3023_v22  ;;  %v2586_v46 = vpack.c.bf16 %v19313_v63, %v19312_v13  ;;  %v3010_v24 = vrot.slane %v3009_v5, 2  ;;  %v11327_v12 = vld [vmem:[#allocation2 + $0x534] sm:$0xf0]  ;;  %v3020_v7 = vrot.slane %v3019_v45, 2 }
 0x297   :  { %2506 = vst [vmem:[#allocation1 + $0x21] ss:$4 sm:$0xff] %v2385_v39  ;;  %v3041_v35 = vor.u32 %v3040_v27, %v3037_v29  ;;  %v3033_v39 = vrot.slane %v3031_v58, 7  ;;  %v15990_v47 = vrot.slane %v3044_v8, 7  ;;  %v13074_v31 = vld [vmem:[#allocation2 + $0x34c] sm:$0xf]  ;;  %v11330_v20 = vor.u32 %v13134_v55, %v11327_v12 }
 0x298   :  { %2507 = vst [vmem:[#allocation1 + $0x22] ss:$4 sm:$0xff] %v2389_v19  ;;  %v3029_v32 = vrot.slane %v3028_v23, 2  ;;  %v11087_v18 = vld [vmem:[#allocation2 + $0x354] sm:$0xf0]  ;;  %v19317_v19 = vld [vmem:[#allocation40_spill] sm:$0xff]  ;;  %v2588_v45 = vpack.c.bf16 %v15557_v52, %v15555_v60  ;;  %v3015_v12 = vsel %vm15986_vm2, %v3010_v24, %v3014_v6  ;;  %v2589_v23 = vpack.c.bf16 %v15572_v33, %v15570_v36 }
 0x299   :  { %v3042_v4 = vrot.slane %v3041_v35, 2  ;;  %v19316_v13 = vld [vmem:[#allocation19_spill] sm:$0xff]  ;;  %v2653_v27 = vrot.slane %v2586_v46, 2  ;;  %v11090_v59 = vor.u32 %v13074_v31, %v11087_v18  ;;  %4207 = vmatpush.bf16.msrb.mxu3 %v11330_v20  ;;  %v2590_v35 = vpack.c.bf16 %v15589_v51, %v15587_v42  ;;  %v13119_v6 = vld [vmem:[#allocation2 + $0x4b4] sm:$0xf] }
 0x29a   :  { %v2587_v29 = vpack.c.bf16 %v19317_v19, %v19316_v13  ;;  %v2591_v18 = vpack.c.bf16 %v15593_v30, %v15591_v17  ;;  %v3024_v60 = vsel %vm15986_vm2, %v3020_v7, %v3023_v22  ;;  %v3034_v52 = vsel %vm15986_vm2, %v3029_v32, %v3033_v39  ;;  %v11183_v55 = vld [vmem:[#allocation2 + $0x414] sm:$0xf0]  ;;  %v11267_v33 = vld [vmem:[#allocation2 + $0x4bc] sm:$0xf0] }
 0x29b   :  { %4086 = vmatpush.bf16.msra.mxu0 %v11090_v59  ;;  %v2725_v24 = vsel %vm2174_vm4, %v2586_v46, %v2653_v27  ;;  %v11186_v36 = vor.u32 %v13098_v56, %v11183_v55  ;;  %v2961_v51 = vsel %vm2180_vm6, %v2586_v46, %v2653_v27  ;;  %v3047_v17 = vsel %vm15986_vm2, %v3042_v4, %v15990_v47  ;;  %v13071_v27 = vld [vmem:[#allocation2 + $0x334] sm:$0xf] }
 0x29c   :  { %v15994_v5 = vld.sshfl [vmem:[#allocation1] sm:$0xff pattern:$0x73625140]  ;;  %v15996_v63 = vld.sshfl [vmem:[#allocation1 + $0x8] sm:$0xff pattern:$0x73625140]  ;;  %v11270_v30 = vor.u32 %v13119_v6, %v11267_v33 }
 0x29d   :  { %v16000_v58 = vld.sshfl [vmem:[#allocation1 + $0x10] sm:$0xff pattern:$0x73625140]  ;;  %v16002_v8 = vld.sshfl [vmem:[#allocation1 + $0x18] sm:$0xff pattern:$0x73625140]  ;;  %4125 = vmatpush.bf16.msra.mxu1 %v11186_v36 }
 0x29e   :  { %3373 = vst [vmem:[#allocation1] ss:$4 sm:$0xff] %v3015_v12  ;;  %v2654_v31 = vrot.slane %v2587_v29, 4  ;;  %v2655_v42 = vrot.slane %v2587_v29, 6  ;;  %v2656_v22 = vrot.slane %v2588_v45, 2  ;;  %v2657_v59 = vrot.slane %v2589_v23, 4  ;;  %4165 = vmatpush.bf16.msrb.mxu2 %v11270_v30 }
 0x29f   :  { %3376 = vst [vmem:[#allocation1 + $0x1] ss:$4 sm:$0xff] %v3024_v60  ;;  %v2658_v20 = vrot.slane %v2589_v23, 6  ;;  %v2659_v13 = vrot.slane %v2590_v35, 2  ;;  %v2660_v19 = vrot.slane %v2591_v18, 4  ;;  %v2661_v29 = vrot.slane %v2591_v18, 6 }
 0x2a0   :  { %3379 = vst [vmem:[#allocation1 + $0x2] ss:$4 sm:$0xff] %v3034_v52  ;;  %v2728_v7 = vsel %vm2176_vm5, %v2654_v31, %v2655_v42  ;;  %v2962_v56 = vsel %vm2182_vm7, %v2655_v42, %v2654_v31  ;;  %v2732_v46 = vsel %vm2174_vm4, %v2588_v45, %v2656_v22  ;;  %v2737_v39 = vsel %vm2180_vm6, %v2588_v45, %v2656_v22  ;;  %v11075_v6 = vld [vmem:[#allocation2 + $0x33c] sm:$0xf0]  ;;  %v13095_v33 = vld [vmem:[#allocation2 + $0x3f4] sm:$0xf] }
 0x2a1   :  { %3382 = vst [vmem:[#allocation1 + $0x3] ss:$4 sm:$0xff] %v3047_v17  ;;  %v16024_v32 = vsel %vm2178_vm8, %v2725_v24, %v2728_v7  ;;  %v16029_v4 = vsel %vm2184_vm10, %v2961_v51, %v2962_v56  ;;  %v3048_v60 = vshrl.u32 %v15959_v53, 16  ;;  %v2735_v24 = vsel %vm2176_vm5, %v2657_v59, %v2658_v20  ;;  %v11171_v18 = vld [vmem:[#allocation2 + $0x3fc] sm:$0xf0] }
 0x2a2   :  { %19318 = vst [vmem:[#allocation63_spill] sm:$0xff] %v16024_v32  ;;  %v3053_v52 = vshll.u32 %v16024_v32, 16  ;;  %v3057_v55 = vshrl.u32 %v16024_v32, 16  ;;  %v2738_v45 = vsel %vm2182_vm7, %v2658_v20, %v2657_v59  ;;  %v2744_v36 = vsel %vm2174_vm4, %v2590_v35, %v2659_v13  ;;  %v13116_v31 = vld [vmem:[#allocation2 + $0x49c] sm:$0xf] }
 0x2a3   :  { %19319 = vst [vmem:[#allocation46_spill] sm:$0xff] %v16029_v4  ;;  %v2747_v23 = vsel %vm2176_vm5, %v2660_v19, %v2661_v29  ;;  %v16040_v42 = vsel %vm2178_vm8, %v2732_v46, %v2735_v24  ;;  %v2739_v51 = vsel %vm2184_vm10, %v2737_v39, %v2738_v45  ;;  %v2966_v17 = vsel %vm2180_vm6, %v2590_v35, %v2659_v13  ;;  %v11255_v30 = vld [vmem:[#allocation2 + $0x4a4] sm:$0xf0]  ;;  %v13131_v22 = vld [vmem:[#allocation2 + $0x514] sm:$0xf] }
 0x2a4   :  { %v11315_v7 = vld [vmem:[#allocation2 + $0x51c] sm:$0xf0]  ;;  %v16044_v56 = vrot.slane %v2739_v51, 2  ;;  %v2967_v59 = vsel %vm2182_vm7, %v2661_v29, %v2660_v19  ;;  %v3050_v20 = vrot.slane %v3048_v60, 6  ;;  %v3055_v12 = vrot.slane %v3053_v52, 7 }
 0x2a5   :  { %v16052_v46 = vsel %vm2178_vm8, %v2744_v36, %v2747_v23  ;;  %v11078_v24 = vor.u32 %v13071_v27, %v11075_v6  ;;  %v11174_v39 = vor.u32 %v13095_v33, %v11171_v18  ;;  %v11258_v45 = vor.u32 %v13116_v31, %v11255_v30  ;;  %v16060_v19 = vld.sshfl [vmem:[#allocation1 + $0x20] sm:$0xff pattern:$0x73625140]  ;;  %v16062_v29 = vld.sshfl [vmem:[#allocation1 + $0x28] sm:$0xff pattern:$0x73625140] }
 0x2a6   :  { %v16064_v60 = vld.sshfl [vmem:[#allocation1 + $0x30] sm:$0xff pattern:$0x73625140]  ;;  %v16067_v52 = vsel %vm2184_vm10, %v2966_v17, %v2967_v59  ;;  %v3051_v27 = vor.u32 %v3050_v20, %v15990_v47  ;;  %v11318_v6 = vor.u32 %v13131_v22, %v11315_v7  ;;  %v16073_v36 = vld.sshfl [vmem:[#allocation1 + $0x38] sm:$0xff pattern:$0x73625140] }
 0x2a7   :  { %19324 = vst [vmem:[#allocation21_spill] sm:$0xff] %v16067_v52  ;;  %v3059_v23 = vrot.slane %v3057_v55, 6  ;;  %v19325_v33 = vrot.slane %v16029_v4, 2  ;;  %v3067_v31 = vshrl.u32 %v16040_v42, 16  ;;  %v3070_v17 = vshll.u32 %v16040_v42, 16  ;;  %4087 = vmatpush.bf16.msra.mxu0 %v11078_v24  ;;  %4126 = vmatpush.bf16.msra.mxu1 %v11174_v39 }
 0x2a8   :  { %v16047_v32 = vld.sshfl [vmem:[#allocation1] sm:$0xff pattern:$0x73625140]  ;;  %v16049_v53 = vld.sshfl [vmem:[#allocation1 + $0x8] sm:$0xff pattern:$0x73625140]  ;;  %4166 = vmatpush.bf16.msrb.mxu2 %v11258_v45  ;;  %4208 = vmatpush.bf16.msrb.mxu3 %v11318_v6 }
 0x2a9   :  { %19320 = vst [vmem:[#allocation64_spill] sm:$0xff] %v16047_v32  ;;  %3938 = vmatmul.bf16.vlgmr.msrb.gmra.mxu0 %v16047_v32  ;;  %3977 = vmatmul.bf16.vlgmr.msrb.gmra.mxu1 %v16049_v53  ;;  %v16056_v35 = vld.sshfl [vmem:[#allocation1 + $0x10] sm:$0xff pattern:$0x73625140]  ;;  %v3063_v18 = vshll.u32 %v19325_v33, 16  ;;  %v3052_v51 = vrot.slane %v3051_v27, 2  ;;  %v3060_v7 = vor.u32 %v3059_v23, %v3055_v12 }
 0x2aa   :  { %19321 = vst [vmem:[#allocation47_spill] sm:$0xff] %v16049_v53  ;;  %v16058_v13 = vld.sshfl [vmem:[#allocation1 + $0x18] sm:$0xff pattern:$0x73625140]  ;;  %4016 = vmatmul.bf16.vlgmr.msra.gmra.mxu2 %v16056_v35  ;;  %v3076_v30 = vshll.u32 %v16044_v56, 16  ;;  %v3080_v47 = vshrl.u32 %v16044_v56, 16 }
 0x2ab   :  { %19322 = vst [vmem:[#allocation20_spill] sm:$0xff] %v16056_v35  ;;  %11335 = vmatmul.msk.bf16.vlgmr.msra.gmra.mxu3 %vm3917_vm3, %v16058_v13  ;;  %v3069_v59 = vrot.slane %v3067_v31, 6  ;;  %v3085_v55 = vshll.u32 %v16052_v46, 16  ;;  %v3056_v20 = vsel %vm15986_vm2, %v3052_v51, %v3055_v12  ;;  %v3072_v27 = vrot.slane %v3070_v17, 7  ;;  %v13068_v51 = vld [vmem:[#allocation2 + $0x31c] sm:$0xf] }
 0x2ac   :  { %19323 = vst [vmem:[#allocation48_spill] sm:$0xff] %v16058_v13  ;;  %v3078_v33 = vrot.slane %v3076_v30, 7  ;;  %v3082_v4 = vrot.slane %v3080_v47, 6  ;;  %v3061_v13 = vrot.slane %v3060_v7, 2  ;;  %v3065_v35 = vrot.slane %v3063_v18, 7  ;;  %v19327_v7 = vld [vmem:[#allocation41_spill] sm:$0xff] }
 0x2ad   :  { %v3087_v53 = vrot.slane %v3085_v55, 7  ;;  %v3089_v24 = vshrl.u32 %v16052_v46, 16  ;;  %3385 = vst [vmem:[#allocation1 + $0x20] ss:$4 sm:$0xff] %v3056_v20  ;;  %v3073_v39 = vor.u32 %v3072_v27, %v3069_v59  ;;  %v19326_v45 = vrot.slane %v16067_v52, 2  ;;  %v19328_v59 = vld [vmem:[#allocation18_spill] sm:$0xff] }
 0x2ae   :  { %v3083_v22 = vor.u32 %v3082_v4, %v3078_v33  ;;  %v3066_v23 = vsel %vm15986_vm2, %v3061_v13, %v3065_v35  ;;  %v11063_v30 = vld [vmem:[#allocation2 + $0x324] sm:$0xf0]  ;;  %v13092_v18 = vld [vmem:[#allocation2 + $0x3dc] sm:$0xf]  ;;  %v2592_v55 = vpack.c.bf16 %v19327_v7, %v15646_v14  ;;  %v2593_v4 = vpack.c.bf16 %v15665_v50, %v15663_v1  ;;  %v11051_v7 = vld [vmem:[#allocation2 + $0x30c] sm:$0xf0] }
 0x2af   :  { %v3091_v31 = vrot.slane %v3089_v24, 6  ;;  %v3095_v6 = vshll.u32 %v19326_v45, 16  ;;  %v3074_v32 = vrot.slane %v3073_v39, 2  ;;  %3388 = vst [vmem:[#allocation1 + $0x21] ss:$4 sm:$0xff] %v3066_v23  ;;  %v2594_v13 = vpack.c.bf16 %v15681_v38, %v15679_v2 }
 0x2b0   :  { %v3084_v12 = vrot.slane %v3083_v22, 2  ;;  %v11159_v47 = vld [vmem:[#allocation2 + $0x3e4] sm:$0xf0]  ;;  %v11066_v14 = vor.u32 %v13068_v51, %v11063_v30  ;;  %v2662_v1 = vrot.slane %v2592_v55, 2  ;;  %v2664_v2 = vrot.slane %v2593_v4, 6 }
 0x2b1   :  { %v3092_v17 = vor.u32 %v3091_v31, %v3087_v53  ;;  %v3079_v35 = vsel %vm15986_vm2, %v3074_v32, %v3078_v33  ;;  %v19329_v22 = vld [vmem:[#allocation37_spill] sm:$0xff]  ;;  %v3097_v39 = vrot.slane %v3095_v6, 7  ;;  %v11162_v23 = vor.u32 %v13092_v18, %v11159_v47  ;;  %v13113_v31 = vld [vmem:[#allocation2 + $0x484] sm:$0xf] }
 0x2b2   :  { %v2595_v20 = vpack.c.bf16 %v19329_v22, %v19328_v59  ;;  %v3088_v27 = vsel %vm15986_vm2, %v3084_v12, %v3087_v53  ;;  %3391 = vst [vmem:[#allocation1 + $0x22] ss:$4 sm:$0xff] %v3079_v35  ;;  %v2663_v32 = vrot.slane %v2593_v4, 4  ;;  %4088 = vmatpush.bf16.msra.mxu0 %v11066_v14  ;;  %v2665_v38 = vrot.slane %v2594_v13, 2  ;;  %v11243_v12 = vld [vmem:[#allocation2 + $0x48c] sm:$0xf0] }
 0x2b3   :  { %v3093_v24 = vrot.slane %v3092_v17, 2  ;;  %3394 = vst [vmem:[#allocation1 + $0x23] ss:$4 sm:$0xff] %v3088_v27  ;;  %4127 = vmatpush.bf16.msra.mxu1 %v11162_v23  ;;  %v2751_v53 = vsel %vm2174_vm4, %v2592_v55, %v2662_v1  ;;  %v2756_v6 = vsel %vm2180_vm6, %v2592_v55, %v2662_v1  ;;  %v13065_v51 = vld [vmem:[#allocation2 + $0x304] sm:$0xf] }
 0x2b4   :  { %v2666_v33 = vrot.slane %v2595_v20, 4  ;;  %v2667_v45 = vrot.slane %v2595_v20, 6  ;;  %v2754_v17 = vsel %vm2176_vm5, %v2663_v32, %v2664_v2  ;;  %v2757_v30 = vsel %vm2182_vm7, %v2664_v2, %v2663_v32  ;;  %v13089_v4 = vld [vmem:[#allocation2 + $0x3c4] sm:$0xf]  ;;  %v11147_v35 = vld [vmem:[#allocation2 + $0x3cc] sm:$0xf0] }
 0x2b5   :  { %v3098_v50 = vsel %vm15986_vm2, %v3093_v24, %v3097_v39  ;;  %v2763_v18 = vsel %vm2174_vm4, %v2594_v13, %v2665_v38  ;;  %v2971_v47 = vsel %vm2180_vm6, %v2594_v13, %v2665_v38  ;;  %v16111_v59 = vsel %vm2178_vm8, %v2751_v53, %v2754_v17 }
 0x2b6   :  { %3404 = vst [vmem:[#allocation1] ss:$4 sm:$0xff] %v3098_v50  ;;  %v2758_v22 = vsel %vm2184_vm10, %v2756_v6, %v2757_v30  ;;  %v2766_v55 = vsel %vm2176_vm5, %v2666_v33, %v2667_v45  ;;  %v2972_v20 = vsel %vm2182_vm7, %v2667_v45, %v2666_v33  ;;  %v3099_v39 = vshrl.u32 %v16111_v59, 16 }
 0x2b7   :  { %v16116_v27 = vrot.slane %v2758_v22, 2  ;;  %v16119_v24 = vsel %vm2184_vm10, %v2971_v47, %v2972_v20  ;;  %v16127_v23 = vsel %vm2178_vm8, %v2763_v18, %v2766_v55  ;;  %v11246_v50 = vor.u32 %v13113_v31, %v11243_v12  ;;  %v19334_v55 = vld [vmem:[#allocation9_spill] sm:$0xff]  ;;  %v19335_v20 = vld [vmem:[#allocation11_spill] sm:$0xff] }
 0x2b8   :  { %v11054_v1 = vor.u32 %v13065_v51, %v11051_v7  ;;  %v11150_v32 = vor.u32 %v13089_v4, %v11147_v35  ;;  %v18878_v33 = vrot.slane %v16119_v24, 2  ;;  %v3101_v45 = vrot.slane %v3099_v39, 6 }
 0x2b9   :  { %v3102_v31 = vshll.u32 %v16111_v59, 16  ;;  %v3108_v53 = vshll.u32 %v16116_v27, 16  ;;  %v3112_v6 = vshrl.u32 %v16116_v27, 16  ;;  %v3117_v12 = vshll.u32 %v16127_v23, 16  ;;  %4167 = vmatpush.bf16.msrb.mxu2 %v11246_v50 }
 0x2ba   :  { %v16122_v13 = vld.sshfl [vmem:[#allocation1 + $0x20] sm:$0xff pattern:$0x73625140]  ;;  %v16124_v14 = vld.sshfl [vmem:[#allocation1 + $0x28] sm:$0xff pattern:$0x73625140]  ;;  %4089 = vmatpush.bf16.msra.mxu0 %v11054_v1  ;;  %4128 = vmatpush.bf16.msra.mxu1 %v11150_v32  ;;  %v2596_v22 = vpack.c.bf16 %v15740_v26, %v15738_v61  ;;  %v2597_v39 = vpack.c.bf16 %v19335_v20, %v19334_v55  ;;  %v2598_v50 = vpack.c.bf16 %v15768_v34, %v15766_v62 }
 0x2bb   :  { %19330 = vst [vmem:[#allocation69_spill] sm:$0xff] %v16122_v13  ;;  %3943 = vmatmul.bf16.gmra.mxu0 %v16122_v13  ;;  %3982 = vmatmul.bf16.gmra.mxu1 %v16124_v14  ;;  %v16131_v2 = vld.sshfl [vmem:[#allocation1 + $0x30] sm:$0xff pattern:$0x73625140]  ;;  %v3121_v51 = vshrl.u32 %v16127_v23, 16  ;;  %v3104_v17 = vrot.slane %v3102_v31, 7  ;;  %v2599_v32 = vpack.c.bf16 %v15779_v41, %v15777_v57  ;;  %v2600_v31 = vpack.c.bf16 %v15817_v21, %v15815_v40 }
 0x2bc   :  { %19331 = vst [vmem:[#allocation70_spill] sm:$0xff] %v16124_v14  ;;  %v16133_v38 = vld.sshfl [vmem:[#allocation1 + $0x38] sm:$0xff pattern:$0x73625140]  ;;  %4021 = vmatmul.bf16.gmra.mxu2 %v16131_v2  ;;  %v3110_v30 = vrot.slane %v3108_v53, 7  ;;  %v3114_v18 = vrot.slane %v3112_v6, 6  ;;  %v2602_v6 = vpack.c.bf16 %v15844_v3, %v15842_v28  ;;  %v2603_v62 = vpack.c.bf16 %v15851_v25, %v15849_v43 }
 0x2bd   :  { %19332 = vst [vmem:[#allocation71_spill] sm:$0xff] %v16131_v2  ;;  %11336 = vmatmul.msk.bf16.gmra.mxu3 %vm3917_vm3, %v16133_v38  ;;  %v3119_v47 = vrot.slane %v3117_v12, 7  ;;  %v3123_v7 = vrot.slane %v3121_v51, 6  ;;  %v3127_v4 = vshll.u32 %v18878_v33, 16  ;;  %v3105_v35 = vor.u32 %v3104_v17, %v3101_v45  ;;  %v13110_v20 = vld [vmem:[#allocation2 + $0x46c] sm:$0xf] }
 0x2be   :  { %19333 = vst [vmem:[#allocation49_spill] sm:$0xff] %v16133_v38  ;;  %v3115_v52 = vor.u32 %v3114_v18, %v3110_v30  ;;  %v2601_v45 = vpack.c.bf16 %v15825_v0, %v15823_v15  ;;  %v2668_v34 = vrot.slane %v2596_v22, 2  ;;  %v2669_v57 = vrot.slane %v2597_v39, 4 }
 0x2bf   :  { %v3124_v38 = vor.u32 %v3123_v7, %v3119_v47  ;;  %v3106_v1 = vrot.slane %v3105_v35, 2  ;;  %v3129_v26 = vrot.slane %v3127_v4, 7  ;;  %v2670_v21 = vrot.slane %v2597_v39, 6  ;;  %v11231_v39 = vld [vmem:[#allocation2 + $0x474] sm:$0xf0] }
 0x2c0   :  { %v3116_v53 = vrot.slane %v3115_v52, 2  ;;  %v2671_v15 = vrot.slane %v2598_v50, 2  ;;  %v2672_v0 = vrot.slane %v2599_v32, 4  ;;  %v2673_v28 = vrot.slane %v2599_v32, 6 }
 0x2c1   :  { %v3125_v61 = vrot.slane %v3124_v38, 2  ;;  %v3111_v12 = vsel %vm15986_vm2, %v3106_v1, %v3110_v30  ;;  %v2674_v3 = vrot.slane %v2600_v31, 2  ;;  %v2675_v52 = vrot.slane %v2601_v45, 4 }
 0x2c2   :  { %v3120_v41 = vsel %vm15986_vm2, %v3116_v53, %v3119_v47  ;;  %3406 = vst [vmem:[#allocation1 + $0x1] ss:$4 sm:$0xff] %v3111_v12  ;;  %v2676_v38 = vrot.slane %v2601_v45, 6  ;;  %v2677_v51 = vrot.slane %v2602_v6, 2  ;;  %v2678_v43 = vrot.slane %v2603_v62, 4 }
 0x2c3   :  { %v3130_v40 = vsel %vm15986_vm2, %v3125_v61, %v3129_v26  ;;  %3408 = vst [vmem:[#allocation1 + $0x2] ss:$4 sm:$0xff] %v3120_v41  ;;  %v2679_v25 = vrot.slane %v2603_v62, 6  ;;  %v2770_v17 = vsel %vm2174_vm4, %v2596_v22, %v2668_v34  ;;  %v2773_v30 = vsel %vm2176_vm5, %v2669_v57, %v2670_v21  ;;  %v13128_v53 = vld [vmem:[#allocation2 + $0x4fc] sm:$0xf] }
 0x2c4   :  { %3410 = vst [vmem:[#allocation1 + $0x3] ss:$4 sm:$0xff] %v3130_v40  ;;  %v2775_v18 = vsel %vm2180_vm6, %v2596_v22, %v2668_v34  ;;  %v2776_v47 = vsel %vm2182_vm7, %v2670_v21, %v2669_v57  ;;  %v16173_v7 = vsel %vm2178_vm8, %v2770_v17, %v2773_v30  ;;  %v2782_v35 = vsel %vm2174_vm4, %v2598_v50, %v2671_v15  ;;  %v11303_v61 = vld [vmem:[#allocation2 + $0x504] sm:$0xf0]  ;;  %v13062_v57 = vld [vmem:[#allocation2 + $0x2ec] sm:$0xf] }
 0x2c5   :  { %v2777_v4 = vsel %vm2184_vm10, %v2775_v18, %v2776_v47  ;;  %v2785_v55 = vsel %vm2176_vm5, %v2672_v0, %v2673_v28  ;;  %v2789_v22 = vsel %vm2174_vm4, %v2600_v31, %v2674_v3  ;;  %v2792_v45 = vsel %vm2176_vm5, %v2675_v52, %v2676_v38  ;;  %v11039_v41 = vld [vmem:[#allocation2 + $0x2f4] sm:$0xf0]  ;;  %v13086_v40 = vld [vmem:[#allocation2 + $0x3ac] sm:$0xf] }
 0x2c6   :  { %v16178_v1 = vrot.slane %v2777_v4, 2  ;;  %v16181_v32 = vsel %vm2178_vm8, %v2782_v35, %v2785_v55  ;;  %v16186_v26 = vsel %vm2178_vm8, %v2789_v22, %v2792_v45  ;;  %v2794_v12 = vsel %vm2180_vm6, %v2600_v31, %v2674_v3  ;;  %v11135_v47 = vld [vmem:[#allocation2 + $0x3b4] sm:$0xf0]  ;;  %v13107_v4 = vld [vmem:[#allocation2 + $0x454] sm:$0xf] }
 0x2c7   :  { %v2795_v62 = vsel %vm2182_vm7, %v2676_v38, %v2675_v52  ;;  %v2801_v34 = vsel %vm2174_vm4, %v2602_v6, %v2677_v51  ;;  %v2804_v17 = vsel %vm2176_vm5, %v2678_v43, %v2679_v25  ;;  %v2976_v30 = vsel %vm2180_vm6, %v2598_v50, %v2671_v15  ;;  %v11219_v35 = vld [vmem:[#allocation2 + $0x45c] sm:$0xf0] }
 0x2c8   :  { %v2796_v21 = vsel %vm2184_vm10, %v2794_v12, %v2795_v62  ;;  %v2977_v18 = vsel %vm2182_vm7, %v2673_v28, %v2672_v0  ;;  %v16198_v31 = vsel %vm2178_vm8, %v2801_v34, %v2804_v17  ;;  %v2981_v52 = vsel %vm2180_vm6, %v2602_v6, %v2677_v51 }
 0x2c9   :  { %v16195_v55 = vrot.slane %v2796_v21, 2  ;;  %v16201_v3 = vsel %vm2184_vm10, %v2976_v30, %v2977_v18  ;;  %v2982_v50 = vsel %vm2182_vm7, %v2679_v25, %v2678_v43  ;;  %v11234_v15 = vor.u32 %v13110_v20, %v11231_v39 }
 0x2ca   :  { %v11306_v0 = vor.u32 %v13128_v53, %v11303_v61  ;;  %v11042_v28 = vor.u32 %v13062_v57, %v11039_v41  ;;  %v16216_v62 = vsel %vm2184_vm10, %v2981_v52, %v2982_v50  ;;  %v11138_v6 = vor.u32 %v13086_v40, %v11135_v47 }
 0x2cb   :  { %v16204_v38 = vld.sshfl [vmem:[#allocation1] sm:$0xff pattern:$0x73625140]  ;;  %v16206_v22 = vld.sshfl [vmem:[#allocation1 + $0x8] sm:$0xff pattern:$0x73625140]  ;;  %v11222_v51 = vor.u32 %v13107_v4, %v11219_v35  ;;  %4168 = vmatpush.bf16.msrb.mxu2 %v11234_v15 }
 0x2cc   :  { %3948 = vmatmul.bf16.gmra.mxu0 %v16204_v38  ;;  %3987 = vmatmul.bf16.gmra.mxu1 %v16206_v22  ;;  %v16211_v45 = vld.sshfl [vmem:[#allocation1 + $0x10] sm:$0xff pattern:$0x73625140]  ;;  %v16213_v12 = vld.sshfl [vmem:[#allocation1 + $0x18] sm:$0xff pattern:$0x73625140] }
 0x2cd   :  { %4026 = vmatmul.bf16.gmra.mxu2 %v16211_v45  ;;  %11337 = vmatmul.msk.bf16.gmra.mxu3 %vm3917_vm3, %v16213_v12  ;;  %v18879_v43 = vrot.slane %v16201_v3, 2  ;;  %v3131_v20 = vshrl.u32 %v16173_v7, 16  ;;  %v3134_v39 = vshll.u32 %v16173_v7, 16  ;;  %v3140_v53 = vshll.u32 %v16178_v1, 16 }
 0x2ce   :  { %v3144_v61 = vshrl.u32 %v16178_v1, 16  ;;  %v3149_v34 = vshll.u32 %v16181_v32, 16  ;;  %v3153_v57 = vshrl.u32 %v16181_v32, 16  ;;  %4209 = vmatpush.bf16.msrb.mxu3 %v11306_v0  ;;  %v3163_v17 = vshrl.u32 %v16186_v26, 16  ;;  %4090 = vmatpush.bf16.msra.mxu0 %v11042_v28 }
 0x2cf   :  { %v3133_v41 = vrot.slane %v3131_v20, 6  ;;  %v3136_v40 = vrot.slane %v3134_v39, 7  ;;  %v3159_v21 = vshll.u32 %v18879_v43, 16  ;;  %4129 = vmatpush.bf16.msra.mxu1 %v11138_v6  ;;  %v3142_v30 = vrot.slane %v3140_v53, 7  ;;  %4169 = vmatpush.bf16.msrb.mxu2 %v11222_v51 }
 0x2d0   :  { %v3146_v18 = vrot.slane %v3144_v61, 6  ;;  %v3151_v47 = vrot.slane %v3149_v34, 7  ;;  %v3155_v4 = vrot.slane %v3153_v57, 6  ;;  %v3165_v50 = vrot.slane %v3163_v17, 6 }
 0x2d1   :  { %v3137_v35 = vor.u32 %v3136_v40, %v3133_v41  ;;  %v3161_v52 = vrot.slane %v3159_v21, 7  ;;  %v3166_v33 = vshll.u32 %v16186_v26, 16  ;;  %v3172_v20 = vshll.u32 %v16195_v55, 16 }
 0x2d2   :  { %v3147_v15 = vor.u32 %v3146_v18, %v3142_v30  ;;  %v3156_v0 = vor.u32 %v3155_v4, %v3151_v47  ;;  %v3176_v39 = vshrl.u32 %v16195_v55, 16  ;;  %v3181_v28 = vshll.u32 %v16198_v31, 16 }
 0x2d3   :  { %v3138_v43 = vrot.slane %v3137_v35, 2  ;;  %v3168_v25 = vrot.slane %v3166_v33, 7  ;;  %v3185_v6 = vshrl.u32 %v16198_v31, 16  ;;  %v3174_v34 = vrot.slane %v3172_v20, 7 }
 0x2d4   :  { %v3148_v53 = vrot.slane %v3147_v15, 2  ;;  %v3157_v61 = vrot.slane %v3156_v0, 2  ;;  %v3178_v57 = vrot.slane %v3176_v39, 6  ;;  %v3183_v21 = vrot.slane %v3181_v28, 7  ;;  %v13059_v39 = vld [vmem:[#allocation2 + $0x2d4] sm:$0xf] }
 0x2d5   :  { %v3143_v41 = vsel %vm15986_vm2, %v3138_v43, %v3142_v30  ;;  %v3169_v40 = vor.u32 %v3168_v25, %v3165_v50  ;;  %v3187_v17 = vrot.slane %v3185_v6, 6  ;;  %v19336_v33 = vrot.slane %v16216_v62, 2  ;;  %v11027_v28 = vld [vmem:[#allocation2 + $0x2dc] sm:$0xf0] }
 0x2d6   :  { %v3152_v18 = vsel %vm15986_vm2, %v3148_v53, %v3151_v47  ;;  %v3179_v51 = vor.u32 %v3178_v57, %v3174_v34  ;;  %3412 = vst [vmem:[#allocation1 + $0x20] ss:$4 sm:$0xff] %v3143_v41  ;;  %v3162_v35 = vsel %vm15986_vm2, %v3157_v61, %v3161_v52  ;;  %v2604_v52 = vpack.c.bf16 %v15939_v54, %v15937_v49  ;;  %v11123_v57 = vld [vmem:[#allocation2 + $0x39c] sm:$0xf0] }
 0x2d7   :  { %v3191_v4 = vshll.u32 %v19336_v33, 16  ;;  %v3170_v15 = vrot.slane %v3169_v40, 2  ;;  %v3188_v0 = vor.u32 %v3187_v17, %v3183_v21  ;;  %3414 = vst [vmem:[#allocation1 + $0x21] ss:$4 sm:$0xff] %v3152_v18  ;;  %v2605_v6 = vpack.c.bf16 %v15949_v16, %v15947_v11  ;;  %v13104_v17 = vld [vmem:[#allocation2 + $0x43c] sm:$0xf] }
 0x2d8   :  { %v3180_v20 = vrot.slane %v3179_v51, 2  ;;  %3416 = vst [vmem:[#allocation1 + $0x22] ss:$4 sm:$0xff] %v3162_v35  ;;  %v16257_v53 = vpack.c.bf16 %v15963_v37, %v15961_v44  ;;  %v16261_v61 = vpack.c.bf16 %v15967_v9, %v15965_v48  ;;  %v2680_v41 = vrot.slane %v2604_v52, 2  ;;  %v11207_v18 = vld [vmem:[#allocation2 + $0x444] sm:$0xf0] }
 0x2d9   :  { %v3175_v43 = vsel %vm15986_vm2, %v3170_v15, %v3174_v34  ;;  %v3189_v25 = vrot.slane %v3188_v0, 2  ;;  %v3193_v30 = vrot.slane %v3191_v4, 7  ;;  %v13083_v34 = vld [vmem:[#allocation2 + $0x394] sm:$0xf]  ;;  %v11030_v40 = vor.u32 %v13059_v39, %v11027_v28  ;;  %v13125_v11 = vld [vmem:[#allocation2 + $0x4e4] sm:$0xf] }
 0x2da   :  { %v3184_v47 = vsel %vm15986_vm2, %v3180_v20, %v3183_v21  ;;  %3418 = vst [vmem:[#allocation1 + $0x23] ss:$4 sm:$0xff] %v3175_v43  ;;  %v11126_v21 = vor.u32 %v13083_v34, %v11123_v57  ;;  %v2681_v49 = vrot.slane %v2605_v6, 4  ;;  %v2682_v54 = vrot.slane %v2605_v6, 6  ;;  %v11291_v9 = vld [vmem:[#allocation2 + $0x4ec] sm:$0xf0] }
 0x2db   :  { %v3194_v50 = vsel %vm15986_vm2, %v3189_v25, %v3193_v30  ;;  %3428 = vst [vmem:[#allocation1] ss:$4 sm:$0xff] %v3184_v47  ;;  %v2683_v51 = vrot.slane %v16257_v53, 2  ;;  %v2684_v16 = vrot.slane %v16261_v61, 4  ;;  %v2685_v44 = vrot.slane %v16261_v61, 6  ;;  %4091 = vmatpush.bf16.msra.mxu0 %v11030_v40 }
 0x2dc   :  { %3430 = vst [vmem:[#allocation1 + $0x1] ss:$4 sm:$0xff] %v3194_v50  ;;  %v2808_v37 = vsel %vm2174_vm4, %v2604_v52, %v2680_v41  ;;  %v2813_v48 = vsel %vm2180_vm6, %v2604_v52, %v2680_v41  ;;  %4130 = vmatpush.bf16.msra.mxu1 %v11126_v21  ;;  %v13056_v33 = vld [vmem:[#allocation2 + $0x2bc] sm:$0xf]  ;;  %v2811_v15 = vsel %vm2176_vm5, %v2681_v49, %v2682_v54  ;;  %v11015_v57 = vld [vmem:[#allocation2 + $0x2c4] sm:$0xf0] }
 0x2dd   :  { %v2814_v0 = vsel %vm2182_vm7, %v2682_v54, %v2681_v49  ;;  %v2820_v20 = vsel %vm2174_vm4, %v16257_v53, %v2683_v51  ;;  %v11210_v43 = vor.u32 %v13104_v17, %v11207_v18  ;;  %v16285_v47 = vsel %vm2178_vm8, %v2808_v37, %v2811_v15  ;;  %v13080_v17 = vld [vmem:[#allocation2 + $0x37c] sm:$0xf]  ;;  %v11111_v18 = vld [vmem:[#allocation2 + $0x384] sm:$0xf0] }
 0x2de   :  { %v2815_v50 = vsel %vm2184_vm10, %v2813_v48, %v2814_v0  ;;  %v2823_v39 = vsel %vm2176_vm5, %v2684_v16, %v2685_v44  ;;  %v3195_v6 = vshrl.u32 %v16285_v47, 16  ;;  %v3198_v34 = vshll.u32 %v16285_v47, 16 }
 0x2df   :  { %v16296_v52 = vrot.slane %v2815_v50, 2  ;;  %v16299_v28 = vsel %vm2178_vm8, %v2820_v20, %v2823_v39  ;;  %4170 = vmatpush.bf16.msrb.mxu2 %v11210_v43  ;;  %v11294_v40 = vor.u32 %v13125_v11, %v11291_v9  ;;  %v11018_v21 = vor.u32 %v13056_v33, %v11015_v57 }
 0x2e0   :  { %v3213_v41 = vshll.u32 %v16299_v28, 16  ;;  %v2608_v49 = vpack.c.bf16 %v15996_v63, %v15994_v5  ;;  %v3197_v54 = vrot.slane %v3195_v6, 6  ;;  %v3200_v37 = vrot.slane %v3198_v34, 7 }
 0x2e1   :  { %v16268_v4 = vld.sshfl [vmem:[#allocation1 + $0x20] sm:$0xff pattern:$0x73625140]  ;;  %v16270_v35 = vld.sshfl [vmem:[#allocation1 + $0x28] sm:$0xff pattern:$0x73625140]  ;;  %4210 = vmatpush.bf16.msrb.mxu3 %v11294_v40  ;;  %4092 = vmatpush.bf16.msra.mxu0 %v11018_v21  ;;  %v11114_v20 = vor.u32 %v13080_v17, %v11111_v18  ;;  %v2609_v11 = vpack.c.bf16 %v16002_v8, %v16000_v58  ;;  %v2610_v9 = vpack.c.bf16 %v16062_v29, %v16060_v19 }
 0x2e2   :  { %3953 = vmatmul.bf16.gmra.mxu0 %v16268_v4  ;;  %3992 = vmatmul.bf16.gmra.mxu1 %v16270_v35  ;;  %v16280_v25 = vld.sshfl [vmem:[#allocation1 + $0x30] sm:$0xff pattern:$0x73625140]  ;;  %v16282_v30 = vld.sshfl [vmem:[#allocation1 + $0x38] sm:$0xff pattern:$0x73625140]  ;;  %v3201_v33 = vor.u32 %v3200_v37, %v3197_v54  ;;  %v2611_v63 = vpack.c.bf16 %v16073_v36, %v16064_v60 }
 0x2e3   :  { %4031 = vmatmul.bf16.gmra.mxu2 %v16280_v25  ;;  %11338 = vmatmul.msk.bf16.gmra.mxu3 %vm3917_vm3, %v16282_v30  ;;  %v3204_v48 = vshll.u32 %v16296_v52, 16  ;;  %v3208_v15 = vshrl.u32 %v16296_v52, 16  ;;  %v16308_v0 = vrot.slane %v3213_v41, 7  ;;  %v2686_v50 = vrot.slane %v2608_v49, 2 }
 0x2e4   :  { %4131 = vmatpush.bf16.msra.mxu1 %v11114_v20  ;;  %v2687_v39 = vrot.slane %v2609_v11, 4  ;;  %v2688_v6 = vrot.slane %v2609_v11, 6  ;;  %v2689_v34 = vrot.slane %v2610_v9, 2  ;;  %v3202_v57 = vrot.slane %v3201_v33, 2 }
 0x2e5   :  { %v3206_v43 = vrot.slane %v3204_v48, 7  ;;  %v3210_v5 = vrot.slane %v3208_v15, 6  ;;  %v2690_v40 = vrot.slane %v2611_v63, 4  ;;  %v2691_v21 = vrot.slane %v2611_v63, 6 }
 0x2e6   :  { %v2827_v58 = vsel %vm2174_vm4, %v2608_v49, %v2686_v50  ;;  %v2830_v8 = vsel %vm2176_vm5, %v2687_v39, %v2688_v6  ;;  %v2832_v19 = vsel %vm2180_vm6, %v2608_v49, %v2686_v50  ;;  %v2833_v29 = vsel %vm2182_vm7, %v2688_v6, %v2687_v39 }
 0x2e7   :  { %v3211_v41 = vor.u32 %v3210_v5, %v3206_v43  ;;  %v3207_v60 = vsel %vm15986_vm2, %v3202_v57, %v3206_v43  ;;  %v16323_v17 = vsel %vm2178_vm8, %v2827_v58, %v2830_v8  ;;  %v2834_v18 = vsel %vm2184_vm10, %v2832_v19, %v2833_v29  ;;  %v11195_v57 = vld [vmem:[#allocation2 + $0x42c] sm:$0xf0]  ;;  %v13077_v29 = vld [vmem:[#allocation2 + $0x364] sm:$0xf] }
 0x2e8   :  { %3432 = vst [vmem:[#allocation1 + $0x2] ss:$4 sm:$0xff] %v3207_v60  ;;  %v16326_v54 = vrot.slane %v2834_v18, 2  ;;  %v2839_v37 = vsel %vm2174_vm4, %v2610_v9, %v2689_v34  ;;  %v2842_v48 = vsel %vm2176_vm5, %v2690_v40, %v2691_v21  ;;  %v2986_v49 = vsel %vm2180_vm6, %v16257_v53, %v2683_v51 }
 0x2e9   :  { %v3212_v36 = vrot.slane %v3211_v41, 2  ;;  %v16338_v20 = vsel %vm2178_vm8, %v2839_v37, %v2842_v48  ;;  %v2987_v11 = vsel %vm2182_vm7, %v2685_v44, %v2684_v16  ;;  %v2991_v33 = vsel %vm2180_vm6, %v2610_v9, %v2689_v34  ;;  %v13101_v34 = vld [vmem:[#allocation2 + $0x424] sm:$0xf]  ;;  %vm5417_vm6 = vmor %vm113_vm9, %vm121_vm12  ;;  %v11099_v48 = vld [vmem:[#allocation2 + $0x36c] sm:$0xf0] }
 0x2ea   :  { %v2988_v43 = vsel %vm2184_vm10, %v2986_v49, %v2987_v11  ;;  %v2992_v53 = vsel %vm2182_vm7, %v2691_v21, %v2690_v40  ;;  %v3217_v51 = vshrl.u32 %v16299_v28, 16  ;;  %v3227_v5 = vshrl.u32 %v16323_v17, 16  ;;  %v13053_v41 = vld [vmem:[#allocation2 + $0x2a4] sm:$0xf]  ;;  %v11003_v40 = vld [vmem:[#allocation2 + $0x2ac] sm:$0xf0]  ;;  %vm16369_vm9 = vmor %vm5417_vm6, %vm5418_vm11 }
 0x2eb   :  { %v3216_v15 = vsel %vm15986_vm2, %v3212_v36, %v16308_v0  ;;  %v2990_v63 = vrot.slane %v2988_v43, 2  ;;  %v16351_v50 = vsel %vm2184_vm10, %v2991_v33, %v2992_v53  ;;  %v3230_v39 = vshll.u32 %v16323_v17, 16  ;;  %vm16394_vm12 = vmor %vm16369_vm9, %vm5420_vm13 }
 0x2ec   :  { %3434 = vst [vmem:[#allocation1 + $0x3] ss:$4 sm:$0xff] %v3216_v15  ;;  %v3236_v61 = vshll.u32 %v16326_v54, 16  ;;  %v18880_v16 = vrot.slane %v16351_v50, 2  ;;  %v3219_v44 = vrot.slane %v3217_v51, 6  ;;  %v3229_v9 = vrot.slane %v3227_v5, 6 }
 0x2ed   :  { %v3240_v6 = vshrl.u32 %v16326_v54, 16  ;;  %v3223_v21 = vshll.u32 %v2990_v63, 16  ;;  %v3232_v58 = vrot.slane %v3230_v39, 7  ;;  %v3245_v19 = vshll.u32 %v16338_v20, 16 }
 0x2ee   :  { %v16357_v8 = vrot.slane %v3236_v61, 7  ;;  %v3220_v60 = vor.u32 %v3219_v44, %v16308_v0  ;;  %v3249_v18 = vshrl.u32 %v16338_v20, 16  ;;  %v3255_v37 = vshll.u32 %v18880_v16, 16  ;;  %v19346_v16 = vld [vmem:[#allocation62_spill] sm:$0xff] }
 0x2ef   :  { %v3242_v36 = vrot.slane %v3240_v6, 6  ;;  %v3225_v49 = vrot.slane %v3223_v21, 7  ;;  %v3233_v15 = vor.u32 %v3232_v58, %v3229_v9  ;;  %v3247_v11 = vrot.slane %v3245_v19, 7 }
 0x2f0   :  { %v11713_v33 = vrot.slane %v16285_v47, 9  ;;  %v3221_v43 = vrot.slane %v3220_v60, 2  ;;  %v3251_v51 = vrot.slane %v3249_v18, 6  ;;  %v3257_v5 = vrot.slane %v3255_v37, 7  ;;  %v19344_v18 = vld [vmem:[#allocation43_spill] sm:$0xff] }
 0x2f1   :  { %v3243_v53 = vor.u32 %v3242_v36, %v16357_v8  ;;  %v11198_v44 = vor.u32 %v13101_v34, %v11195_v57  ;;  %v11006_v6 = vor.u32 %v13053_v41, %v11003_v40  ;;  %v11102_v9 = vor.u32 %v13077_v29, %v11099_v48  ;;  %v19341_v34 = vld [vmem:[#allocation35_spill] sm:$0xff] }
 0x2f2   :  { %v3226_v19 = vsel %vm15986_vm2, %v3221_v43, %v3225_v49  ;;  %v3252_v60 = vor.u32 %v3251_v51, %v3247_v11  ;;  %v3234_v57 = vrot.slane %v3233_v15, 2  ;;  %v5484_v40 = vrot.slane %v16296_v52, 7  ;;  %v19345_v43 = vld [vmem:[#allocation44_spill] sm:$0xff] }
 0x2f3   :  { %v16373_v39 = vld.sshfl [vmem:[#allocation1] sm:$0xff pattern:$0x73625140]  ;;  %v16375_v61 = vld.sshfl [vmem:[#allocation1 + $0x8] sm:$0xff pattern:$0x73625140]  ;;  %4171 = vmatpush.bf16.msrb.mxu2 %v11198_v44  ;;  %4093 = vmatpush.bf16.msra.mxu0 %v11006_v6 }
 0x2f4   :  { %3958 = vmatmul.bf16.gmra.mxu0 %v16373_v39  ;;  %3997 = vmatmul.bf16.gmra.mxu1 %v16375_v61  ;;  %v16379_v21 = vld.sshfl [vmem:[#allocation1 + $0x10] sm:$0xff pattern:$0x73625140]  ;;  %v16381_v58 = vld.sshfl [vmem:[#allocation1 + $0x18] sm:$0xff pattern:$0x73625140]  ;;  %v16411_v0 = vsel %vm16394_vm12, %v11713_v33, %v5484_v40 }
 0x2f5   :  { %19339 = vst [vmem:[#allocation65_spill] sm:$0xff] %v16379_v21  ;;  %4036 = vmatmul.bf16.gmra.mxu2 %v16379_v21  ;;  %11339 = vmatmul.msk.bf16.gmra.mxu3 %vm3917_vm3, %v16381_v58  ;;  %v3244_v41 = vrot.slane %v3243_v53, 2  ;;  %v5487_v29 = vrot.slane %v16299_v28, 7  ;;  %v3253_v37 = vrot.slane %v3252_v60, 2  ;;  %v16399_v48 = vrot.slane %v2990_v63, 7 }
 0x2f6   :  { %19340 = vst [vmem:[#allocation50_spill] sm:$0xff] %v16381_v58  ;;  %v11714_v49 = vrot.slane %v16323_v17, 9  ;;  %v5494_v15 = vrot.slane %v16326_v54, 7  ;;  %v3239_v53 = vsel %vm15986_vm2, %v3234_v57, %v16357_v8  ;;  %v5486_v63 = vrot.slane %v5484_v40, 2  ;;  %4132 = vmatpush.bf16.msra.mxu1 %v11102_v9  ;;  %v11285_v60 = vld [vmem:[#allocation2 + $0x4d0] sm:$0xf] }
 0x2f7   :  { %4398 = vst [vmem:[#allocation1] ss:$4 sm:$0xff] %v19341_v34  ;;  %v3248_v51 = vsel %vm15986_vm2, %v3244_v41, %v3247_v11  ;;  %v3258_v44 = vsel %vm15986_vm2, %v3253_v37, %v3257_v5  ;;  %v16416_v6 = vrot.slane %v5487_v29, 2  ;;  %v13124_v11 = vld [vmem:[#allocation2 + $0x4d8] sm:$0xf0]  ;;  %v5497_v9 = vrot.slane %v16338_v20, 7 }
 0x2f8   :  { %4400 = vst [vmem:[#allocation1 + $0x1] ss:$4 sm:$0xff] %v19344_v18  ;;  %v16420_v8 = vsel %vm16394_vm12, %v11714_v49, %v5494_v15  ;;  %v5496_v57 = vrot.slane %v5494_v15, 2  ;;  %v16424_v33 = vsel %vm16394_vm12, %v5486_v63, %v5487_v29  ;;  %v19347_v41 = vrot.slane %v16351_v50, 2  ;;  %v11333_v5 = vld [vmem:[#allocation2 + $0x530] sm:$0xf] }
 0x2f9   :  { %4402 = vst [vmem:[#allocation1 + $0x2] ss:$4 sm:$0xff] %v19345_v43  ;;  %v11286_v10 = vor.u32 %v13124_v11, %v11285_v60  ;;  %v13136_v49 = vld [vmem:[#allocation2 + $0x538] sm:$0xf0]  ;;  %v16439_v15 = vrot.slane %v5497_v9, 2  ;;  %vm6888_vm7 = vcmask 1042432  }
 0x2fa   :  { %4404 = vst [vmem:[#allocation1 + $0x3] ss:$4 sm:$0xff] %v19346_v16  ;;  %v16429_v40 = vrot.slane %v19347_v41, 7  ;;  %v16437_v29 = vsel %vm16394_vm12, %v5496_v57, %v5497_v9  ;;  %v11334_v50 = vor.u32 %v13136_v49, %v11333_v5  ;;  %v13076_v63 = vld [vmem:[#allocation2 + $0x358] sm:$0xf0]  ;;  %vm6889_vm10 = vcmask 1046532  }
 0x2fb   :  { %3436 = vst [vmem:[#allocation1 + $0x20] ss:$4 sm:$0xff] %v3226_v19  ;;  %v11093_v19 = vld [vmem:[#allocation2 + $0x350] sm:$0xf]  ;;  %4320 = vmatpush.bf16.msra.mxu2 %v11286_v10  ;;  %v13100_v11 = vld [vmem:[#allocation2 + $0x418] sm:$0xf0]  ;;  %vm17145_vm15 = vmor %vm6888_vm7, %vm6889_vm10 }
 0x2fc   :  { %3438 = vst [vmem:[#allocation1 + $0x21] ss:$4 sm:$0xff] %v3239_v53  ;;  %v11094_v60 = vor.u32 %v13076_v63, %v11093_v19  ;;  %v11189_v53 = vld [vmem:[#allocation2 + $0x410] sm:$0xf]  ;;  %4363 = vmatpush.bf16.msra.mxu3 %v11334_v50  ;;  %v11273_v37 = vld [vmem:[#allocation2 + $0x4b8] sm:$0xf] }
 0x2fd   :  { %3440 = vst [vmem:[#allocation1 + $0x22] ss:$4 sm:$0xff] %v3248_v51  ;;  %v11190_v51 = vor.u32 %v13100_v11, %v11189_v53  ;;  %v13121_v58 = vld [vmem:[#allocation2 + $0x4c0] sm:$0xf0]  ;;  %v19356_v50 = vld [vmem:[#allocation45_spill] sm:$0xff]  ;;  %v19357_v53 = vld [vmem:[#allocation63_spill] sm:$0xff] }
 0x2fe   :  { %3442 = vst [vmem:[#allocation1 + $0x23] ss:$4 sm:$0xff] %v3258_v44  ;;  %4242 = vmatpush.bf16.msrb.mxu0 %v11094_v60  ;;  %v11274_v57 = vor.u32 %v13121_v58, %v11273_v37  ;;  %v11081_v63 = vld [vmem:[#allocation2 + $0x338] sm:$0xf]  ;;  %v13073_v60 = vld [vmem:[#allocation2 + $0x340] sm:$0xf0] }
 0x2ff   :  { %4281 = vmatpush.bf16.msrb.mxu1 %v11190_v51  ;;  %v11082_v11 = vor.u32 %v13073_v60, %v11081_v63  ;;  %v11177_v51 = vld [vmem:[#allocation2 + $0x3f8] sm:$0xf]  ;;  %v11165_v21 = vld [vmem:[#allocation2 + $0x3e0] sm:$0xf]  ;;  %v13094_v60 = vld [vmem:[#allocation2 + $0x3e8] sm:$0xf0] }
 0x300   :  { %4321 = vmatpush.bf16.msra.mxu2 %v11274_v57  ;;  %v13097_v57 = vld [vmem:[#allocation2 + $0x400] sm:$0xf0]  ;;  %vm7533_vm4 = vcmask 785408   ;;  %vm7966_vm5 = vcmask 1047556  }
 0x301   :  { %v16445_v9 = vld.sshfl [vmem:[#allocation1] sm:$0xff pattern:$0x73625140]  ;;  %v16447_v10 = vld.sshfl [vmem:[#allocation1 + $0x8] sm:$0xff pattern:$0x73625140]  ;;  %v11178_v41 = vor.u32 %v13097_v57, %v11177_v51  ;;  %v11166_v51 = vor.u32 %v13094_v60, %v11165_v21 }
 0x302   :  { %19348 = vst [vmem:[#allocation66_spill] sm:$0xff] %v16445_v9  ;;  %v16449_v44 = vld.sshfl [vmem:[#allocation1 + $0x10] sm:$0xff pattern:$0x73625140]  ;;  %4243 = vmatpush.bf16.msrb.mxu0 %v11082_v11  ;;  %v11321_v9 = vld [vmem:[#allocation2 + $0x518] sm:$0xf] }
 0x303   :  { %19349 = vst [vmem:[#allocation72_spill] sm:$0xff] %v16447_v10  ;;  %v16451_v5 = vld.sshfl [vmem:[#allocation1 + $0x18] sm:$0xff pattern:$0x73625140]  ;;  %4282 = vmatpush.bf16.msrb.mxu1 %v11178_v41  ;;  %v11249_v57 = vld [vmem:[#allocation2 + $0x488] sm:$0xf] }
 0x304   :  { %19350 = vst [vmem:[#allocation51_spill] sm:$0xff] %v16449_v44  ;;  %v13118_v44 = vld [vmem:[#allocation2 + $0x4a8] sm:$0xf0]  ;;  %v11057_v60 = vld [vmem:[#allocation2 + $0x308] sm:$0xf] }
 0x305   :  { %19351 = vst [vmem:[#allocation23_spill] sm:$0xff] %v16451_v5  ;;  %v16455_v49 = vld.sshfl [vmem:[#allocation1 + $0x20] sm:$0xff pattern:$0x73625140]  ;;  %v11261_v5 = vld [vmem:[#allocation2 + $0x4a0] sm:$0xf] }
 0x306   :  { %4421 = vst [vmem:[#allocation1] ss:$4 sm:$0xff] %v16052_v46  ;;  %v16457_v19 = vld.sshfl [vmem:[#allocation1 + $0x28] sm:$0xff pattern:$0x73625140]  ;;  %3963 = vmatmul.bf16.gmra.mxu0 %v16455_v49  ;;  %v11262_v10 = vor.u32 %v13118_v44, %v11261_v5 }
 0x307   :  { %4422 = vst [vmem:[#allocation1 + $0x1] ss:$4 sm:$0xff] %v16111_v59  ;;  %4002 = vmatmul.bf16.gmra.mxu1 %v16457_v19  ;;  %v16461_v58 = vld.sshfl [vmem:[#allocation1 + $0x30] sm:$0xff pattern:$0x73625140]  ;;  %v19364_v5 = vld [vmem:[#allocation64_spill] sm:$0xff] }
 0x308   :  { %19352 = vst [vmem:[#allocation52_spill] sm:$0xff] %v16455_v49  ;;  %v16463_v37 = vld.sshfl [vmem:[#allocation1 + $0x38] sm:$0xff pattern:$0x73625140]  ;;  %4041 = vmatmul.bf16.gmra.mxu2 %v16461_v58  ;;  %v13070_v49 = vld [vmem:[#allocation2 + $0x328] sm:$0xf0]  ;;  %4283 = vmatpush.bf16.msrb.mxu1 %v11166_v51 }
 0x309   :  { %19353 = vst [vmem:[#allocation24_spill] sm:$0xff] %v16457_v19  ;;  %11340 = vmatmul.msk.bf16.gmra.mxu3 %vm3917_vm3, %v16463_v37  ;;  %v11069_v19 = vld [vmem:[#allocation2 + $0x320] sm:$0xf]  ;;  %4322 = vmatpush.bf16.msra.mxu2 %v11262_v10 }
 0x30a   :  { %19354 = vst [vmem:[#allocation53_spill] sm:$0xff] %v16461_v58  ;;  %v11070_v63 = vor.u32 %v13070_v49, %v11069_v19  ;;  %v19365_v49 = vld [vmem:[#allocation47_spill] sm:$0xff] }
 0x30b   :  { %19355 = vst [vmem:[#allocation67_spill] sm:$0xff] %v16463_v37  ;;  %v13133_v37 = vld [vmem:[#allocation2 + $0x520] sm:$0xf0] }
 0x30c   :  { %4406 = vst [vmem:[#allocation1 + $0x20] ss:$4 sm:$0xff] %v19356_v50  ;;  %v11322_v58 = vor.u32 %v13133_v37, %v11321_v9  ;;  %4244 = vmatpush.bf16.msrb.mxu0 %v11070_v63  ;;  %v19368_v37 = vld [vmem:[#allocation48_spill] sm:$0xff]  ;;  %v13115_v63 = vld [vmem:[#allocation2 + $0x490] sm:$0xf0] }
 0x30d   :  { %4408 = vst [vmem:[#allocation1 + $0x21] ss:$4 sm:$0xff] %v19357_v53  ;;  %v11250_v51 = vor.u32 %v13115_v63, %v11249_v57 }
 0x30e   :  { %4410 = vst [vmem:[#allocation1 + $0x22] ss:$4 sm:$0xff] %v16040_v42  ;;  %4364 = vmatpush.bf16.msra.mxu3 %v11322_v58  ;;  %v19367_v58 = vld [vmem:[#allocation20_spill] sm:$0xff] }
 0x30f   :  { %4412 = vst [vmem:[#allocation1 + $0x23] ss:$4 sm:$0xff] %v16044_v56  ;;  %4323 = vmatpush.bf16.msra.mxu2 %v11250_v51  ;;  %v11707_v51 = vrot.slane %v19341_v34, 9  ;;  %v11708_v34 = vrot.slane %v19346_v16, 9 }
 0x310   :  { %4423 = vst [vmem:[#allocation1 + $0x2] ss:$4 sm:$0xff] %v16116_v27 }
 0x311   :  { %4424 = vst [vmem:[#allocation1 + $0x3] ss:$4 sm:$0xff] %v16127_v23 }
 0x316   :  { %v16474_v11 = vld.sshfl [vmem:[#allocation1 + $0x20] sm:$0xff pattern:$0x73625140]  ;;  %v16476_v44 = vld.sshfl [vmem:[#allocation1 + $0x28] sm:$0xff pattern:$0x73625140]  ;;  %4094 = vmatmul.bf16.vlgmr.msra.gmra.mxu0 %v19364_v5 }
 0x317   :  { %19358 = vst [vmem:[#allocation54_spill] sm:$0xff] %v16474_v11  ;;  %v16478_v41 = vld.sshfl [vmem:[#allocation1 + $0x30] sm:$0xff pattern:$0x73625140]  ;;  %4133 = vmatmul.bf16.vlgmr.msra.gmra.mxu1 %v19365_v49  ;;  %v19381_v49 = vld [vmem:[#allocation46_spill] sm:$0xff] }
 0x318   :  { %19359 = vst [vmem:[#allocation68_spill] sm:$0xff] %v16476_v44  ;;  %v16480_v9 = vld.sshfl [vmem:[#allocation1 + $0x38] sm:$0xff pattern:$0x73625140]  ;;  %4172 = vmatmul.bf16.vlgmr.msrb.gmra.mxu2 %v19367_v58  ;;  %v13109_v5 = vld [vmem:[#allocation2 + $0x460] sm:$0xf0] }
 0x319   :  { %19360 = vst [vmem:[#allocation55_spill] sm:$0xff] %v16478_v41  ;;  %v16485_v10 = vld.sshfl [vmem:[#allocation1] sm:$0xff pattern:$0x73625140]  ;;  %11341 = vmatmul.msk.bf16.vlgmr.msrb.gmra.mxu3 %vm3917_vm3, %v19368_v37 }
 0x31a   :  { %19361 = vst [vmem:[#allocation74_spill] sm:$0xff] %v16480_v9  ;;  %v16487_v21 = vld.sshfl [vmem:[#allocation1 + $0x8] sm:$0xff pattern:$0x73625140]  ;;  %v11153_v9 = vld [vmem:[#allocation2 + $0x3c8] sm:$0xf] }
 0x31b   :  { %4425 = vst [vmem:[#allocation1 + $0x20] ss:$4 sm:$0xff] %v16173_v7  ;;  %v16492_v19 = vld.sshfl [vmem:[#allocation1 + $0x10] sm:$0xff pattern:$0x73625140] }
 0x31c   :  { %4426 = vst [vmem:[#allocation1 + $0x21] ss:$4 sm:$0xff] %v16178_v1  ;;  %v16497_v11 = vld.sshfl [vmem:[#allocation1 + $0x18] sm:$0xff pattern:$0x73625140] }
 0x31d   :  { %4427 = vst [vmem:[#allocation1 + $0x22] ss:$4 sm:$0xff] %v16181_v32  ;;  %v11225_v37 = vld [vmem:[#allocation2 + $0x458] sm:$0xf] }
 0x31e   :  { %19362 = vst [vmem:[#allocation75_spill] sm:$0xff] %v16485_v10  ;;  %v13067_v10 = vld [vmem:[#allocation2 + $0x310] sm:$0xf0] }
 0x31f   :  { %19363 = vst [vmem:[#allocation76_spill] sm:$0xff] %v16487_v21  ;;  %v13091_v21 = vld [vmem:[#allocation2 + $0x3d0] sm:$0xf0]  ;;  %v11058_v41 = vor.u32 %v13067_v10, %v11057_v60 }
 0x320   :  { %4428 = vst [vmem:[#allocation1 + $0x23] ss:$4 sm:$0xff] %v16186_v26  ;;  %v11154_v44 = vor.u32 %v13091_v21, %v11153_v9  ;;  %v5427_v9 = vrot.slane %v19345_v43, 7 }
 0x321   :  { %19366 = vst [vmem:[#allocation77_spill] sm:$0xff] %v16492_v19  ;;  %4245 = vmatpush.bf16.msrb.mxu0 %v11058_v41 }
 0x322   :  { %19369 = vst [vmem:[#allocation56_spill] sm:$0xff] %v16497_v11  ;;  %4284 = vmatpush.bf16.msrb.mxu1 %v11154_v44  ;;  %v5424_v44 = vrot.slane %v19344_v18, 7  ;;  %v5429_v43 = vrot.slane %v5427_v9, 2 }
 0x323   :  { %4437 = vst [vmem:[#allocation1] ss:$4 sm:$0xff] %v16195_v55 }
 0x324   :  { %4438 = vst [vmem:[#allocation1 + $0x1] ss:$4 sm:$0xff] %v16198_v31 }
 0x325   :  { %4439 = vst [vmem:[#allocation1 + $0x2] ss:$4 sm:$0xff] %v16285_v47  ;;  %v5434_v47 = vrot.slane %v19356_v50, 7 }
 0x326   :  { %4440 = vst [vmem:[#allocation1 + $0x3] ss:$4 sm:$0xff] %v16296_v52  ;;  %v3939_v41 = vpop.f32.mrf.mxu0  ;;  %v3978_v21 = vpop.f32.mrf.mxu1  ;;  %v5437_v52 = vrot.slane %v19357_v53, 7  ;;  %4099 = vmatmul.bf16.gmra.mxu0 %v16122_v13  ;;  %v11141_v13 = vld [vmem:[#allocation2 + $0x3b0] sm:$0xf] }
 0x327   :  { %v16503_v19 = vld.sshfl [vmem:[#allocation1 + $0x20] sm:$0xff pattern:$0x73625140]  ;;  %v16505_v57 = vld.sshfl [vmem:[#allocation1 + $0x28] sm:$0xff pattern:$0x73625140]  ;;  %v3979_v60 = vadd.f32 %v3978_v21, %v3939_v41  ;;  %4138 = vmatmul.bf16.gmra.mxu1 %v16124_v14  ;;  %v5435_v58 = vsel %vm16394_vm12, %v11708_v34, %v5434_v47 }
 0x328   :  { %19370 = vst [vmem:[#allocation30_spill] sm:$0xff] %v16503_v19  ;;  %v16507_v63 = vld.sshfl [vmem:[#allocation1 + $0x30] sm:$0xff pattern:$0x73625140]  ;;  %v5436_v41 = vrot.slane %v5434_v47, 2  ;;  %v5439_v21 = vrot.slane %v5437_v52, 2  ;;  %4177 = vmatmul.bf16.gmra.mxu2 %v16131_v2  ;;  %v11226_v47 = vor.u32 %v13109_v5, %v11225_v37 }
 0x329   :  { %19371 = vst [vmem:[#allocation22_spill] sm:$0xff] %v16505_v57  ;;  %v16510_v10 = vld.sshfl [vmem:[#allocation1 + $0x38] sm:$0xff pattern:$0x73625140]  ;;  %v13064_v19 = vld [vmem:[#allocation2 + $0x2f8] sm:$0xf0] }
 0x32a   :  { %19372 = vst [vmem:[#allocation57_spill] sm:$0xff] %v16507_v63  ;;  %v19374_v63 = vld [vmem:[#allocation61_spill] sm:$0xff]  ;;  %v5454_v5 = vrot.slane %v16116_v27, 7  ;;  %v11710_v34 = vrot.slane %v16111_v59, 9 }
 0x32b   :  { %19373 = vst [vmem:[#allocation32_spill] sm:$0xff] %v16510_v10  ;;  %v19375_v10 = vrot.slane %v19374_v63, 2  ;;  %v11237_v63 = vld [vmem:[#allocation2 + $0x470] sm:$0xf] }
 0x32c   :  { %4441 = vst [vmem:[#allocation1 + $0x20] ss:$4 sm:$0xff] %v16299_v28  ;;  %v5456_v27 = vrot.slane %v5454_v5, 2  ;;  %v5455_v59 = vsel %vm16394_vm12, %v11710_v34, %v5454_v5  ;;  %v11129_v5 = vld [vmem:[#allocation2 + $0x398] sm:$0xf] }
 0x32d   :  { %4442 = vst [vmem:[#allocation1 + $0x21] ss:$4 sm:$0xff] %v16323_v17  ;;  %v5430_v57 = vrot.slane %v19375_v10, 7  ;;  %v16522_v28 = vld.sshfl [vmem:[#allocation1] sm:$0xff pattern:$0x73625140]  ;;  %v5425_v17 = vsel %vm16394_vm12, %v11707_v51, %v5424_v44 }
 0x32e   :  { %4443 = vst [vmem:[#allocation1 + $0x22] ss:$4 sm:$0xff] %v16326_v54  ;;  %v16524_v18 = vld.sshfl [vmem:[#allocation1 + $0x8] sm:$0xff pattern:$0x73625140]  ;;  %v5426_v54 = vrot.slane %v5424_v44, 2  ;;  %v4056_v16 = vpop.f32.mrf.mxu3 }
 0x32f   :  { %4444 = vst [vmem:[#allocation1 + $0x23] ss:$4 sm:$0xff] %v16338_v20  ;;  %v16528_v50 = vld.sshfl [vmem:[#allocation1 + $0x10] sm:$0xff pattern:$0x73625140] }
 0x330   :  { %19376 = vst [vmem:[#allocation28_spill] sm:$0xff] %v16522_v28  ;;  %v16530_v53 = vld.sshfl [vmem:[#allocation1 + $0x18] sm:$0xff pattern:$0x73625140]  ;;  %v19380_v20 = vld [vmem:[#allocation49_spill] sm:$0xff]  ;;  %v5428_v44 = vsel %vm16394_vm12, %v5426_v54, %v5427_v9  ;;  %v19382_v9 = vrot.slane %v19381_v49, 2 }
 0x331   :  { %19377 = vst [vmem:[#allocation26_spill] sm:$0xff] %v16524_v18  ;;  %11342 = vmatmul.msk.bf16.gmra.mxu3 %vm3917_vm3, %v19380_v20  ;;  %v13112_v10 = vld [vmem:[#allocation2 + $0x478] sm:$0xf0]  ;;  %v11309_v51 = vld [vmem:[#allocation2 + $0x500] sm:$0xf] }
 0x332   :  { %19378 = vst [vmem:[#allocation58_spill] sm:$0xff] %v16528_v50  ;;  %v11238_v50 = vor.u32 %v13112_v10, %v11237_v63  ;;  %v13130_v18 = vld [vmem:[#allocation2 + $0x508] sm:$0xf0]  ;;  %v11045_v28 = vld [vmem:[#allocation2 + $0x2f0] sm:$0xf]  ;;  %v5440_v54 = vrot.slane %v19382_v9, 7 }
 0x333   :  { %19379 = vst [vmem:[#allocation73_spill] sm:$0xff] %v16530_v53  ;;  %v4017_v53 = vpop.f32.mrf.mxu2  ;;  %v11310_v2 = vor.u32 %v13130_v18, %v11309_v51  ;;  %v11046_v14 = vor.u32 %v13064_v19, %v11045_v28  ;;  %v13088_v20 = vld [vmem:[#allocation2 + $0x3b8] sm:$0xf0]  ;;  %v5444_v63 = vrot.slane %v16044_v56, 7  ;;  %v16550_v19 = vpop.f32.mrf.mxu0  ;;  %v5447_v56 = vrot.slane %v16052_v46, 7 }
 0x334   :  { %5616 = vst [vmem:[#allocation1] ss:$4 sm:$0xff] %v5425_v17  ;;  %v5431_v17 = vsel %vm16394_vm12, %v5429_v43, %v5430_v57  ;;  %v4018_v11 = vadd.f32 %v4017_v53, %v3979_v60  ;;  %4324 = vmatpush.bf16.msra.mxu2 %v11238_v50  ;;  %v11142_v10 = vor.u32 %v13088_v20, %v11141_v13  ;;  %v11709_v57 = vrot.slane %v16040_v42, 9  ;;  %v16552_v43 = vpop.f32.mrf.mxu1 }
 0x335   :  { %5619 = vst [vmem:[#allocation1 + $0x1] ss:$4 sm:$0xff] %v5428_v44  ;;  %4365 = vmatpush.bf16.msra.mxu3 %v11310_v2  ;;  %4246 = vmatpush.bf16.msrb.mxu0 %v11046_v14  ;;  %v5438_v42 = vsel %vm16394_vm12, %v5436_v41, %v5437_v52  ;;  %v5441_v14 = vsel %vm16394_vm12, %v5439_v21, %v5440_v54  ;;  %v5446_v2 = vrot.slane %v5444_v63, 2  ;;  %v5449_v37 = vrot.slane %v5447_v56, 2  ;;  %v19383_v52 = vld [vmem:[#allocation21_spill] sm:$0xff] }
 0x336   :  { %v16548_v60 = vadd.f32 %v4056_v16, %v4018_v11  ;;  %5622 = vst [vmem:[#allocation1 + $0x2] ss:$4 sm:$0xff] %v5431_v17  ;;  %v16554_v49 = vld.sshfl [vmem:[#allocation1 + $0x20] sm:$0xff pattern:$0x73625140]  ;;  %4285 = vmatpush.bf16.msrb.mxu1 %v11142_v10  ;;  %v5445_v46 = vsel %vm16394_vm12, %v11709_v57, %v5444_v63  ;;  %v19384_v18 = vrot.slane %v19383_v52, 2  ;;  %v16580_v51 = vpop.f32.mrf.mxu3  ;;  %4104 = vmatmul.bf16.gmra.mxu0 %v16204_v38 }
 0x337   :  { %5625 = vst [vmem:[#allocation1 + $0x3] ss:$4 sm:$0xff] %v5435_v58  ;;  %v16557_v13 = vld.sshfl [vmem:[#allocation1 + $0x28] sm:$0xff pattern:$0x73625140]  ;;  %v5448_v58 = vsel %vm16394_vm12, %v5446_v2, %v5447_v56  ;;  %v5457_v53 = vrot.slane %v16127_v23, 7  ;;  %4143 = vmatmul.bf16.gmra.mxu1 %v16206_v22 }
 0x338   :  { %v16561_v11 = vld.sshfl [vmem:[#allocation1 + $0x30] sm:$0xff pattern:$0x73625140]  ;;  %v16563_v28 = vld.sshfl [vmem:[#allocation1 + $0x38] sm:$0xff pattern:$0x73625140]  ;;  %4325 = vmatpush.bf16.msra.mxu2 %v11226_v47 }
 0x339   :  { %5628 = vst [vmem:[#allocation1 + $0x20] ss:$4 sm:$0xff] %v5438_v42  ;;  %v5450_v50 = vrot.slane %v19384_v18, 7  ;;  %v5464_v41 = vrot.slane %v16178_v1, 7  ;;  %v5467_v21 = vrot.slane %v16181_v32, 7  ;;  %v5459_v1 = vrot.slane %v5457_v53, 2  ;;  %4182 = vmatmul.bf16.gmra.mxu2 %v16211_v45 }
 0x33a   :  { %5631 = vst [vmem:[#allocation1 + $0x21] ss:$4 sm:$0xff] %v5441_v14  ;;  %v19389_v32 = vrot.slane %v16119_v24, 2  ;;  %v11711_v63 = vrot.slane %v16173_v7, 9  ;;  %v19390_v42 = vrot.slane %v16201_v3, 2 }
 0x33b   :  { %5634 = vst [vmem:[#allocation1 + $0x22] ss:$4 sm:$0xff] %v5445_v46  ;;  %v16578_v20 = vpop.f32.mrf.mxu2  ;;  %v5451_v17 = vsel %vm16394_vm12, %v5449_v37, %v5450_v50  ;;  %v3944_v10 = vpop.f32.mrf.mxu0  ;;  %v5466_v47 = vrot.slane %v5464_v41, 2  ;;  %v5469_v56 = vrot.slane %v5467_v21, 2  ;;  %v11033_v24 = vld [vmem:[#allocation2 + $0x2d8] sm:$0xf]  ;;  %v5458_v46 = vsel %vm16394_vm12, %v5456_v27, %v5457_v53 }
 0x33c   :  { %5637 = vst [vmem:[#allocation1 + $0x23] ss:$4 sm:$0xff] %v5448_v58  ;;  %v5460_v54 = vrot.slane %v19389_v32, 7  ;;  %v3983_v57 = vpop.f32.mrf.mxu1  ;;  %v5470_v14 = vrot.slane %v19390_v42, 7  ;;  %v13061_v7 = vld [vmem:[#allocation2 + $0x2e0] sm:$0xf0] }
 0x33d   :  { %v3984_v2 = vadd.f32 %v3983_v57, %v3944_v10  ;;  %v11034_v58 = vor.u32 %v13061_v7, %v11033_v24  ;;  %v13085_v3 = vld [vmem:[#allocation2 + $0x3a0] sm:$0xf0]  ;;  %v11213_v37 = vld [vmem:[#allocation2 + $0x440] sm:$0xf]  ;;  %v13106_v52 = vld [vmem:[#allocation2 + $0x448] sm:$0xf0] }
 0x33e   :  { %v16582_v44 = vld.sshfl [vmem:[#allocation1] sm:$0xff pattern:$0x73625140]  ;;  %v16584_v16 = vld.sshfl [vmem:[#allocation1 + $0x8] sm:$0xff pattern:$0x73625140]  ;;  %v5461_v18 = vsel %vm16394_vm12, %v5459_v1, %v5460_v54  ;;  %v11130_v50 = vor.u32 %v13085_v3, %v11129_v5  ;;  %v11214_v34 = vor.u32 %v13106_v52, %v11213_v37 }
 0x33f   :  { %19385 = vst [vmem:[#allocation59_spill] sm:$0xff] %v16582_v44  ;;  %v16588_v23 = vld.sshfl [vmem:[#allocation1 + $0x10] sm:$0xff pattern:$0x73625140]  ;;  %v5474_v32 = vrot.slane %v16195_v55, 7  ;;  %4247 = vmatpush.bf16.msrb.mxu0 %v11034_v58  ;;  %v5477_v24 = vrot.slane %v16198_v31, 7  ;;  %v5465_v55 = vsel %vm16394_vm12, %v11711_v63, %v5464_v41 }
 0x340   :  { %19386 = vst [vmem:[#allocation34_spill] sm:$0xff] %v16584_v16  ;;  %v16590_v9 = vld.sshfl [vmem:[#allocation1 + $0x18] sm:$0xff pattern:$0x73625140]  ;;  %4286 = vmatpush.bf16.msrb.mxu1 %v11130_v50  ;;  %4326 = vmatpush.bf16.msra.mxu2 %v11214_v34  ;;  %v11021_v53 = vld [vmem:[#allocation2 + $0x2c0] sm:$0xf]  ;;  %v4061_v54 = vpop.f32.mrf.mxu3  ;;  %v5471_v50 = vsel %vm16394_vm12, %v5469_v56, %v5470_v14 }
 0x341   :  { %19387 = vst [vmem:[#allocation60_spill] sm:$0xff] %v16588_v23  ;;  %11343 = vmatmul.msk.bf16.gmra.mxu3 %vm3917_vm3, %v16213_v12  ;;  %v13058_v27 = vld [vmem:[#allocation2 + $0x2c8] sm:$0xf0]  ;;  %v11117_v42 = vld [vmem:[#allocation2 + $0x380] sm:$0xf]  ;;  %v11712_v31 = vrot.slane %v16186_v26, 9 }
 0x342   :  { %19388 = vst [vmem:[#allocation36_spill] sm:$0xff] %v16590_v9  ;;  %v11022_v7 = vor.u32 %v13058_v27, %v11021_v53  ;;  %v13082_v5 = vld [vmem:[#allocation2 + $0x388] sm:$0xf0]  ;;  %v13041_v9 = vld [vmem:[#allocation2 + $0x244] sm:$0xf] }
 0x343   :  { %5647 = vst [vmem:[#allocation1] ss:$4 sm:$0xff] %v5451_v17  ;;  %v11297_v17 = vld [vmem:[#allocation2 + $0x4e8] sm:$0xf]  ;;  %v4022_v1 = vpop.f32.mrf.mxu2  ;;  %v11118_v3 = vor.u32 %v13082_v5, %v11117_v42  ;;  %v5475_v63 = vsel %vm16394_vm12, %v11712_v31, %v5474_v32  ;;  %v13103_v5 = vld [vmem:[#allocation2 + $0x430] sm:$0xf0] }
 0x344   :  { %5649 = vst [vmem:[#allocation1 + $0x1] ss:$4 sm:$0xff] %v5455_v59  ;;  %v13127_v59 = vld [vmem:[#allocation2 + $0x4f0] sm:$0xf0]  ;;  %v4023_v58 = vadd.f32 %v4022_v1, %v3984_v2  ;;  %4248 = vmatpush.bf16.msrb.mxu0 %v11022_v7  ;;  %v16629_v41 = vpop.f32.mrf.mxu1  ;;  %v5479_v2 = vrot.slane %v5477_v24, 2 }
 0x345   :  { %5651 = vst [vmem:[#allocation1 + $0x2] ss:$4 sm:$0xff] %v5458_v46  ;;  %v11298_v10 = vor.u32 %v13127_v59, %v11297_v17  ;;  %v16609_v57 = vld.sshfl [vmem:[#allocation1 + $0x20] sm:$0xff pattern:$0x73625140]  ;;  %v16627_v17 = vpop.f32.mrf.mxu0  ;;  %4287 = vmatpush.bf16.msrb.mxu1 %v11118_v3 }
 0x346   :  { %5653 = vst [vmem:[#allocation1 + $0x3] ss:$4 sm:$0xff] %v5461_v18  ;;  %v16612_v46 = vld.sshfl [vmem:[#allocation1 + $0x28] sm:$0xff pattern:$0x73625140]  ;;  %v5468_v18 = vsel %vm16394_vm12, %v5466_v47, %v5467_v21  ;;  %v16625_v34 = vadd.f32 %v4061_v54, %v4023_v58  ;;  %v19395_v21 = vrot.slane %v16216_v62, 2  ;;  %4109 = vmatmul.bf16.gmra.mxu0 %v16268_v4 }
 0x347   :  { %19391 = vst [vmem:[#allocation27_spill] sm:$0xff] %v16609_v57  ;;  %4366 = vmatpush.bf16.msra.mxu3 %v11298_v10  ;;  %v16616_v37 = vld.sshfl [vmem:[#allocation1 + $0x30] sm:$0xff pattern:$0x73625140]  ;;  %v5476_v47 = vrot.slane %v5474_v32, 2  ;;  %4148 = vmatmul.bf16.gmra.mxu1 %v16270_v35 }
 0x348   :  { %19392 = vst [vmem:[#allocation31_spill] sm:$0xff] %v16612_v46  ;;  %v16618_v52 = vld.sshfl [vmem:[#allocation1 + $0x38] sm:$0xff pattern:$0x73625140]  ;;  %v5480_v26 = vrot.slane %v19395_v21, 7  ;;  %v16651_v32 = vpop.f32.mrf.mxu3 }
 0x349   :  { %19393 = vst [vmem:[#allocation33_spill] sm:$0xff] %v16616_v37  ;;  %v5478_v10 = vsel %vm16394_vm12, %v5476_v47, %v5477_v24  ;;  %4187 = vmatmul.bf16.gmra.mxu2 %v16280_v25  ;;  %v11201_v7 = vld [vmem:[#allocation2 + $0x428] sm:$0xf]  ;;  %v13079_v31 = vld [vmem:[#allocation2 + $0x370] sm:$0xf0] }
 0x34a   :  { %19394 = vst [vmem:[#allocation39_spill] sm:$0xff] %v16618_v52  ;;  %v5481_v27 = vsel %vm16394_vm12, %v5479_v2, %v5480_v26  ;;  %v11202_v3 = vor.u32 %v13103_v5, %v11201_v7  ;;  %v19405_v26 = vsel %vm16394_vm12, %v16439_v15, %v16429_v40  ;;  %v13039_v40 = vld [vmem:[#allocation2 + $0x230] sm:$0xf0]  ;;  %v11679_v15 = vld [vmem:[#allocation2 + $0x288] sm:$0xf] }
 0x34b   :  { %5655 = vst [vmem:[#allocation1 + $0x20] ss:$4 sm:$0xff] %v5465_v55  ;;  %v16649_v62 = vpop.f32.mrf.mxu2  ;;  %v11009_v55 = vld [vmem:[#allocation2 + $0x2a8] sm:$0xf]  ;;  %v13002_v52 = vld [vmem:[#allocation2 + $0x10c] sm:$0xf] }
 0x34c   :  { %5657 = vst [vmem:[#allocation1 + $0x21] ss:$4 sm:$0xff] %v5468_v18  ;;  %v3988_v54 = vpop.f32.mrf.mxu1  ;;  %v13055_v18 = vld [vmem:[#allocation2 + $0x2b0] sm:$0xf0]  ;;  %4327 = vmatpush.bf16.msra.mxu2 %v11202_v3  ;;  %v11489_v46 = vld [vmem:[#allocation2 + $0x114] sm:$0xf0] }
 0x34d   :  { %5659 = vst [vmem:[#allocation1 + $0x22] ss:$4 sm:$0xff] %v5471_v50  ;;  %v16635_v59 = vld.sshfl [vmem:[#allocation1] sm:$0xff pattern:$0x73625140]  ;;  %v3949_v1 = vpop.f32.mrf.mxu0  ;;  %v11010_v50 = vor.u32 %v13055_v18, %v11009_v55  ;;  %v11492_v57 = vor.u32 %v13002_v52, %v11489_v46  ;;  %v19442_v46 = vld [vmem:[#allocation56_spill] sm:$0xff] }
 0x34e   :  { %5661 = vst [vmem:[#allocation1 + $0x23] ss:$4 sm:$0xff] %v5475_v63  ;;  %v16637_v56 = vld.sshfl [vmem:[#allocation1 + $0x8] sm:$0xff pattern:$0x73625140]  ;;  %v3989_v58 = vadd.f32 %v3988_v54, %v3949_v1 }
 0x34f   :  { %19396 = vst [vmem:[#allocation13_spill] sm:$0xff] %v16635_v59  ;;  %v16639_v14 = vld.sshfl [vmem:[#allocation1 + $0x10] sm:$0xff pattern:$0x73625140]  ;;  %4249 = vmatpush.bf16.msrb.mxu0 %v11010_v50  ;;  %v13051_v55 = vld [vmem:[#allocation2 + $0x290] sm:$0xf0] }
 0x350   :  { %19397 = vst [vmem:[#allocation12_spill] sm:$0xff] %v16637_v56  ;;  %v16643_v53 = vld.sshfl [vmem:[#allocation1 + $0x18] sm:$0xff pattern:$0x73625140]  ;;  %v11680_v3 = vor.u32 %v13051_v55, %v11679_v15  ;;  %v19410_v55 = vld [vmem:[#allocation53_spill] sm:$0xff] }
 0x351   :  { %19398 = vst [vmem:[#allocation17_spill] sm:$0xff] %v16639_v14  ;;  %11344 = vmatmul.msk.bf16.gmra.mxu3 %vm3917_vm3, %v16282_v30  ;;  %v12991_v50 = vld [vmem:[#allocation2 + $0xb0] sm:$0xf0]  ;;  %v11645_v16 = vld [vmem:[#allocation2 + $0x24c] sm:$0xf0] }
 0x352   :  { %19399 = vst [vmem:[#allocation16_spill] sm:$0xff] %v16643_v53  ;;  %5052 = vmatpush.bf16.msrb.mxu3 %v11680_v3  ;;  %v12999_v52 = vld [vmem:[#allocation2 + $0xf4] sm:$0xf]  ;;  %v11648_v44 = vor.u32 %v13041_v9, %v11645_v16  ;;  %v19447_v16 = vld [vmem:[#allocation57_spill] sm:$0xff] }
 0x353   :  { %5671 = vst [vmem:[#allocation1] ss:$4 sm:$0xff] %v5478_v10  ;;  %v4027_v47 = vpop.f32.mrf.mxu2  ;;  %v4066_v10 = vpop.f32.mrf.mxu3 }
 0x354   :  { %5673 = vst [vmem:[#allocation1 + $0x1] ss:$4 sm:$0xff] %v5481_v27  ;;  %v4028_v27 = vadd.f32 %v4027_v47, %v3989_v58 }
 0x355   :  { %5675 = vst [vmem:[#allocation1 + $0x2] ss:$4 sm:$0xff] %v16411_v0  ;;  %v16658_v42 = vld.sshfl [vmem:[#allocation1 + $0x20] sm:$0xff pattern:$0x73625140]  ;;  %v3951_v54 = vpop.f32.mrf.mxu0 }
 0x356   :  { %5677 = vst [vmem:[#allocation1 + $0x3] ss:$4 sm:$0xff] %v16424_v33  ;;  %v16660_v24 = vld.sshfl [vmem:[#allocation1 + $0x28] sm:$0xff pattern:$0x73625140]  ;;  %v19404_v33 = vsel %vm16394_vm12, %v16416_v6, %v16399_v48  ;;  %v16678_v1 = vadd.f32 %v4066_v10, %v4028_v27  ;;  %v3990_v48 = vpop.f32.mrf.mxu1  ;;  %4114 = vmatmul.bf16.gmra.mxu0 %v16373_v39  ;;  %v19406_v6 = vld [vmem:[#allocation65_spill] sm:$0xff] }
 0x357   :  { %19400 = vst [vmem:[#allocation38_spill] sm:$0xff] %v16658_v42  ;;  %v11105_v0 = vld [vmem:[#allocation2 + $0x368] sm:$0xf]  ;;  %v16664_v21 = vld.sshfl [vmem:[#allocation1 + $0x38] sm:$0xff pattern:$0x73625140]  ;;  %4153 = vmatmul.bf16.gmra.mxu1 %v16375_v61  ;;  %v3991_v36 = vadd.f32 %v3990_v48, %v3951_v54 }
 0x358   :  { %19401 = vst [vmem:[#allocation10_spill] sm:$0xff] %v16660_v24  ;;  %v11106_v63 = vor.u32 %v13079_v31, %v11105_v0  ;;  %v16662_v2 = vld.sshfl [vmem:[#allocation1 + $0x30] sm:$0xff pattern:$0x73625140]  ;;  %v11619_v48 = vld [vmem:[#allocation2 + $0x210] sm:$0xf] }
 0x359   :  { %19402 = vst [vmem:[#allocation15_spill] sm:$0xff] %v16662_v2  ;;  %4192 = vmatmul.bf16.gmra.mxu2 %v19406_v6  ;;  %v11439_v31 = vld [vmem:[#allocation2 + $0xa8] sm:$0xf]  ;;  %v11667_v2 = vld [vmem:[#allocation2 + $0x270] sm:$0xf] }
 0x35a   :  { %19403 = vst [vmem:[#allocation8_spill] sm:$0xff] %v16664_v21  ;;  %4288 = vmatpush.bf16.msrb.mxu1 %v11106_v63  ;;  %v11535_v63 = vld [vmem:[#allocation2 + $0x168] sm:$0xf] }
 0x35b   :  { %5679 = vst [vmem:[#allocation1 + $0x20] ss:$4 sm:$0xff] %v19404_v33  ;;  %v4029_v7 = vpop.f32.mrf.mxu2  ;;  %v4068_v18 = vpop.f32.mrf.mxu3  ;;  %v11440_v33 = vor.u32 %v12991_v50, %v11439_v31  ;;  %v11427_v50 = vld [vmem:[#allocation2 + $0x90] sm:$0xf] }
 0x35c   :  { %5681 = vst [vmem:[#allocation1 + $0x21] ss:$4 sm:$0xff] %v16420_v8  ;;  %v19407_v8 = vld [vmem:[#allocation50_spill] sm:$0xff]  ;;  %v4030_v58 = vadd.f32 %v4029_v7, %v3991_v36  ;;  %v19408_v36 = vld [vmem:[#allocation52_spill] sm:$0xff] }
 0x35d   :  { %5683 = vst [vmem:[#allocation1 + $0x22] ss:$4 sm:$0xff] %v16437_v29  ;;  %v11631_v29 = vld [vmem:[#allocation2 + $0x228] sm:$0xf]  ;;  %4931 = vmatpush.bf16.msra.mxu0 %v11440_v33  ;;  %v11523_v33 = vld [vmem:[#allocation2 + $0x150] sm:$0xf] }
 0x35e   :  { %5685 = vst [vmem:[#allocation1 + $0x23] ss:$4 sm:$0xff] %v19405_v26  ;;  %v11632_v5 = vor.u32 %v13039_v40, %v11631_v29  ;;  %v16685_v0 = vadd.f32 %v4068_v18, %v4030_v58  ;;  %v13015_v26 = vld [vmem:[#allocation2 + $0x170] sm:$0xf0]  ;;  %v13036_v29 = vld [vmem:[#allocation2 + $0x218] sm:$0xf0] }
 0x35f   :  { %v3954_v47 = vpop.f32.mrf.mxu0  ;;  %v3993_v10 = vpop.f32.mrf.mxu1  ;;  %v11536_v27 = vor.u32 %v13015_v26, %v11535_v63  ;;  %v19409_v40 = vld [vmem:[#allocation24_spill] sm:$0xff]  ;;  %v19411_v58 = vld [vmem:[#allocation67_spill] sm:$0xff] }
 0x360   :  { %5009 = vmatpush.bf16.msrb.mxu2 %v11632_v5  ;;  %v3994_v54 = vadd.f32 %v3993_v10, %v3954_v47  ;;  %v11620_v5 = vor.u32 %v13036_v29, %v11619_v48  ;;  %v12988_v63 = vld [vmem:[#allocation2 + $0x98] sm:$0xf0]  ;;  %v11607_v48 = vld [vmem:[#allocation2 + $0x1f8] sm:$0xf]  ;;  %v13033_v29 = vld [vmem:[#allocation2 + $0x200] sm:$0xf0] }
 0x361   :  { %11345 = vmatmul.msk.bf16.gmra.mxu3 %vm3917_vm3, %v19407_v8  ;;  %4970 = vmatpush.bf16.msra.mxu1 %v11536_v27  ;;  %v11428_v47 = vor.u32 %v12988_v63, %v11427_v50  ;;  %v13012_v10 = vld [vmem:[#allocation2 + $0x158] sm:$0xf0]  ;;  %v11608_v42 = vor.u32 %v13033_v29, %v11607_v48  ;;  %v11511_v50 = vld [vmem:[#allocation2 + $0x138] sm:$0xf] }
 0x362   :  { %v11524_v21 = vor.u32 %v13012_v10, %v11523_v33  ;;  %v19413_v63 = vld [vmem:[#allocation47_spill] sm:$0xff]  ;;  %v19414_v10 = vld [vmem:[#allocation20_spill] sm:$0xff] }
 0x363   :  { %4932 = vmatpush.bf16.msra.mxu0 %v11428_v47  ;;  %v13009_v47 = vld [vmem:[#allocation2 + $0x140] sm:$0xf0] }
 0x364   :  { %5010 = vmatpush.bf16.msrb.mxu2 %v11620_v5 }
 0x365   :  { %4971 = vmatpush.bf16.msra.mxu1 %v11524_v21  ;;  %v19412_v21 = vld [vmem:[#allocation64_spill] sm:$0xff] }
 0x366   :  { %4119 = vmatmul.bf16.gmra.mxu0 %v19408_v36  ;;  %v4032_v15 = vpop.f32.mrf.mxu2  ;;  %v4071_v7 = vpop.f32.mrf.mxu3 }
 0x367   :  { %4158 = vmatmul.bf16.gmra.mxu1 %v19409_v40  ;;  %v4033_v3 = vadd.f32 %v4032_v15, %v3994_v54  ;;  %v3956_v18 = vpop.f32.mrf.mxu0  ;;  %v3995_v31 = vpop.f32.mrf.mxu1  ;;  %v13048_v54 = vld [vmem:[#allocation2 + $0x278] sm:$0xf0] }
 0x368   :  { %v3996_v26 = vadd.f32 %v3995_v31, %v3956_v18  ;;  %v11668_v53 = vor.u32 %v13048_v54, %v11667_v2  ;;  %5011 = vmatpush.bf16.msrb.mxu2 %v11608_v42  ;;  %v12985_v31 = vld [vmem:[#allocation2 + $0x80] sm:$0xf0] }
 0x369   :  { %4197 = vmatmul.bf16.gmra.mxu2 %v19410_v55  ;;  %v16692_v27 = vadd.f32 %v4071_v7, %v4033_v3  ;;  %v11415_v3 = vld [vmem:[#allocation2 + $0x78] sm:$0xf] }
 0x36a   :  { %5053 = vmatpush.bf16.msrb.mxu3 %v11668_v53  ;;  %v11416_v33 = vor.u32 %v12985_v31, %v11415_v3  ;;  %v12982_v31 = vld [vmem:[#allocation2 + $0x68] sm:$0xf0] }
 0x36c   :  { %4933 = vmatpush.bf16.msra.mxu0 %v11416_v33 }
 0x36e   :  { %v4034_v24 = vpop.f32.mrf.mxu2  ;;  %v4073_v14 = vpop.f32.mrf.mxu3 }
 0x36f   :  { %v4035_v15 = vadd.f32 %v4034_v24, %v3996_v26  ;;  %v19415_v24 = vld [vmem:[#allocation48_spill] sm:$0xff] }
 0x371   :  { %11346 = vmatmul.msk.bf16.gmra.mxu3 %vm3917_vm3, %v19411_v58  ;;  %v16694_v56 = vadd.f32 %v4073_v14, %v4035_v15  ;;  %v3959_v5 = vpop.f32.mrf.mxu0  ;;  %v3998_v18 = vpop.f32.mrf.mxu1  ;;  %v11512_v14 = vor.u32 %v13009_v47, %v11511_v50  ;;  %v11595_v15 = vld [vmem:[#allocation2 + $0x1e0] sm:$0xf] }
 0x372   :  { %v3999_v7 = vadd.f32 %v3998_v18, %v3959_v5  ;;  %v13030_v5 = vld [vmem:[#allocation2 + $0x1e8] sm:$0xf0]  ;;  %v11403_v18 = vld [vmem:[#allocation2 + $0x60] sm:$0xf] }
 0x373   :  { %4972 = vmatpush.bf16.msra.mxu1 %v11512_v14  ;;  %v11596_v3 = vor.u32 %v13030_v5, %v11595_v15  ;;  %v19419_v15 = vld [vmem:[#allocation49_spill] sm:$0xff] }
 0x374   :  { %v11583_v5 = vld [vmem:[#allocation2 + $0x1c8] sm:$0xf] }
 0x375   :  { %5012 = vmatpush.bf16.msrb.mxu2 %v11596_v3  ;;  %v11655_v3 = vld [vmem:[#allocation2 + $0x258] sm:$0xf] }
 0x376   :  { %4250 = vmatmul.bf16.vlgmr.msrb.gmra.mxu0 %v19412_v21  ;;  %v11499_v21 = vld [vmem:[#allocation2 + $0x120] sm:$0xf] }
 0x377   :  { %4289 = vmatmul.bf16.vlgmr.msrb.gmra.mxu1 %v19413_v63  ;;  %v13006_v63 = vld [vmem:[#allocation2 + $0x128] sm:$0xf0] }
 0x378   :  { %v4037_v53 = vpop.f32.mrf.mxu2  ;;  %v4076_v42 = vpop.f32.mrf.mxu3 }
 0x379   :  { %4328 = vmatmul.bf16.vlgmr.msra.gmra.mxu2 %v19414_v10  ;;  %v4038_v2 = vadd.f32 %v4037_v53, %v3999_v7  ;;  %v3961_v26 = vpop.f32.mrf.mxu0  ;;  %v4000_v48 = vpop.f32.mrf.mxu1  ;;  %v11404_v10 = vor.u32 %v12982_v31, %v11403_v18  ;;  %v13027_v18 = vld [vmem:[#allocation2 + $0x1d0] sm:$0xf0] }
 0x37a   :  { %v4001_v29 = vadd.f32 %v4000_v48, %v3961_v26  ;;  %v19417_v26 = vld [vmem:[#allocation70_spill] sm:$0xff]  ;;  %v19418_v48 = vld [vmem:[#allocation71_spill] sm:$0xff]  ;;  %v11584_v31 = vor.u32 %v13027_v18, %v11583_v5 }
 0x37b   :  { %v16701_v54 = vadd.f32 %v4076_v42, %v4038_v2  ;;  %4934 = vmatpush.bf16.msra.mxu0 %v11404_v10  ;;  %v19416_v2 = vld [vmem:[#allocation69_spill] sm:$0xff] }
 0x37c   :  { %5013 = vmatpush.bf16.msrb.mxu2 %v11584_v31 }
 0x380   :  { %v4039_v50 = vpop.f32.mrf.mxu2  ;;  %v4078_v33 = vpop.f32.mrf.mxu3 }
 0x381   :  { %11347 = vmatmul.msk.bf16.vlgmr.msra.gmra.mxu3 %vm3917_vm3, %v19415_v24  ;;  %v11500_v24 = vor.u32 %v13006_v63, %v11499_v21  ;;  %v4040_v7 = vadd.f32 %v4039_v50, %v4001_v29  ;;  %v13045_v21 = vld [vmem:[#allocation2 + $0x260] sm:$0xf0] }
 0x382   :  { %v11656_v29 = vor.u32 %v13045_v21, %v11655_v3 }
 0x383   :  { %4973 = vmatpush.bf16.msra.mxu1 %v11500_v24  ;;  %v3964_v47 = vpop.f32.mrf.mxu0  ;;  %v16703_v42 = vadd.f32 %v4078_v33, %v4040_v7 }
 0x384   :  { %v4003_v14 = vpop.f32.mrf.mxu1  ;;  %5054 = vmatpush.bf16.msrb.mxu3 %v11656_v29  ;;  %v11571_v29 = vld [vmem:[#allocation2 + $0x1b0] sm:$0xf] }
 0x385   :  { %v4004_v53 = vadd.f32 %v4003_v14, %v3964_v47  ;;  %v11391_v14 = vld [vmem:[#allocation2 + $0x48] sm:$0xf] }
 0x386   :  { %4255 = vmatmul.bf16.gmra.mxu0 %v19416_v2  ;;  %v12979_v2 = vld [vmem:[#allocation2 + $0x50] sm:$0xf0] }
 0x387   :  { %4294 = vmatmul.bf16.gmra.mxu1 %v19417_v26  ;;  %v11487_v26 = vld [vmem:[#allocation2 + $0x108] sm:$0xf] }
 0x389   :  { %4333 = vmatmul.bf16.gmra.mxu2 %v19418_v48  ;;  %v11392_v48 = vor.u32 %v12979_v2, %v11391_v14  ;;  %v13000_v14 = vld [vmem:[#allocation2 + $0xf8] sm:$0xf0] }
 0x38b   :  { %v4042_v63 = vpop.f32.mrf.mxu2  ;;  %v3966_v50 = vpop.f32.mrf.mxu0  ;;  %4935 = vmatpush.bf16.msra.mxu0 %v11392_v48 }
 0x38c   :  { %v4081_v10 = vpop.f32.mrf.mxu3  ;;  %v4043_v24 = vadd.f32 %v4042_v63, %v4004_v53  ;;  %v4005_v33 = vpop.f32.mrf.mxu1 }
 0x38d   :  { %v4006_v7 = vadd.f32 %v4005_v33, %v3966_v50  ;;  %v13024_v50 = vld [vmem:[#allocation2 + $0x1b8] sm:$0xf0]  ;;  %v11475_v33 = vld [vmem:[#allocation2 + $0xf0] sm:$0xf] }
 0x38e   :  { %v16710_v47 = vadd.f32 %v4081_v10, %v4043_v24  ;;  %v11572_v10 = vor.u32 %v13024_v50, %v11571_v29  ;;  %v12976_v24 = vld [vmem:[#allocation2 + $0x38] sm:$0xf0]  ;;  %v11476_v2 = vor.u32 %v13000_v14, %v11475_v33  ;;  %v11367_v14 = vld [vmem:[#allocation2 + $0x18] sm:$0xf] }
 0x390   :  { %5014 = vmatpush.bf16.msrb.mxu2 %v11572_v10 }
 0x391   :  { %11348 = vmatmul.msk.bf16.gmra.mxu3 %vm3917_vm3, %v19419_v15  ;;  %v13003_v15 = vld [vmem:[#allocation2 + $0x110] sm:$0xf0] }
 0x392   :  { %v11488_v59 = vor.u32 %v13003_v15, %v11487_v26 }
 0x393   :  { %v4044_v5 = vpop.f32.mrf.mxu2  ;;  %v4095_v21 = vpop.f32.mrf.mxu0 }
 0x394   :  { %4974 = vmatpush.bf16.msra.mxu1 %v11488_v59  ;;  %v4083_v18 = vpop.f32.mrf.mxu3  ;;  %v4045_v3 = vadd.f32 %v4044_v5, %v4006_v7  ;;  %v4134_v31 = vpop.f32.mrf.mxu1  ;;  %v11379_v59 = vld [vmem:[#allocation2 + $0x30] sm:$0xf] }
 0x395   :  { %v4135_v53 = vadd.f32 %v4134_v31, %v4095_v21  ;;  %v11380_v7 = vor.u32 %v12976_v24, %v11379_v59  ;;  %v13042_v31 = vld [vmem:[#allocation2 + $0x248] sm:$0xf0] }
 0x396   :  { %v16712_v63 = vadd.f32 %v4083_v18, %v4045_v3  ;;  %4260 = vmatmul.bf16.gmra.mxu0 %v16204_v38  ;;  %v13021_v3 = vld [vmem:[#allocation2 + $0x1a0] sm:$0xf0] }
 0x397   :  { %4299 = vmatmul.bf16.gmra.mxu1 %v16206_v22  ;;  %4936 = vmatpush.bf16.msra.mxu0 %v11380_v7 }
 0x398   :  { %4975 = vmatpush.bf16.msra.mxu1 %v11476_v2  ;;  %v12973_v2 = vld [vmem:[#allocation2 + $0x20] sm:$0xf0] }
 0x399   :  { %4338 = vmatmul.bf16.gmra.mxu2 %v16211_v45  ;;  %v11559_v45 = vld [vmem:[#allocation2 + $0x198] sm:$0xf] }
 0x39a   :  { %v11560_v21 = vor.u32 %v13021_v3, %v11559_v45 }
 0x39b   :  { %v4173_v26 = vpop.f32.mrf.mxu2  ;;  %v4097_v38 = vpop.f32.mrf.mxu0 }
 0x39c   :  { %v4212_v48 = vpop.f32.mrf.mxu3  ;;  %v4174_v15 = vadd.f32 %v4173_v26, %v4135_v53  ;;  %v4136_v5 = vpop.f32.mrf.mxu1  ;;  %5015 = vmatpush.bf16.msrb.mxu2 %v11560_v21  ;;  %v11463_v26 = vld [vmem:[#allocation2 + $0xd8] sm:$0xf] }
 0x39d   :  { %v4137_v22 = vadd.f32 %v4136_v5, %v4097_v38 }
 0x39e   :  { %v16719_v18 = vadd.f32 %v4212_v48, %v4174_v15  ;;  %v11368_v48 = vor.u32 %v12973_v2, %v11367_v14  ;;  %v12997_v15 = vld [vmem:[#allocation2 + $0xe0] sm:$0xf0] }
 0x39f   :  { %v11464_v38 = vor.u32 %v12997_v15, %v11463_v26 }
 0x3a0   :  { %4937 = vmatpush.bf16.msra.mxu0 %v11368_v48 }
 0x3a1   :  { %11349 = vmatmul.msk.bf16.gmra.mxu3 %vm3917_vm3, %v16213_v12  ;;  %v11643_v12 = vld [vmem:[#allocation2 + $0x240] sm:$0xf]  ;;  %4976 = vmatpush.bf16.msra.mxu1 %v11464_v38  ;;  %v13038_v38 = vld [vmem:[#allocation2 + $0x22c] sm:$0xf] }
 0x3a2   :  { %v11644_v29 = vor.u32 %v13042_v31, %v11643_v12 }
 0x3a3   :  { %v4175_v50 = vpop.f32.mrf.mxu2  ;;  %v4100_v24 = vpop.f32.mrf.mxu0 }
 0x3a4   :  { %5055 = vmatpush.bf16.msrb.mxu3 %v11644_v29  ;;  %v4214_v10 = vpop.f32.mrf.mxu3  ;;  %v4176_v59 = vadd.f32 %v4175_v50, %v4137_v22  ;;  %v4139_v33 = vpop.f32.mrf.mxu1  ;;  %v11355_v29 = vld [vmem:[#allocation2] sm:$0xf] }
 0x3a5   :  { %v4140_v53 = vadd.f32 %v4139_v33, %v4100_v24 }
 0x3a6   :  { %v16721_v7 = vadd.f32 %v4214_v10, %v4176_v59  ;;  %4265 = vmatmul.bf16.gmra.mxu0 %v16268_v4  ;;  %v11547_v4 = vld [vmem:[#allocation2 + $0x180] sm:$0xf]  ;;  %v12970_v10 = vld [vmem:[#allocation2 + $0x8] sm:$0xf0] }
 0x3a7   :  { %4304 = vmatmul.bf16.gmra.mxu1 %v16270_v35  ;;  %v13018_v35 = vld [vmem:[#allocation2 + $0x188] sm:$0xf0]  ;;  %v11356_v24 = vor.u32 %v12970_v10, %v11355_v29  ;;  %v11441_v10 = vld [vmem:[#allocation2 + $0xb4] sm:$0xf0] }
 0x3a8   :  { %19420 = vst [vmem:[#allocation29_spill] sm:$0xff] %v16721_v7  ;;  %v11548_v50 = vor.u32 %v13018_v35, %v11547_v4  ;;  %v12994_v59 = vld [vmem:[#allocation2 + $0xc8] sm:$0xf0] }
 0x3a9   :  { %4343 = vmatmul.bf16.gmra.mxu2 %v16280_v25  ;;  %v11451_v25 = vld [vmem:[#allocation2 + $0xc0] sm:$0xf]  ;;  %4938 = vmatpush.bf16.msra.mxu0 %v11356_v24 }
 0x3aa   :  { %5016 = vmatpush.bf16.msrb.mxu2 %v11548_v50 }
 0x3ab   :  { %v4178_v5 = vpop.f32.mrf.mxu2  ;;  %v4102_v3 = vpop.f32.mrf.mxu0 }
 0x3ac   :  { %v4179_v45 = vadd.f32 %v4178_v5, %v4140_v53  ;;  %v4141_v12 = vpop.f32.mrf.mxu1  ;;  %v11633_v5 = vld [vmem:[#allocation2 + $0x234] sm:$0xf0] }
 0x3ad   :  { %v4142_v21 = vadd.f32 %v4141_v12, %v4102_v3  ;;  %v11681_v3 = vld [vmem:[#allocation2 + $0x294] sm:$0xf0] }
 0x3b1   :  { %11350 = vmatmul.msk.bf16.gmra.mxu3 %vm3917_vm3, %v16282_v30  ;;  %v11452_v30 = vor.u32 %v12994_v59, %v11451_v25  ;;  %v13014_v25 = vld [vmem:[#allocation2 + $0x16c] sm:$0xf]  ;;  %v11537_v59 = vld [vmem:[#allocation2 + $0x174] sm:$0xf0] }
 0x3b2   :  { %v11540_v24 = vor.u32 %v13014_v25, %v11537_v59  ;;  %v11609_v25 = vld [vmem:[#allocation2 + $0x204] sm:$0xf0]  ;;  %v11669_v59 = vld [vmem:[#allocation2 + $0x27c] sm:$0xf0] }
 0x3b3   :  { %4977 = vmatpush.bf16.msra.mxu1 %v11452_v30  ;;  %v4180_v33 = vpop.f32.mrf.mxu2  ;;  %v4105_v2 = vpop.f32.mrf.mxu0 }
 0x3b4   :  { %v4217_v22 = vpop.f32.mrf.mxu3  ;;  %v4181_v53 = vadd.f32 %v4180_v33, %v4142_v21  ;;  %v4144_v26 = vpop.f32.mrf.mxu1 }
 0x3b5   :  { %v16728_v31 = vadd.f32 %v4217_v22, %v4179_v45  ;;  %v4145_v48 = vadd.f32 %v4144_v26, %v4105_v2  ;;  %v13050_v22 = vld [vmem:[#allocation2 + $0x28c] sm:$0xf]  ;;  %v11636_v45 = vor.u32 %v13038_v38, %v11633_v5  ;;  %v13035_v38 = vld [vmem:[#allocation2 + $0x214] sm:$0xf]  ;;  %v11621_v5 = vld [vmem:[#allocation2 + $0x21c] sm:$0xf0] }
 0x3b6   :  { %4270 = vmatmul.bf16.gmra.mxu0 %v16373_v39  ;;  %v11684_v12 = vor.u32 %v13050_v22, %v11681_v3  ;;  %v11624_v22 = vor.u32 %v13035_v38, %v11621_v5  ;;  %v11429_v3 = vld [vmem:[#allocation2 + $0x9c] sm:$0xf0]  ;;  %v12984_v5 = vld [vmem:[#allocation2 + $0x7c] sm:$0xf] }
 0x3b7   :  { %19421 = vst [vmem:[#allocation25_spill] sm:$0xff] %v16728_v31  ;;  %4309 = vmatmul.bf16.gmra.mxu1 %v16375_v61  ;;  %5165 = vmatpush.bf16.msra.mxu2 %v11636_v45  ;;  %v12987_v45 = vld [vmem:[#allocation2 + $0x94] sm:$0xf] }
 0x3b8   :  { %5208 = vmatpush.bf16.msra.mxu3 %v11684_v12  ;;  %5126 = vmatpush.bf16.msrb.mxu1 %v11540_v24  ;;  %v13011_v12 = vld [vmem:[#allocation2 + $0x154] sm:$0xf] }
 0x3b9   :  { %4348 = vmatmul.bf16.gmra.mxu2 %v19406_v6  ;;  %v12990_v6 = vld [vmem:[#allocation2 + $0xac] sm:$0xf] }
 0x3bb   :  { %v4107_v29 = vpop.f32.mrf.mxu0  ;;  %5166 = vmatpush.bf16.msra.mxu2 %v11624_v22  ;;  %v11417_v22 = vld [vmem:[#allocation2 + $0x84] sm:$0xf0] }
 0x3bc   :  { %v4219_v14 = vpop.f32.mrf.mxu3  ;;  %v4183_v21 = vpop.f32.mrf.mxu2 }
 0x3bd   :  { %v16730_v15 = vadd.f32 %v4219_v14, %v4181_v53  ;;  %v4184_v35 = vadd.f32 %v4183_v21, %v4145_v48  ;;  %v4146_v50 = vpop.f32.mrf.mxu1  ;;  %v11432_v21 = vor.u32 %v12987_v45, %v11429_v3  ;;  %v13008_v45 = vld [vmem:[#allocation2 + $0x13c] sm:$0xf]  ;;  %v19427_v3 = vld [vmem:[#allocation66_spill] sm:$0xff] }
 0x3be   :  { %v4147_v39 = vadd.f32 %v4146_v50, %v4107_v29 }
 0x3bf   :  { %19422 = vst [vmem:[#allocation42_spill] sm:$0xff] %v16730_v15  ;;  %v13016_v15 = vld [vmem:[#allocation2 + $0x178] sm:$0xf0] }
 0x3c1   :  { %11351 = vmatmul.msk.bf16.gmra.mxu3 %vm3917_vm3, %v19407_v8  ;;  %v11444_v8 = vor.u32 %v12990_v6, %v11441_v10 }
 0x3c3   :  { %5087 = vmatpush.bf16.msrb.mxu0 %v11444_v8  ;;  %v4110_v53 = vpop.f32.mrf.mxu0 }
 0x3c4   :  { %v4222_v4 = vpop.f32.mrf.mxu3  ;;  %v4185_v30 = vpop.f32.mrf.mxu2 }
 0x3c5   :  { %v16737_v61 = vadd.f32 %v4222_v4, %v4184_v35  ;;  %v4186_v14 = vadd.f32 %v4185_v30, %v4147_v39  ;;  %v4149_v2 = vpop.f32.mrf.mxu1  ;;  %v11525_v4 = vld [vmem:[#allocation2 + $0x15c] sm:$0xf0] }
 0x3c6   :  { %v4150_v26 = vadd.f32 %v4149_v2, %v4110_v53  ;;  %4275 = vmatmul.bf16.gmra.mxu0 %v19408_v36  ;;  %v11528_v35 = vor.u32 %v13011_v12, %v11525_v4  ;;  %v19428_v12 = vld [vmem:[#allocation72_spill] sm:$0xff]  ;;  %v11513_v4 = vld [vmem:[#allocation2 + $0x144] sm:$0xf0] }
 0x3c7   :  { %19423 = vst [vmem:[#allocation14_spill] sm:$0xff] %v16737_v61  ;;  %4314 = vmatmul.bf16.gmra.mxu1 %v19409_v40  ;;  %5088 = vmatpush.bf16.msrb.mxu0 %v11432_v21  ;;  %v11420_v21 = vor.u32 %v12984_v5, %v11417_v22 }
 0x3c8   :  { %5127 = vmatpush.bf16.msrb.mxu1 %v11528_v35  ;;  %v19429_v35 = vld [vmem:[#allocation51_spill] sm:$0xff] }
 0x3c9   :  { %4353 = vmatmul.bf16.gmra.mxu2 %v19410_v55  ;;  %v13032_v55 = vld [vmem:[#allocation2 + $0x1fc] sm:$0xf] }
 0x3ca   :  { %v11612_v8 = vor.u32 %v13032_v55, %v11609_v25 }
 0x3cb   :  { %v4112_v36 = vpop.f32.mrf.mxu0  ;;  %5089 = vmatpush.bf16.msrb.mxu0 %v11420_v21 }
 0x3cc   :  { %v4224_v33 = vpop.f32.mrf.mxu3  ;;  %v4188_v29 = vpop.f32.mrf.mxu2  ;;  %5167 = vmatpush.bf16.msra.mxu2 %v11612_v8  ;;  %v13029_v8 = vld [vmem:[#allocation2 + $0x1e4] sm:$0xf] }
 0x3cd   :  { %v16739_v48 = vadd.f32 %v4224_v33, %v4186_v14  ;;  %v4189_v39 = vadd.f32 %v4188_v29, %v4150_v26  ;;  %v4151_v6 = vpop.f32.mrf.mxu1  ;;  %v19430_v29 = vld [vmem:[#allocation23_spill] sm:$0xff] }
 0x3ce   :  { %v4152_v40 = vadd.f32 %v4151_v6, %v4112_v36 }
 0x3cf   :  { %19424 = vst [vmem:[#allocation19_spill] sm:$0xff] %v16739_v48 }
 0x3d1   :  { %11352 = vmatmul.msk.bf16.gmra.mxu3 %vm3917_vm3, %v19411_v58  ;;  %v13047_v58 = vld [vmem:[#allocation2 + $0x274] sm:$0xf] }
 0x3d2   :  { %v11672_v24 = vor.u32 %v13047_v58, %v11669_v59  ;;  %v11597_v59 = vld [vmem:[#allocation2 + $0x1ec] sm:$0xf0] }
 0x3d3   :  { %v4115_v53 = vpop.f32.mrf.mxu0 }
 0x3d4   :  { %v4227_v50 = vpop.f32.mrf.mxu3  ;;  %5209 = vmatpush.bf16.msra.mxu3 %v11672_v24  ;;  %v4190_v30 = vpop.f32.mrf.mxu2  ;;  %v12981_v24 = vld [vmem:[#allocation2 + $0x64] sm:$0xf] }
 0x3d5   :  { %v16746_v10 = vadd.f32 %v4227_v50, %v4189_v39  ;;  %v4191_v14 = vadd.f32 %v4190_v30, %v4152_v40  ;;  %v4154_v2 = vpop.f32.mrf.mxu1  ;;  %v11516_v50 = vor.u32 %v13008_v45, %v11513_v4  ;;  %v11600_v30 = vor.u32 %v13029_v8, %v11597_v59  ;;  %v13026_v8 = vld [vmem:[#allocation2 + $0x1cc] sm:$0xf]  ;;  %v11585_v59 = vld [vmem:[#allocation2 + $0x1d4] sm:$0xf0] }
 0x3d6   :  { %v4155_v26 = vadd.f32 %v4154_v2, %v4115_v53  ;;  %4939 = vmatmul.bf16.vlgmr.msra.gmra.mxu0 %v19427_v3  ;;  %v11501_v53 = vld [vmem:[#allocation2 + $0x12c] sm:$0xf0] }
 0x3d7   :  { %19425 = vst [vmem:[#allocation40_spill] sm:$0xff] %v16746_v10  ;;  %4978 = vmatmul.bf16.vlgmr.msra.gmra.mxu1 %v19428_v12  ;;  %5168 = vmatpush.bf16.msra.mxu2 %v11600_v30  ;;  %v11588_v30 = vor.u32 %v13026_v8, %v11585_v59 }
 0x3d8   :  { %5128 = vmatpush.bf16.msrb.mxu1 %v11516_v50 }
 0x3d9   :  { %5017 = vmatmul.bf16.vlgmr.msrb.gmra.mxu2 %v19429_v35 }
 0x3db   :  { %v4117_v40 = vpop.f32.mrf.mxu0  ;;  %5169 = vmatpush.bf16.msra.mxu2 %v11588_v30 }
 0x3dc   :  { %v4229_v33 = vpop.f32.mrf.mxu3  ;;  %v4193_v39 = vpop.f32.mrf.mxu2 }
 0x3dd   :  { %v16748_v38 = vadd.f32 %v4229_v33, %v4191_v14  ;;  %v4194_v6 = vadd.f32 %v4193_v39, %v4155_v26  ;;  %v4156_v55 = vpop.f32.mrf.mxu1  ;;  %v11405_v33 = vld [vmem:[#allocation2 + $0x6c] sm:$0xf0]  ;;  %v13005_v14 = vld [vmem:[#allocation2 + $0x124] sm:$0xf] }
 0x3de   :  { %v4157_v25 = vadd.f32 %v4156_v55, %v4117_v40  ;;  %v11408_v2 = vor.u32 %v12981_v24, %v11405_v33  ;;  %v11504_v5 = vor.u32 %v13005_v14, %v11501_v53  ;;  %v19435_v40 = vld [vmem:[#allocation55_spill] sm:$0xff]  ;;  %v19436_v55 = vld [vmem:[#allocation74_spill] sm:$0xff]  ;;  %v11657_v33 = vld [vmem:[#allocation2 + $0x264] sm:$0xf0] }
 0x3df   :  { %19426 = vst [vmem:[#allocation41_spill] sm:$0xff] %v16748_v38  ;;  %v13044_v24 = vld [vmem:[#allocation2 + $0x25c] sm:$0xf]  ;;  %v11453_v38 = vld [vmem:[#allocation2 + $0xcc] sm:$0xf0] }
 0x3e0   :  { %5090 = vmatpush.bf16.msrb.mxu0 %v11408_v2  ;;  %5129 = vmatpush.bf16.msrb.mxu1 %v11504_v5 }
 0x3e1   :  { %11689 = vmatmul.msk.bf16.vlgmr.msrb.gmra.mxu3 %vm3917_vm3, %v19430_v29 }
 0x3e3   :  { %v4120_v21 = vpop.f32.mrf.mxu0 }
 0x3e4   :  { %v4232_v36 = vpop.f32.mrf.mxu3  ;;  %v4195_v22 = vpop.f32.mrf.mxu2  ;;  %5130 = vmatpush.bf16.msrb.mxu1 %v11492_v57  ;;  %v12975_v57 = vld [vmem:[#allocation2 + $0x34] sm:$0xf] }
 0x3e5   :  { %v16755_v58 = vadd.f32 %v4232_v36, %v4194_v6  ;;  %v4196_v26 = vadd.f32 %v4195_v22, %v4157_v25  ;;  %v4159_v4 = vpop.f32.mrf.mxu1  ;;  %v19433_v36 = vld [vmem:[#allocation54_spill] sm:$0xff]  ;;  %v19434_v6 = vld [vmem:[#allocation68_spill] sm:$0xff]  ;;  %v11660_v25 = vor.u32 %v13044_v24, %v11657_v33 }
 0x3e6   :  { %v4160_v50 = vadd.f32 %v4159_v4, %v4120_v21  ;;  %4944 = vmatmul.bf16.gmra.mxu0 %v19433_v36  ;;  %v12978_v21 = vld [vmem:[#allocation2 + $0x4c] sm:$0xf]  ;;  %v11393_v4 = vld [vmem:[#allocation2 + $0x54] sm:$0xf0] }
 0x3e7   :  { %19431 = vst [vmem:[#allocation18_spill] sm:$0xff] %v16755_v58  ;;  %4983 = vmatmul.bf16.gmra.mxu1 %v19434_v6  ;;  %5210 = vmatpush.bf16.msra.mxu3 %v11660_v25  ;;  %v11396_v37 = vor.u32 %v12978_v21, %v11393_v4  ;;  %v13023_v25 = vld [vmem:[#allocation2 + $0x1b4] sm:$0xf]  ;;  %v19441_v21 = vld [vmem:[#allocation77_spill] sm:$0xff]  ;;  %v11477_v4 = vld [vmem:[#allocation2 + $0xfc] sm:$0xf0] }
 0x3e8   :  { %v12993_v58 = vld [vmem:[#allocation2 + $0xc4] sm:$0xf] }
 0x3e9   :  { %5022 = vmatmul.bf16.gmra.mxu2 %v19435_v40  ;;  %5091 = vmatpush.bf16.msrb.mxu0 %v11396_v37  ;;  %v11381_v37 = vld [vmem:[#allocation2 + $0x3c] sm:$0xf0]  ;;  %v11456_v48 = vor.u32 %v12993_v58, %v11453_v38  ;;  %v11639_v38 = vld [vmem:[#allocation2 + $0x230] sm:$0xf] }
 0x3eb   :  { %v4122_v5 = vpop.f32.mrf.mxu0  ;;  %5211 = vmatpush.bf16.msra.mxu3 %v11648_v44  ;;  %v19448_v44 = vld [vmem:[#allocation32_spill] sm:$0xff] }
 0x3ec   :  { %v4234_v45 = vpop.f32.mrf.mxu3  ;;  %v4198_v14 = vpop.f32.mrf.mxu2 }
 0x3ed   :  { %v16757_v39 = vadd.f32 %v4234_v45, %v4196_v26  ;;  %v4199_v2 = vadd.f32 %v4198_v14, %v4160_v50  ;;  %v4161_v22 = vpop.f32.mrf.mxu1 }
 0x3ee   :  { %v4162_v45 = vadd.f32 %v4161_v22, %v4122_v5  ;;  %v11573_v5 = vld [vmem:[#allocation2 + $0x1bc] sm:$0xf0] }
 0x3ef   :  { %19432 = vst [vmem:[#allocation37_spill] sm:$0xff] %v16757_v39  ;;  %v11576_v22 = vor.u32 %v13023_v25, %v11573_v5  ;;  %v11561_v39 = vld [vmem:[#allocation2 + $0x1a4] sm:$0xf0] }
 0x3f1   :  { %11690 = vmatmul.msk.bf16.gmra.mxu3 %vm3917_vm3, %v19436_v55  ;;  %5170 = vmatpush.bf16.msra.mxu2 %v11576_v22 }
 0x3f3   :  { %v4251_v33 = vpop.f32.mrf.mxu0 }
 0x3f4   :  { %v4237_v53 = vpop.f32.mrf.mxu3  ;;  %v4200_v8 = vpop.f32.mrf.mxu2 }
 0x3f5   :  { %v16764_v26 = vadd.f32 %v4237_v53, %v4199_v2  ;;  %v4201_v24 = vadd.f32 %v4200_v8, %v4162_v45  ;;  %v4290_v30 = vpop.f32.mrf.mxu1  ;;  %v19439_v53 = vld [vmem:[#allocation75_spill] sm:$0xff]  ;;  %v19440_v2 = vld [vmem:[#allocation76_spill] sm:$0xff]  ;;  %v11384_v45 = vor.u32 %v12975_v57, %v11381_v37  ;;  %v11480_v8 = vor.u32 %v12999_v52, %v11477_v4 }
 0x3f6   :  { %v4291_v50 = vadd.f32 %v4290_v30, %v4251_v33  ;;  %4949 = vmatmul.bf16.gmra.mxu0 %v19439_v53 }
 0x3f7   :  { %19437 = vst [vmem:[#allocation9_spill] sm:$0xff] %v16764_v26  ;;  %4988 = vmatmul.bf16.gmra.mxu1 %v19440_v2  ;;  %5092 = vmatpush.bf16.msrb.mxu0 %v11384_v45  ;;  %v13020_v26 = vld [vmem:[#allocation2 + $0x19c] sm:$0xf] }
 0x3f8   :  { %5131 = vmatpush.bf16.msrb.mxu1 %v11480_v8  ;;  %v11564_v23 = vor.u32 %v13020_v26, %v11561_v39  ;;  %v12972_v8 = vld [vmem:[#allocation2 + $0x1c] sm:$0xf]  ;;  %v11465_v26 = vld [vmem:[#allocation2 + $0xe4] sm:$0xf0] }
 0x3f9   :  { %5027 = vmatmul.bf16.gmra.mxu2 %v19441_v21 }
 0x3fa   :  { %5171 = vmatpush.bf16.msra.mxu2 %v11564_v23 }
 0x3fb   :  { %v4253_v30 = vpop.f32.mrf.mxu0 }
 0x3fc   :  { %v4239_v59 = vpop.f32.mrf.mxu3 }
 0x3fd   :  { %v16766_v14 = vadd.f32 %v4239_v59, %v4201_v24  ;;  %v4329_v59 = vpop.f32.mrf.mxu2 }
 0x3fe   :  { %v4330_v33 = vadd.f32 %v4329_v59, %v4291_v50  ;;  %v12996_v59 = vld [vmem:[#allocation2 + $0xdc] sm:$0xf] }
 0x3ff   :  { %19438 = vst [vmem:[#allocation11_spill] sm:$0xff] %v16766_v14  ;;  %v4292_v14 = vpop.f32.mrf.mxu1  ;;  %v11468_v23 = vor.u32 %v12996_v59, %v11465_v26 }
 0x400   :  { %v4293_v25 = vadd.f32 %v4292_v14, %v4253_v30  ;;  %v11369_v14 = vld [vmem:[#allocation2 + $0x24] sm:$0xf0] }
 0x401   :  { %11691 = vmatmul.msk.bf16.gmra.mxu3 %vm3917_vm3, %v19442_v46  ;;  %v11372_v39 = vor.u32 %v12972_v8, %v11369_v14  ;;  %5132 = vmatpush.bf16.msrb.mxu1 %v11468_v23  ;;  %v12969_v8 = vld [vmem:[#allocation2 + $0x4] sm:$0xf] }
 0x403   :  { %v4256_v52 = vpop.f32.mrf.mxu0  ;;  %5093 = vmatpush.bf16.msrb.mxu0 %v11372_v39 }
 0x404   :  { %v4368_v24 = vpop.f32.mrf.mxu3 }
 0x405   :  { %v16773_v5 = vadd.f32 %v4368_v24, %v4330_v33  ;;  %v4331_v22 = vpop.f32.mrf.mxu2  ;;  %v19445_v24 = vld [vmem:[#allocation30_spill] sm:$0xff]  ;;  %5133 = vmatpush.bf16.msrb.mxu1 %v11456_v48 }
 0x406   :  { %v4332_v37 = vadd.f32 %v4331_v22, %v4293_v25  ;;  %4954 = vmatmul.bf16.gmra.mxu0 %v19445_v24  ;;  %v19446_v33 = vld [vmem:[#allocation22_spill] sm:$0xff] }
 0x407   :  { %19443 = vst [vmem:[#allocation35_spill] sm:$0xff] %v16773_v5  ;;  %v4295_v45 = vpop.f32.mrf.mxu1  ;;  %4993 = vmatmul.bf16.gmra.mxu1 %v19446_v33  ;;  %v11357_v5 = vld [vmem:[#allocation2 + $0xc] sm:$0xf0] }
 0x408   :  { %v4296_v50 = vadd.f32 %v4295_v45, %v4256_v52  ;;  %v13017_v45 = vld [vmem:[#allocation2 + $0x184] sm:$0xf]  ;;  %v11360_v10 = vor.u32 %v12969_v8, %v11357_v5  ;;  %v11687_v48 = vld [vmem:[#allocation2 + $0x290] sm:$0xf]  ;;  %v13052_v5 = vld [vmem:[#allocation2 + $0x298] sm:$0xf0] }
 0x409   :  { %5032 = vmatmul.bf16.gmra.mxu2 %v19447_v16 }
 0x40a   :  { %5094 = vmatpush.bf16.msrb.mxu0 %v11360_v10  ;;  %v13040_v10 = vld [vmem:[#allocation2 + $0x238] sm:$0xf0] }
 0x40b   :  { %v4258_v22 = vpop.f32.mrf.mxu0  ;;  %v11640_v58 = vor.u32 %v13040_v10, %v11639_v38 }
 0x40c   :  { %v4370_v57 = vpop.f32.mrf.mxu3 }
 0x40d   :  { %v16775_v4 = vadd.f32 %v4370_v57, %v4332_v37  ;;  %v4334_v9 = vpop.f32.mrf.mxu2 }
 0x40e   :  { %v4335_v25 = vadd.f32 %v4334_v9, %v4296_v50 }
 0x40f   :  { %19444 = vst [vmem:[#allocation43_spill] sm:$0xff] %v16775_v4  ;;  %v4297_v57 = vpop.f32.mrf.mxu1  ;;  %v11549_v4 = vld [vmem:[#allocation2 + $0x18c] sm:$0xf0] }
 0x410   :  { %v4298_v37 = vadd.f32 %v4297_v57, %v4258_v22  ;;  %v11552_v14 = vor.u32 %v13017_v45, %v11549_v4  ;;  %v19452_v22 = vld [vmem:[#allocation26_spill] sm:$0xff]  ;;  %v19454_v57 = vld [vmem:[#allocation73_spill] sm:$0xff] }
 0x411   :  { %11692 = vmatmul.msk.bf16.gmra.mxu3 %vm3917_vm3, %v19448_v44  ;;  %v19453_v4 = vld [vmem:[#allocation58_spill] sm:$0xff] }
 0x412   :  { %5172 = vmatpush.bf16.msra.mxu2 %v11552_v14 }
 0x413   :  { %v4261_v26 = vpop.f32.mrf.mxu0 }
 0x414   :  { %v4373_v30 = vpop.f32.mrf.mxu3 }
 0x415   :  { %v16782_v52 = vadd.f32 %v4373_v30, %v4335_v25  ;;  %v4336_v59 = vpop.f32.mrf.mxu2  ;;  %v19451_v25 = vld [vmem:[#allocation28_spill] sm:$0xff] }
 0x416   :  { %v4337_v50 = vadd.f32 %v4336_v59, %v4298_v37  ;;  %4959 = vmatmul.bf16.gmra.mxu0 %v19451_v25  ;;  %v11688_v37 = vor.u32 %v13052_v5, %v11687_v48  ;;  %5321 = vmatpush.bf16.msrb.mxu2 %v11640_v58 }
 0x417   :  { %19449 = vst [vmem:[#allocation44_spill] sm:$0xff] %v16782_v52  ;;  %v4300_v23 = vpop.f32.mrf.mxu1  ;;  %4998 = vmatmul.bf16.gmra.mxu1 %v19452_v22  ;;  %v11543_v52 = vld [vmem:[#allocation2 + $0x170] sm:$0xf] }
 0x418   :  { %v4301_v9 = vadd.f32 %v4300_v23, %v4261_v26  ;;  %5364 = vmatpush.bf16.msrb.mxu3 %v11688_v37  ;;  %v11447_v23 = vld [vmem:[#allocation2 + $0xb0] sm:$0xf]  ;;  %v11544_v31 = vor.u32 %v13016_v15, %v11543_v52  ;;  %v11627_v37 = vld [vmem:[#allocation2 + $0x218] sm:$0xf]  ;;  %v12989_v15 = vld [vmem:[#allocation2 + $0xa0] sm:$0xf0] }
 0x419   :  { %5037 = vmatmul.bf16.gmra.mxu2 %v19453_v4 }
 0x41a   :  { %5282 = vmatpush.bf16.msra.mxu1 %v11544_v31  ;;  %v11435_v31 = vld [vmem:[#allocation2 + $0x98] sm:$0xf] }
 0x41b   :  { %v4263_v59 = vpop.f32.mrf.mxu0  ;;  %v11436_v52 = vor.u32 %v12989_v15, %v11435_v31 }
 0x41c   :  { %v4375_v39 = vpop.f32.mrf.mxu3 }
 0x41d   :  { %v16784_v30 = vadd.f32 %v4375_v39, %v4337_v50  ;;  %v4339_v45 = vpop.f32.mrf.mxu2 }
 0x41e   :  { %v4340_v14 = vadd.f32 %v4339_v45, %v4301_v9 }
 0x41f   :  { %19450 = vst [vmem:[#allocation62_spill] sm:$0xff] %v16784_v30  ;;  %v4302_v39 = vpop.f32.mrf.mxu1  ;;  %v12992_v30 = vld [vmem:[#allocation2 + $0xb8] sm:$0xf0] }
 0x420   :  { %v4303_v50 = vadd.f32 %v4302_v39, %v4263_v59  ;;  %v11448_v61 = vor.u32 %v12992_v30, %v11447_v23  ;;  %v13037_v59 = vld [vmem:[#allocation2 + $0x220] sm:$0xf0] }
 0x421   :  { %11693 = vmatmul.msk.bf16.gmra.mxu3 %vm3917_vm3, %v19454_v57  ;;  %v13013_v30 = vld [vmem:[#allocation2 + $0x160] sm:$0xf0] }
 0x422   :  { %5243 = vmatpush.bf16.msra.mxu0 %v11448_v61  ;;  %v11531_v61 = vld [vmem:[#allocation2 + $0x158] sm:$0xf] }
 0x423   :  { %v4266_v5 = vpop.f32.mrf.mxu0 }
 0x424   :  { %v4378_v8 = vpop.f32.mrf.mxu3 }
 0x425   :  { %v16791_v26 = vadd.f32 %v4378_v8, %v4340_v14  ;;  %v4341_v38 = vpop.f32.mrf.mxu2  ;;  %v11628_v8 = vor.u32 %v13037_v59, %v11627_v37  ;;  %v11532_v14 = vor.u32 %v13013_v30, %v11531_v61  ;;  %v13034_v37 = vld [vmem:[#allocation2 + $0x208] sm:$0xf0]  ;;  %v11675_v59 = vld [vmem:[#allocation2 + $0x278] sm:$0xf] }
 0x426   :  { %v4342_v48 = vadd.f32 %v4341_v38, %v4303_v50  ;;  %4964 = vmatmul.bf16.gmra.mxu0 %v16554_v49 }
 0x427   :  { %19455 = vst [vmem:[#allocation45_spill] sm:$0xff] %v16791_v26  ;;  %v4305_v58 = vpop.f32.mrf.mxu1  ;;  %5003 = vmatmul.bf16.gmra.mxu1 %v16557_v13  ;;  %5322 = vmatpush.bf16.msrb.mxu2 %v11628_v8  ;;  %v13049_v26 = vld [vmem:[#allocation2 + $0x280] sm:$0xf0] }
 0x428   :  { %v4306_v9 = vadd.f32 %v4305_v58, %v4266_v5  ;;  %5244 = vmatpush.bf16.msra.mxu0 %v11436_v52  ;;  %5283 = vmatpush.bf16.msra.mxu1 %v11532_v14  ;;  %v11615_v58 = vld [vmem:[#allocation2 + $0x200] sm:$0xf]  ;;  %v11676_v7 = vor.u32 %v13049_v26, %v11675_v59 }
 0x429   :  { %5042 = vmatmul.bf16.gmra.mxu2 %v16561_v11  ;;  %v11423_v14 = vld [vmem:[#allocation2 + $0x80] sm:$0xf] }
 0x42a   :  { %5365 = vmatpush.bf16.msrb.mxu3 %v11676_v7 }
 0x42b   :  { %v4268_v38 = vpop.f32.mrf.mxu0 }
 0x42c   :  { %v4380_v10 = vpop.f32.mrf.mxu3 }
 0x42d   :  { %v16793_v45 = vadd.f32 %v4380_v10, %v4342_v48  ;;  %v4344_v39 = vpop.f32.mrf.mxu2 }
 0x42e   :  { %v4345_v23 = vadd.f32 %v4344_v39, %v4306_v9  ;;  %v12986_v39 = vld [vmem:[#allocation2 + $0x88] sm:$0xf0] }
 0x42f   :  { %19456 = vst [vmem:[#allocation63_spill] sm:$0xff] %v16793_v45  ;;  %v4307_v10 = vpop.f32.mrf.mxu1  ;;  %v11616_v45 = vor.u32 %v13034_v37, %v11615_v58 }
 0x430   :  { %v4308_v48 = vadd.f32 %v4307_v10, %v4268_v38  ;;  %v13010_v38 = vld [vmem:[#allocation2 + $0x148] sm:$0xf0] }
 0x431   :  { %11694 = vmatmul.msk.bf16.gmra.mxu3 %vm3917_vm3, %v16563_v28  ;;  %5323 = vmatpush.bf16.msrb.mxu2 %v11616_v45 }
 0x433   :  { %v4271_v61 = vpop.f32.mrf.mxu0 }
 0x434   :  { %v4383_v50 = vpop.f32.mrf.mxu3 }
 0x435   :  { %v16800_v5 = vadd.f32 %v4383_v50, %v4345_v23  ;;  %v4346_v8 = vpop.f32.mrf.mxu2  ;;  %v11519_v50 = vld [vmem:[#allocation2 + $0x140] sm:$0xf]  ;;  %v11424_v23 = vor.u32 %v12986_v39, %v11423_v14  ;;  %v11507_v14 = vld [vmem:[#allocation2 + $0x128] sm:$0xf] }
 0x436   :  { %v4347_v15 = vadd.f32 %v4346_v8, %v4308_v48  ;;  %5095 = vmatmul.bf16.vlgmr.msrb.gmra.mxu0 %v19427_v3  ;;  %v11520_v7 = vor.u32 %v13010_v38, %v11519_v50  ;;  %v11603_v8 = vld [vmem:[#allocation2 + $0x1e8] sm:$0xf] }
 0x437   :  { %v4310_v52 = vpop.f32.mrf.mxu1  ;;  %5134 = vmatmul.bf16.vlgmr.msrb.gmra.mxu1 %v19428_v12  ;;  %5245 = vmatpush.bf16.msra.mxu0 %v11424_v23 }
 0x438   :  { %v4311_v9 = vadd.f32 %v4310_v52, %v4271_v61  ;;  %5284 = vmatpush.bf16.msra.mxu1 %v11520_v7  ;;  %v11411_v61 = vld [vmem:[#allocation2 + $0x68] sm:$0xf]  ;;  %v12983_v52 = vld [vmem:[#allocation2 + $0x70] sm:$0xf0] }
 0x439   :  { %5173 = vmatmul.bf16.vlgmr.msra.gmra.mxu2 %v19429_v35  ;;  %v11412_v39 = vor.u32 %v12983_v52, %v11411_v61 }
 0x43b   :  { %v4273_v48 = vpop.f32.mrf.mxu0  ;;  %5246 = vmatpush.bf16.msra.mxu0 %v11412_v39 }
 0x43c   :  { %v4385_v31 = vpop.f32.mrf.mxu3 }
 0x43d   :  { %v16802_v30 = vadd.f32 %v4385_v31, %v4347_v15  ;;  %v4349_v26 = vpop.f32.mrf.mxu2  ;;  %v13031_v31 = vld [vmem:[#allocation2 + $0x1f0] sm:$0xf0] }
 0x43e   :  { %v4350_v10 = vadd.f32 %v4349_v26, %v4311_v9  ;;  %v11604_v15 = vor.u32 %v13031_v31, %v11603_v8  ;;  %v13046_v31 = vld [vmem:[#allocation2 + $0x268] sm:$0xf0] }
 0x43f   :  { %19457 = vst [vmem:[#allocation61_spill] sm:$0xff] %v16802_v30  ;;  %v4312_v58 = vpop.f32.mrf.mxu1  ;;  %v13007_v30 = vld [vmem:[#allocation2 + $0x130] sm:$0xf0] }
 0x440   :  { %v4313_v37 = vadd.f32 %v4312_v58, %v4273_v48  ;;  %5324 = vmatpush.bf16.msrb.mxu2 %v11604_v15  ;;  %v11508_v50 = vor.u32 %v13007_v30, %v11507_v14  ;;  %v11591_v30 = vld [vmem:[#allocation2 + $0x1d0] sm:$0xf]  ;;  %v11663_v58 = vld [vmem:[#allocation2 + $0x260] sm:$0xf] }
 0x441   :  { %11695 = vmatmul.msk.bf16.vlgmr.msra.gmra.mxu3 %vm3917_vm3, %v19430_v29 }
 0x442   :  { %5285 = vmatpush.bf16.msra.mxu1 %v11508_v50 }
 0x443   :  { %v4276_v7 = vpop.f32.mrf.mxu0 }
 0x444   :  { %v4388_v45 = vpop.f32.mrf.mxu3 }
 0x445   :  { %v16809_v59 = vadd.f32 %v4388_v45, %v4350_v10  ;;  %v4351_v23 = vpop.f32.mrf.mxu2  ;;  %v13028_v10 = vld [vmem:[#allocation2 + $0x1d8] sm:$0xf0] }
 0x446   :  { %v4352_v9 = vadd.f32 %v4351_v23, %v4313_v37  ;;  %5100 = vmatmul.bf16.gmra.mxu0 %v19433_v36  ;;  %v11592_v8 = vor.u32 %v13028_v10, %v11591_v30  ;;  %v11664_v37 = vor.u32 %v13046_v31, %v11663_v58 }
 0x447   :  { %19458 = vst [vmem:[#allocation46_spill] sm:$0xff] %v16809_v59  ;;  %v4315_v26 = vpop.f32.mrf.mxu1  ;;  %5139 = vmatmul.bf16.gmra.mxu1 %v19434_v6 }
 0x448   :  { %v4316_v48 = vadd.f32 %v4315_v26, %v4276_v7  ;;  %5325 = vmatpush.bf16.msrb.mxu2 %v11592_v8  ;;  %5366 = vmatpush.bf16.msrb.mxu3 %v11664_v37  ;;  %v11495_v7 = vld [vmem:[#allocation2 + $0x110] sm:$0xf] }
 0x449   :  { %5178 = vmatmul.bf16.gmra.mxu2 %v19435_v40 }
 0x44b   :  { %v4278_v14 = vpop.f32.mrf.mxu0 }
 0x44c   :  { %v4390_v38 = vpop.f32.mrf.mxu3 }
 0x44d   :  { %v16811_v45 = vadd.f32 %v4390_v38, %v4352_v9  ;;  %v4354_v15 = vpop.f32.mrf.mxu2  ;;  %v11399_v38 = vld [vmem:[#allocation2 + $0x50] sm:$0xf]  ;;  %v12980_v9 = vld [vmem:[#allocation2 + $0x58] sm:$0xf0] }
 0x44e   :  { %v4355_v52 = vadd.f32 %v4354_v15, %v4316_v48  ;;  %v11400_v26 = vor.u32 %v12980_v9, %v11399_v38  ;;  %v3981_v48 = vadd.f32 %v16552_v43, %v16550_v19  ;;  %v11387_v19 = vld [vmem:[#allocation2 + $0x38] sm:$0xf]  ;;  %v12977_v43 = vld [vmem:[#allocation2 + $0x40] sm:$0xf0] }
 0x44f   :  { %19459 = vst [vmem:[#allocation21_spill] sm:$0xff] %v16811_v45  ;;  %v4317_v39 = vpop.f32.mrf.mxu1  ;;  %v13004_v45 = vld [vmem:[#allocation2 + $0x118] sm:$0xf0] }
 0x450   :  { %v4318_v50 = vadd.f32 %v4317_v39, %v4278_v14  ;;  %v11496_v59 = vor.u32 %v13004_v45, %v11495_v7  ;;  %5247 = vmatpush.bf16.msra.mxu0 %v11400_v26  ;;  %v4020_v14 = vadd.f32 %v16578_v20, %v3981_v48  ;;  %v11388_v45 = vor.u32 %v12977_v43, %v11387_v19  ;;  %v11567_v48 = vld [vmem:[#allocation2 + $0x1a0] sm:$0xf] }
 0x451   :  { %11696 = vmatmul.msk.bf16.gmra.mxu3 %vm3917_vm3, %v19436_v55 }
 0x452   :  { %5286 = vmatpush.bf16.msra.mxu1 %v11496_v59  ;;  %v4059_v20 = vadd.f32 %v16580_v51, %v4020_v14 }
 0x453   :  { %v4940_v31 = vpop.f32.mrf.mxu0 }
 0x454   :  { %v4393_v61 = vpop.f32.mrf.mxu3  ;;  %v4941_v37 = vadd.f32 %v4940_v31, %v16548_v60  ;;  %v11483_v60 = vld [vmem:[#allocation2 + $0xf8] sm:$0xf]  ;;  %5248 = vmatpush.bf16.msra.mxu0 %v11388_v45  ;;  %v3986_v45 = vadd.f32 %v16629_v41, %v16627_v17 }
 0x455   :  { %v16818_v23 = vadd.f32 %v4393_v61, %v4355_v52  ;;  %v4356_v30 = vpop.f32.mrf.mxu2  ;;  %v11579_v61 = vld [vmem:[#allocation2 + $0x1b8] sm:$0xf]  ;;  %v13025_v52 = vld [vmem:[#allocation2 + $0x1c0] sm:$0xf0] }
 0x456   :  { %v4357_v58 = vadd.f32 %v4356_v30, %v4318_v50  ;;  %5105 = vmatmul.bf16.gmra.mxu0 %v19439_v53  ;;  %v11580_v59 = vor.u32 %v13025_v52, %v11579_v61  ;;  %v13001_v50 = vld [vmem:[#allocation2 + $0x100] sm:$0xf0]  ;;  %v11651_v61 = vld [vmem:[#allocation2 + $0x248] sm:$0xf] }
 0x457   :  { %v4979_v8 = vpop.f32.mrf.mxu1  ;;  %5144 = vmatmul.bf16.gmra.mxu1 %v19440_v2  ;;  %v11484_v38 = vor.u32 %v13001_v50, %v11483_v60 }
 0x458   :  { %v4980_v39 = vadd.f32 %v4979_v8, %v4941_v37  ;;  %5326 = vmatpush.bf16.msrb.mxu2 %v11580_v59  ;;  %v13022_v37 = vld [vmem:[#allocation2 + $0x1a8] sm:$0xf0]  ;;  %v13043_v59 = vld [vmem:[#allocation2 + $0x250] sm:$0xf0] }
 0x459   :  { %5183 = vmatmul.bf16.gmra.mxu2 %v19441_v21  ;;  %5287 = vmatpush.bf16.msra.mxu1 %v11484_v38  ;;  %v11568_v52 = vor.u32 %v13022_v37, %v11567_v48  ;;  %v11652_v19 = vor.u32 %v13043_v59, %v11651_v61  ;;  %v11555_v59 = vld [vmem:[#allocation2 + $0x188] sm:$0xf] }
 0x45b   :  { %v4942_v30 = vpop.f32.mrf.mxu0  ;;  %5367 = vmatpush.bf16.msrb.mxu3 %v11652_v19  ;;  %v13019_v19 = vld [vmem:[#allocation2 + $0x190] sm:$0xf0] }
 0x45c   :  { %v4395_v10 = vpop.f32.mrf.mxu3  ;;  %5327 = vmatpush.bf16.msrb.mxu2 %v11568_v52 }
 0x45d   :  { %v16823_v15 = vadd.f32 %v4395_v10, %v4357_v58  ;;  %v5018_v9 = vpop.f32.mrf.mxu2  ;;  %v4943_v58 = vadd.f32 %v4942_v30, %v4059_v20  ;;  %v11375_v20 = vld [vmem:[#allocation2 + $0x20] sm:$0xf] }
 0x45e   :  { %v5019_v26 = vadd.f32 %v5018_v9, %v4980_v39  ;;  %v12974_v9 = vld [vmem:[#allocation2 + $0x28] sm:$0xf0] }
 0x45f   :  { %v4981_v10 = vpop.f32.mrf.mxu1 }
 0x460   :  { %v4982_v8 = vadd.f32 %v4981_v10, %v4943_v58  ;;  %v11376_v10 = vor.u32 %v12974_v9, %v11375_v20  ;;  %v12998_v58 = vld [vmem:[#allocation2 + $0xe8] sm:$0xf0] }
 0x461   :  { %11697 = vmatmul.msk.bf16.gmra.mxu3 %vm3917_vm3, %v19442_v46 }
 0x462   :  { %5249 = vmatpush.bf16.msra.mxu0 %v11376_v10 }
 0x463   :  { %v4945_v60 = vpop.f32.mrf.mxu0 }
 0x464   :  { %v5057_v7 = vpop.f32.mrf.mxu3  ;;  %v4946_v50 = vadd.f32 %v4945_v60, %v16625_v34  ;;  %v12971_v60 = vld [vmem:[#allocation2 + $0x10] sm:$0xf0] }
 0x465   :  { %v16832_v31 = vadd.f32 %v5057_v7, %v5019_v26  ;;  %v5020_v43 = vpop.f32.mrf.mxu2  ;;  %v11471_v7 = vld [vmem:[#allocation2 + $0xe0] sm:$0xf]  ;;  %v4025_v26 = vadd.f32 %v16649_v62, %v3986_v45 }
 0x466   :  { %v5021_v14 = vadd.f32 %v5020_v43, %v4982_v8  ;;  %5110 = vmatmul.bf16.gmra.mxu0 %v19445_v24  ;;  %v11472_v34 = vor.u32 %v12998_v58, %v11471_v7 }
 0x467   :  { %v4984_v39 = vpop.f32.mrf.mxu1  ;;  %5149 = vmatmul.bf16.gmra.mxu1 %v19446_v33  ;;  %v4064_v17 = vadd.f32 %v16651_v32, %v4025_v26 }
 0x468   :  { %v4985_v30 = vadd.f32 %v4984_v39, %v4946_v50  ;;  %5288 = vmatpush.bf16.msra.mxu1 %v11472_v34  ;;  %v11459_v39 = vld [vmem:[#allocation2 + $0xc8] sm:$0xf]  ;;  %v12995_v50 = vld [vmem:[#allocation2 + $0xd0] sm:$0xf0] }
 0x469   :  { %5188 = vmatmul.bf16.gmra.mxu2 %v19447_v16  ;;  %v11460_v20 = vor.u32 %v12995_v50, %v11459_v39  ;;  %v13159_v39 = vld [vmem:[#allocation2 + $0x5f0] sm:$0xf0] }
 0x46b   :  { %v4947_v48 = vpop.f32.mrf.mxu0 }
 0x46c   :  { %v5059_v51 = vpop.f32.mrf.mxu3  ;;  %v4948_v61 = vadd.f32 %v4947_v48, %v4064_v17  ;;  %5289 = vmatpush.bf16.msra.mxu1 %v11460_v20  ;;  %v11993_v17 = vld [vmem:[#allocation2 + $0x768] sm:$0xf]  ;;  %v13219_v48 = vld [vmem:[#allocation2 + $0x7d0] sm:$0xf0] }
 0x46d   :  { %v16837_v38 = vadd.f32 %v5059_v51, %v5021_v14  ;;  %v5023_v41 = vpop.f32.mrf.mxu2  ;;  %v11556_v51 = vor.u32 %v13019_v19, %v11555_v59  ;;  %v11363_v14 = vld [vmem:[#allocation2 + $0x8] sm:$0xf] }
 0x46e   :  { %v5024_v62 = vadd.f32 %v5023_v41, %v4985_v30  ;;  %v11364_v45 = vor.u32 %v12971_v60, %v11363_v14  ;;  %v13207_v41 = vld [vmem:[#allocation2 + $0x770] sm:$0xf0]  ;;  %v11801_v60 = vld [vmem:[#allocation2 + $0x5e8] sm:$0xf] }
 0x46f   :  { %v4986_v37 = vpop.f32.mrf.mxu1  ;;  %5328 = vmatpush.bf16.msrb.mxu2 %v11556_v51  ;;  %v11802_v20 = vor.u32 %v13159_v39, %v11801_v60 }
 0x470   :  { %v4987_v43 = vadd.f32 %v4986_v37, %v4948_v61  ;;  %5250 = vmatpush.bf16.msra.mxu0 %v11364_v45  ;;  %v11897_v45 = vld [vmem:[#allocation2 + $0x6a8] sm:$0xf] }
 0x471   :  { %11698 = vmatmul.msk.bf16.gmra.mxu3 %vm3917_vm3, %v19448_v44 }
 0x473   :  { %v4950_v26 = vpop.f32.mrf.mxu0 }
 0x474   :  { %v5062_v8 = vpop.f32.mrf.mxu3  ;;  %v4951_v10 = vadd.f32 %v4950_v26, %v16678_v1  ;;  %6172 = vmatpush.bf16.msrb.mxu0 %v11802_v20 }
 0x475   :  { %v16846_v52 = vadd.f32 %v5062_v8, %v5024_v62  ;;  %v5025_v32 = vpop.f32.mrf.mxu2  ;;  %v12041_v8 = vld [vmem:[#allocation2 + $0x7c8] sm:$0xf]  ;;  %v11994_v62 = vor.u32 %v13207_v41, %v11993_v17 }
 0x476   :  { %v5026_v7 = vadd.f32 %v5025_v32, %v4987_v43  ;;  %5115 = vmatmul.bf16.gmra.mxu0 %v19451_v25  ;;  %v12042_v37 = vor.u32 %v13219_v48, %v12041_v8  ;;  %v13183_v32 = vld [vmem:[#allocation2 + $0x6b0] sm:$0xf0]  ;;  %v13204_v8 = vld [vmem:[#allocation2 + $0x758] sm:$0xf0] }
 0x477   :  { %v4989_v30 = vpop.f32.mrf.mxu1  ;;  %5154 = vmatmul.bf16.gmra.mxu1 %v19452_v22  ;;  %6250 = vmatpush.bf16.msra.mxu2 %v11994_v62 }
 0x478   :  { %v4990_v34 = vadd.f32 %v4989_v30, %v4951_v10  ;;  %6293 = vmatpush.bf16.msra.mxu3 %v12042_v37  ;;  %v11789_v37 = vld [vmem:[#allocation2 + $0x5d0] sm:$0xf] }
 0x479   :  { %5193 = vmatmul.bf16.gmra.mxu2 %v19453_v4 }
 0x47b   :  { %v4952_v19 = vpop.f32.mrf.mxu0 }
 0x47c   :  { %v5064_v9 = vpop.f32.mrf.mxu3  ;;  %v4953_v51 = vadd.f32 %v4952_v19, %v16685_v0  ;;  %v11981_v0 = vld [vmem:[#allocation2 + $0x750] sm:$0xf] }
 0x47d   :  { %v16849_v58 = vadd.f32 %v5064_v9, %v5026_v7  ;;  %v5028_v61 = vpop.f32.mrf.mxu2  ;;  %v11898_v9 = vor.u32 %v13183_v32, %v11897_v45  ;;  %v11982_v48 = vor.u32 %v13204_v8, %v11981_v0 }
 0x47e   :  { %v5029_v59 = vadd.f32 %v5028_v61, %v4990_v34  ;;  %v13156_v61 = vld [vmem:[#allocation2 + $0x5d8] sm:$0xf0] }
 0x47f   :  { %v4991_v43 = vpop.f32.mrf.mxu1  ;;  %6211 = vmatpush.bf16.msrb.mxu1 %v11898_v9  ;;  %6251 = vmatpush.bf16.msra.mxu2 %v11982_v48  ;;  %v11969_v9 = vld [vmem:[#allocation2 + $0x738] sm:$0xf] }
 0x480   :  { %v4992_v50 = vadd.f32 %v4991_v43, %v4953_v51 }
 0x481   :  { %11699 = vmatmul.msk.bf16.gmra.mxu3 %vm3917_vm3, %v19454_v57 }
 0x483   :  { %v4955_v10 = vpop.f32.mrf.mxu0 }
 0x484   :  { %v5067_v1 = vpop.f32.mrf.mxu3  ;;  %v4956_v17 = vadd.f32 %v4955_v10, %v16692_v27  ;;  %v11790_v27 = vor.u32 %v13156_v61, %v11789_v37  ;;  %v13216_v10 = vld [vmem:[#allocation2 + $0x7b8] sm:$0xf0] }
 0x485   :  { %v16857_v14 = vadd.f32 %v5067_v1, %v5029_v59  ;;  %v5030_v7 = vpop.f32.mrf.mxu2  ;;  %v11885_v1 = vld [vmem:[#allocation2 + $0x690] sm:$0xf]  ;;  %v13180_v59 = vld [vmem:[#allocation2 + $0x698] sm:$0xf0] }
 0x486   :  { %v5031_v30 = vadd.f32 %v5030_v7, %v4992_v50  ;;  %5120 = vmatmul.bf16.gmra.mxu0 %v16554_v49  ;;  %v11886_v19 = vor.u32 %v13180_v59, %v11885_v1  ;;  %v13201_v7 = vld [vmem:[#allocation2 + $0x740] sm:$0xf0] }
 0x487   :  { %v4994_v34 = vpop.f32.mrf.mxu1  ;;  %5159 = vmatmul.bf16.gmra.mxu1 %v16557_v13  ;;  %6173 = vmatpush.bf16.msrb.mxu0 %v11790_v27  ;;  %v13153_v1 = vld [vmem:[#allocation2 + $0x5c0] sm:$0xf0]  ;;  %v11873_v27 = vld [vmem:[#allocation2 + $0x678] sm:$0xf] }
 0x488   :  { %v4995_v62 = vadd.f32 %v4994_v34, %v4956_v17  ;;  %6212 = vmatpush.bf16.msrb.mxu1 %v11886_v19 }
 0x489   :  { %5198 = vmatmul.bf16.gmra.mxu2 %v16561_v11 }
 0x48b   :  { %v4957_v39 = vpop.f32.mrf.mxu0 }
 0x48c   :  { %v5069_v26 = vpop.f32.mrf.mxu3  ;;  %v4958_v50 = vadd.f32 %v4957_v39, %v16694_v56  ;;  %v11777_v56 = vld [vmem:[#allocation2 + $0x5b8] sm:$0xf] }
 0x48d   :  { %v16860_v41 = vadd.f32 %v5069_v26, %v5031_v30  ;;  %v5033_v43 = vpop.f32.mrf.mxu2  ;;  %v12029_v26 = vld [vmem:[#allocation2 + $0x7b0] sm:$0xf]  ;;  %v11970_v30 = vor.u32 %v13201_v7, %v11969_v9  ;;  %v11778_v19 = vor.u32 %v13153_v1, %v11777_v56  ;;  %v13198_v9 = vld [vmem:[#allocation2 + $0x728] sm:$0xf0] }
 0x48e   :  { %v5034_v60 = vadd.f32 %v5033_v43, %v4995_v62  ;;  %v12030_v34 = vor.u32 %v13216_v10, %v12029_v26  ;;  %v13177_v43 = vld [vmem:[#allocation2 + $0x680] sm:$0xf0]  ;;  %v11861_v10 = vld [vmem:[#allocation2 + $0x660] sm:$0xf] }
 0x48f   :  { %v4996_v45 = vpop.f32.mrf.mxu1  ;;  %6252 = vmatpush.bf16.msra.mxu2 %v11970_v30  ;;  %6174 = vmatpush.bf16.msrb.mxu0 %v11778_v19  ;;  %v13150_v30 = vld [vmem:[#allocation2 + $0x5a8] sm:$0xf0]  ;;  %v12017_v19 = vld [vmem:[#allocation2 + $0x798] sm:$0xf] }
 0x490   :  { %v4997_v32 = vadd.f32 %v4996_v45, %v4958_v50  ;;  %6294 = vmatpush.bf16.msra.mxu3 %v12030_v34  ;;  %v13174_v34 = vld [vmem:[#allocation2 + $0x668] sm:$0xf0] }
 0x491   :  { %11700 = vmatmul.msk.bf16.gmra.mxu3 %vm3917_vm3, %v16563_v28 }
 0x493   :  { %v4960_v62 = vpop.f32.mrf.mxu0 }
 0x494   :  { %v5072_v51 = vpop.f32.mrf.mxu3  ;;  %v4961_v37 = vadd.f32 %v4960_v62, %v16701_v54 }
 0x495   :  { %v16868_v20 = vadd.f32 %v5072_v51, %v5034_v60  ;;  %v5035_v17 = vpop.f32.mrf.mxu2  ;;  %v11874_v51 = vor.u32 %v13177_v43, %v11873_v27  ;;  %v11945_v27 = vld [vmem:[#allocation2 + $0x708] sm:$0xf] }
 0x496   :  { %v5036_v8 = vadd.f32 %v5035_v17, %v4997_v32  ;;  %5251 = vmatmul.bf16.vlgmr.msra.gmra.mxu0 %v19427_v3  ;;  %v11862_v17 = vor.u32 %v13174_v34, %v11861_v10 }
 0x497   :  { %v4999_v48 = vpop.f32.mrf.mxu1  ;;  %5290 = vmatmul.bf16.vlgmr.msra.gmra.mxu1 %v19428_v12  ;;  %v11957_v12 = vld [vmem:[#allocation2 + $0x720] sm:$0xf] }
 0x498   :  { %v5000_v59 = vadd.f32 %v4999_v48, %v4961_v37  ;;  %6213 = vmatpush.bf16.msrb.mxu1 %v11874_v51  ;;  %v11958_v26 = vor.u32 %v13198_v9, %v11957_v12  ;;  %v13213_v51 = vld [vmem:[#allocation2 + $0x7a0] sm:$0xf0] }
 0x499   :  { %5329 = vmatmul.bf16.vlgmr.msrb.gmra.mxu2 %v19429_v35  ;;  %v11765_v35 = vld [vmem:[#allocation2 + $0x5a0] sm:$0xf] }
 0x49a   :  { %6253 = vmatpush.bf16.msra.mxu2 %v11958_v26 }
 0x49b   :  { %v4962_v45 = vpop.f32.mrf.mxu0 }
 0x49c   :  { %v5074_v0 = vpop.f32.mrf.mxu3  ;;  %v4963_v32 = vadd.f32 %v4962_v45, %v16703_v42  ;;  %6214 = vmatpush.bf16.msrb.mxu1 %v11862_v17 }
 0x49d   :  { %v16871_v61 = vadd.f32 %v5074_v0, %v5036_v8  ;;  %v5038_v54 = vpop.f32.mrf.mxu2 }
 0x49e   :  { %v5039_v39 = vadd.f32 %v5038_v54, %v5000_v59  ;;  %v13195_v59 = vld [vmem:[#allocation2 + $0x710] sm:$0xf0]  ;;  %v12018_v54 = vor.u32 %v13213_v51, %v12017_v19 }
 0x49f   :  { %v5001_v50 = vpop.f32.mrf.mxu1  ;;  %v11946_v43 = vor.u32 %v13195_v59, %v11945_v27  ;;  %v13168_v27 = vld [vmem:[#allocation2 + $0x638] sm:$0xf0] }
 0x4a0   :  { %v5002_v7 = vadd.f32 %v5001_v50, %v4963_v32  ;;  %6295 = vmatpush.bf16.msra.mxu3 %v12018_v54  ;;  %v13147_v32 = vld [vmem:[#allocation2 + $0x590] sm:$0xf0] }
 0x4a1   :  { %11701 = vmatmul.msk.bf16.vlgmr.msrb.gmra.mxu3 %vm3917_vm3, %v19430_v29  ;;  %v11766_v29 = vor.u32 %v13150_v30, %v11765_v35  ;;  %6254 = vmatpush.bf16.msra.mxu2 %v11946_v43 }
 0x4a3   :  { %6175 = vmatpush.bf16.msrb.mxu0 %v11766_v29  ;;  %v4965_v48 = vpop.f32.mrf.mxu0 }
 0x4a4   :  { %v5077_v60 = vpop.f32.mrf.mxu3  ;;  %v4966_v37 = vadd.f32 %v4965_v48, %v16710_v47 }
 0x4a5   :  { %v16879_v3 = vadd.f32 %v5077_v60, %v5039_v39  ;;  %v5040_v0 = vpop.f32.mrf.mxu2 }
 0x4a6   :  { %v5041_v62 = vadd.f32 %v5040_v0, %v5002_v7  ;;  %5256 = vmatmul.bf16.gmra.mxu0 %v19433_v36  ;;  %v13171_v7 = vld [vmem:[#allocation2 + $0x650] sm:$0xf0] }
 0x4a7   :  { %v5004_v42 = vpop.f32.mrf.mxu1  ;;  %5295 = vmatmul.bf16.gmra.mxu1 %v19434_v6 }
 0x4a8   :  { %v5005_v1 = vadd.f32 %v5004_v42, %v4966_v37  ;;  %v11741_v42 = vld [vmem:[#allocation2 + $0x570] sm:$0xf]  ;;  %v13144_v37 = vld [vmem:[#allocation2 + $0x578] sm:$0xf0] }
 0x4a9   :  { %5334 = vmatmul.bf16.gmra.mxu2 %v19435_v40  ;;  %v11753_v40 = vld [vmem:[#allocation2 + $0x588] sm:$0xf] }
 0x4aa   :  { %v11754_v9 = vor.u32 %v13147_v32, %v11753_v40 }
 0x4ab   :  { %v4967_v45 = vpop.f32.mrf.mxu0 }
 0x4ac   :  { %v5079_v8 = vpop.f32.mrf.mxu3  ;;  %v4968_v36 = vadd.f32 %v4967_v45, %v16712_v63  ;;  %6176 = vmatpush.bf16.msrb.mxu0 %v11754_v9  ;;  %v11933_v63 = vld [vmem:[#allocation2 + $0x6f0] sm:$0xf]  ;;  %v12005_v45 = vld [vmem:[#allocation2 + $0x780] sm:$0xf] }
 0x4ad   :  { %v16882_v56 = vadd.f32 %v5079_v8, %v5041_v62  ;;  %v5043_v60 = vpop.f32.mrf.mxu2  ;;  %v13192_v8 = vld [vmem:[#allocation2 + $0x6f8] sm:$0xf0] }
 0x4ae   :  { %v5044_v39 = vadd.f32 %v5043_v60, %v5005_v1  ;;  %v11934_v48 = vor.u32 %v13192_v8, %v11933_v63  ;;  %v11837_v1 = vld [vmem:[#allocation2 + $0x630] sm:$0xf]  ;;  %v13165_v8 = vld [vmem:[#allocation2 + $0x620] sm:$0xf0] }
 0x4af   :  { %v5006_v50 = vpop.f32.mrf.mxu1  ;;  %v11838_v59 = vor.u32 %v13168_v27, %v11837_v1  ;;  %v19462_v27 = vld [vmem:[#allocation42_spill] sm:$0xff] }
 0x4b0   :  { %v5007_v12 = vadd.f32 %v5006_v50, %v4968_v36  ;;  %6255 = vmatpush.bf16.msra.mxu2 %v11934_v48  ;;  %v13210_v36 = vld [vmem:[#allocation2 + $0x788] sm:$0xf0] }
 0x4b1   :  { %11702 = vmatmul.msk.bf16.gmra.mxu3 %vm3917_vm3, %v19436_v55  ;;  %v11849_v55 = vld [vmem:[#allocation2 + $0x648] sm:$0xf]  ;;  %v12006_v40 = vor.u32 %v13210_v36, %v12005_v45  ;;  %v19463_v36 = vld [vmem:[#allocation14_spill] sm:$0xff] }
 0x4b2   :  { %v11850_v26 = vor.u32 %v13171_v7, %v11849_v55 }
 0x4b3   :  { %v5096_v29 = vpop.f32.mrf.mxu0  ;;  %6296 = vmatpush.bf16.msra.mxu3 %v12006_v40 }
 0x4b4   :  { %v5082_v47 = vpop.f32.mrf.mxu3  ;;  %6215 = vmatpush.bf16.msrb.mxu1 %v11850_v26  ;;  %v5097_v17 = vadd.f32 %v5096_v29, %v16719_v18  ;;  %v11742_v18 = vor.u32 %v13144_v37, %v11741_v42  ;;  %v19461_v26 = vld [vmem:[#allocation25_spill] sm:$0xff]  ;;  %v13141_v29 = vld [vmem:[#allocation2 + $0x560] sm:$0xf0] }
 0x4b5   :  { %v16890_v6 = vadd.f32 %v5082_v47, %v5044_v39  ;;  %v5045_v35 = vpop.f32.mrf.mxu2  ;;  %v13189_v39 = vld [vmem:[#allocation2 + $0x6e0] sm:$0xf0] }
 0x4b6   :  { %v5046_v10 = vadd.f32 %v5045_v35, %v5007_v12  ;;  %5261 = vmatmul.bf16.gmra.mxu0 %v19439_v53 }
 0x4b7   :  { %v5135_v34 = vpop.f32.mrf.mxu1  ;;  %5300 = vmatmul.bf16.gmra.mxu1 %v19440_v2  ;;  %6177 = vmatpush.bf16.msrb.mxu0 %v11742_v18  ;;  %v19460_v2 = vld [vmem:[#allocation29_spill] sm:$0xff] }
 0x4b8   :  { %v5136_v62 = vadd.f32 %v5135_v34, %v5097_v17  ;;  %6216 = vmatpush.bf16.msrb.mxu1 %v11838_v59  ;;  %v11825_v34 = vld [vmem:[#allocation2 + $0x618] sm:$0xf] }
 0x4b9   :  { %5339 = vmatmul.bf16.gmra.mxu2 %v19441_v21 }
 0x4bb   :  { %v5098_v53 = vpop.f32.mrf.mxu0 }
 0x4bc   :  { %v5084_v30 = vpop.f32.mrf.mxu3  ;;  %v5099_v60 = vadd.f32 %v5098_v53, %v19460_v2  ;;  %v13138_v53 = vld [vmem:[#allocation2 + $0x548] sm:$0xf0] }
 0x4bd   :  { %v16893_v0 = vadd.f32 %v5084_v30, %v5046_v10  ;;  %v5174_v19 = vpop.f32.mrf.mxu2  ;;  %v11729_v10 = vld [vmem:[#allocation2 + $0x558] sm:$0xf]  ;;  %v13162_v2 = vld [vmem:[#allocation2 + $0x608] sm:$0xf0] }
 0x4be   :  { %v5175_v51 = vadd.f32 %v5174_v19, %v5136_v62  ;;  %v11730_v63 = vor.u32 %v13141_v29, %v11729_v10  ;;  %v11826_v62 = vor.u32 %v13165_v8, %v11825_v34  ;;  %v13186_v19 = vld [vmem:[#allocation2 + $0x6c8] sm:$0xf0] }
 0x4bf   :  { %v5137_v54 = vpop.f32.mrf.mxu1 }
 0x4c0   :  { %v5138_v47 = vadd.f32 %v5137_v54, %v5099_v60  ;;  %6178 = vmatpush.bf16.msrb.mxu0 %v11730_v63  ;;  %6217 = vmatpush.bf16.msrb.mxu1 %v11826_v62  ;;  %v11813_v54 = vld [vmem:[#allocation2 + $0x600] sm:$0xf] }
 0x4c1   :  { %11703 = vmatmul.msk.bf16.gmra.mxu3 %vm3917_vm3, %v19442_v46  ;;  %v11921_v46 = vld [vmem:[#allocation2 + $0x6d8] sm:$0xf]  ;;  %v11814_v60 = vor.u32 %v13162_v2, %v11813_v54  ;;  %v13203_v54 = vld [vmem:[#allocation2 + $0x754] sm:$0xf] }
 0x4c2   :  { %v11922_v50 = vor.u32 %v13189_v39, %v11921_v46 }
 0x4c3   :  { %v5101_v9 = vpop.f32.mrf.mxu0 }
 0x4c4   :  { %v5213_v43 = vpop.f32.mrf.mxu3  ;;  %6256 = vmatpush.bf16.msra.mxu2 %v11922_v50  ;;  %v5102_v35 = vadd.f32 %v5101_v9, %v19461_v26  ;;  %6218 = vmatpush.bf16.msrb.mxu1 %v11814_v60  ;;  %v11995_v9 = vld [vmem:[#allocation2 + $0x774] sm:$0xf0] }
 0x4c5   :  { %v16901_v21 = vadd.f32 %v5213_v43, %v5175_v51  ;;  %v5176_v32 = vpop.f32.mrf.mxu2 }
 0x4c6   :  { %v5177_v12 = vadd.f32 %v5176_v32, %v5138_v47  ;;  %5266 = vmatmul.bf16.gmra.mxu0 %v19445_v24 }
 0x4c7   :  { %v5140_v7 = vpop.f32.mrf.mxu1  ;;  %5305 = vmatmul.bf16.gmra.mxu1 %v19446_v33  ;;  %v11909_v33 = vld [vmem:[#allocation2 + $0x6c0] sm:$0xf] }
 0x4c8   :  { %v5141_v17 = vadd.f32 %v5140_v7, %v5102_v35  ;;  %v11910_v51 = vor.u32 %v13186_v19, %v11909_v33  ;;  %v13218_v7 = vld [vmem:[#allocation2 + $0x7cc] sm:$0xf]  ;;  %v12043_v35 = vld [vmem:[#allocation2 + $0x7d4] sm:$0xf0] }
 0x4c9   :  { %5344 = vmatmul.bf16.gmra.mxu2 %v19447_v16  ;;  %v11717_v16 = vld [vmem:[#allocation2 + $0x540] sm:$0xf]  ;;  %v12046_v10 = vor.u32 %v13218_v7, %v12043_v35  ;;  %v11971_v35 = vld [vmem:[#allocation2 + $0x744] sm:$0xf0] }
 0x4ca   :  { %6257 = vmatpush.bf16.msra.mxu2 %v11910_v51  ;;  %v19467_v51 = vld [vmem:[#allocation40_spill] sm:$0xff] }
 0x4cb   :  { %v5103_v1 = vpop.f32.mrf.mxu0  ;;  %6449 = vmatpush.bf16.msrb.mxu3 %v12046_v10  ;;  %v13215_v10 = vld [vmem:[#allocation2 + $0x7b4] sm:$0xf] }
 0x4cc   :  { %v5215_v55 = vpop.f32.mrf.mxu3  ;;  %v5104_v59 = vadd.f32 %v5103_v1, %v19462_v27  ;;  %v11899_v1 = vld [vmem:[#allocation2 + $0x6b4] sm:$0xf0] }
 0x4cd   :  { %v16904_v30 = vadd.f32 %v5215_v55, %v5177_v12  ;;  %v5179_v48 = vpop.f32.mrf.mxu2  ;;  %v13206_v12 = vld [vmem:[#allocation2 + $0x76c] sm:$0xf] }
 0x4ce   :  { %v5180_v37 = vadd.f32 %v5179_v48, %v5141_v17  ;;  %v11998_v26 = vor.u32 %v13206_v12, %v11995_v9  ;;  %v11803_v48 = vld [vmem:[#allocation2 + $0x5f4] sm:$0xf0] }
 0x4cf   :  { %v5142_v18 = vpop.f32.mrf.mxu1 }
 0x4d0   :  { %v5143_v43 = vadd.f32 %v5142_v18, %v5104_v59  ;;  %6406 = vmatpush.bf16.msrb.mxu2 %v11998_v26 }
 0x4d1   :  { %11704 = vmatmul.msk.bf16.gmra.mxu3 %vm3917_vm3, %v19448_v44  ;;  %v11718_v44 = vor.u32 %v13138_v53, %v11717_v16 }
 0x4d3   :  { %6179 = vmatpush.bf16.msrb.mxu0 %v11718_v44  ;;  %v5106_v45 = vpop.f32.mrf.mxu0  ;;  %v11983_v44 = vld [vmem:[#allocation2 + $0x75c] sm:$0xf0] }
 0x4d4   :  { %v5218_v42 = vpop.f32.mrf.mxu3  ;;  %v5107_v40 = vadd.f32 %v5106_v45, %v19463_v36  ;;  %v11986_v60 = vor.u32 %v13203_v54, %v11983_v44 }
 0x4d5   :  { %v16912_v24 = vadd.f32 %v5218_v42, %v5180_v37  ;;  %v5181_v47 = vpop.f32.mrf.mxu2 }
 0x4d6   :  { %v5182_v39 = vadd.f32 %v5181_v47, %v5143_v43  ;;  %5271 = vmatmul.bf16.gmra.mxu0 %v19451_v25  ;;  %v19465_v25 = vld [vmem:[#allocation19_spill] sm:$0xff]  ;;  %v13155_v47 = vld [vmem:[#allocation2 + $0x5d4] sm:$0xf]  ;;  %6407 = vmatpush.bf16.msrb.mxu2 %v11986_v60 }
 0x4d7   :  { %v5145_v50 = vpop.f32.mrf.mxu1  ;;  %5310 = vmatmul.bf16.gmra.mxu1 %v19452_v22 }
 0x4d8   :  { %v5146_v55 = vadd.f32 %v5145_v50, %v5107_v40  ;;  %v11887_v50 = vld [vmem:[#allocation2 + $0x69c] sm:$0xf0] }
 0x4d9   :  { %5349 = vmatmul.bf16.gmra.mxu2 %v19453_v4  ;;  %v13158_v4 = vld [vmem:[#allocation2 + $0x5ec] sm:$0xf] }
 0x4da   :  { %v11806_v37 = vor.u32 %v13158_v4, %v11803_v48  ;;  %v19471_v48 = vld [vmem:[#allocation18_spill] sm:$0xff] }
 0x4db   :  { %v5108_v63 = vpop.f32.mrf.mxu0 }
 0x4dc   :  { %v5220_v46 = vpop.f32.mrf.mxu3  ;;  %v5109_v22 = vadd.f32 %v5108_v63, %v19465_v25  ;;  %6328 = vmatpush.bf16.msra.mxu0 %v11806_v37  ;;  %v13152_v37 = vld [vmem:[#allocation2 + $0x5bc] sm:$0xf] }
 0x4dd   :  { %v16915_v32 = vadd.f32 %v5220_v46, %v5182_v39  ;;  %v5184_v29 = vpop.f32.mrf.mxu2  ;;  %v11791_v46 = vld [vmem:[#allocation2 + $0x5dc] sm:$0xf0]  ;;  %v13179_v39 = vld [vmem:[#allocation2 + $0x694] sm:$0xf] }
 0x4de   :  { %v5185_v17 = vadd.f32 %v5184_v29, %v5146_v55  ;;  %v11794_v45 = vor.u32 %v13155_v47, %v11791_v46  ;;  %v11890_v36 = vor.u32 %v13179_v39, %v11887_v50  ;;  %v19477_v39 = vld [vmem:[#allocation37_spill] sm:$0xff] }
 0x4df   :  { %19464 = vst [vmem:[#allocation65_spill] sm:$0xff] %v16915_v32  ;;  %v5147_v8 = vpop.f32.mrf.mxu1  ;;  %v13172_v32 = vld [vmem:[#allocation2 + $0x658] sm:$0xf0] }
 0x4e0   :  { %v5148_v42 = vadd.f32 %v5147_v8, %v5109_v22  ;;  %6329 = vmatpush.bf16.msra.mxu0 %v11794_v45 }
 0x4e1   :  { %11705 = vmatmul.msk.bf16.gmra.mxu3 %vm3917_vm3, %v19454_v57  ;;  %v13182_v57 = vld [vmem:[#allocation2 + $0x6ac] sm:$0xf] }
 0x4e2   :  { %v11902_v18 = vor.u32 %v13182_v57, %v11899_v1  ;;  %v11779_v1 = vld [vmem:[#allocation2 + $0x5c4] sm:$0xf0] }
 0x4e3   :  { %v5111_v19 = vpop.f32.mrf.mxu0 }
 0x4e4   :  { %v5223_v34 = vpop.f32.mrf.mxu3  ;;  %6367 = vmatpush.bf16.msra.mxu1 %v11902_v18  ;;  %v5112_v16 = vadd.f32 %v5111_v19, %v19467_v51  ;;  %v13176_v18 = vld [vmem:[#allocation2 + $0x67c] sm:$0xf]  ;;  %v11782_v19 = vor.u32 %v13152_v37, %v11779_v1  ;;  %v19475_v51 = vld [vmem:[#allocation60_spill] sm:$0xff]  ;;  %v13194_v1 = vld [vmem:[#allocation2 + $0x70c] sm:$0xf] }
 0x4e5   :  { %v16923_v62 = vadd.f32 %v5223_v34, %v5185_v17  ;;  %v5186_v27 = vpop.f32.mrf.mxu2  ;;  %v12031_v34 = vld [vmem:[#allocation2 + $0x7bc] sm:$0xf0]  ;;  %v19484_v37 = vld [vmem:[#allocation39_spill] sm:$0xff] }
 0x4e6   :  { %v5187_v33 = vadd.f32 %v5186_v27, %v5148_v42  ;;  %5276 = vmatmul.bf16.gmra.mxu0 %v16554_v49  ;;  %v12034_v17 = vor.u32 %v13215_v10, %v12031_v34 }
 0x4e7   :  { %19466 = vst [vmem:[#allocation50_spill] sm:$0xff] %v16923_v62  ;;  %v5150_v43 = vpop.f32.mrf.mxu1  ;;  %5315 = vmatmul.bf16.gmra.mxu1 %v16557_v13  ;;  %v19469_v13 = vld [vmem:[#allocation41_spill] sm:$0xff]  ;;  %6330 = vmatpush.bf16.msra.mxu0 %v11782_v19 }
 0x4e8   :  { %v5151_v2 = vadd.f32 %v5150_v43, %v5112_v16  ;;  %6368 = vmatpush.bf16.msra.mxu1 %v11890_v36  ;;  %6450 = vmatpush.bf16.msrb.mxu3 %v12034_v17  ;;  %v11875_v43 = vld [vmem:[#allocation2 + $0x684] sm:$0xf0]  ;;  %v19476_v16 = vld [vmem:[#allocation36_spill] sm:$0xff] }
 0x4e9   :  { %5354 = vmatmul.bf16.gmra.mxu2 %v16561_v11  ;;  %v11878_v54 = vor.u32 %v13176_v18, %v11875_v43  ;;  %v13197_v36 = vld [vmem:[#allocation2 + $0x724] sm:$0xf]  ;;  %v11947_v18 = vld [vmem:[#allocation2 + $0x714] sm:$0xf0]  ;;  %v12019_v43 = vld [vmem:[#allocation2 + $0x7a4] sm:$0xf0] }
 0x4ea   :  { %v11950_v19 = vor.u32 %v13194_v1, %v11947_v18  ;;  %v19489_v18 = vld [vmem:[#allocation13_spill] sm:$0xff] }
 0x4eb   :  { %v5113_v49 = vpop.f32.mrf.mxu0 }
 0x4ec   :  { %v5225_v59 = vpop.f32.mrf.mxu3  ;;  %v5114_v7 = vadd.f32 %v5113_v49, %v19469_v13  ;;  %6369 = vmatpush.bf16.msra.mxu1 %v11878_v54  ;;  %v13149_v49 = vld [vmem:[#allocation2 + $0x5a4] sm:$0xf] }
 0x4ed   :  { %v16926_v53 = vadd.f32 %v5225_v59, %v5187_v33  ;;  %v5189_v40 = vpop.f32.mrf.mxu2  ;;  %v19473_v59 = vld [vmem:[#allocation59_spill] sm:$0xff]  ;;  %v19474_v33 = vld [vmem:[#allocation34_spill] sm:$0xff]  ;;  %v13173_v13 = vld [vmem:[#allocation2 + $0x664] sm:$0xf] }
 0x4ee   :  { %v5190_v12 = vadd.f32 %v5189_v40, %v5151_v2  ;;  %v11959_v40 = vld [vmem:[#allocation2 + $0x72c] sm:$0xf0] }
 0x4ef   :  { %19468 = vst [vmem:[#allocation52_spill] sm:$0xff] %v16926_v53  ;;  %v5152_v9 = vpop.f32.mrf.mxu1 }
 0x4f0   :  { %v5153_v26 = vadd.f32 %v5152_v9, %v5114_v7  ;;  %v11767_v9 = vld [vmem:[#allocation2 + $0x5ac] sm:$0xf0] }
 0x4f1   :  { %11706 = vmatmul.msk.bf16.gmra.mxu3 %vm3917_vm3, %v16563_v28  ;;  %v13200_v28 = vld [vmem:[#allocation2 + $0x73c] sm:$0xf]  ;;  %v11770_v7 = vor.u32 %v13149_v49, %v11767_v9 }
 0x4f2   :  { %v11974_v29 = vor.u32 %v13200_v28, %v11971_v35 }
 0x4f3   :  { %v5116_v22 = vpop.f32.mrf.mxu0  ;;  %6331 = vmatpush.bf16.msra.mxu0 %v11770_v7 }
 0x4f4   :  { %v5228_v55 = vpop.f32.mrf.mxu3  ;;  %6408 = vmatpush.bf16.msrb.mxu2 %v11974_v29  ;;  %v5117_v57 = vadd.f32 %v5116_v22, %v19471_v48  ;;  %v19482_v48 = vld [vmem:[#allocation31_spill] sm:$0xff] }
 0x4f5   :  { %v16934_v11 = vadd.f32 %v5228_v55, %v5190_v12  ;;  %v5191_v63 = vpop.f32.mrf.mxu2  ;;  %v11962_v12 = vor.u32 %v13197_v36, %v11959_v40  ;;  %v13146_v40 = vld [vmem:[#allocation2 + $0x58c] sm:$0xf] }
 0x4f6   :  { %v5192_v25 = vadd.f32 %v5191_v63, %v5153_v26  ;;  %6180 = vmatmul.bf16.vlgmr.msrb.gmra.mxu0 %v19473_v59  ;;  %v11863_v26 = vld [vmem:[#allocation2 + $0x66c] sm:$0xf0]  ;;  %v19479_v63 = vld [vmem:[#allocation9_spill] sm:$0xff] }
 0x4f7   :  { %19470 = vst [vmem:[#allocation24_spill] sm:$0xff] %v16934_v11  ;;  %v5155_v4 = vpop.f32.mrf.mxu1  ;;  %6219 = vmatmul.bf16.vlgmr.msrb.gmra.mxu1 %v19474_v33  ;;  %v11866_v28 = vor.u32 %v13173_v13, %v11863_v26  ;;  %v11851_v13 = vld [vmem:[#allocation2 + $0x654] sm:$0xf0] }
 0x4f8   :  { %v5156_v27 = vadd.f32 %v5155_v4, %v5117_v57  ;;  %6409 = vmatpush.bf16.msrb.mxu2 %v11962_v12  ;;  %v19481_v4 = vld [vmem:[#allocation27_spill] sm:$0xff]  ;;  %v19483_v57 = vld [vmem:[#allocation33_spill] sm:$0xff] }
 0x4f9   :  { %6258 = vmatmul.bf16.vlgmr.msra.gmra.mxu2 %v19475_v51  ;;  %6370 = vmatpush.bf16.msra.mxu1 %v11866_v28  ;;  %v13170_v12 = vld [vmem:[#allocation2 + $0x64c] sm:$0xf]  ;;  %v12037_v11 = vld [vmem:[#allocation2 + $0x7b8] sm:$0xf] }
 0x4fa   :  { %v11854_v7 = vor.u32 %v13170_v12, %v11851_v13 }
 0x4fb   :  { %v5118_v47 = vpop.f32.mrf.mxu0 }
 0x4fc   :  { %v5230_v8 = vpop.f32.mrf.mxu3  ;;  %v5119_v45 = vadd.f32 %v5118_v47, %v19477_v39  ;;  %6410 = vmatpush.bf16.msrb.mxu2 %v11950_v19  ;;  %v19485_v39 = vld [vmem:[#allocation11_spill] sm:$0xff] }
 0x4fd   :  { %v16937_v42 = vadd.f32 %v5230_v8, %v5192_v25  ;;  %v5194_v44 = vpop.f32.mrf.mxu2  ;;  %6371 = vmatpush.bf16.msra.mxu1 %v11854_v7 }
 0x4fe   :  { %v5195_v60 = vadd.f32 %v5194_v44, %v5156_v27  ;;  %v13212_v27 = vld [vmem:[#allocation2 + $0x79c] sm:$0xf] }
 0x4ff   :  { %19472 = vst [vmem:[#allocation53_spill] sm:$0xff] %v16937_v42  ;;  %v5157_v46 = vpop.f32.mrf.mxu1  ;;  %v12022_v54 = vor.u32 %v13212_v27, %v12019_v43  ;;  %v19490_v27 = vld [vmem:[#allocation12_spill] sm:$0xff]  ;;  %v19491_v43 = vld [vmem:[#allocation17_spill] sm:$0xff] }
 0x500   :  { %v5158_v55 = vadd.f32 %v5157_v46, %v5119_v45  ;;  %v13202_v42 = vld [vmem:[#allocation2 + $0x748] sm:$0xf0] }
 0x501   :  { %12051 = vmatmul.msk.bf16.vlgmr.msra.gmra.mxu3 %vm3917_vm3, %v19476_v16 }
 0x502   :  { %6451 = vmatpush.bf16.msrb.mxu3 %v12022_v54  ;;  %v19492_v54 = vld [vmem:[#allocation16_spill] sm:$0xff] }
 0x503   :  { %v5121_v34 = vpop.f32.mrf.mxu0 }
 0x504   :  { %v5233_v2 = vpop.f32.mrf.mxu3  ;;  %v5122_v8 = vadd.f32 %v5121_v34, %v19479_v63  ;;  %v19487_v34 = vld [vmem:[#allocation35_spill] sm:$0xff] }
 0x505   :  { %v16945_v50 = vadd.f32 %v5233_v2, %v5195_v60  ;;  %v5196_v35 = vpop.f32.mrf.mxu2 }
 0x506   :  { %v5197_v29 = vadd.f32 %v5196_v35, %v5158_v55  ;;  %6185 = vmatmul.bf16.gmra.mxu0 %v19481_v4  ;;  %v11755_v55 = vld [vmem:[#allocation2 + $0x594] sm:$0xf0] }
 0x507   :  { %19478 = vst [vmem:[#allocation67_spill] sm:$0xff] %v16945_v50  ;;  %v5160_v17 = vpop.f32.mrf.mxu1  ;;  %6224 = vmatmul.bf16.gmra.mxu1 %v19482_v48  ;;  %v11758_v9 = vor.u32 %v13146_v40, %v11755_v55  ;;  %v13184_v50 = vld [vmem:[#allocation2 + $0x6b8] sm:$0xf0] }
 0x508   :  { %v5161_v22 = vadd.f32 %v5160_v17, %v5122_v8  ;;  %v13191_v8 = vld [vmem:[#allocation2 + $0x6f4] sm:$0xf] }
 0x509   :  { %6263 = vmatmul.bf16.gmra.mxu2 %v19483_v57  ;;  %6332 = vmatpush.bf16.msra.mxu0 %v11758_v9  ;;  %v19493_v9 = vld [vmem:[#allocation43_spill] sm:$0xff] }
 0x50b   :  { %v5123_v47 = vpop.f32.mrf.mxu0 }
 0x50c   :  { %v5235_v10 = vpop.f32.mrf.mxu3  ;;  %v5124_v45 = vadd.f32 %v5123_v47, %v19485_v39 }
 0x50d   :  { %v16948_v25 = vadd.f32 %v5235_v10, %v5197_v29  ;;  %v5199_v44 = vpop.f32.mrf.mxu2 }
 0x50e   :  { %v5200_v60 = vadd.f32 %v5199_v44, %v5161_v22  ;;  %v11935_v22 = vld [vmem:[#allocation2 + $0x6fc] sm:$0xf0]  ;;  %v13143_v44 = vld [vmem:[#allocation2 + $0x574] sm:$0xf] }
 0x50f   :  { %19480 = vst [vmem:[#allocation64_spill] sm:$0xff] %v16948_v25  ;;  %v5162_v46 = vpop.f32.mrf.mxu1  ;;  %v11938_v19 = vor.u32 %v13191_v8, %v11935_v22 }
 0x510   :  { %v5163_v49 = vadd.f32 %v5162_v46, %v5124_v45  ;;  %v11839_v46 = vld [vmem:[#allocation2 + $0x63c] sm:$0xf0] }
 0x511   :  { %12052 = vmatmul.msk.bf16.gmra.mxu3 %vm3917_vm3, %v19484_v37  ;;  %6411 = vmatpush.bf16.msrb.mxu2 %v11938_v19 }
 0x513   :  { %v5252_v10 = vpop.f32.mrf.mxu0 }
 0x514   :  { %v5238_v2 = vpop.f32.mrf.mxu3  ;;  %v5253_v17 = vadd.f32 %v5252_v10, %v19487_v34  ;;  %v13209_v10 = vld [vmem:[#allocation2 + $0x784] sm:$0xf]  ;;  %v12007_v34 = vld [vmem:[#allocation2 + $0x78c] sm:$0xf0] }
 0x515   :  { %v16956_v36 = vadd.f32 %v5238_v2, %v5200_v60  ;;  %v5201_v26 = vpop.f32.mrf.mxu2  ;;  %v11743_v2 = vld [vmem:[#allocation2 + $0x57c] sm:$0xf0]  ;;  %v13167_v60 = vld [vmem:[#allocation2 + $0x634] sm:$0xf] }
 0x516   :  { %v5202_v35 = vadd.f32 %v5201_v26, %v5163_v49  ;;  %6190 = vmatmul.bf16.gmra.mxu0 %v19489_v18  ;;  %v11746_v47 = vor.u32 %v13143_v44, %v11743_v2  ;;  %v11842_v39 = vor.u32 %v13167_v60, %v11839_v46  ;;  %v19495_v2 = vld [vmem:[#allocation44_spill] sm:$0xff]  ;;  %v13140_v46 = vld [vmem:[#allocation2 + $0x55c] sm:$0xf] }
 0x517   :  { %19486 = vst [vmem:[#allocation47_spill] sm:$0xff] %v16956_v36  ;;  %v5291_v29 = vpop.f32.mrf.mxu1  ;;  %6229 = vmatmul.bf16.gmra.mxu1 %v19490_v27 }
 0x518   :  { %v5292_v1 = vadd.f32 %v5291_v29, %v5253_v17  ;;  %6333 = vmatpush.bf16.msra.mxu0 %v11746_v47  ;;  %6372 = vmatpush.bf16.msra.mxu1 %v11842_v39  ;;  %v12010_v17 = vor.u32 %v13209_v10, %v12007_v34  ;;  %v11731_v39 = vld [vmem:[#allocation2 + $0x564] sm:$0xf0] }
 0x519   :  { %6268 = vmatmul.bf16.gmra.mxu2 %v19491_v43 }
 0x51a   :  { %6452 = vmatpush.bf16.msrb.mxu3 %v12010_v17 }
 0x51b   :  { %v5254_v12 = vpop.f32.mrf.mxu0 }
 0x51c   :  { %v5240_v28 = vpop.f32.mrf.mxu3  ;;  %v5255_v13 = vadd.f32 %v5254_v12, %v19493_v9  ;;  %v19498_v12 = vld [vmem:[#allocation10_spill] sm:$0xff]  ;;  %v11827_v9 = vld [vmem:[#allocation2 + $0x624] sm:$0xf0] }
 0x51d   :  { %v16959_v63 = vadd.f32 %v5240_v28, %v5202_v35  ;;  %v5330_v45 = vpop.f32.mrf.mxu2  ;;  %v13188_v28 = vld [vmem:[#allocation2 + $0x6dc] sm:$0xf]  ;;  %v11923_v35 = vld [vmem:[#allocation2 + $0x6e4] sm:$0xf0] }
 0x51e   :  { %v5331_v55 = vadd.f32 %v5330_v45, %v5292_v1  ;;  %v11926_v29 = vor.u32 %v13188_v28, %v11923_v35  ;;  %v13164_v45 = vld [vmem:[#allocation2 + $0x61c] sm:$0xf]  ;;  %v19500_v28 = vld [vmem:[#allocation8_spill] sm:$0xff] }
 0x51f   :  { %19488 = vst [vmem:[#allocation20_spill] sm:$0xff] %v16959_v63  ;;  %v5293_v49 = vpop.f32.mrf.mxu1  ;;  %v11905_v63 = vld [vmem:[#allocation2 + $0x6b0] sm:$0xf] }
 0x520   :  { %v5294_v26 = vadd.f32 %v5293_v49, %v5255_v13  ;;  %6412 = vmatpush.bf16.msrb.mxu2 %v11926_v29  ;;  %v11734_v49 = vor.u32 %v13140_v46, %v11731_v39  ;;  %v19499_v13 = vld [vmem:[#allocation15_spill] sm:$0xff]  ;;  %v13137_v46 = vld [vmem:[#allocation2 + $0x544] sm:$0xf]  ;;  %v11719_v39 = vld [vmem:[#allocation2 + $0x54c] sm:$0xf0] }
 0x521   :  { %12053 = vmatmul.msk.bf16.gmra.mxu3 %vm3917_vm3, %v19492_v54 }
 0x522   :  { %6334 = vmatpush.bf16.msra.mxu0 %v11734_v49 }
 0x523   :  { %v5257_v1 = vpop.f32.mrf.mxu0 }
 0x524   :  { %v5369_v40 = vpop.f32.mrf.mxu3  ;;  %v5258_v60 = vadd.f32 %v5257_v1, %v19495_v2  ;;  %v13185_v1 = vld [vmem:[#allocation2 + $0x6c4] sm:$0xf] }
 0x525   :  { %v16967_v7 = vadd.f32 %v5369_v40, %v5331_v55  ;;  %v5332_v8 = vpop.f32.mrf.mxu2  ;;  %v19497_v55 = vld [vmem:[#allocation38_spill] sm:$0xff] }
 0x526   :  { %v5333_v19 = vadd.f32 %v5332_v8, %v5294_v26  ;;  %6195 = vmatmul.bf16.gmra.mxu0 %v19497_v55  ;;  %v11830_v26 = vor.u32 %v13164_v45, %v11827_v9  ;;  %v19501_v8 = vld [vmem:[#allocation62_spill] sm:$0xff] }
 0x527   :  { %19494 = vst [vmem:[#allocation48_spill] sm:$0xff] %v16967_v7  ;;  %v5296_v44 = vpop.f32.mrf.mxu1  ;;  %6234 = vmatmul.bf16.gmra.mxu1 %v19498_v12  ;;  %v11722_v7 = vor.u32 %v13137_v46, %v11719_v39  ;;  %v11815_v45 = vld [vmem:[#allocation2 + $0x60c] sm:$0xf0]  ;;  %v13220_v39 = vld [vmem:[#allocation2 + $0x7d8] sm:$0xf0] }
 0x528   :  { %v5297_v40 = vadd.f32 %v5296_v44, %v5258_v60  ;;  %6373 = vmatpush.bf16.msra.mxu1 %v11830_v26  ;;  %v11911_v44 = vld [vmem:[#allocation2 + $0x6cc] sm:$0xf0] }
 0x529   :  { %6273 = vmatmul.bf16.gmra.mxu2 %v19499_v13  ;;  %v11914_v60 = vor.u32 %v13185_v1, %v11911_v44  ;;  %6335 = vmatpush.bf16.msra.mxu0 %v11722_v7  ;;  %v16989_v7 = vld.sshfl [vmem:[#allocation1 + $0x10] sm:$0xff pattern:$0x73625140]  ;;  %v12001_v44 = vld [vmem:[#allocation2 + $0x770] sm:$0xf] }
 0x52b   :  { %v5259_v34 = vpop.f32.mrf.mxu0  ;;  %6413 = vmatpush.bf16.msrb.mxu2 %v11914_v60  ;;  %v12049_v60 = vld [vmem:[#allocation2 + $0x7d0] sm:$0xf] }
 0x52c   :  { %v5371_v22 = vpop.f32.mrf.mxu3 }
 0x52d   :  { %v16970_v47 = vadd.f32 %v5371_v22, %v5333_v19  ;;  %v5335_v35 = vpop.f32.mrf.mxu2  ;;  %v5260_v22 = vadd.f32 %v5259_v34, %v19501_v8 }
 0x52e   :  { %v5336_v29 = vadd.f32 %v5335_v35, %v5297_v40 }
 0x52f   :  { %19496 = vst [vmem:[#allocation69_spill] sm:$0xff] %v16970_v47  ;;  %v5298_v17 = vpop.f32.mrf.mxu1  ;;  %v13161_v47 = vld [vmem:[#allocation2 + $0x604] sm:$0xf] }
 0x530   :  { %v5299_v2 = vadd.f32 %v5298_v17, %v5260_v22  ;;  %v11818_v49 = vor.u32 %v13161_v47, %v11815_v45  ;;  %v16983_v17 = vld.sshfl [vmem:[#allocation1] sm:$0xff pattern:$0x73625140]  ;;  %v16985_v22 = vld.sshfl [vmem:[#allocation1 + $0x8] sm:$0xff pattern:$0x73625140]  ;;  %v12050_v45 = vor.u32 %v13220_v39, %v12049_v60 }
 0x531   :  { %12054 = vmatmul.msk.bf16.gmra.mxu3 %vm3917_vm3, %v19500_v28  ;;  %v16991_v47 = vld.sshfl [vmem:[#allocation1 + $0x18] sm:$0xff pattern:$0x73625140] }
 0x532   :  { %6374 = vmatpush.bf16.msra.mxu1 %v11818_v49  ;;  %6605 = vmatpush.bf16.msra.mxu3 %v12050_v45 }
 0x533   :  { %v5262_v35 = vpop.f32.mrf.mxu0 }
 0x534   :  { %v5374_v10 = vpop.f32.mrf.mxu3 }
 0x535   :  { %v16978_v19 = vadd.f32 %v5374_v10, %v5336_v29  ;;  %v5337_v9 = vpop.f32.mrf.mxu2  ;;  %v19503_v10 = vld [vmem:[#allocation45_spill] sm:$0xff] }
 0x536   :  { %v5338_v26 = vadd.f32 %v5337_v9, %v5299_v2  ;;  %v5263_v29 = vadd.f32 %v5262_v35, %v19503_v10  ;;  %6200 = vmatmul.bf16.gmra.mxu0 %v16983_v17  ;;  %v13208_v2 = vld [vmem:[#allocation2 + $0x778] sm:$0xf0] }
 0x537   :  { %19502 = vst [vmem:[#allocation70_spill] sm:$0xff] %v16978_v19  ;;  %v5301_v34 = vpop.f32.mrf.mxu1  ;;  %6239 = vmatmul.bf16.gmra.mxu1 %v16985_v22  ;;  %v12002_v46 = vor.u32 %v13208_v2, %v12001_v44  ;;  %v13160_v19 = vld [vmem:[#allocation2 + $0x5f8] sm:$0xf0]  ;;  %v11906_v44 = vor.u32 %v13184_v50, %v11905_v63  ;;  %v17008_v50 = vld.sshfl [vmem:[#allocation1 + $0x30] sm:$0xff pattern:$0x73625140] }
 0x538   :  { %v5302_v1 = vadd.f32 %v5301_v34, %v5263_v29  ;;  %v19505_v34 = vld [vmem:[#allocation63_spill] sm:$0xff]  ;;  %v13157_v63 = vld [vmem:[#allocation2 + $0x5e0] sm:$0xf0] }
 0x539   :  { %6278 = vmatmul.bf16.gmra.mxu2 %v16989_v7  ;;  %6523 = vmatpush.bf16.msrb.mxu1 %v11906_v44 }
 0x53a   :  { %6562 = vmatpush.bf16.msra.mxu2 %v12002_v46 }
 0x53c   :  { %v5376_v40 = vpop.f32.mrf.mxu3 }
 0x53d   :  { %v16981_v8 = vadd.f32 %v5376_v40, %v5338_v26  ;;  %v5340_v49 = vpop.f32.mrf.mxu2  ;;  %v5264_v26 = vpop.f32.mrf.mxu0 }
 0x53e   :  { %v5341_v40 = vadd.f32 %v5340_v49, %v5302_v1  ;;  %v5265_v10 = vadd.f32 %v5264_v26, %v19505_v34  ;;  %v17000_v49 = vld.sshfl [vmem:[#allocation1 + $0x20] sm:$0xff pattern:$0x73625140] }
 0x53f   :  { %19504 = vst [vmem:[#allocation71_spill] sm:$0xff] %v16981_v8  ;;  %v5303_v35 = vpop.f32.mrf.mxu1  ;;  %v11809_v8 = vld [vmem:[#allocation2 + $0x5f0] sm:$0xf]  ;;  %v11989_v26 = vld [vmem:[#allocation2 + $0x758] sm:$0xf] }
 0x540   :  { %v5304_v36 = vadd.f32 %v5303_v35, %v5265_v10  ;;  %v11810_v25 = vor.u32 %v13160_v19, %v11809_v8  ;;  %v13205_v35 = vld [vmem:[#allocation2 + $0x760] sm:$0xf0]  ;;  %v11893_v8 = vld [vmem:[#allocation2 + $0x698] sm:$0xf] }
 0x541   :  { %12055 = vmatmul.msk.bf16.gmra.mxu3 %vm3917_vm3, %v16991_v47  ;;  %v13181_v10 = vld [vmem:[#allocation2 + $0x6a0] sm:$0xf0] }
 0x542   :  { %6484 = vmatpush.bf16.msrb.mxu0 %v11810_v25  ;;  %v17010_v25 = vld.sshfl [vmem:[#allocation1 + $0x38] sm:$0xff pattern:$0x73625140]  ;;  %v11894_v44 = vor.u32 %v13181_v10, %v11893_v8 }
 0x544   :  { %v5379_v9 = vpop.f32.mrf.mxu3  ;;  %6524 = vmatpush.bf16.msrb.mxu1 %v11894_v44 }
 0x545   :  { %v16997_v29 = vadd.f32 %v5379_v9, %v5341_v40  ;;  %v5342_v2 = vpop.f32.mrf.mxu2  ;;  %v5267_v1 = vpop.f32.mrf.mxu0  ;;  %v17002_v9 = vld.sshfl [vmem:[#allocation1 + $0x28] sm:$0xff pattern:$0x73625140] }
 0x546   :  { %v5343_v46 = vadd.f32 %v5342_v2, %v5304_v36  ;;  %v5268_v45 = vadd.f32 %v5267_v1, %v16800_v5  ;;  %6205 = vmatmul.bf16.gmra.mxu0 %v17000_v49  ;;  %v11990_v36 = vor.u32 %v13205_v35, %v11989_v26  ;;  %v11797_v5 = vld [vmem:[#allocation2 + $0x5d8] sm:$0xf] }
 0x547   :  { %19506 = vst [vmem:[#allocation49_spill] sm:$0xff] %v16997_v29  ;;  %v5306_v39 = vpop.f32.mrf.mxu1  ;;  %6244 = vmatmul.bf16.gmra.mxu1 %v17002_v9  ;;  %v11798_v34 = vor.u32 %v13157_v63, %v11797_v5  ;;  %v11977_v29 = vld [vmem:[#allocation2 + $0x740] sm:$0xf] }
 0x548   :  { %v5307_v19 = vadd.f32 %v5306_v39, %v5268_v45  ;;  %6563 = vmatpush.bf16.msra.mxu2 %v11990_v36  ;;  %v19508_v45 = vld [vmem:[#allocation61_spill] sm:$0xff]  ;;  %v11978_v53 = vor.u32 %v13202_v42, %v11977_v29  ;;  %v13217_v36 = vld [vmem:[#allocation2 + $0x7c0] sm:$0xf0] }
 0x549   :  { %6283 = vmatmul.bf16.gmra.mxu2 %v17008_v50  ;;  %6485 = vmatpush.bf16.msrb.mxu0 %v11798_v34  ;;  %v12038_v5 = vor.u32 %v13217_v36, %v12037_v11 }
 0x54b   :  { %6606 = vmatpush.bf16.msra.mxu3 %v12038_v5  ;;  %v19512_v5 = vld [vmem:[#allocation21_spill] sm:$0xff] }
 0x54c   :  { %v5381_v60 = vpop.f32.mrf.mxu3  ;;  %6564 = vmatpush.bf16.msra.mxu2 %v11978_v53  ;;  %v13178_v53 = vld [vmem:[#allocation2 + $0x688] sm:$0xf0] }
 0x54d   :  { %v17004_v40 = vadd.f32 %v5381_v60, %v5343_v46  ;;  %v5345_v2 = vpop.f32.mrf.mxu2  ;;  %v5269_v1 = vpop.f32.mrf.mxu0 }
 0x54e   :  { %v5346_v46 = vadd.f32 %v5345_v2, %v5307_v19  ;;  %v5270_v26 = vadd.f32 %v5269_v1, %v19508_v45  ;;  %v19510_v2 = vld [vmem:[#allocation46_spill] sm:$0xff]  ;;  %v11881_v1 = vld [vmem:[#allocation2 + $0x680] sm:$0xf] }
 0x54f   :  { %19507 = vst [vmem:[#allocation66_spill] sm:$0xff] %v17004_v40  ;;  %v5308_v39 = vpop.f32.mrf.mxu1  ;;  %v11882_v42 = vor.u32 %v13178_v53, %v11881_v1  ;;  %v11773_v1 = vld [vmem:[#allocation2 + $0x5a8] sm:$0xf] }
 0x550   :  { %v5309_v40 = vadd.f32 %v5308_v39, %v5270_v26 }
 0x551   :  { %12056 = vmatmul.msk.bf16.gmra.mxu3 %vm3917_vm3, %v17010_v25  ;;  %6525 = vmatpush.bf16.msrb.mxu1 %v11882_v42  ;;  %v13151_v42 = vld [vmem:[#allocation2 + $0x5b0] sm:$0xf0] }
 0x554   :  { %v5384_v60 = vpop.f32.mrf.mxu3 }
 0x555   :  { %v17016_v35 = vadd.f32 %v5384_v60, %v5346_v46  ;;  %v5347_v63 = vpop.f32.mrf.mxu2  ;;  %v5272_v19 = vpop.f32.mrf.mxu0  ;;  %v11785_v60 = vld [vmem:[#allocation2 + $0x5c0] sm:$0xf]  ;;  %v13154_v46 = vld [vmem:[#allocation2 + $0x5c8] sm:$0xf0] }
 0x556   :  { %v5348_v34 = vadd.f32 %v5347_v63, %v5309_v40  ;;  %v5273_v44 = vadd.f32 %v5272_v19, %v19510_v2  ;;  %6336 = vmatmul.bf16.vlgmr.msra.gmra.mxu0 %v19473_v59  ;;  %v11786_v11 = vor.u32 %v13154_v46, %v11785_v60  ;;  %v11965_v46 = vld [vmem:[#allocation2 + $0x728] sm:$0xf] }
 0x557   :  { %19509 = vst [vmem:[#allocation72_spill] sm:$0xff] %v17016_v35  ;;  %v5311_v10 = vpop.f32.mrf.mxu1  ;;  %6375 = vmatmul.bf16.vlgmr.msra.gmra.mxu1 %v19474_v33 }
 0x558   :  { %v5312_v39 = vadd.f32 %v5311_v10, %v5273_v44  ;;  %6486 = vmatpush.bf16.msrb.mxu0 %v11786_v11 }
 0x559   :  { %6414 = vmatmul.bf16.vlgmr.msrb.gmra.mxu2 %v19475_v51 }
 0x55c   :  { %v5386_v8 = vpop.f32.mrf.mxu3 }
 0x55d   :  { %v17019_v62 = vadd.f32 %v5386_v8, %v5348_v34  ;;  %v5350_v29 = vpop.f32.mrf.mxu2  ;;  %v5274_v26 = vpop.f32.mrf.mxu0 }
 0x55e   :  { %v5351_v45 = vadd.f32 %v5350_v29, %v5312_v39  ;;  %v5275_v63 = vadd.f32 %v5274_v26, %v19512_v5  ;;  %v11869_v39 = vld [vmem:[#allocation2 + $0x668] sm:$0xf]  ;;  %v13175_v29 = vld [vmem:[#allocation2 + $0x670] sm:$0xf0]  ;;  %v11774_v26 = vor.u32 %v13151_v42, %v11773_v1 }
 0x55f   :  { %19511 = vst [vmem:[#allocation51_spill] sm:$0xff] %v17019_v62  ;;  %v5313_v36 = vpop.f32.mrf.mxu1  ;;  %v13199_v62 = vld [vmem:[#allocation2 + $0x730] sm:$0xf0] }
 0x560   :  { %v5314_v34 = vadd.f32 %v5313_v36, %v5275_v63  ;;  %v11966_v53 = vor.u32 %v13199_v62, %v11965_v46  ;;  %6487 = vmatpush.bf16.msrb.mxu0 %v11774_v26 }
 0x561   :  { %12057 = vmatmul.msk.bf16.vlgmr.msrb.gmra.mxu3 %vm3917_vm3, %v19476_v16 }
 0x562   :  { %6565 = vmatpush.bf16.msra.mxu2 %v11966_v53 }
 0x564   :  { %v5389_v40 = vpop.f32.mrf.mxu3 }
 0x565   :  { %v17027_v8 = vadd.f32 %v5389_v40, %v5351_v45  ;;  %v5352_v19 = vpop.f32.mrf.mxu2  ;;  %v5277_v44 = vpop.f32.mrf.mxu0  ;;  %v11870_v40 = vor.u32 %v13175_v29, %v11869_v39 }
 0x566   :  { %v5353_v2 = vadd.f32 %v5352_v19, %v5314_v34  ;;  %v5278_v11 = vadd.f32 %v5277_v44, %v16818_v23  ;;  %6341 = vmatmul.bf16.gmra.mxu0 %v19481_v4  ;;  %v11953_v34 = vld [vmem:[#allocation2 + $0x710] sm:$0xf]  ;;  %v13196_v19 = vld [vmem:[#allocation2 + $0x718] sm:$0xf0] }
 0x567   :  { %19513 = vst [vmem:[#allocation23_spill] sm:$0xff] %v17027_v8  ;;  %v5316_v60 = vpop.f32.mrf.mxu1  ;;  %6380 = vmatmul.bf16.gmra.mxu1 %v19482_v48  ;;  %v11954_v44 = vor.u32 %v13196_v19, %v11953_v34 }
 0x568   :  { %v5317_v45 = vadd.f32 %v5316_v60, %v5278_v11  ;;  %6526 = vmatpush.bf16.msrb.mxu1 %v11870_v40  ;;  %v13214_v60 = vld [vmem:[#allocation2 + $0x7a8] sm:$0xf0]  ;;  %v11761_v40 = vld [vmem:[#allocation2 + $0x590] sm:$0xf] }
 0x569   :  { %6419 = vmatmul.bf16.gmra.mxu2 %v19483_v57 }
 0x56a   :  { %6566 = vmatpush.bf16.msra.mxu2 %v11954_v44  ;;  %v11749_v44 = vld [vmem:[#allocation2 + $0x578] sm:$0xf] }
 0x56c   :  { %v5391_v10 = vpop.f32.mrf.mxu3 }
 0x56d   :  { %v17030_v35 = vadd.f32 %v5391_v10, %v5353_v2  ;;  %v5355_v23 = vpop.f32.mrf.mxu2  ;;  %v5279_v5 = vpop.f32.mrf.mxu0  ;;  %v12025_v10 = vld [vmem:[#allocation2 + $0x7a0] sm:$0xf] }
 0x56e   :  { %v5356_v36 = vadd.f32 %v5355_v23, %v5317_v45  ;;  %v5280_v2 = vadd.f32 %v5279_v5, %v16823_v15  ;;  %v12026_v1 = vor.u32 %v13214_v60, %v12025_v10  ;;  %v13148_v45 = vld [vmem:[#allocation2 + $0x598] sm:$0xf0]  ;;  %v11857_v23 = vld [vmem:[#allocation2 + $0x650] sm:$0xf]  ;;  %v11941_v10 = vld [vmem:[#allocation2 + $0x6f8] sm:$0xf] }
 0x56f   :  { %19514 = vst [vmem:[#allocation54_spill] sm:$0xff] %v17030_v35  ;;  %v5318_v63 = vpop.f32.mrf.mxu1  ;;  %v11762_v8 = vor.u32 %v13148_v45, %v11761_v40  ;;  %v11858_v5 = vor.u32 %v13172_v32, %v11857_v23 }
 0x570   :  { %v5319_v11 = vadd.f32 %v5318_v63, %v5280_v2  ;;  %6607 = vmatpush.bf16.msra.mxu3 %v12026_v1  ;;  %v13193_v2 = vld [vmem:[#allocation2 + $0x700] sm:$0xf0] }
 0x571   :  { %12058 = vmatmul.msk.bf16.gmra.mxu3 %vm3917_vm3, %v19484_v37  ;;  %6488 = vmatpush.bf16.msrb.mxu0 %v11762_v8  ;;  %v11942_v60 = vor.u32 %v13193_v2, %v11941_v10  ;;  %v13145_v1 = vld [vmem:[#allocation2 + $0x580] sm:$0xf0]  ;;  %v12013_v10 = vld [vmem:[#allocation2 + $0x788] sm:$0xf]  ;;  %v13211_v2 = vld [vmem:[#allocation2 + $0x790] sm:$0xf0] }
 0x572   :  { %6527 = vmatpush.bf16.msrb.mxu1 %v11858_v5  ;;  %v11929_v5 = vld [vmem:[#allocation2 + $0x6e0] sm:$0xf] }
 0x573   :  { %6567 = vmatpush.bf16.msra.mxu2 %v11942_v60 }
 0x574   :  { %v5394_v62 = vpop.f32.mrf.mxu3 }
 0x575   :  { %v17038_v46 = vadd.f32 %v5394_v62, %v5356_v36  ;;  %v5357_v53 = vpop.f32.mrf.mxu2  ;;  %v6181_v29 = vpop.f32.mrf.mxu0 }
 0x576   :  { %v5358_v39 = vadd.f32 %v5357_v53, %v5319_v11  ;;  %6346 = vmatmul.bf16.gmra.mxu0 %v19489_v18  ;;  %v11845_v11 = vld [vmem:[#allocation2 + $0x638] sm:$0xf]  ;;  %v13169_v53 = vld [vmem:[#allocation2 + $0x640] sm:$0xf0] }
 0x577   :  { %v6220_v26 = vpop.f32.mrf.mxu1  ;;  %6385 = vmatmul.bf16.gmra.mxu1 %v19490_v27 }
 0x578   :  { %v6221_v35 = vadd.f32 %v6220_v26, %v6181_v29  ;;  %v11846_v29 = vor.u32 %v13169_v53, %v11845_v11  ;;  %v11737_v53 = vld [vmem:[#allocation2 + $0x560] sm:$0xf] }
 0x579   :  { %6424 = vmatmul.bf16.gmra.mxu2 %v19491_v43 }
 0x57a   :  { %6528 = vmatpush.bf16.msrb.mxu1 %v11846_v29 }
 0x57c   :  { %v5396_v42 = vpop.f32.mrf.mxu3 }
 0x57d   :  { %v17040_v15 = vadd.f32 %v5396_v42, %v5358_v39  ;;  %v6259_v62 = vpop.f32.mrf.mxu2  ;;  %v6183_v34 = vpop.f32.mrf.mxu0  ;;  %v11750_v39 = vor.u32 %v13145_v1, %v11749_v44 }
 0x57e   :  { %v6260_v63 = vadd.f32 %v6259_v62, %v6221_v35  ;;  %v13190_v62 = vld [vmem:[#allocation2 + $0x6e8] sm:$0xf0] }
 0x57f   :  { %v6222_v19 = vpop.f32.mrf.mxu1  ;;  %6489 = vmatpush.bf16.msrb.mxu0 %v11750_v39 }
 0x580   :  { %v6223_v32 = vadd.f32 %v6222_v19, %v6183_v34  ;;  %v11930_v19 = vor.u32 %v13190_v62, %v11929_v5 }
 0x581   :  { %12059 = vmatmul.msk.bf16.gmra.mxu3 %vm3917_vm3, %v19492_v54 }
 0x582   :  { %6568 = vmatpush.bf16.msra.mxu2 %v11930_v19 }
 0x584   :  { %v6298_v36 = vpop.f32.mrf.mxu3 }
 0x585   :  { %v6299_v42 = vadd.f32 %v6298_v36, %v6260_v63  ;;  %v6261_v35 = vpop.f32.mrf.mxu2  ;;  %v6186_v45 = vpop.f32.mrf.mxu0  ;;  %v12014_v63 = vor.u32 %v13211_v2, %v12013_v10  ;;  %v11917_v10 = vld [vmem:[#allocation2 + $0x6c8] sm:$0xf]  ;;  %v13187_v2 = vld [vmem:[#allocation2 + $0x6d0] sm:$0xf0] }
 0x586   :  { %v6262_v40 = vadd.f32 %v6261_v35, %v6223_v32  ;;  %6351 = vmatmul.bf16.gmra.mxu0 %v19497_v55  ;;  %v11833_v35 = vld [vmem:[#allocation2 + $0x620] sm:$0xf] }
 0x587   :  { %v17048_v8 = vadd.f32 %v6299_v42, %v16832_v31  ;;  %v6225_v23 = vpop.f32.mrf.mxu1  ;;  %6390 = vmatmul.bf16.gmra.mxu1 %v19498_v12  ;;  %6608 = vmatpush.bf16.msra.mxu3 %v12014_v63  ;;  %v13142_v42 = vld [vmem:[#allocation2 + $0x568] sm:$0xf0]  ;;  %v11918_v63 = vor.u32 %v13187_v2, %v11917_v10 }
 0x588   :  { %v6226_v34 = vadd.f32 %v6225_v23, %v6186_v45  ;;  %v11738_v29 = vor.u32 %v13142_v42, %v11737_v53 }
 0x589   :  { %6429 = vmatmul.bf16.gmra.mxu2 %v19499_v13 }
 0x58a   :  { %6490 = vmatpush.bf16.msrb.mxu0 %v11738_v29  ;;  %6569 = vmatpush.bf16.msra.mxu2 %v11918_v63 }
 0x58c   :  { %v6300_v26 = vpop.f32.mrf.mxu3 }
 0x58d   :  { %v6301_v36 = vadd.f32 %v6300_v26, %v6262_v40  ;;  %v6264_v44 = vpop.f32.mrf.mxu2  ;;  %v6188_v1 = vpop.f32.mrf.mxu0  ;;  %v13166_v26 = vld [vmem:[#allocation2 + $0x628] sm:$0xf0] }
 0x58e   :  { %v6265_v60 = vadd.f32 %v6264_v44, %v6226_v34  ;;  %v11834_v40 = vor.u32 %v13166_v26, %v11833_v35  ;;  %v11725_v44 = vld [vmem:[#allocation2 + $0x548] sm:$0xf] }
 0x58f   :  { %v17053_v31 = vadd.f32 %v6301_v36, %v16837_v38  ;;  %v6227_v11 = vpop.f32.mrf.mxu1 }
 0x590   :  { %v6228_v39 = vadd.f32 %v6227_v11, %v6188_v1  ;;  %6529 = vmatpush.bf16.msrb.mxu1 %v11834_v40  ;;  %v13139_v1 = vld [vmem:[#allocation2 + $0x550] sm:$0xf0]  ;;  %v11821_v11 = vld [vmem:[#allocation2 + $0x608] sm:$0xf] }
 0x591   :  { %12060 = vmatmul.msk.bf16.gmra.mxu3 %vm3917_vm3, %v19500_v28 }
 0x594   :  { %v6303_v32 = vpop.f32.mrf.mxu3 }
 0x595   :  { %v6304_v38 = vadd.f32 %v6303_v32, %v6265_v60  ;;  %v6266_v23 = vpop.f32.mrf.mxu2  ;;  %v6191_v19 = vpop.f32.mrf.mxu0  ;;  %v11726_v32 = vor.u32 %v13139_v1, %v11725_v44  ;;  %v13163_v60 = vld [vmem:[#allocation2 + $0x610] sm:$0xf0] }
 0x596   :  { %v6267_v62 = vadd.f32 %v6266_v23, %v6228_v39  ;;  %6356 = vmatmul.bf16.gmra.mxu0 %v16983_v17 }
 0x597   :  { %v17059_v45 = vadd.f32 %v6304_v38, %v16846_v52  ;;  %v6230_v34 = vpop.f32.mrf.mxu1  ;;  %6395 = vmatmul.bf16.gmra.mxu1 %v16985_v22  ;;  %v11822_v52 = vor.u32 %v13163_v60, %v11821_v11  ;;  %6491 = vmatpush.bf16.msrb.mxu0 %v11726_v32 }
 0x598   :  { %v6231_v36 = vadd.f32 %v6230_v34, %v6191_v19 }
 0x599   :  { %6434 = vmatmul.bf16.gmra.mxu2 %v16989_v7  ;;  %6530 = vmatpush.bf16.msrb.mxu1 %v11822_v52 }
 0x59c   :  { %v6305_v5 = vpop.f32.mrf.mxu3 }
 0x59d   :  { %v6306_v53 = vadd.f32 %v6305_v5, %v6267_v62  ;;  %v6269_v39 = vpop.f32.mrf.mxu2  ;;  %v6193_v26 = vpop.f32.mrf.mxu0 }
 0x59e   :  { %v6270_v35 = vadd.f32 %v6269_v39, %v6231_v36 }
 0x59f   :  { %v17064_v42 = vadd.f32 %v6306_v53, %v16849_v58  ;;  %v6232_v38 = vpop.f32.mrf.mxu1 }
 0x5a0   :  { %v6233_v40 = vadd.f32 %v6232_v38, %v6193_v26 }
 0x5a1   :  { %12061 = vmatmul.msk.bf16.gmra.mxu3 %vm3917_vm3, %v16991_v47 }
 0x5a4   :  { %v6308_v29 = vpop.f32.mrf.mxu3 }
 0x5a5   :  { %v6309_v23 = vadd.f32 %v6308_v29, %v6270_v35  ;;  %v6271_v58 = vpop.f32.mrf.mxu2  ;;  %v6196_v34 = vpop.f32.mrf.mxu0 }
 0x5a6   :  { %v6272_v19 = vadd.f32 %v6271_v58, %v6233_v40  ;;  %6361 = vmatmul.bf16.gmra.mxu0 %v17000_v49 }
 0x5a7   :  { %v17070_v5 = vadd.f32 %v6309_v23, %v16857_v14  ;;  %v6235_v10 = vpop.f32.mrf.mxu1  ;;  %6400 = vmatmul.bf16.gmra.mxu1 %v17002_v9 }
 0x5a8   :  { %v6236_v2 = vadd.f32 %v6235_v10, %v6196_v34 }
 0x5a9   :  { %6439 = vmatmul.bf16.gmra.mxu2 %v17008_v50 }
 0x5ac   :  { %v6310_v62 = vpop.f32.mrf.mxu3 }
 0x5ad   :  { %v6311_v44 = vadd.f32 %v6310_v62, %v6272_v19  ;;  %v6274_v14 = vpop.f32.mrf.mxu2  ;;  %v6198_v11 = vpop.f32.mrf.mxu0 }
 0x5ae   :  { %v6275_v1 = vadd.f32 %v6274_v14, %v6236_v2 }
 0x5af   :  { %v17075_v36 = vadd.f32 %v6311_v44, %v16860_v41  ;;  %v6237_v53 = vpop.f32.mrf.mxu1 }
 0x5b0   :  { %v6238_v32 = vadd.f32 %v6237_v53, %v6198_v11 }
 0x5b1   :  { %12062 = vmatmul.msk.bf16.gmra.mxu3 %vm3917_vm3, %v17010_v25 }
 0x5b4   :  { %v6313_v63 = vpop.f32.mrf.mxu3 }
 0x5b5   :  { %v6314_v60 = vadd.f32 %v6313_v63, %v6275_v1  ;;  %v6276_v39 = vpop.f32.mrf.mxu2  ;;  %v6201_v41 = vpop.f32.mrf.mxu0 }
 0x5b6   :  { %v6277_v35 = vadd.f32 %v6276_v39, %v6238_v32  ;;  %6492 = vmatmul.bf16.vlgmr.msrb.gmra.mxu0 %v19473_v59 }
 0x5b7   :  { %v17081_v52 = vadd.f32 %v6314_v60, %v16868_v20  ;;  %v6240_v26 = vpop.f32.mrf.mxu1  ;;  %6531 = vmatmul.bf16.vlgmr.msrb.gmra.mxu1 %v19474_v33 }
 0x5b8   :  { %v6241_v38 = vadd.f32 %v6240_v26, %v6201_v41 }
 0x5b9   :  { %6570 = vmatmul.bf16.vlgmr.msra.gmra.mxu2 %v19475_v51 }
 0x5bc   :  { %v6315_v29 = vpop.f32.mrf.mxu3 }
 0x5bd   :  { %v6316_v40 = vadd.f32 %v6315_v29, %v6277_v35  ;;  %v6279_v20 = vpop.f32.mrf.mxu2  ;;  %v6203_v19 = vpop.f32.mrf.mxu0 }
 0x5be   :  { %v6280_v62 = vadd.f32 %v6279_v20, %v6241_v38 }
 0x5bf   :  { %v17086_v23 = vadd.f32 %v6316_v40, %v16871_v61  ;;  %v6242_v34 = vpop.f32.mrf.mxu1 }
 0x5c0   :  { %v6243_v10 = vadd.f32 %v6242_v34, %v6203_v19 }
 0x5c1   :  { %12063 = vmatmul.msk.bf16.vlgmr.msra.gmra.mxu3 %vm3917_vm3, %v19476_v16 }
 0x5c4   :  { %v6318_v58 = vpop.f32.mrf.mxu3 }
 0x5c5   :  { %v6319_v2 = vadd.f32 %v6318_v58, %v6280_v62  ;;  %v6281_v59 = vpop.f32.mrf.mxu2  ;;  %v6206_v61 = vpop.f32.mrf.mxu0 }
 0x5c6   :  { %v6282_v14 = vadd.f32 %v6281_v59, %v6243_v10  ;;  %6497 = vmatmul.bf16.gmra.mxu0 %v19481_v4 }
 0x5c7   :  { %v17092_v44 = vadd.f32 %v6319_v2, %v16879_v3  ;;  %v6245_v63 = vpop.f32.mrf.mxu1  ;;  %6536 = vmatmul.bf16.gmra.mxu1 %v19482_v48 }
 0x5c8   :  { %v6246_v1 = vadd.f32 %v6245_v63, %v6206_v61 }
 0x5c9   :  { %6575 = vmatmul.bf16.gmra.mxu2 %v19483_v57 }
 0x5cc   :  { %v6320_v33 = vpop.f32.mrf.mxu3 }
 0x5cd   :  { %v6321_v51 = vadd.f32 %v6320_v33, %v6282_v14  ;;  %v6284_v3 = vpop.f32.mrf.mxu2  ;;  %v6208_v32 = vpop.f32.mrf.mxu0 }
 0x5ce   :  { %v6285_v53 = vadd.f32 %v6284_v3, %v6246_v1 }
 0x5cf   :  { %v17097_v16 = vadd.f32 %v6321_v51, %v16882_v56  ;;  %v6247_v60 = vpop.f32.mrf.mxu1 }
 0x5d0   :  { %v6248_v39 = vadd.f32 %v6247_v60, %v6208_v32 }
 0x5d1   :  { %12064 = vmatmul.msk.bf16.gmra.mxu3 %vm3917_vm3, %v19484_v37  ;;  %v17116_v37 = vld [vmem:[%s18811_s4] sm:$0x7]  ;;  %s13528_s4 = smov 96  }
 0x5d4   :  { %v6323_v11 = vpop.f32.mrf.mxu3 }
 0x5d5   :  { %v6324_v29 = vadd.f32 %v6323_v11, %v6285_v53  ;;  %v6286_v4 = vpop.f32.mrf.mxu2  ;;  %v6337_v56 = vpop.f32.mrf.mxu0 }
 0x5d6   :  { %v6287_v41 = vadd.f32 %v6286_v4, %v6248_v39  ;;  %6502 = vmatmul.bf16.gmra.mxu0 %v19489_v18 }
 0x5d7   :  { %v17103_v35 = vadd.f32 %v6324_v29, %v16890_v6  ;;  %v6376_v26 = vpop.f32.mrf.mxu1  ;;  %6541 = vmatmul.bf16.gmra.mxu1 %v19490_v27  ;;  %v17119_v27 = vperm.slane %v17116_v37, 0 }
 0x5d8   :  { %v6377_v6 = vadd.f32 %v6376_v26, %v6337_v56 }
 0x5d9   :  { %6580 = vmatmul.bf16.gmra.mxu2 %v19491_v43  ;;  %v17122_v43 = vperm.slane %v17116_v37, 1  ;;  %v6684_v19 = vadd.f32 %v17119_v27, %v17048_v8 }
 0x5db   :  { %v6720_v1 = vmax.f32 %v6684_v19, 0.0 }
 0x5dc   :  { %v6325_v48 = vpop.f32.mrf.mxu3 }
 0x5dd   :  { %v6326_v38 = vadd.f32 %v6325_v48, %v6287_v41  ;;  %v6415_v40 = vpop.f32.mrf.mxu2  ;;  %v6339_v18 = vpop.f32.mrf.mxu0 }
 0x5de   :  { %v6416_v58 = vadd.f32 %v6415_v40, %v6377_v6 }
 0x5df   :  { %v17108_v57 = vadd.f32 %v6326_v38, %v16893_v0  ;;  %v6378_v62 = vpop.f32.mrf.mxu1 }
 0x5e0   :  { %v6379_v10 = vadd.f32 %v6378_v62, %v6339_v18 }
 0x5e1   :  { %12065 = vmatmul.msk.bf16.gmra.mxu3 %vm3917_vm3, %v19492_v54 }
 0x5e4   :  { %v6454_v20 = vpop.f32.mrf.mxu3 }
 0x5e5   :  { %v6455_v0 = vadd.f32 %v6454_v20, %v6416_v58  ;;  %v6417_v2 = vpop.f32.mrf.mxu2  ;;  %v6342_v61 = vpop.f32.mrf.mxu0 }
 0x5e6   :  { %v6418_v14 = vadd.f32 %v6417_v2, %v6379_v10  ;;  %6507 = vmatmul.bf16.gmra.mxu0 %v19497_v55 }
 0x5e7   :  { %v6641_v54 = vadd.f32 %v6455_v0, %v16901_v21  ;;  %v6381_v63 = vpop.f32.mrf.mxu1  ;;  %6546 = vmatmul.bf16.gmra.mxu1 %v19498_v12  ;;  %v6687_v12 = vadd.f32 %v17119_v27, %v17053_v31 }
 0x5e9   :  { %v6685_v34 = vadd.f32 %v17122_v43, %v6641_v54  ;;  %6585 = vmatmul.bf16.gmra.mxu2 %v19499_v13  ;;  %v6723_v40 = vmax.f32 %v6687_v12, 0.0 }
 0x5eb   :  { %v6721_v33 = vmax.f32 %v6685_v34, 0.0 }
 0x5ec   :  { %v6456_v59 = vpop.f32.mrf.mxu3 }
 0x5ed   :  { %v6792_v51 = vrot.slane %v6721_v33, 4  ;;  %v6457_v3 = vadd.f32 %v6456_v59, %v6418_v14  ;;  %v6344_v26 = vpop.f32.mrf.mxu0  ;;  %v6690_v59 = vadd.f32 %v17119_v27, %v17059_v45 }
 0x5ef   :  { %v6805_v21 = vsel %vm2178_vm8, %v6792_v51, %v6720_v1  ;;  %v6644_v8 = vadd.f32 %v6457_v3, %v16904_v30  ;;  %v6804_v11 = vsel %vm2178_vm8, %v6720_v1, %v6792_v51  ;;  %v6382_v30 = vadd.f32 %v6381_v63, %v6342_v61  ;;  %v6383_v38 = vpop.f32.mrf.mxu1 }
 0x5f0   :  { %v6806_v53 = vrot.slane %v6805_v21, 4  ;;  %v12069_v39 = vrot.slane %v6804_v11, 9  ;;  %v12085_v4 = vrot.slane %v6804_v11, 10  ;;  %v6384_v14 = vadd.f32 %v6383_v38, %v6344_v26 }
 0x5f1   :  { %12066 = vmatmul.msk.bf16.gmra.mxu3 %vm3917_vm3, %v19500_v28  ;;  %v6688_v32 = vadd.f32 %v17122_v43, %v6644_v8  ;;  %v6420_v28 = vpop.f32.mrf.mxu2 }
 0x5f2   :  { %v6893_v29 = vrot.slane %v6806_v53, 5  ;;  %v7118_v48 = vrot.slane %v6806_v53, 6  ;;  %v6421_v56 = vadd.f32 %v6420_v28, %v6382_v30 }
 0x5f3   :  { %v6724_v41 = vmax.f32 %v6688_v32, 0.0  ;;  %v6726_v32 = vmax.f32 %v6690_v59, 0.0 }
 0x5f4   :  { %v6459_v60 = vpop.f32.mrf.mxu3  ;;  %v6894_v31 = vsel %vm17145_vm15, %v12069_v39, %v6893_v29  ;;  %v7119_v6 = vsel %vm17138_vm14, %v12085_v4, %v7118_v48  ;;  %v6899_v34 = vrot.slane %v6893_v29, 4  ;;  %v7124_v1 = vrot.slane %v7118_v48, 4  ;;  %v19519_v4 = vld [vmem:[#allocation65_spill] sm:$0xff] }
 0x5f5   :  { %v6793_v20 = vrot.slane %v6724_v41, 4  ;;  %v6460_v58 = vadd.f32 %v6459_v60, %v6421_v56  ;;  %v7067_v18 = vmax.f32 %v6804_v11, %v6894_v31  ;;  %v6347_v21 = vpop.f32.mrf.mxu0  ;;  %v6693_v39 = vadd.f32 %v17119_v27, %v17064_v42 }
 0x5f6   :  { %6512 = vmatmul.bf16.gmra.mxu0 %v16983_v17 }
 0x5f7   :  { %v17154_v62 = vsel %vm2178_vm8, %v6723_v40, %v6793_v20  ;;  %v6647_v0 = vadd.f32 %v6460_v58, %v16912_v24  ;;  %v17157_v54 = vmax.f32 %v7067_v18, %v7119_v6  ;;  %v6809_v19 = vsel %vm2178_vm8, %v6793_v20, %v6723_v40  ;;  %v6386_v8 = vpop.f32.mrf.mxu1  ;;  %6551 = vmatmul.bf16.gmra.mxu1 %v16985_v22 }
 0x5f8   :  { %v18940_v10 = vrot.slane %v17154_v62, 5  ;;  %v18938_v2 = vrot.slane %v17154_v62, 6  ;;  %v6810_v11 = vrot.slane %v6809_v19, 4  ;;  %v6387_v38 = vadd.f32 %v6386_v8, %v6347_v21  ;;  %v19521_v8 = vld [vmem:[#allocation50_spill] sm:$0xff] }
 0x5f9   :  { %v6691_v33 = vadd.f32 %v17122_v43, %v6647_v0  ;;  %7388 = vrot.lane.b32.xlu2 %v17157_v54, %s13528_s4  ;;  %v6422_v24 = vpop.f32.mrf.mxu2  ;;  %6590 = vmatmul.bf16.gmra.mxu2 %v16989_v7 }
 0x5fa   :  { %v6901_v63 = vsel %vm17145_vm15, %v6899_v34, %v18940_v10  ;;  %v6423_v3 = vadd.f32 %v6422_v24, %v6384_v14  ;;  %v7126_v12 = vsel %vm17138_vm14, %v7124_v1, %v18938_v2  ;;  %v12071_v41 = vrot.slane %v6810_v11, 9 }
 0x5fb   :  { %v6727_v51 = vmax.f32 %v6691_v33, 0.0  ;;  %v7069_v45 = vmax.f32 %v6806_v53, %v6901_v63  ;;  %v12087_v22 = vrot.slane %v6810_v11, 10  ;;  %v6729_v33 = vmax.f32 %v6693_v39, 0.0 }
 0x5fc   :  { %v6461_v61 = vpop.f32.mrf.mxu3 }
 0x5fd   :  { %v6794_v30 = vrot.slane %v6727_v51, 4  ;;  %v6462_v28 = vadd.f32 %v6461_v61, %v6423_v3  ;;  %v17175_v60 = vmax.f32 %v7069_v45, %v7126_v12  ;;  %v6349_v0 = vpop.f32.mrf.mxu0 }
 0x5ff   :  { %v6812_v53 = vsel %vm2178_vm8, %v6726_v32, %v6794_v30  ;;  %v6813_v29 = vsel %vm2178_vm8, %v6794_v30, %v6726_v32  ;;  %v6650_v48 = vadd.f32 %v6462_v28, %v19519_v4  ;;  %7681 = vrot.lane.b32.xlu1 %v17175_v60, %s13526_s21  ;;  %7392 = vrot.lane.b32.xlu0 %v17175_v60, %s13528_s4  ;;  %v6388_v19 = vpop.f32.mrf.mxu1 }
 0x600   :  { %v17187_v56 = vrot.slane %v6813_v29, 4  ;;  %v6909_v17 = vrot.slane %v6812_v53, 5  ;;  %v7134_v42 = vrot.slane %v6812_v53, 6  ;;  %v6696_v30 = vadd.f32 %v17119_v27, %v17070_v5 }
 0x601   :  { %12067 = vmatmul.msk.bf16.gmra.mxu3 %vm3917_vm3, %v16991_v47  ;;  %v6694_v26 = vadd.f32 %v17122_v43, %v6650_v48  ;;  %7677 = vrot.lane.b32.xlu2 %v17157_v54, %s13526_s21  ;;  %v6425_v7 = vpop.f32.mrf.mxu2  ;;  %v6389_v39 = vadd.f32 %v6388_v19, %v6349_v0  ;;  %v19522_v19 = vld [vmem:[#allocation52_spill] sm:$0xff] }
 0x602   :  { %v6910_v31 = vsel %vm17145_vm15, %v12071_v41, %v6909_v17  ;;  %v7135_v6 = vsel %vm17138_vm14, %v12087_v22, %v7134_v42  ;;  %v6915_v40 = vrot.slane %v6909_v17, 4  ;;  %v6916_v20 = vrot.slane %v17187_v56, 5 }
 0x603   :  { %v6730_v58 = vmax.f32 %v6694_v26, 0.0  ;;  %v6426_v18 = vadd.f32 %v6425_v7, %v6387_v38  ;;  %v7073_v34 = vmax.f32 %v6810_v11, %v6910_v31  ;;  %v7140_v59 = vrot.slane %v7134_v42, 4 }
 0x604   :  { %v6464_v47 = vpop.f32.mrf.mxu3  ;;  %v6917_v14 = vsel %vm17145_vm15, %v6915_v40, %v6916_v20  ;;  %v7141_v24 = vrot.slane %v17187_v56, 6 }
 0x605   :  { %v6795_v61 = vrot.slane %v6730_v58, 4  ;;  %v6465_v63 = vadd.f32 %v6464_v47, %v6426_v18  ;;  %v17204_v1 = vmax.f32 %v7073_v34, %v7135_v6  ;;  %v7075_v51 = vmax.f32 %v6812_v53, %v6917_v14  ;;  %v6352_v26 = vpop.f32.mrf.mxu0 }
 0x606   :  { %v7142_v3 = vsel %vm17138_vm14, %v7140_v59, %v7141_v24  ;;  %v6732_v47 = vmax.f32 %v6696_v30, 0.0  ;;  %6517 = vmatmul.bf16.gmra.mxu0 %v17000_v49  ;;  %v6921_v58 = vrot.slane %v6916_v20, 4 }
 0x607   :  { %19520 = vst [vmem:[#allocation68_spill] sm:$0xff] %v17204_v1  ;;  %v6817_v21 = vsel %vm2178_vm8, %v6795_v61, %v6729_v33  ;;  %v6653_v45 = vadd.f32 %v6465_v63, %v19521_v8  ;;  %v17212_v11 = vmax.f32 %v7075_v51, %v7142_v3  ;;  %v6816_v12 = vsel %vm2178_vm8, %v6729_v33, %v6795_v61  ;;  %v6391_v38 = vpop.f32.mrf.mxu1 }
 0x608   :  { %v6818_v32 = vrot.slane %v6817_v21, 4  ;;  %7400 = vrot.lane.b32.xlu0 %v17204_v1, %s13528_s4  ;;  %v12073_v4 = vrot.slane %v6816_v12, 9  ;;  %v12089_v41 = vrot.slane %v6816_v12, 10  ;;  %6556 = vmatmul.bf16.gmra.mxu1 %v17002_v9  ;;  %v6699_v33 = vadd.f32 %v17119_v27, %v17075_v36 }
 0x609   :  { %v6697_v28 = vadd.f32 %v17122_v43, %v6653_v45  ;;  %7404 = vrot.lane.b32.xlu2 %v17212_v11, %s13528_s4  ;;  %v6427_v53 = vpop.f32.mrf.mxu2  ;;  %6595 = vmatmul.bf16.gmra.mxu2 %v17008_v50  ;;  %v6392_v61 = vadd.f32 %v6391_v38, %v6352_v26  ;;  %v7077_v3 = vmax.f32 %v17187_v56, %v6921_v58 }
 0x60a   :  { %v6925_v48 = vrot.slane %v6818_v32, 5  ;;  %v7150_v17 = vrot.slane %v6818_v32, 6  ;;  %v6428_v42 = vadd.f32 %v6427_v53, %v6389_v39  ;;  %v7146_v39 = vrot.slane %v7141_v24, 4 }
 0x60b   :  { %v6733_v22 = vmax.f32 %v6697_v28, 0.0  ;;  %v6735_v53 = vmax.f32 %v6699_v33, 0.0 }
 0x60c   :  { %v6466_v29 = vpop.f32.mrf.mxu3  ;;  %v6926_v7 = vsel %vm17145_vm15, %v12073_v4, %v6925_v48  ;;  %v7151_v5 = vsel %vm17138_vm14, %v12089_v41, %v7150_v17  ;;  %v6931_v49 = vrot.slane %v6925_v48, 4  ;;  %v7156_v51 = vrot.slane %v7150_v17, 4 }
 0x60d   :  { %v6796_v31 = vrot.slane %v6733_v22, 4  ;;  %v6467_v6 = vadd.f32 %v6466_v29, %v6428_v42  ;;  %v7079_v40 = vmax.f32 %v6816_v12, %v6926_v7  ;;  %v6354_v45 = vpop.f32.mrf.mxu0  ;;  %v6702_v41 = vadd.f32 %v17119_v27, %v17081_v52  ;;  %v19525_v42 = vld [vmem:[#allocation24_spill] sm:$0xff] }
 0x60e   :  { %v17264_v17 = vmax.f32 %v7077_v3, %v7146_v39 }
 0x60f   :  { %v17229_v18 = vsel %vm2178_vm8, %v6732_v47, %v6796_v31  ;;  %v6821_v0 = vsel %vm2178_vm8, %v6796_v31, %v6732_v47  ;;  %v6656_v34 = vadd.f32 %v6467_v6, %v19522_v19  ;;  %v17238_v59 = vmax.f32 %v7079_v40, %v7151_v5  ;;  %v6393_v12 = vpop.f32.mrf.mxu1 }
 0x610   :  { %7689 = vrot.lane.b32.xlu0 %v17204_v1, %s13526_s21  ;;  %v18935_v9 = vrot.slane %v17229_v18, 5  ;;  %v18933_v20 = vrot.slane %v17229_v18, 6  ;;  %v6822_v36 = vrot.slane %v6821_v0, 4  ;;  %19524 = vst [vmem:[#allocation74_spill] sm:$0xff] %v17264_v17  ;;  %v6394_v52 = vadd.f32 %v6393_v12, %v6354_v45 }
 0x611   :  { %12068 = vmatmul.msk.bf16.gmra.mxu3 %vm3917_vm3, %v17010_v25  ;;  %v6700_v14 = vadd.f32 %v17122_v43, %v6656_v34  ;;  %7693 = vrot.lane.b32.xlu2 %v17212_v11, %s13526_s21  ;;  %v6430_v50 = vpop.f32.mrf.mxu2 }
 0x612   :  { %7412 = vrot.lane.b32.xlu1 %v17238_v59, %s13528_s4  ;;  %v6933_v63 = vsel %vm17145_vm15, %v6931_v49, %v18935_v9  ;;  %v6431_v8 = vadd.f32 %v6430_v50, %v6392_v61  ;;  %v7158_v28 = vsel %vm17138_vm14, %v7156_v51, %v18933_v20  ;;  %v12075_v38 = vrot.slane %v6822_v36, 9 }
 0x613   :  { %v6736_v21 = vmax.f32 %v6700_v14, 0.0  ;;  %v7081_v30 = vmax.f32 %v6818_v32, %v6933_v63  ;;  %v12091_v24 = vrot.slane %v6822_v36, 10 }
 0x614   :  { %v6469_v25 = vpop.f32.mrf.mxu3 }
 0x615   :  { %v6797_v29 = vrot.slane %v6736_v21, 4  ;;  %v6470_v4 = vadd.f32 %v6469_v25, %v6431_v8  ;;  %v17260_v48 = vmax.f32 %v7081_v30, %v7158_v28  ;;  %v6357_v33 = vpop.f32.mrf.mxu0  ;;  %v6738_v25 = vmax.f32 %v6702_v41, 0.0  ;;  %v19527_v30 = vld [vmem:[#allocation53_spill] sm:$0xff] }
 0x617   :  { %19523 = vst [vmem:[#allocation55_spill] sm:$0xff] %v17260_v48  ;;  %v6824_v32 = vsel %vm2178_vm8, %v6735_v53, %v6797_v29  ;;  %v6825_v22 = vsel %vm2178_vm8, %v6797_v29, %v6735_v53  ;;  %v6659_v26 = vadd.f32 %v6470_v4, %v19525_v42  ;;  %v6396_v14 = vpop.f32.mrf.mxu1  ;;  %v6705_v4 = vadd.f32 %v17119_v27, %v17086_v23 }
 0x618   :  { %v17269_v7 = vrot.slane %v6825_v22, 4  ;;  %7416 = vrot.lane.b32.xlu0 %v17260_v48, %s13528_s4  ;;  %v6941_v56 = vrot.slane %v6824_v32, 5  ;;  %v7166_v5 = vrot.slane %v6824_v32, 6 }
 0x619   :  { %v6703_v47 = vadd.f32 %v17122_v43, %v6659_v26  ;;  %7408 = vrot.lane.b32.xlu2 %v17264_v17, %s13528_s4  ;;  %v6432_v31 = vpop.f32.mrf.mxu2 }
 0x61a   :  { %7701 = vrot.lane.b32.xlu1 %v17238_v59, %s13526_s21  ;;  %v6942_v40 = vsel %vm17145_vm15, %v12075_v38, %v6941_v56  ;;  %v7167_v58 = vsel %vm17138_vm14, %v12091_v24, %v7166_v5  ;;  %v6947_v0 = vrot.slane %v6941_v56, 4  ;;  %v18944_v19 = vrot.slane %v17269_v7, 5 }
 0x61b   :  { %v6739_v34 = vmax.f32 %v6703_v47, 0.0  ;;  %v6433_v49 = vadd.f32 %v6432_v31, %v6394_v52  ;;  %v7085_v61 = vmax.f32 %v6822_v36, %v6942_v40  ;;  %v7172_v50 = vrot.slane %v7166_v5, 4 }
 0x61c   :  { %v6471_v6 = vpop.f32.mrf.mxu3  ;;  %v6949_v63 = vsel %vm17145_vm15, %v6947_v0, %v18944_v19  ;;  %v18942_v51 = vrot.slane %v17269_v7, 6  ;;  %v6741_v40 = vmax.f32 %v6705_v4, 0.0 }
 0x61d   :  { %v6798_v3 = vrot.slane %v6739_v34, 4  ;;  %v6472_v21 = vadd.f32 %v6471_v6, %v6433_v49  ;;  %v17288_v8 = vmax.f32 %v7085_v61, %v7167_v58  ;;  %v7087_v45 = vmax.f32 %v6824_v32, %v6949_v63  ;;  %v6359_v52 = vpop.f32.mrf.mxu0 }
 0x61e   :  { %v7174_v12 = vsel %vm17138_vm14, %v7172_v50, %v18942_v51  ;;  %v6397_v32 = vadd.f32 %v6396_v14, %v6357_v33  ;;  %v19529_v33 = vld [vmem:[#allocation67_spill] sm:$0xff] }
 0x61f   :  { %19526 = vst [vmem:[#allocation75_spill] sm:$0xff] %v17288_v8  ;;  %v6829_v36 = vsel %vm2178_vm8, %v6798_v3, %v6738_v25  ;;  %v6662_v28 = vadd.f32 %v6472_v21, %v19527_v30  ;;  %v17296_v39 = vmax.f32 %v7087_v45, %v7174_v12  ;;  %v6828_v53 = vsel %vm2178_vm8, %v6738_v25, %v6798_v3  ;;  %v6398_v31 = vpop.f32.mrf.mxu1 }
 0x620   :  { %v6830_v29 = vrot.slane %v6829_v36, 4  ;;  %7705 = vrot.lane.b32.xlu0 %v17260_v48, %s13526_s21  ;;  %v12077_v26 = vrot.slane %v6828_v53, 9  ;;  %v12093_v56 = vrot.slane %v6828_v53, 10  ;;  %v6708_v21 = vadd.f32 %v17119_v27, %v17092_v44 }
 0x621   :  { %19528 = vst [vmem:[#allocation76_spill] sm:$0xff] %v17296_v39  ;;  %v6706_v41 = vadd.f32 %v17122_v43, %v6662_v28  ;;  %7428 = vrot.lane.b32.xlu2 %v17296_v39, %s13528_s4  ;;  %v6435_v22 = vpop.f32.mrf.mxu2  ;;  %v6399_v12 = vadd.f32 %v6398_v31, %v6359_v52  ;;  %v19532_v31 = vld [vmem:[#allocation64_spill] sm:$0xff] }
 0x622   :  { %7713 = vrot.lane.b32.xlu1 %v17288_v8, %s13526_s21  ;;  %v6957_v38 = vrot.slane %v6830_v29, 5  ;;  %v7182_v24 = vrot.slane %v6830_v29, 6  ;;  %v6436_v47 = vadd.f32 %v6435_v22, %v6397_v32 }
 0x623   :  { %v6742_v5 = vmax.f32 %v6706_v41, 0.0 }
 0x624   :  { %v6474_v42 = vpop.f32.mrf.mxu3  ;;  %v6958_v23 = vsel %vm17145_vm15, %v12077_v26, %v6957_v38  ;;  %v7183_v6 = vsel %vm17138_vm14, %v12093_v56, %v7182_v24  ;;  %v6963_v25 = vrot.slane %v6957_v38, 4  ;;  %v6744_v38 = vmax.f32 %v6708_v21, 0.0 }
 0x625   :  { %v6799_v58 = vrot.slane %v6742_v5, 4  ;;  %v6475_v0 = vadd.f32 %v6474_v42, %v6436_v47  ;;  %v7091_v34 = vmax.f32 %v6828_v53, %v6958_v23  ;;  %v7188_v53 = vrot.slane %v7182_v24, 4  ;;  %v6362_v32 = vpop.f32.mrf.mxu0 }
 0x627   :  { %v17313_v49 = vsel %vm2178_vm8, %v6741_v40, %v6799_v58  ;;  %v6665_v14 = vadd.f32 %v6475_v0, %v19529_v33  ;;  %v17316_v61 = vmax.f32 %v7091_v34, %v7183_v6  ;;  %v6833_v50 = vsel %vm2178_vm8, %v6799_v58, %v6741_v40  ;;  %v6401_v22 = vpop.f32.mrf.mxu1 }
 0x628   :  { %7424 = vrot.lane.b32.xlu0 %v17288_v8, %s13528_s4  ;;  %v18941_v63 = vrot.slane %v17313_v49, 5  ;;  %v18939_v3 = vrot.slane %v17313_v49, 6  ;;  %v6834_v44 = vrot.slane %v6833_v50, 4  ;;  %v6711_v34 = vadd.f32 %v17119_v27, %v17097_v16 }
 0x629   :  { %19530 = vst [vmem:[#allocation77_spill] sm:$0xff] %v17316_v61  ;;  %v6709_v45 = vadd.f32 %v17122_v43, %v6665_v14  ;;  %7436 = vrot.lane.b32.xlu2 %v17316_v61, %s13528_s4  ;;  %v6437_v36 = vpop.f32.mrf.mxu2  ;;  %v6402_v14 = vadd.f32 %v6401_v22, %v6362_v32 }
 0x62a   :  { %v6965_v28 = vsel %vm17145_vm15, %v6963_v25, %v18941_v63  ;;  %v6438_v41 = vadd.f32 %v6437_v36, %v6399_v12  ;;  %v7190_v26 = vsel %vm17138_vm14, %v7188_v53, %v18939_v3  ;;  %v12095_v58 = vrot.slane %v6834_v44, 10 }
 0x62b   :  { %v6745_v4 = vmax.f32 %v6709_v45, 0.0  ;;  %v7093_v42 = vmax.f32 %v6830_v29, %v6965_v28  ;;  %v12079_v29 = vrot.slane %v6834_v44, 9 }
 0x62c   :  { %v6476_v30 = vpop.f32.mrf.mxu3 }
 0x62d   :  { %v6800_v56 = vrot.slane %v6745_v4, 4  ;;  %v6477_v5 = vadd.f32 %v6476_v30, %v6438_v41  ;;  %v17336_v47 = vmax.f32 %v7093_v42, %v7190_v26  ;;  %v6364_v16 = vpop.f32.mrf.mxu0  ;;  %v6747_v41 = vmax.f32 %v6711_v34, 0.0 }
 0x62f   :  { %19531 = vst [vmem:[#allocation56_spill] sm:$0xff] %v17336_v47  ;;  %v6836_v52 = vsel %vm2178_vm8, %v6744_v38, %v6800_v56  ;;  %v6837_v24 = vsel %vm2178_vm8, %v6800_v56, %v6744_v38  ;;  %v6668_v23 = vadd.f32 %v6477_v5, %v19532_v31  ;;  %7440 = vrot.lane.b32.xlu1 %v17336_v47, %s13528_s4  ;;  %v6403_v53 = vpop.f32.mrf.mxu1  ;;  %v19534_v56 = vld [vmem:[#allocation47_spill] sm:$0xff] }
 0x630   :  { %v17343_v6 = vrot.slane %v6837_v24, 4  ;;  %7717 = vrot.lane.b32.xlu0 %v17296_v39, %s13526_s21  ;;  %v6973_v40 = vrot.slane %v6836_v52, 5  ;;  %v7198_v0 = vrot.slane %v6836_v52, 6 }
 0x631   :  { %v6712_v33 = vadd.f32 %v17122_v43, %v6668_v23  ;;  %7729 = vrot.lane.b32.xlu2 %v17336_v47, %s13526_s21  ;;  %v6440_v50 = vpop.f32.mrf.mxu2 }
 0x632   :  { %v6974_v21 = vsel %vm17145_vm15, %v12079_v29, %v6973_v40  ;;  %v7199_v45 = vsel %vm17138_vm14, %v12095_v58, %v7198_v0  ;;  %v6979_v12 = vrot.slane %v6973_v40, 4  ;;  %v18949_v36 = vrot.slane %v17343_v6, 5 }
 0x633   :  { %v6748_v30 = vmax.f32 %v6712_v33, 0.0  ;;  %v6441_v28 = vadd.f32 %v6440_v50, %v6402_v14  ;;  %v7097_v4 = vmax.f32 %v6834_v44, %v6974_v21  ;;  %v6714_v44 = vadd.f32 %v17119_v27, %v17103_v35 }
 0x634   :  { %v6479_v25 = vpop.f32.mrf.mxu3  ;;  %v6981_v26 = vsel %vm17145_vm15, %v6979_v12, %v18949_v36  ;;  %v7204_v23 = vrot.slane %v7198_v0, 4  ;;  %v18946_v29 = vrot.slane %v17343_v6, 6  ;;  %v6404_v58 = vadd.f32 %v6403_v53, %v6364_v16 }
 0x635   :  { %v6801_v32 = vrot.slane %v6748_v30, 4  ;;  %v6480_v22 = vadd.f32 %v6479_v25, %v6441_v28  ;;  %v17357_v42 = vmax.f32 %v7097_v4, %v7199_v45  ;;  %v7099_v34 = vmax.f32 %v6836_v52, %v6981_v26  ;;  %v6493_v30 = vpop.f32.mrf.mxu0 }
 0x636   :  { %v6750_v0 = vmax.f32 %v6714_v44, 0.0  ;;  %v7206_v16 = vsel %vm17138_vm14, %v7204_v23, %v18946_v29  ;;  %v6717_v23 = vadd.f32 %v17119_v27, %v17108_v57 }
 0x637   :  { %19533 = vst [vmem:[#allocation30_spill] sm:$0xff] %v17357_v42  ;;  %v6841_v38 = vsel %vm2178_vm8, %v6801_v32, %v6747_v41  ;;  %v6671_v5 = vadd.f32 %v6480_v22, %v19534_v56  ;;  %7448 = vrot.lane.b32.xlu1 %v17357_v42, %s13528_s4  ;;  %v6840_v24 = vsel %vm2178_vm8, %v6747_v41, %v6801_v32  ;;  %v6532_v28 = vpop.f32.mrf.mxu1  ;;  %v19536_v56 = vld [vmem:[#allocation20_spill] sm:$0xff] }
 0x638   :  { %v6842_v31 = vrot.slane %v6841_v38, 4  ;;  %7725 = vrot.lane.b32.xlu0 %v17316_v61, %s13526_s21  ;;  %v12081_v50 = vrot.slane %v6840_v24, 9  ;;  %v12097_v21 = vrot.slane %v6840_v24, 10  ;;  %v17384_v32 = vmax.f32 %v7099_v34, %v7206_v16 }
 0x639   :  { %v6715_v40 = vadd.f32 %v17122_v43, %v6671_v5  ;;  %7737 = vrot.lane.b32.xlu2 %v17357_v42, %s13526_s21  ;;  %v6442_v33 = vpop.f32.mrf.mxu2 }
 0x63a   :  { %v6989_v25 = vrot.slane %v6842_v31, 5  ;;  %v7214_v35 = vrot.slane %v6842_v31, 6  ;;  %v6443_v12 = vadd.f32 %v6442_v33, %v6404_v58  ;;  %19535 = vst [vmem:[#allocation22_spill] sm:$0xff] %v17384_v32  ;;  %v6533_v33 = vadd.f32 %v6532_v28, %v6493_v30 }
 0x63b   :  { %v6751_v45 = vmax.f32 %v6715_v40, 0.0 }
 0x63c   :  { %v6481_v14 = vpop.f32.mrf.mxu3  ;;  %v6990_v53 = vsel %vm17145_vm15, %v12081_v50, %v6989_v25  ;;  %v7215_v52 = vsel %vm17138_vm14, %v12097_v21, %v7214_v35  ;;  %v6995_v40 = vrot.slane %v6989_v25, 4 }
 0x63d   :  { %v6802_v4 = vrot.slane %v6751_v45, 4  ;;  %v6482_v41 = vadd.f32 %v6481_v14, %v6443_v12  ;;  %v7103_v22 = vmax.f32 %v6840_v24, %v6990_v53  ;;  %v7220_v45 = vrot.slane %v7214_v35, 4  ;;  %v6495_v12 = vpop.f32.mrf.mxu0 }
 0x63e   :  { %v6753_v53 = vmax.f32 %v6717_v23, 0.0 }
 0x63f   :  { %v17387_v26 = vsel %vm2178_vm8, %v6750_v0, %v6802_v4  ;;  %v6845_v38 = vsel %vm2178_vm8, %v6802_v4, %v6750_v0  ;;  %v6674_v5 = vadd.f32 %v6482_v41, %v19536_v56  ;;  %7452 = vrot.lane.b32.xlu1 %v17384_v32, %s13528_s4  ;;  %v17393_v44 = vmax.f32 %v7103_v22, %v7215_v52  ;;  %v6534_v0 = vpop.f32.mrf.mxu1  ;;  %v19539_v22 = vld [vmem:[#allocation48_spill] sm:$0xff] }
 0x640   :  { %v18934_v58 = vrot.slane %v17387_v26, 5  ;;  %v18932_v24 = vrot.slane %v17387_v26, 6  ;;  %v6846_v57 = vrot.slane %v6845_v38, 4  ;;  %v17411_v52 = vperm.slane %v17116_v37, 2 }
 0x641   :  { %19537 = vst [vmem:[#allocation57_spill] sm:$0xff] %v17393_v44  ;;  %v6718_v34 = vadd.f32 %v17122_v43, %v6674_v5  ;;  %7460 = vrot.lane.b32.xlu0 %v17393_v44, %s13528_s4  ;;  %v6571_v14 = vpop.f32.mrf.mxu2 }
 0x642   :  { %v6997_v21 = vsel %vm17145_vm15, %v6995_v40, %v18934_v58  ;;  %v6572_v25 = vadd.f32 %v6571_v14, %v6533_v33  ;;  %v7222_v43 = vsel %vm17138_vm14, %v7220_v45, %v18932_v24  ;;  %v12099_v37 = vrot.slane %v6846_v57, 10 }
 0x643   :  { %v6754_v27 = vmax.f32 %v6718_v34, 0.0  ;;  %v7105_v16 = vmax.f32 %v6842_v31, %v6997_v21  ;;  %v12083_v31 = vrot.slane %v6846_v57, 9  ;;  %v6535_v34 = vadd.f32 %v6534_v0, %v6495_v12 }
 0x644   :  { %v6610_v50 = vpop.f32.mrf.mxu3 }
 0x645   :  { %v6803_v30 = vrot.slane %v6754_v27, 4  ;;  %v6611_v28 = vadd.f32 %v6610_v50, %v6572_v25  ;;  %v17413_v4 = vmax.f32 %v7105_v16, %v7222_v43 }
 0x647   :  { %19538 = vst [vmem:[#allocation32_spill] sm:$0xff] %v17413_v4  ;;  %v6848_v35 = vsel %vm2178_vm8, %v6753_v53, %v6803_v30  ;;  %v6849_v41 = vsel %vm2178_vm8, %v6803_v30, %v6753_v53  ;;  %v6642_v38 = vadd.f32 %v6611_v28, %v19539_v22  ;;  %7741 = vrot.lane.b32.xlu1 %v17384_v32, %s13526_s21  ;;  %v6498_v53 = vpop.f32.mrf.mxu0  ;;  %v6537_v43 = vpop.f32.mrf.mxu1 }
 0x648   :  { %7464 = vrot.lane.b32.xlu2 %v17413_v4, %s13528_s4  ;;  %v17422_v56 = vrot.slane %v6849_v41, 4  ;;  %v7005_v5 = vrot.slane %v6848_v35, 5  ;;  %v7230_v23 = vrot.slane %v6848_v35, 6 }
 0x649   :  { %v6686_v40 = vadd.f32 %v17411_v52, %v6642_v38  ;;  %7749 = vrot.lane.b32.xlu0 %v17393_v44, %s13526_s21  ;;  %v6573_v33 = vpop.f32.mrf.mxu2 }
 0x64a   :  { %v7006_v50 = vsel %vm17145_vm15, %v12083_v31, %v7005_v5  ;;  %v7231_v21 = vsel %vm17138_vm14, %v12099_v37, %v7230_v23  ;;  %v7011_v45 = vrot.slane %v7005_v5, 4  ;;  %v18937_v27 = vrot.slane %v17422_v56, 5  ;;  %v19541_v37 = vld [vmem:[#allocation69_spill] sm:$0xff] }
 0x64b   :  { %v6722_v25 = vmax.f32 %v6686_v40, 0.0  ;;  %v6574_v16 = vadd.f32 %v6573_v33, %v6535_v34  ;;  %v7109_v30 = vmax.f32 %v6846_v57, %v7006_v50  ;;  %v7236_v12 = vrot.slane %v7230_v23, 4 }
 0x64c   :  { %v6612_v14 = vpop.f32.mrf.mxu3  ;;  %v7013_v0 = vsel %vm17145_vm15, %v7011_v45, %v18937_v27  ;;  %v18936_v28 = vrot.slane %v17422_v56, 6 }
 0x64d   :  { %v6807_v41 = vrot.slane %v6722_v25, 4  ;;  %v6613_v22 = vadd.f32 %v6612_v14, %v6574_v16  ;;  %v17437_v38 = vmax.f32 %v7109_v30, %v7231_v21  ;;  %v7111_v31 = vmax.f32 %v6848_v35, %v7013_v0 }
 0x64e   :  { %v7238_v5 = vsel %vm17138_vm14, %v7236_v12, %v18936_v28  ;;  %v12070_v40 = vrot.slane %v6722_v25, 9  ;;  %v6538_v35 = vadd.f32 %v6537_v43, %v6498_v53 }
 0x64f   :  { %19540 = vst [vmem:[#allocation28_spill] sm:$0xff] %v17437_v38  ;;  %v6645_v57 = vadd.f32 %v6613_v22, %v19541_v37  ;;  %7472 = vrot.lane.b32.xlu1 %v17437_v38, %s13528_s4  ;;  %v17448_v23 = vmax.f32 %v7111_v31, %v7238_v5  ;;  %v6897_v34 = vrot.slane %v6807_v41, 5  ;;  %v7122_v45 = vrot.slane %v6807_v41, 6  ;;  %v6500_v0 = vpop.f32.mrf.mxu0  ;;  %v6539_v31 = vpop.f32.mrf.mxu1 }
 0x650   :  { %7753 = vrot.lane.b32.xlu2 %v17413_v4, %s13526_s21  ;;  %v12086_v5 = vrot.slane %v6722_v25, 10 }
 0x651   :  { %19542 = vst [vmem:[#allocation26_spill] sm:$0xff] %v17448_v23  ;;  %v6689_v33 = vadd.f32 %v17411_v52, %v6645_v57  ;;  %7476 = vrot.lane.b32.xlu0 %v17448_v23, %s13528_s4  ;;  %v6898_v14 = vsel %vm17145_vm15, %v12070_v40, %v6897_v34  ;;  %v6576_v50 = vpop.f32.mrf.mxu2  ;;  %v6902_v53 = vrot.slane %v6897_v34, 4  ;;  %v19543_v40 = vld [vmem:[#allocation70_spill] sm:$0xff] }
 0x652   :  { %v6577_v30 = vadd.f32 %v6576_v50, %v6538_v35  ;;  %v7068_v22 = vmax.f32 %v6722_v25, %v6898_v14  ;;  %v7123_v57 = vsel %vm17138_vm14, %v12086_v5, %v7122_v45  ;;  %v6540_v50 = vadd.f32 %v6539_v31, %v6500_v0 }
 0x653   :  { %v17455_v16 = vmax.f32 %v6689_v33, 0.0  ;;  %v17457_v12 = vpop.permute.xlu2 %7388 }
 0x654   :  { %v6615_v21 = vpop.f32.mrf.mxu3  ;;  %v17467_v33 = vmax.f32 %v7068_v22, %v7123_v57  ;;  %v7127_v22 = vrot.slane %v7122_v45, 4 }
 0x655   :  { %v6616_v37 = vadd.f32 %v6615_v21, %v6577_v30  ;;  %v18945_v43 = vrot.slane %v17455_v16, 5  ;;  %v18943_v34 = vrot.slane %v17455_v16, 6  ;;  %v6811_v35 = vrot.slane %v17455_v16, 4 }
 0x657   :  { %v6648_v24 = vadd.f32 %v6616_v37, %v19543_v40  ;;  %7765 = vrot.lane.b32.xlu1 %v17448_v23, %s13526_s21  ;;  %v6904_v25 = vsel %vm17145_vm15, %v6902_v53, %v18945_v43  ;;  %v6503_v20 = vpop.f32.mrf.mxu0  ;;  %v6542_v53 = vpop.f32.mrf.mxu1  ;;  %v7129_v58 = vsel %vm17138_vm14, %v7127_v22, %v18943_v34 }
 0x658   :  { %7761 = vrot.lane.b32.xlu2 %v17437_v38, %s13526_s21  ;;  %v7070_v21 = vmax.f32 %v6807_v41, %v6904_v25  ;;  %v12088_v25 = vrot.slane %v6811_v35, 10 }
 0x659   :  { %v6692_v14 = vadd.f32 %v17411_v52, %v6648_v24  ;;  %7679 = vrot.lane.b32.xlu0 %v17467_v33, %s13526_s21  ;;  %v6578_v30 = vpop.f32.mrf.mxu2  ;;  %v12072_v24 = vrot.slane %v6811_v35, 9 }
 0x65a   :  { %v6579_v57 = vadd.f32 %v6578_v30, %v6540_v50  ;;  %v17486_v9 = vmax.f32 %v7070_v21, %v7129_v58  ;;  %v6543_v21 = vadd.f32 %v6542_v53, %v6503_v20 }
 0x65b   :  { %v6728_v37 = vmax.f32 %v6692_v14, 0.0  ;;  %v17478_v40 = vpop.permute.xlu2 %7677  ;;  %v19544_v14 = vld [vmem:[#allocation71_spill] sm:$0xff] }
 0x65c   :  { %v6617_v5 = vpop.f32.mrf.mxu3 }
 0x65d   :  { %v17484_v0 = vrot.slane %v6728_v37, 4  ;;  %v6618_v31 = vadd.f32 %v6617_v5, %v6579_v57  ;;  %v6913_v41 = vrot.slane %v6728_v37, 5  ;;  %v7138_v45 = vrot.slane %v6728_v37, 6 }
 0x65f   :  { %v6651_v50 = vadd.f32 %v6618_v31, %v19544_v14  ;;  %7394 = vrot.lane.b32.xlu1 %v17486_v9, %s13528_s4  ;;  %v6914_v30 = vsel %vm17145_vm15, %v12072_v24, %v6913_v41  ;;  %v6918_v22 = vrot.slane %v6913_v41, 4  ;;  %v18951_v28 = vrot.slane %v17484_v0, 5  ;;  %v6505_v63 = vpop.f32.mrf.mxu0  ;;  %v6544_v24 = vpop.f32.mrf.mxu1 }
 0x660   :  { %7390 = vrot.lane.b32.xlu2 %v17467_v33, %s13528_s4  ;;  %v7074_v5 = vmax.f32 %v6811_v35, %v6914_v30  ;;  %v7139_v57 = vsel %vm17138_vm14, %v12088_v25, %v7138_v45  ;;  %v7143_v20 = vrot.slane %v7138_v45, 4  ;;  %v18950_v53 = vrot.slane %v17484_v0, 6  ;;  %v19546_v30 = vld [vmem:[#allocation49_spill] sm:$0xff] }
 0x661   :  { %v6695_v58 = vadd.f32 %v17411_v52, %v6651_v50  ;;  %v6581_v31 = vpop.f32.mrf.mxu2  ;;  %v6920_v35 = vsel %vm17145_vm15, %v6918_v22, %v18951_v28 }
 0x662   :  { %v17499_v27 = vmax.f32 %v7074_v5, %v7139_v57  ;;  %v6582_v3 = vadd.f32 %v6581_v31, %v6543_v21  ;;  %v7076_v50 = vmax.f32 %v6728_v37, %v6920_v35  ;;  %v7145_v45 = vsel %vm17138_vm14, %v7143_v20, %v18950_v53 }
 0x663   :  { %v6731_v2 = vmax.f32 %v6695_v58, 0.0  ;;  %v17501_v10 = vpop.permute.xlu2 %7404 }
 0x664   :  { %v6620_v14 = vpop.f32.mrf.mxu3  ;;  %19545 = vst [vmem:[#allocation58_spill] sm:$0xff] %v17499_v27  ;;  %7402 = vrot.lane.b32.xlu0 %v17499_v27, %s13528_s4 }
 0x665   :  { %v6819_v41 = vrot.slane %v6731_v2, 4  ;;  %v6621_v25 = vadd.f32 %v6620_v14, %v6582_v3  ;;  %v12074_v58 = vrot.slane %v6731_v2, 9  ;;  %v6545_v3 = vadd.f32 %v6544_v24, %v6505_v63 }
 0x666   :  { %v12090_v31 = vrot.slane %v6731_v2, 10 }
 0x667   :  { %v6654_v5 = vadd.f32 %v6621_v25, %v19546_v30  ;;  %7691 = vrot.lane.b32.xlu1 %v17499_v27, %s13526_s21  ;;  %v6929_v22 = vrot.slane %v6819_v41, 5  ;;  %v7154_v21 = vrot.slane %v6819_v41, 6  ;;  %v17522_v25 = vmax.f32 %v7076_v50, %v7145_v45  ;;  %v6508_v43 = vpop.f32.mrf.mxu0  ;;  %v19547_v45 = vld [vmem:[#allocation66_spill] sm:$0xff] }
 0x668   :  { %7683 = vrot.lane.b32.xlu2 %v17486_v9, %s13526_s21 }
 0x669   :  { %v6698_v57 = vadd.f32 %v17411_v52, %v6654_v5  ;;  %v6930_v37 = vsel %vm17145_vm15, %v12074_v58, %v6929_v22  ;;  %v6583_v14 = vpop.f32.mrf.mxu2  ;;  %v7155_v20 = vsel %vm17138_vm14, %v12090_v31, %v7154_v21  ;;  %v6547_v5 = vpop.f32.mrf.mxu1  ;;  %v6934_v58 = vrot.slane %v6929_v22, 4 }
 0x66a   :  { %v7080_v30 = vmax.f32 %v6731_v2, %v6930_v37  ;;  %v6584_v34 = vadd.f32 %v6583_v14, %v6545_v3  ;;  %v7159_v37 = vrot.slane %v7154_v21, 4  ;;  %v6548_v22 = vadd.f32 %v6547_v5, %v6508_v43 }
 0x66b   :  { %v17524_v51 = vmax.f32 %v6698_v57, 0.0  ;;  %v17526_v19 = vpop.permute.xlu2 %7693 }
 0x66c   :  { %v6622_v35 = vpop.f32.mrf.mxu3  ;;  %7406 = vrot.lane.b32.xlu0 %v17522_v25, %s13528_s4  ;;  %v17532_v63 = vmax.f32 %v7080_v30, %v7155_v20 }
 0x66d   :  { %v6623_v24 = vadd.f32 %v6622_v35, %v6584_v34  ;;  %v18948_v50 = vrot.slane %v17524_v51, 5  ;;  %v18947_v2 = vrot.slane %v17524_v51, 6  ;;  %v6823_v20 = vrot.slane %v17524_v51, 4 }
 0x66f   :  { %v6657_v57 = vadd.f32 %v6623_v24, %v19547_v45  ;;  %v6936_v3 = vsel %vm17145_vm15, %v6934_v58, %v18948_v50  ;;  %v7161_v34 = vsel %vm17138_vm14, %v7159_v37, %v18947_v2  ;;  %v19549_v2 = vld [vmem:[#allocation72_spill] sm:$0xff] }
 0x670   :  { %7414 = vrot.lane.b32.xlu2 %v17532_v63, %s13528_s4  ;;  %v7082_v31 = vmax.f32 %v6819_v41, %v6936_v3  ;;  %v6510_v41 = vpop.f32.mrf.mxu0 }
 0x671   :  { %v6701_v14 = vadd.f32 %v17411_v52, %v6657_v57  ;;  %v17548_v35 = vpop.permute.xlu0 %7392  ;;  %v6586_v45 = vpop.f32.mrf.mxu2 }
 0x672   :  { %v17550_v30 = vmax.f32 %v7082_v31, %v7161_v34  ;;  %v6587_v58 = vadd.f32 %v6586_v45, %v6548_v22  ;;  %v6549_v57 = vpop.f32.mrf.mxu1  ;;  %v12076_v31 = vrot.slane %v6823_v20, 9  ;;  %v17572_v53 = vpop.permute.xlu1 %7681  ;;  %v12092_v45 = vrot.slane %v6823_v20, 10 }
 0x673   :  { %v6737_v24 = vmax.f32 %v6701_v14, 0.0  ;;  %v17553_v21 = vpop.permute.xlu2 %7408  ;;  %v6550_v23 = vadd.f32 %v6549_v57, %v6510_v41 }
 0x674   :  { %v6625_v29 = vpop.f32.mrf.mxu3  ;;  %19548 = vst [vmem:[#allocation73_spill] sm:$0xff] %v17553_v21  ;;  %7695 = vrot.lane.b32.xlu0 %v17522_v25, %s13526_s21  ;;  %7418 = vrot.lane.b32.xlu1 %v17550_v30, %s13528_s4 }
 0x675   :  { %v17559_v43 = vrot.slane %v6737_v24, 4  ;;  %v6945_v5 = vrot.slane %v6737_v24, 5  ;;  %v7170_v3 = vrot.slane %v6737_v24, 6  ;;  %v6626_v37 = vadd.f32 %v6625_v29, %v6587_v58 }
 0x677   :  { %v6950_v14 = vrot.slane %v6945_v5, 4  ;;  %v18957_v34 = vrot.slane %v17559_v43, 5  ;;  %v7175_v22 = vrot.slane %v7170_v3, 4  ;;  %v6660_v50 = vadd.f32 %v6626_v37, %v19549_v2 }
 0x678   :  { %7703 = vrot.lane.b32.xlu2 %v17532_v63, %s13526_s21  ;;  %v6946_v36 = vsel %vm17145_vm15, %v12076_v31, %v6945_v5  ;;  %v19550_v37 = vrot.slane %v17559_v43, 6 }
 0x679   :  { %v6952_v29 = vsel %vm17145_vm15, %v6950_v14, %v18957_v34  ;;  %v7086_v58 = vmax.f32 %v6823_v20, %v6946_v36  ;;  %v6704_v28 = vadd.f32 %v17411_v52, %v6660_v50  ;;  %v6588_v32 = vpop.f32.mrf.mxu2  ;;  %v6513_v36 = vpop.f32.mrf.mxu0  ;;  %v7171_v20 = vsel %vm17138_vm14, %v12092_v45, %v7170_v3 }
 0x67a   :  { %v17575_v4 = vpop.permute.xlu0 %7400  ;;  %v7088_v21 = vmax.f32 %v6737_v24, %v6952_v29  ;;  %v7177_v5 = vsel %vm17138_vm14, %v7175_v22, %v19550_v37  ;;  %v6589_v38 = vadd.f32 %v6588_v32, %v6550_v23  ;;  %v6552_v24 = vpop.f32.mrf.mxu1  ;;  %v19553_v32 = vld [vmem:[#allocation51_spill] sm:$0xff] }
 0x67b   :  { %v6740_v31 = vmax.f32 %v6704_v28, 0.0  ;;  %v17581_v14 = vpop.permute.xlu2 %7428  ;;  %v17589_v41 = vmax.f32 %v7086_v58, %v7171_v20 }
 0x67c   :  { %v6627_v2 = vpop.f32.mrf.mxu3  ;;  %7707 = vrot.lane.b32.xlu1 %v17550_v30, %s13526_s21  ;;  %v17585_v50 = vmax.f32 %v7088_v21, %v7177_v5  ;;  %v6553_v5 = vadd.f32 %v6552_v24, %v6513_v36 }
 0x67d   :  { %19552 = vst [vmem:[#allocation25_spill] sm:$0xff] %v17589_v41  ;;  %v6831_v57 = vrot.slane %v6740_v31, 4  ;;  %v6628_v29 = vadd.f32 %v6627_v2, %v6589_v38  ;;  %v12078_v23 = vrot.slane %v6740_v31, 9  ;;  %v12094_v38 = vrot.slane %v6740_v31, 10 }
 0x67e   :  { %19551 = vst [vmem:[#allocation29_spill] sm:$0xff] %v17585_v50  ;;  %7430 = vrot.lane.b32.xlu0 %v17585_v50, %s13528_s4 }
 0x67f   :  { %v6663_v28 = vadd.f32 %v6628_v29, %v19553_v32  ;;  %v6961_v22 = vrot.slane %v6831_v57, 5  ;;  %v7186_v21 = vrot.slane %v6831_v57, 6 }
 0x680   :  { %7715 = vrot.lane.b32.xlu2 %v17589_v41, %s13526_s21 }
 0x681   :  { %v6707_v37 = vadd.f32 %v17411_v52, %v6663_v28  ;;  %v6962_v45 = vsel %vm17145_vm15, %v12078_v23, %v6961_v22  ;;  %v6591_v58 = vpop.f32.mrf.mxu2  ;;  %v7187_v36 = vsel %vm17138_vm14, %v12094_v38, %v7186_v21  ;;  %v6515_v24 = vpop.f32.mrf.mxu0  ;;  %v6966_v23 = vrot.slane %v6961_v22, 4 }
 0x682   :  { %v17597_v3 = vpop.permute.xlu0 %7689  ;;  %v7092_v20 = vmax.f32 %v6740_v31, %v6962_v45  ;;  %v6592_v44 = vadd.f32 %v6591_v58, %v6553_v5  ;;  %v6554_v32 = vpop.f32.mrf.mxu1  ;;  %v19556_v45 = vld [vmem:[#allocation23_spill] sm:$0xff] }
 0x683   :  { %v17601_v34 = vmax.f32 %v6707_v37, 0.0  ;;  %v17605_v29 = vpop.permute.xlu2 %7436  ;;  %v7191_v37 = vrot.slane %v7186_v21, 4 }
 0x684   :  { %v6630_v2 = vpop.f32.mrf.mxu3  ;;  %v17603_v61 = vpop.permute.xlu1 %7412  ;;  %19554 = vst [vmem:[#allocation42_spill] sm:$0xff] %v17605_v29  ;;  %7426 = vrot.lane.b32.xlu1 %v17589_v41, %s13528_s4  ;;  %v17611_v28 = vmax.f32 %v7092_v20, %v7187_v36 }
 0x685   :  { %v6631_v42 = vadd.f32 %v6630_v2, %v6592_v44  ;;  %v18965_v31 = vrot.slane %v17601_v34, 5  ;;  %v18966_v5 = vrot.slane %v17601_v34, 6  ;;  %v6555_v2 = vadd.f32 %v6554_v32, %v6515_v24 }
 0x686   :  { %19555 = vst [vmem:[#allocation14_spill] sm:$0xff] %v17611_v28  ;;  %7438 = vrot.lane.b32.xlu0 %v17611_v28, %s13528_s4  ;;  %v6835_v36 = vrot.slane %v17601_v34, 4 }
 0x687   :  { %v6666_v58 = vadd.f32 %v6631_v42, %v19556_v45  ;;  %v6968_v38 = vsel %vm17145_vm15, %v6966_v23, %v18965_v31  ;;  %v7193_v44 = vsel %vm17138_vm14, %v7191_v37, %v18966_v5 }
 0x688   :  { %v7094_v22 = vmax.f32 %v6831_v57, %v6968_v38  ;;  %v12080_v32 = vrot.slane %v6835_v36, 9 }
 0x689   :  { %v6710_v21 = vadd.f32 %v17411_v52, %v6666_v58  ;;  %v6593_v29 = vpop.f32.mrf.mxu2  ;;  %v6518_v23 = vpop.f32.mrf.mxu0 }
 0x68a   :  { %v17627_v20 = vpop.permute.xlu0 %7416  ;;  %v17630_v45 = vmax.f32 %v7094_v22, %v7193_v44  ;;  %v6594_v47 = vadd.f32 %v6593_v29, %v6555_v2  ;;  %v6557_v31 = vpop.f32.mrf.mxu1  ;;  %v12096_v29 = vrot.slane %v6835_v36, 10  ;;  %v19558_v22 = vld [vmem:[#allocation54_spill] sm:$0xff] }
 0x68b   :  { %v6746_v39 = vmax.f32 %v6710_v21, 0.0  ;;  %v17640_v38 = vpop.permute.xlu2 %7729 }
 0x68c   :  { %v6632_v42 = vpop.f32.mrf.mxu3  ;;  %19557 = vst [vmem:[#allocation19_spill] sm:$0xff] %v17630_v45  ;;  %7719 = vrot.lane.b32.xlu1 %v17585_v50, %s13526_s21  ;;  %7442 = vrot.lane.b32.xlu2 %v17630_v45, %s13528_s4  ;;  %v17638_v58 = vpop.permute.xlu1 %7701 }
 0x68d   :  { %v17636_v57 = vrot.slane %v6746_v39, 4  ;;  %v6633_v24 = vadd.f32 %v6632_v42, %v6594_v47  ;;  %v6977_v37 = vrot.slane %v6746_v39, 5  ;;  %v7202_v44 = vrot.slane %v6746_v39, 6 }
 0x68e   :  { %7731 = vrot.lane.b32.xlu0 %v17630_v45, %s13526_s21  ;;  %v6558_v45 = vadd.f32 %v6557_v31, %v6518_v23 }
 0x68f   :  { %v6669_v21 = vadd.f32 %v6633_v24, %v19558_v22  ;;  %v6978_v2 = vsel %vm17145_vm15, %v12080_v32, %v6977_v37  ;;  %v6982_v5 = vrot.slane %v6977_v37, 4  ;;  %v18974_v50 = vrot.slane %v17636_v57, 5 }
 0x690   :  { %v7098_v47 = vmax.f32 %v6835_v36, %v6978_v2  ;;  %v7203_v42 = vsel %vm17138_vm14, %v12096_v29, %v7202_v44  ;;  %v7207_v8 = vrot.slane %v7202_v44, 4  ;;  %v18975_v41 = vrot.slane %v17636_v57, 6 }
 0x691   :  { %v6713_v27 = vadd.f32 %v17411_v52, %v6669_v21  ;;  %v6984_v24 = vsel %vm17145_vm15, %v6982_v5, %v18974_v50  ;;  %v6596_v32 = vpop.f32.mrf.mxu2  ;;  %v6520_v5 = vpop.f32.mrf.mxu0 }
 0x692   :  { %v17652_v1 = vpop.permute.xlu0 %7705  ;;  %v17658_v22 = vmax.f32 %v7098_v47, %v7203_v42  ;;  %v7100_v36 = vmax.f32 %v6746_v39, %v6984_v24  ;;  %v6597_v29 = vadd.f32 %v6596_v32, %v6558_v45  ;;  %v7209_v31 = vsel %vm17138_vm14, %v7207_v8, %v18975_v41  ;;  %v6559_v50 = vpop.f32.mrf.mxu1 }
 0x693   :  { %v6749_v2 = vmax.f32 %v6713_v27, 0.0  ;;  %v17675_v47 = vpop.permute.xlu2 %7737  ;;  %v6560_v32 = vadd.f32 %v6559_v50, %v6520_v5 }
 0x694   :  { %v6635_v37 = vpop.f32.mrf.mxu3  ;;  %19559 = vst [vmem:[#allocation40_spill] sm:$0xff] %v17658_v22  ;;  %7727 = vrot.lane.b32.xlu1 %v17611_v28, %s13526_s21  ;;  %v17666_v23 = vmax.f32 %v7100_v36, %v7209_v31  ;;  %v17673_v45 = vpop.permute.xlu1 %7713 }
 0x695   :  { %v6636_v44 = vadd.f32 %v6635_v37, %v6597_v29  ;;  %v6843_v21 = vrot.slane %v6749_v2, 4  ;;  %19561 = vst [vmem:[#allocation18_spill] sm:$0xff] %v17675_v47  ;;  %v12082_v42 = vrot.slane %v6749_v2, 9 }
 0x696   :  { %19560 = vst [vmem:[#allocation41_spill] sm:$0xff] %v17666_v23  ;;  %7739 = vrot.lane.b32.xlu0 %v17658_v22, %s13526_s21  ;;  %7454 = vrot.lane.b32.xlu2 %v17666_v23, %s13528_s4 }
 0x697   :  { %v6672_v39 = vadd.f32 %v6636_v44, %v17038_v46  ;;  %v6993_v27 = vrot.slane %v6843_v21, 5  ;;  %v7218_v8 = vrot.slane %v6843_v21, 6 }
 0x699   :  { %v6716_v24 = vadd.f32 %v17411_v52, %v6672_v39  ;;  %v6598_v36 = vpop.f32.mrf.mxu2  ;;  %v6994_v29 = vsel %vm17145_vm15, %v12082_v42, %v6993_v27  ;;  %v6998_v44 = vrot.slane %v6993_v27, 4  ;;  %v7223_v28 = vrot.slane %v7218_v8, 4 }
 0x69a   :  { %v17678_v37 = vpop.permute.xlu0 %7424  ;;  %v6599_v41 = vadd.f32 %v6598_v36, %v6560_v32  ;;  %v7104_v5 = vmax.f32 %v6749_v2, %v6994_v29  ;;  %v12098_v39 = vrot.slane %v6749_v2, 10  ;;  %v19562_v42 = vrot.slane %v17484_v0, 5 }
 0x69b   :  { %v17682_v31 = vmax.f32 %v6716_v24, 0.0 }
 0x69c   :  { %7450 = vrot.lane.b32.xlu1 %v17658_v22, %s13528_s4  ;;  %v6637_v46 = vpop.f32.mrf.mxu3  ;;  %v6922_v24 = vrot.slane %v19562_v42, 4 }
 0x69d   :  { %v6638_v47 = vadd.f32 %v6637_v46, %v6599_v41  ;;  %v18979_v48 = vrot.slane %v17682_v31, 5  ;;  %v18981_v50 = vrot.slane %v17682_v31, 6  ;;  %v7219_v46 = vsel %vm17138_vm14, %v12098_v39, %v7218_v8 }
 0x69e   :  { %7743 = vrot.lane.b32.xlu2 %v17666_v23, %s13526_s21  ;;  %v17713_v22 = vmax.f32 %v7104_v5, %v7219_v46 }
 0x69f   :  { %v6675_v32 = vadd.f32 %v6638_v47, %v17040_v15  ;;  %v7000_v27 = vsel %vm17145_vm15, %v6998_v44, %v18979_v48  ;;  %v7225_v41 = vsel %vm17138_vm14, %v7223_v28, %v18981_v50  ;;  %v7078_v15 = vmax.f32 %v17484_v0, %v6922_v24 }
 0x6a0   :  { %v7106_v2 = vmax.f32 %v6843_v21, %v7000_v27  ;;  %v19564_v47 = vrot.slane %v17484_v0, 6  ;;  %19565 = vst [vmem:[#allocation34_spill] sm:$0xff] %v17713_v22  ;;  %v6847_v28 = vrot.slane %v17682_v31, 4 }
 0x6a1   :  { %v17701_v36 = vpop.permute.xlu1 %7440  ;;  %v6719_v44 = vadd.f32 %v17411_v52, %v6675_v32 }
 0x6a2   :  { %v17703_v29 = vpop.permute.xlu2 %7464  ;;  %v7147_v42 = vrot.slane %v19564_v47, 4  ;;  %v17711_v48 = vpop.permute.xlu0 %7717  ;;  %v17716_v50 = vmax.f32 %v7106_v2, %v7225_v41  ;;  %v12084_v0 = vrot.slane %v6847_v28, 9  ;;  %v12100_v8 = vrot.slane %v6847_v28, 10 }
 0x6a3   :  { %19563 = vst [vmem:[#allocation59_spill] sm:$0xff] %v17703_v29  ;;  %v17720_v21 = vmax.f32 %v6719_v44, 0.0  ;;  %v19569_v2 = vrot.slane %v17343_v6, 5 }
 0x6a4   :  { %19566 = vst [vmem:[#allocation60_spill] sm:$0xff] %v17716_v50  ;;  %v17718_v29 = vmax.f32 %v7078_v15, %v7147_v42  ;;  %7462 = vrot.lane.b32.xlu1 %v17713_v22, %s13528_s4  ;;  %7466 = vrot.lane.b32.xlu0 %v17716_v50, %s13528_s4  ;;  %v19572_v42 = vrot.slane %v17636_v57, 5 }
 0x6a5   :  { %v18984_v52 = vrot.slane %v17720_v21, 5  ;;  %v18983_v5 = vrot.slane %v17720_v21, 6  ;;  %v6985_v46 = vrot.slane %v19569_v2, 4  ;;  %v19576_v2 = vrot.slane %v17636_v57, 6 }
 0x6a6   :  { %v6986_v44 = vrot.slane %v19572_v42, 4  ;;  %v19611_v13 = vrot.slane %v17720_v21, 6 }
 0x6a7   :  { %v7010_v39 = vsel %vm17145_vm15, %v12084_v0, %v18984_v52  ;;  %v7235_v24 = vsel %vm17138_vm14, %v12100_v8, %v18983_v5  ;;  %v19573_v8 = vrot.slane %v17343_v6, 6  ;;  %v7211_v42 = vrot.slane %v19576_v2, 4 }
 0x6a8   :  { %v7110_v41 = vmax.f32 %v6847_v28, %v7010_v39  ;;  %v7101_v28 = vmax.f32 %v17343_v6, %v6985_v46  ;;  %v7102_v0 = vmax.f32 %v17636_v57, %v6986_v44  ;;  %v19578_v52 = vrot.slane %v17455_v16, 5 }
 0x6a9   :  { %v17736_v32 = vpop.permute.xlu1 %7448  ;;  %v7210_v39 = vrot.slane %v19573_v8, 4  ;;  %v19582_v6 = vrot.slane %v17269_v7, 5  ;;  %v19585_v2 = vrot.slane %v17455_v16, 6 }
 0x6aa   :  { %19567 = vst [vmem:[#allocation36_spill] sm:$0xff] %v17736_v32  ;;  %v17738_v27 = vpop.permute.xlu2 %7753  ;;  %v17742_v15 = vpop.permute.xlu0 %7725  ;;  %v17744_v47 = vmax.f32 %v7110_v41, %v7235_v24  ;;  %v17772_v44 = vmax.f32 %v7102_v0, %v7211_v42 }
 0x6ab   :  { %19568 = vst [vmem:[#allocation37_spill] sm:$0xff] %v17738_v27  ;;  %v17764_v5 = vmax.f32 %v7101_v28, %v7210_v39  ;;  %v6906_v27 = vrot.slane %v19578_v52, 4  ;;  %v6953_v8 = vrot.slane %v19582_v6, 4  ;;  %v19583_v28 = vrot.slane %v17559_v43, 6 }
 0x6ac   :  { %19570 = vst [vmem:[#allocation9_spill] sm:$0xff] %v17742_v15  ;;  %7751 = vrot.lane.b32.xlu1 %v17713_v22, %s13526_s21  ;;  %7755 = vrot.lane.b32.xlu0 %v17716_v50, %s13526_s21  ;;  %v19579_v22 = vrot.slane %v17559_v43, 5  ;;  %v7131_v42 = vrot.slane %v19585_v2, 4 }
 0x6ad   :  { %19571 = vst [vmem:[#allocation27_spill] sm:$0xff] %v17744_v47  ;;  %7474 = vrot.lane.b32.xlu2 %v17744_v47, %s13528_s4  ;;  %v7179_v39 = vrot.slane %v19583_v28, 4  ;;  %v7089_v0 = vmax.f32 %v17269_v7, %v6953_v8  ;;  %v19591_v8 = vrot.slane %v17154_v62, 5 }
 0x6ae   :  { %19577 = vst [vmem:[#allocation39_spill] sm:$0xff] %v17764_v5  ;;  %v6954_v46 = vrot.slane %v19579_v22, 4  ;;  %v7072_v22 = vmax.f32 %v17455_v16, %v6906_v27 }
 0x6af   :  { %19581 = vst [vmem:[#allocation35_spill] sm:$0xff] %v17772_v44  ;;  %v6905_v16 = vrot.slane %v19591_v8, 4 }
 0x6b0   :  { %v7090_v57 = vmax.f32 %v17559_v43, %v6954_v46  ;;  %v19587_v43 = vrot.slane %v17269_v7, 6 }
 0x6b1   :  { %v17758_v24 = vpop.permute.xlu1 %7452 }
 0x6b2   :  { %19574 = vst [vmem:[#allocation31_spill] sm:$0xff] %v17758_v24  ;;  %v17760_v41 = vpop.permute.xlu2 %7761  ;;  %v17786_v52 = vmax.f32 %v7090_v57, %v7179_v39  ;;  %v7178_v28 = vrot.slane %v19587_v43, 4  ;;  %v17797_v24 = vmax.f32 %v7072_v22, %v7131_v42  ;;  %v19592_v39 = vrot.slane %v17601_v34, 5 }
 0x6b3   :  { %19575 = vst [vmem:[#allocation33_spill] sm:$0xff] %v17760_v41  ;;  %v17770_v15 = vpop.permute.xlu0 %7460 }
 0x6b4   :  { %19580 = vst [vmem:[#allocation11_spill] sm:$0xff] %v17770_v15  ;;  %7456 = vrot.lane.b32.xlu1 %v17764_v5, %s13528_s4  ;;  %7763 = vrot.lane.b32.xlu0 %v17744_v47, %s13526_s21  ;;  %v19588_v47 = vrot.slane %v17313_v49, 5  ;;  %v17803_v57 = vmax.f32 %v7089_v0, %v7178_v28  ;;  %v6970_v2 = vrot.slane %v19592_v39, 4  ;;  %v19593_v0 = vrot.slane %v17313_v49, 6 }
 0x6b5   :  { %7458 = vrot.lane.b32.xlu2 %v17772_v44, %s13528_s4  ;;  %19584 = vst [vmem:[#allocation13_spill] sm:$0xff] %v17786_v52  ;;  %v19595_v28 = vrot.slane %v17154_v62, 6  ;;  %v19596_v39 = vrot.slane %v17601_v34, 6 }
 0x6b6   :  { %v6969_v41 = vrot.slane %v19588_v47, 4  ;;  %19590 = vst [vmem:[#allocation16_spill] sm:$0xff] %v17803_v57  ;;  %v7071_v47 = vmax.f32 %v17154_v62, %v6905_v16  ;;  %v7096_v22 = vmax.f32 %v17601_v34, %v6970_v2  ;;  %v7194_v42 = vrot.slane %v19593_v0, 4 }
 0x6b7   :  { %v7130_v8 = vrot.slane %v19595_v28, 4  ;;  %v19602_v2 = vrot.slane %v17524_v51, 5 }
 0x6b8   :  { %v7095_v7 = vmax.f32 %v17313_v49, %v6969_v41  ;;  %v19601_v49 = vrot.slane %v17422_v56, 5 }
 0x6b9   :  { %v17791_v6 = vpop.permute.xlu1 %7741  ;;  %v17828_v15 = vmax.f32 %v7071_v47, %v7130_v8 }
 0x6ba   :  { %19586 = vst [vmem:[#allocation12_spill] sm:$0xff] %v17791_v6  ;;  %v17793_v46 = vpop.permute.xlu2 %7390  ;;  %v7195_v6 = vrot.slane %v19596_v39, 4  ;;  %v7017_v34 = vrot.slane %v19601_v49, 4  ;;  %v19604_v39 = vrot.slane %v17720_v21, 5 }
 0x6bb   :  { %v17801_v27 = vpop.permute.xlu0 %7749 }
 0x6bc   :  { %19589 = vst [vmem:[#allocation17_spill] sm:$0xff] %v17801_v27  ;;  %7398 = vrot.lane.b32.xlu1 %v17797_v24, %s13528_s4  ;;  %7410 = vrot.lane.b32.xlu0 %v17718_v29, %s13528_s4  ;;  %v17826_v27 = vmax.f32 %v7095_v7, %v7194_v42  ;;  %v17830_v41 = vmax.f32 %v7096_v22, %v7195_v6  ;;  %v6938_v6 = vrot.slane %v19602_v2, 4  ;;  %v17847_v7 = vrot.slane %v17720_v21, 4 }
 0x6bd   :  { %7432 = vrot.lane.b32.xlu2 %v17803_v57, %s13528_s4  ;;  %v19603_v22 = vrot.slane %v17682_v31, 5  ;;  %v7113_v28 = vmax.f32 %v17422_v56, %v7017_v34  ;;  %v7014_v49 = vrot.slane %v19604_v39, 4  ;;  %v7486_v39 = vrot.slane %v17548_v35, 4 }
 0x6be   :  { %19597 = vst [vmem:[#allocation44_spill] sm:$0xff] %v17826_v27  ;;  %v7084_v8 = vmax.f32 %v17524_v51, %v6938_v6  ;;  %v7775_v6 = vrot.slane %v17572_v53, 4 }
 0x6bf   :  { %19598 = vst [vmem:[#allocation38_spill] sm:$0xff] %v17830_v41  ;;  %v7002_v0 = vrot.slane %v19603_v22, 4 }
 0x6c1   :  { %v17820_v43 = vpop.permute.xlu1 %7472 }
 0x6c2   :  { %19594 = vst [vmem:[#allocation43_spill] sm:$0xff] %v17820_v43  ;;  %v7684_v50 = vpop.permute.xlu2 %7683  ;;  %v19606_v43 = vrot.slane %v17524_v51, 6  ;;  %v19610_v51 = vrot.slane %v17847_v7, 5 }
 0x6c3   :  { %v17832_v16 = vpop.permute.xlu0 %7476 }
 0x6c4   :  { %19599 = vst [vmem:[#allocation10_spill] sm:$0xff] %v17832_v16  ;;  %7444 = vrot.lane.b32.xlu1 %v17826_v27, %s13528_s4  ;;  %7396 = vrot.lane.b32.xlu0 %v17828_v15, %s13528_s4  ;;  %v19605_v16 = vrot.slane %v17682_v31, 6  ;;  %v7163_v22 = vrot.slane %v19606_v43, 4  ;;  %v7016_v43 = vsel %vm17145_vm15, %v7014_v49, %v19610_v51 }
 0x6c5   :  { %7446 = vrot.lane.b32.xlu2 %v17830_v41, %s13528_s4  ;;  %v19607_v41 = vrot.slane %v17422_v56, 6 }
 0x6c6   :  { %v17877_v27 = vmax.f32 %v7084_v8, %v7163_v22  ;;  %v19612_v22 = vrot.slane %v17229_v18, 5 }
 0x6c7   :  { %v7242_v34 = vrot.slane %v19607_v41, 4 }
 0x6c9   :  { %v17840_v62 = vpop.permute.xlu1 %7765 }
 0x6ca   :  { %19600 = vst [vmem:[#allocation15_spill] sm:$0xff] %v17840_v62  ;;  %v17851_v47 = vpop.permute.xlu2 %7414  ;;  %v7108_v62 = vmax.f32 %v17682_v31, %v7002_v0 }
 0x6cb   :  { %v17859_v42 = vpop.permute.xlu0 %7679 }
 0x6cc   :  { %7745 = vrot.lane.b32.xlu1 %v17764_v5, %s13526_s21  ;;  %7434 = vrot.lane.b32.xlu0 %v17786_v52, %s13528_s4  ;;  %v7227_v5 = vrot.slane %v19605_v16, 4  ;;  %v17880_v16 = vmax.f32 %v7113_v28, %v7242_v34  ;;  %v7112_v28 = vmax.f32 %v17720_v21, %v7016_v43  ;;  %v19613_v34 = vrot.slane %v17387_v26, 5 }
 0x6cd   :  { %7697 = vrot.lane.b32.xlu2 %v17264_v17, %s13526_s21  ;;  %v7776_v17 = vrot.slane %v7684_v50, 4  ;;  %v7485_v43 = vrot.slane %v17793_v46, 4 }
 0x6ce   :  { %v17873_v23 = vmax.f32 %v7108_v62, %v7227_v5  ;;  %19609 = vst [vmem:[#allocation62_spill] sm:$0xff] %v17880_v16 }
 0x6cf   :  { %v7823_v56 = vsel %vm2178_vm8, %v7775_v6, %v7776_v17  ;;  %v19006_v17 = vrot.slane %v17847_v7, 6  ;;  %v7001_v6 = vrot.slane %v19613_v34, 4  ;;  %v7785_v34 = vrot.slane %v17638_v58, 4 }
 0x6d0   :  { %19608 = vst [vmem:[#allocation8_spill] sm:$0xff] %v17873_v23 }
 0x6d1   :  { %v7395_v32 = vpop.permute.xlu1 %7394  ;;  %v7107_v51 = vmax.f32 %v17387_v26, %v7001_v6 }
 0x6d2   :  { %v7487_v2 = vrot.slane %v7395_v32, 4  ;;  %v7632_v31 = vmax.f32 %v17486_v9, %v7395_v32  ;;  %v7239_v9 = vrot.slane %v19611_v13, 4  ;;  %v7496_v13 = vrot.slane %v17603_v61, 4 }
 0x6d4   :  { %v7535_v5 = vsel %vm2178_vm8, %v7486_v39, %v7487_v2  ;;  %7422 = vrot.lane.b32.xlu1 %v17877_v27, %s13528_s4  ;;  %v17892_v62 = vmax.f32 %v7632_v31, %v7684_v50  ;;  %7480 = vrot.lane.b32.xlu0 %v17880_v16, %s13528_s4  ;;  %v7704_v50 = vpop.permute.xlu2 %7703  ;;  %v7241_v49 = vsel %vm17138_vm14, %v7239_v9, %v19006_v17  ;;  %v7497_v39 = vrot.slane %v17851_v47, 4 }
 0x6d5   :  { %v7536_v41 = vsel %vm7533_vm4, %v17548_v35, %v7535_v5  ;;  %7747 = vrot.lane.b32.xlu2 %v17772_v44, %s13526_s21  ;;  %v7824_v35 = vsel %vm3917_vm3, %v17572_v53, %v7823_v56  ;;  %v17913_v2 = vmax.f32 %v7112_v28, %v7241_v49  ;;  %v19614_v56 = vrot.slane %v17229_v18, 6 }
 0x6d6   :  { %v7631_v32 = vmax.f32 %v17175_v60, %v7536_v41  ;;  %v17902_v0 = vpop.permute.xlu0 %7402  ;;  %v6937_v60 = vrot.slane %v19612_v22, 4  ;;  %v7492_v41 = vrot.slane %v17501_v10, 4  ;;  %v7786_v9 = vrot.slane %v7704_v50, 4 }
 0x6d7   :  { %v7162_v5 = vrot.slane %v19614_v56, 4  ;;  %v19615_v28 = vrot.slane %v17387_v26, 6  ;;  %v7484_v49 = vrot.slane %v17457_v12, 4  ;;  %v7774_v22 = vrot.slane %v17859_v42, 4 }
 0x6d8   :  { %v17907_v8 = vmax.f32 %v7631_v32, %v7824_v35  ;;  %v7083_v21 = vmax.f32 %v17229_v18, %v6937_v60  ;;  %v7545_v18 = vsel %vm2178_vm8, %v7496_v13, %v7497_v39  ;;  %v7773_v17 = vrot.slane %v17478_v40, 4 }
 0x6d9   :  { %v17925_v53 = vpop.permute.xlu1 %7691  ;;  %v7226_v35 = vrot.slane %v19615_v28, 4  ;;  %v7781_v44 = vrot.slane %v17526_v19, 4  ;;  %v7490_v26 = vrot.slane %v17575_v4, 4  ;;  %v7532_v28 = vsel %vm2178_vm8, %v7484_v49, %v7485_v43 }
 0x6da   :  { %v17941_v60 = vmax.f32 %v7083_v21, %v7162_v5  ;;  %v7779_v5 = vrot.slane %v17597_v3, 4  ;;  %v7833_v39 = vsel %vm2178_vm8, %v7785_v34, %v7786_v9  ;;  %v7642_v43 = vmax.f32 %v17532_v63, %v17851_v47 }
 0x6db   :  { %v17946_v56 = vmax.f32 %v7107_v51, %v7226_v35  ;;  %v7546_v51 = vsel %vm7533_vm4, %v17603_v61, %v7545_v18  ;;  %v7498_v21 = vrot.slane %v17627_v20, 4  ;;  %v7834_v61 = vsel %vm3917_vm3, %v17638_v58, %v7833_v39 }
 0x6dc   :  { %7478 = vrot.lane.b32.xlu1 %v17913_v2, %s13528_s4  ;;  %7699 = vrot.lane.b32.xlu0 %v17718_v29, %s13526_s21  ;;  %v17935_v32 = vpop.permute.xlu2 %7715  ;;  %19616 = vst [vmem:[#allocation45_spill] sm:$0xff] %v17941_v60  ;;  %v7930_v63 = vmax.f32 %v7642_v43, %v7704_v50  ;;  %v7641_v47 = vmax.f32 %v17238_v59, %v7546_v51  ;;  %v7799_v18 = vrot.slane %v17640_v38, 4  ;;  %v7787_v59 = vrot.slane %v17652_v1, 4 }
 0x6dd   :  { %7767 = vrot.lane.b32.xlu2 %v17913_v2, %s13526_s21  ;;  %19617 = vst [vmem:[#allocation63_spill] sm:$0xff] %v17946_v56 }
 0x6de   :  { %v7407_v55 = vpop.permute.xlu0 %7406  ;;  %v7929_v50 = vmax.f32 %v7641_v47, %v7834_v61  ;;  %v8270_v43 = vrot.slane %v7930_v63, 4  ;;  %v19618_v47 = vld [vmem:[#allocation55_spill] sm:$0xff] }
 0x6df   :  { %v7493_v31 = vrot.slane %v7407_v55, 4 }
 0x6e1   :  { %v7541_v6 = vsel %vm2178_vm8, %v7492_v41, %v7493_v31  ;;  %v7638_v31 = vmax.f32 %v17522_v25, %v7407_v55  ;;  %v7821_v41 = vsel %vm2178_vm8, %v7773_v17, %v7774_v22  ;;  %v7534_v25 = vsel %vm7533_vm4, %v17457_v12, %v7532_v28 }
 0x6e2   :  { %v7542_v13 = vsel %vm7533_vm4, %v17501_v10, %v7541_v6  ;;  %v7822_v10 = vsel %vm3917_vm3, %v17478_v40, %v7821_v41  ;;  %v7629_v6 = vmax.f32 %v17157_v54, %v7534_v25  ;;  %v7491_v28 = vrot.slane %v17902_v0, 4 }
 0x6e3   :  { %v7637_v17 = vmax.f32 %v17212_v11, %v7542_v13  ;;  %v7630_v40 = vmax.f32 %v17467_v33, %v17793_v46  ;;  %v7791_v54 = vrot.slane %v17673_v45, 4  ;;  %v7510_v25 = vrot.slane %v17701_v36, 4 }
 0x6e4   :  { %7685 = vrot.lane.b32.xlu1 %v17828_v15, %s13526_s21  ;;  %7420 = vrot.lane.b32.xlu0 %v17941_v60, %s13528_s4  ;;  %v7539_v46 = vsel %vm2178_vm8, %v7490_v26, %v7491_v28 }
 0x6e5   :  { %7468 = vrot.lane.b32.xlu2 %v17946_v56, %s13528_s4  ;;  %v7918_v33 = vmax.f32 %v7630_v40, %v17859_v42  ;;  %v7540_v26 = vsel %vm7533_vm4, %v17575_v4, %v7539_v46  ;;  %v19619_v4 = vrot.slane %v17847_v7, 5 }
 0x6e6   :  { %v7696_v9 = vpop.permute.xlu0 %7695  ;;  %v7419_v35 = vpop.permute.xlu1 %7418 }
 0x6e7   :  { %v7782_v55 = vrot.slane %v7696_v9, 4  ;;  %v17971_v49 = vmax.f32 %v7638_v31, %v7696_v9  ;;  %v7499_v34 = vrot.slane %v7419_v35, 4  ;;  %v17981_v12 = vpop.permute.xlu2 %7442  ;;  %v13529_v31 = vmov 1983009808  }
 0x6e8   :  { %v7971_v51 = vunpack.c.l.s4 %v13529_v31  ;;  %v7644_v41 = vmax.f32 %v17550_v30, %v7419_v35  ;;  %v8271_v42 = vsel %vm7966_vm5, %v8270_v43, %v7918_v33  ;;  %v7018_v40 = vrot.slane %v19619_v4, 4 }
 0x6e9   :  { %v7829_v22 = vsel %vm2178_vm8, %v7781_v44, %v7782_v55  ;;  %v7547_v11 = vsel %vm2178_vm8, %v7498_v21, %v7499_v34  ;;  %v7917_v44 = vmax.f32 %v7629_v6, %v7822_v10  ;;  %v7780_v21 = vrot.slane %v17925_v53, 4 }
 0x6ea   :  { %v7830_v58 = vsel %vm3917_vm3, %v17526_v19, %v7829_v22  ;;  %v7502_v19 = vrot.slane %v17678_v37, 4  ;;  %v7548_v13 = vsel %vm7533_vm4, %v17627_v20, %v7547_v11  ;;  %v7965_v55 = vrot.slane %v7929_v50, 4 }
 0x6eb   :  { %v17989_v39 = vmax.f32 %v7637_v17, %v7830_v58  ;;  %v7793_v34 = vrot.slane %v17711_v48, 4  ;;  %v7968_v61 = vrot.slane %v7917_v44, 4  ;;  %v18010_v63 = vunpack.c.0.s8 %v7971_v51 }
 0x6ec   :  { %7723 = vrot.lane.b32.xlu1 %v17786_v52, %s13526_s21  ;;  %7470 = vrot.lane.b32.xlu0 %v17873_v23, %s13528_s4  ;;  %v7643_v10 = vmax.f32 %v19618_v47, %v7548_v13  ;;  %v7827_v58 = vsel %vm2178_vm8, %v7779_v5, %v7780_v21  ;;  %v7967_v31 = vsel %vm7966_vm5, %v7965_v55, %v7917_v44  ;;  %v7792_v33 = vrot.slane %v17935_v32, 4  ;;  %v19623_v47 = vld [vmem:[#allocation25_spill] sm:$0xff]  ;;  %v19650_v52 = vld [vmem:[#allocation30_spill] sm:$0xff] }
 0x6ed   :  { %7687 = vrot.lane.b32.xlu2 %v17797_v24, %s13526_s21  ;;  %v7969_v28 = vsel %vm7966_vm5, %v7929_v50, %v7968_v61  ;;  %v18036_v50 = vperm.slane %v8271_v42, %v18010_v63  ;;  %v7511_v44 = vrot.slane %v17981_v12, 4  ;;  %v18053_v13 = vperm.slane %v7967_v31, %v18010_v63 }
 0x6ee   :  { %v7708_v9 = vpop.permute.xlu1 %7707 }
 0x6ef   :  { %v7788_v30 = vrot.slane %v7708_v9, 4  ;;  %v7932_v35 = vmax.f32 %v7644_v41, %v7708_v9  ;;  %v19620_v41 = vld [vmem:[#allocation68_spill] sm:$0xff]  ;;  %v18056_v9 = vperm.slane %v7969_v28, %v18010_v63  ;;  %v13530_v28 = vmov 1934713408  }
 0x6f0   :  { %v18017_v22 = vpop.permute.xlu0 %7430  ;;  %v18019_v6 = vpop.permute.xlu2 %7454  ;;  %v7635_v5 = vmax.f32 %v19620_v41, %v7540_v26  ;;  %v7559_v4 = vsel %vm2178_vm8, %v7510_v25, %v7511_v44  ;;  %v8284_v41 = vrot.slane %v18036_v50, 4  ;;  %v19627_v25 = vrot.slane %v17581_v14, 4 }
 0x6f1   :  { %v7835_v20 = vsel %vm2178_vm8, %v7787_v59, %v7788_v30  ;;  %v8326_v17 = vrot.slane %v7932_v35, 4  ;;  %v8080_v59 = vrot.slane %v17907_v8, 4  ;;  %v7114_v35 = vmax.f32 %v17847_v7, %v7018_v40  ;;  %v19625_v40 = vld [vmem:[#allocation41_spill] sm:$0xff] }
 0x6f2   :  { %v7836_v11 = vsel %vm3917_vm3, %v17652_v1, %v7835_v20  ;;  %v7828_v1 = vsel %vm3917_vm3, %v17597_v3, %v7827_v58  ;;  %v19622_v3 = vld [vmem:[#allocation58_spill] sm:$0xff]  ;;  %v7505_v42 = vrot.slane %v18017_v22, 4  ;;  %v7839_v20 = vsel %vm2178_vm8, %v7791_v54, %v7792_v33 }
 0x6f3   :  { %v7931_v51 = vmax.f32 %v7643_v10, %v7836_v11  ;;  %v18033_v43 = vsel %vm7966_vm5, %v8326_v17, %v17892_v62  ;;  %v19621_v62 = vld [vmem:[#allocation44_spill] sm:$0xff]  ;;  %v7636_v55 = vmax.f32 %v19622_v3, %v17902_v0  ;;  %v7923_v17 = vmax.f32 %v7635_v5, %v7828_v1  ;;  %v19628_v1 = vld [vmem:[#allocation75_spill] sm:$0xff] }
 0x6f4   :  { %7769 = vrot.lane.b32.xlu1 %v17880_v16, %s13526_s21  ;;  %7721 = vrot.lane.b32.xlu0 %v17803_v57, %s13526_s21  ;;  %v7995_v58 = vunpack.c.l.s4 %v13530_v28  ;;  %v19624_v11 = vrot.slane %v17847_v7, 6  ;;  %v7662_v31 = vmax.f32 %v19625_v40, %v18019_v6  ;;  %v7553_v33 = vsel %vm2178_vm8, %v19627_v25, %v7505_v42  ;;  %v13235_v25 = vld [vmem:[#allocation4 + $0x70] sm:$0xff] }
 0x6f5   :  { %v8078_v46 = vrot.slane %v7931_v51, 4  ;;  %v18046_v21 = vsel %vm7966_vm5, %v7931_v51, %v8080_v59  ;;  %7733 = vrot.lane.b32.xlu2 %v19621_v62, %s13526_s21  ;;  %v7924_v54 = vmax.f32 %v7636_v55, %v17925_v53  ;;  %v7992_v3 = vrot.slane %v18053_v13, 4  ;;  %v19646_v62 = vld [vmem:[#allocation43_spill] sm:$0xff] }
 0x6f6   :  { %v7427_v30 = vpop.permute.xlu1 %7426  ;;  %v7243_v0 = vrot.slane %v19624_v11, 4  ;;  %v8004_v53 = vrot.slane %v18056_v9, 4  ;;  %v18098_v55 = vsel %vm7533_vm4, %v17701_v36, %v7559_v4  ;;  %v19631_v36 = vld [vmem:[#allocation29_spill] sm:$0xff]  ;;  %v19632_v4 = vld [vmem:[#allocation56_spill] sm:$0xff]  ;;  %v7526_v16 = vrot.slane %v19646_v62, 4 }
 0x6f7   :  { %v18063_v61 = vsel %vm7966_vm5, %v8078_v46, %v17907_v8  ;;  %v7503_v26 = vrot.slane %v7427_v30, 4  ;;  %v7648_v10 = vmax.f32 %v19623_v47, %v7427_v30  ;;  %v7980_v30 = vrot.slane %v7923_v17, 4  ;;  %v19629_v47 = vld [vmem:[#allocation38_spill] sm:$0xff] }
 0x6f8   :  { %v18075_v51 = vpop.permute.xlu2 %7743  ;;  %v18081_v7 = vmax.f32 %v7114_v35, %v7243_v0  ;;  %v18087_v46 = vpop.permute.xlu0 %7438  ;;  %v18102_v35 = vunpack.c.0.s8 %v7995_v58  ;;  %v13236_v0 = vld [vmem:[#allocation4 + $0x78] sm:$0xff]  ;;  %v7655_v40 = vmax.f32 %v19632_v4, %v18098_v55 }
 0x6f9   :  { %v7551_v8 = vsel %vm2178_vm8, %v7502_v19, %v7503_v26  ;;  %v7936_v59 = vmax.f32 %v7648_v10, %v17935_v32  ;;  %v18090_v32 = vmax.f32 %v7662_v31, %v18075_v51  ;;  %v19630_v10 = vld [vmem:[#allocation19_spill] sm:$0xff]  ;;  %10279 = vmatpush.bf16.msra.mxu1 %v13236_v0 }
 0x6fa   :  { %v7552_v5 = vsel %vm7533_vm4, %v17678_v37, %v7551_v8  ;;  %19626 = vst [vmem:[#allocation61_spill] sm:$0xff] %v18081_v7  ;;  %v7840_v37 = vsel %vm3917_vm3, %v17673_v45, %v7839_v20  ;;  %v7656_v28 = vmax.f32 %v19630_v10, %v17981_v12  ;;  %v7554_v45 = vsel %vm7533_vm4, %v17581_v14, %v7553_v33 }
 0x6fb   :  { %v7647_v44 = vmax.f32 %v19628_v1, %v7552_v5  ;;  %v8276_v19 = vrot.slane %v7936_v59, 4  ;;  %v7650_v20 = vmax.f32 %v19631_v36, %v18017_v22  ;;  %v8092_v33 = vrot.slane %v17989_v39, 4  ;;  %v19633_v1 = vld [vmem:[#allocation76_spill] sm:$0xff] }
 0x6fc   :  { %7482 = vrot.lane.b32.xlu1 %v18081_v7, %s13528_s4  ;;  %7735 = vrot.lane.b32.xlu0 %v19629_v47, %s13526_s21  ;;  %v8089_v36 = vperm.slane %v18046_v21, %v18010_v63  ;;  %v8085_v21 = vperm.slane %v18063_v61, %v18010_v63  ;;  %v7509_v12 = vrot.slane %v18087_v46, 4 }
 0x6fd   :  { %v7935_v42 = vmax.f32 %v7647_v44, %v7840_v37  ;;  %v8277_v26 = vsel %vm7966_vm5, %v8276_v19, %v7924_v54  ;;  %7771 = vrot.lane.b32.xlu2 %v18081_v7, %s13526_s21  ;;  %v7649_v44 = vmax.f32 %v19633_v1, %v7554_v45  ;;  %10280 = vmatpush.bf16.msra.mxu1 %v13235_v25  ;;  %v19647_v7 = vld [vmem:[#allocation18_spill] sm:$0xff] }
 0x6fe   :  { %v8281_v11 = vperm.slane %v8277_v26, %v18010_v63  ;;  %v7720_v58 = vpop.permute.xlu1 %7719  ;;  %v7803_v57 = vrot.slane %v19647_v7, 4 }
 0x6ff   :  { %v7978_v31 = vrot.slane %v7935_v42, 4  ;;  %v7981_v8 = vsel %vm7966_vm5, %v7935_v42, %v7980_v30  ;;  %v7794_v59 = vrot.slane %v7720_v58, 4  ;;  %v7938_v22 = vmax.f32 %v7650_v20, %v7720_v58 }
 0x700   :  { %v7989_v54 = vperm.slane %v7981_v8, %v18010_v63  ;;  %v8282_v14 = vrot.slane %v8281_v11, 4  ;;  %v18121_v5 = vsel %vm7966_vm5, %v8281_v11, %v8284_v41 }
 0x701   :  { %v7979_v19 = vsel %vm7966_vm5, %v7978_v31, %v7923_v17  ;;  %v7841_v37 = vsel %vm2178_vm8, %v7793_v34, %v7794_v59 }
 0x702   :  { %v7985_v30 = vperm.slane %v7979_v19, %v18010_v63  ;;  %v8002_v42 = vrot.slane %v7989_v54, 4  ;;  %v8005_v26 = vsel %vm7966_vm5, %v7989_v54, %v8004_v53  ;;  %v8283_v41 = vsel %vm7966_vm5, %v8282_v14, %v18036_v50  ;;  %v13234_v50 = vld [vmem:[#allocation4 + $0x68] sm:$0xff] }
 0x703   :  { %v8013_v20 = vperm.slane %v8005_v26, %v18102_v35  ;;  %v18137_v45 = vperm.slane %v8283_v41, %v18102_v35  ;;  %v7842_v17 = vsel %vm3917_vm3, %v17711_v48, %v7841_v37  ;;  %v7732_v48 = vpop.permute.xlu0 %7731  ;;  %v8332_v37 = vrot.slane %v7938_v22, 4  ;;  %10281 = vmatpush.bf16.msra.mxu1 %v13234_v50 }
 0x704   :  { %v7990_v34 = vrot.slane %v7985_v30, 4  ;;  %v7993_v11 = vsel %vm7966_vm5, %v7985_v30, %v7992_v3  ;;  %v8003_v53 = vsel %vm7966_vm5, %v8002_v42, %v18056_v9  ;;  %v7937_v58 = vmax.f32 %v7649_v44, %v7842_v17  ;;  %7709 = vrot.lane.b32.xlu0 %v17941_v60, %s13526_s21 }
 0x705   :  { %v8001_v0 = vperm.slane %v7993_v11, %v18102_v35  ;;  %v18148_v31 = vperm.slane %v8003_v53, %v18102_v35  ;;  %v8018_v8 = vrot.slane %v8013_v20, 4  ;;  %8430 = vst [vmem:[#allocation1 + $0x10] ss:$2 sm:$0xff] %v18137_v45  ;;  %v8331_v9 = vperm.slane %v18033_v43, %v18010_v63  ;;  %7757 = vrot.lane.b32.xlu2 %v17946_v56, %s13526_s21 }
 0x706   :  { %v7991_v3 = vsel %vm7966_vm5, %v7990_v34, %v18053_v13  ;;  %v8090_v59 = vrot.slane %v7937_v58, 4  ;;  %v8093_v61 = vsel %vm7966_vm5, %v7937_v58, %v8092_v33  ;;  %v18160_v54 = vpop.permute.xlu1 %7727  ;;  %v8116_v13 = vrot.slane %v8089_v36, 4 }
 0x707   :  { %v18163_v14 = vperm.slane %v7991_v3, %v18102_v35  ;;  %v8014_v25 = vrot.slane %v18148_v31, 4  ;;  %v18167_v1 = vsel %vm7966_vm5, %v8018_v8, %v8001_v0  ;;  %v8020_v43 = vrot.slane %v8001_v0, 4  ;;  %v18169_v44 = vpop.permute.xlu2 %7474  ;;  %v13233_v0 = vld [vmem:[#allocation4 + $0x60] sm:$0xff]  ;;  %v13228_v8 = vld [vmem:[#allocation4 + $0x38] sm:$0xff] }
 0x708   :  { %v8091_v33 = vsel %vm7966_vm5, %v8090_v59, %v17989_v39  ;;  %v8101_v19 = vperm.slane %v8093_v61, %v18010_v63  ;;  %v8104_v30 = vrot.slane %v8085_v21, 4  ;;  %v8333_v39 = vsel %vm7966_vm5, %v8332_v37, %v17971_v49  ;;  %10282 = vmatpush.bf16.msra.mxu1 %v13233_v0  ;;  %10266 = vmatpush.bf16.msra.mxu0 %v13228_v8  ;;  %v13231_v0 = vld [vmem:[#allocation4 + $0x50] sm:$0xff]  ;;  %v19640_v8 = vld [vmem:[#allocation36_spill] sm:$0xff] }
 0x709   :  { %v8015_v42 = vsel %vm7966_vm5, %v8014_v25, %v18163_v14  ;;  %v18177_v26 = vsel %vm7966_vm5, %v8013_v20, %v8020_v43  ;;  %v8097_v41 = vperm.slane %v8091_v33, %v18010_v63  ;;  %v7800_v11 = vrot.slane %v7732_v48, 4  ;;  %v13232_v33 = vld [vmem:[#allocation4 + $0x58] sm:$0xff] }
 0x70a   :  { %8426 = vst [vmem:[#allocation1] ss:$2 sm:$0xff] %v8015_v42  ;;  %v8114_v17 = vrot.slane %v8101_v19, 4  ;;  %v8117_v34 = vsel %vm7966_vm5, %v8101_v19, %v8116_v13  ;;  %v8340_v53 = vrot.slane %v8331_v9, 4  ;;  %v8337_v59 = vperm.slane %v8333_v39, %v18010_v63 }
 0x70b   :  { %v8102_v22 = vrot.slane %v8097_v41, 4  ;;  %v8105_v58 = vsel %vm7966_vm5, %v8097_v41, %v8104_v30  ;;  %v8125_v50 = vperm.slane %v8117_v34, %v18102_v35  ;;  %v7847_v61 = vsel %vm2178_vm8, %v7799_v18, %v7800_v11  ;;  %v18211_v41 = vpop.permute.xlu0 %7739 }
 0x70c   :  { %v8113_v20 = vperm.slane %v8105_v58, %v18102_v35  ;;  %v8115_v3 = vsel %vm7966_vm5, %v8114_v17, %v8089_v36  ;;  %v7848_v13 = vsel %vm3917_vm3, %v17640_v38, %v7847_v61  ;;  %7759 = vrot.lane.b32.xlu0 %v17873_v23, %s13526_s21  ;;  %v8338_v37 = vrot.slane %v8337_v59, 4  ;;  %10283 = vmatpush.bf16.msra.mxu1 %v13232_v33  ;;  %v19642_v61 = vld [vmem:[#allocation11_spill] sm:$0xff] }
 0x70d   :  { %v8103_v49 = vsel %vm7966_vm5, %v8102_v22, %v8085_v21  ;;  %v8121_v25 = vperm.slane %v8115_v3, %v18102_v35  ;;  %v8130_v43 = vrot.slane %v8125_v50, 4  ;;  %v18199_v30 = vsel %vm7966_vm5, %v8337_v59, %v8340_v53  ;;  %v19641_v3 = vld [vmem:[#allocation42_spill] sm:$0xff] }
 0x70e   :  { %v8109_v36 = vperm.slane %v8103_v49, %v18102_v35  ;;  %v8132_v19 = vrot.slane %v8113_v20, 4  ;;  %19634 = vst [vmem:[#allocation46_spill] sm:$0xff] %v18199_v30  ;;  %v18201_v18 = vpop.permute.xlu1 %7450  ;;  %v18209_v38 = vmax.f32 %v7655_v40, %v7848_v13  ;;  %v18219_v11 = vsel %vm7966_vm5, %v8338_v37, %v8331_v9  ;;  %v13227_v9 = vld [vmem:[#allocation4 + $0x30] sm:$0xff]  ;;  %v19643_v13 = vld [vmem:[#allocation60_spill] sm:$0xff] }
 0x70f   :  { %v8126_v21 = vrot.slane %v8121_v25, 4  ;;  %v18204_v42 = vsel %vm7966_vm5, %v8130_v43, %v8113_v20  ;;  %v18213_v17 = vpop.permute.xlu2 %7458  ;;  %19637 = vst [vmem:[#allocation50_spill] sm:$0xff] %v18219_v11  ;;  %v7944_v53 = vmax.f32 %v7656_v28, %v7732_v48  ;;  %v7514_v20 = vrot.slane %v19640_v8, 4  ;;  %10267 = vmatpush.bf16.msra.mxu0 %v13227_v9  ;;  %v13226_v28 = vld [vmem:[#allocation4 + $0x28] sm:$0xff] }
 0x710   :  { %19635 = vst [vmem:[#allocation21_spill] sm:$0xff] %v18204_v42  ;;  %v8128_v34 = vrot.slane %v8109_v36, 4  ;;  %v18216_v39 = vsel %vm7966_vm5, %v8125_v50, %v8132_v19  ;;  %v7515_v50 = vrot.slane %v18201_v18, 4  ;;  %10284 = vmatpush.bf16.msra.mxu1 %v13231_v0  ;;  %v13230_v48 = vld [vmem:[#allocation4 + $0x48] sm:$0xff]  ;;  %v7508_v59 = vrot.slane %v19641_v3, 4  ;;  %v13268_v42 = vld [vmem:[#allocation4 + $0x178] sm:$0xff] }
 0x711   :  { %19636 = vst [vmem:[#allocation65_spill] sm:$0xff] %v18216_v39  ;;  %v18225_v22 = vsel %vm7966_vm5, %v8126_v21, %v8109_v36  ;;  %v7520_v49 = vrot.slane %v19642_v61, 4  ;;  %v19644_v19 = vld [vmem:[#allocation9_spill] sm:$0xff]  ;;  %v7527_v9 = vrot.slane %v18169_v44, 4  ;;  %v7804_v23 = vrot.slane %v18211_v41, 4  ;;  %v13229_v39 = vld [vmem:[#allocation4 + $0x40] sm:$0xff] }
 0x712   :  { %19638 = vst [vmem:[#allocation52_spill] sm:$0xff] %v18225_v22  ;;  %v18228_v55 = vsel %vm7966_vm5, %v8121_v25, %v8128_v34  ;;  %v7798_v25 = vrot.slane %v18160_v54, 4  ;;  %v7563_v43 = vsel %vm2178_vm8, %v7514_v20, %v7515_v50  ;;  %v7797_v37 = vrot.slane %v19644_v19, 4  ;;  %v19645_v21 = vld [vmem:[#allocation17_spill] sm:$0xff] }
 0x713   :  { %19639 = vst [vmem:[#allocation24_spill] sm:$0xff] %v18228_v55  ;;  %v7809_v34 = vrot.slane %v19645_v21, 4  ;;  %v7557_v47 = vsel %vm2178_vm8, %v7508_v59, %v7509_v12  ;;  %10268 = vmatpush.bf16.msra.mxu0 %v13226_v28  ;;  %v7564_v30 = vsel %vm7533_vm4, %v19640_v8, %v7563_v43  ;;  %v7575_v28 = vsel %vm2178_vm8, %v7526_v16, %v7527_v9  ;;  %v19649_v11 = vld [vmem:[#allocation33_spill] sm:$0xff] }
 0x714   :  { %10285 = vmatpush.bf16.msra.mxu1 %v13230_v48  ;;  %v7845_v12 = vsel %vm2178_vm8, %v7797_v37, %v7798_v25  ;;  %v7815_v8 = vrot.slane %v19649_v11, 4  ;;  %v7851_v43 = vsel %vm2178_vm8, %v7803_v57, %v7804_v23  ;;  %v7659_v22 = vmax.f32 %v19650_v52, %v7564_v30  ;;  %v13267_v23 = vld [vmem:[#allocation4 + $0x170] sm:$0xff]  ;;  %v19652_v57 = vld [vmem:[#allocation77_spill] sm:$0xff]  ;;  %v19653_v30 = vld [vmem:[#allocation27_spill] sm:$0xff] }
 0x715   :  { %v19654_v37 = vld [vmem:[#allocation57_spill] sm:$0xff] }
 0x716   :  { %v7463_v4 = vpop.permute.xlu1 %7462  ;;  %v18230_v40 = vpop.permute.xlu0 %7466 }
 0x717   :  { %v18232_v58 = vpop.permute.xlu2 %7432  ;;  %v7521_v10 = vrot.slane %v7463_v4, 4  ;;  %v7668_v33 = vmax.f32 %v19643_v13, %v18230_v40  ;;  %v13225_v13 = vld [vmem:[#allocation4 + $0x20] sm:$0xff] }
 0x718   :  { %10269 = vmatpush.bf16.msra.mxu0 %v13225_v13  ;;  %10286 = vmatpush.bf16.msra.mxu1 %v13229_v39  ;;  %v7519_v39 = vrot.slane %v18213_v17, 4 }
 0x719   :  { %v7569_v50 = vsel %vm2178_vm8, %v7520_v49, %v7521_v10  ;;  %v7558_v10 = vsel %vm7533_vm4, %v19641_v3, %v7557_v47  ;;  %v19648_v49 = vld [vmem:[#allocation34_spill] sm:$0xff]  ;;  %v7846_v3 = vsel %vm3917_vm3, %v19644_v19, %v7845_v12  ;;  %v7852_v19 = vsel %vm3917_vm3, %v19647_v7, %v7851_v43 }
 0x71a   :  { %v7570_v48 = vsel %vm7533_vm4, %v19642_v61, %v7569_v50  ;;  %v19651_v47 = vld [vmem:[#allocation14_spill] sm:$0xff]  ;;  %v7653_v52 = vmax.f32 %v19652_v57, %v7558_v10  ;;  %v13222_v57 = vld [vmem:[#allocation4 + $0x8] sm:$0xff] }
 0x71b   :  { %v7654_v16 = vmax.f32 %v19651_v47, %v18087_v46  ;;  %v7576_v46 = vsel %vm7533_vm4, %v19646_v62, %v7575_v28  ;;  %v13266_v62 = vld [vmem:[#allocation4 + $0x168] sm:$0xff]  ;;  %v19656_v28 = vld [vmem:[#allocation28_spill] sm:$0xff] }
 0x71c   :  { %10331 = vmatpush.bf16.msrb.mxu1 %v13268_v42 }
 0x71d   :  { %v7942_v7 = vmax.f32 %v7654_v16, %v18160_v54  ;;  %v13265_v16 = vld [vmem:[#allocation4 + $0x160] sm:$0xff] }
 0x71e   :  { %v7752_v36 = vpop.permute.xlu1 %7751  ;;  %v18246_v0 = vpop.permute.xlu0 %7755 }
 0x71f   :  { %v18248_v60 = vpop.permute.xlu2 %7446  ;;  %v7810_v56 = vrot.slane %v7752_v36, 4  ;;  %v7956_v20 = vmax.f32 %v7668_v33, %v18246_v0  ;;  %v7666_v33 = vmax.f32 %v19648_v49, %v7463_v4  ;;  %v7671_v49 = vmax.f32 %v19656_v28, %v7576_v46 }
 0x720   :  { %10332 = vmatpush.bf16.msrb.mxu1 %v13267_v23 }
 0x721   :  { %v8354_v59 = vrot.slane %v7956_v20, 4  ;;  %v7857_v55 = vsel %vm2178_vm8, %v7809_v34, %v7810_v56  ;;  %v13224_v56 = vld [vmem:[#allocation4 + $0x18] sm:$0xff]  ;;  %v7954_v61 = vmax.f32 %v7666_v33, %v7752_v36  ;;  %v7665_v34 = vmax.f32 %v19654_v37, %v7570_v48 }
 0x722   :  { %v7858_v4 = vsel %vm3917_vm3, %v19645_v21, %v7857_v55  ;;  %v19655_v55 = vld [vmem:[#allocation40_spill] sm:$0xff]  ;;  %v7941_v20 = vmax.f32 %v7653_v52, %v7846_v3  ;;  %10270 = vmatpush.bf16.msra.mxu0 %v13224_v56 }
 0x723   :  { %v18270_v25 = vsel %vm7966_vm5, %v8354_v59, %v7944_v53  ;;  %v7672_v53 = vmax.f32 %v19653_v30, %v18169_v44  ;;  %v7660_v42 = vmax.f32 %v19655_v55, %v18201_v18  ;;  %v7947_v44 = vmax.f32 %v7659_v22, %v7852_v19  ;;  %v13223_v59 = vld [vmem:[#allocation4 + $0x10] sm:$0xff] }
 0x724   :  { %v7953_v13 = vmax.f32 %v7665_v34, %v7858_v4  ;;  %v8298_v10 = vrot.slane %v7954_v61, 4  ;;  %v8024_v3 = vrot.slane %v7941_v20, 4  ;;  %10333 = vmatpush.bf16.msrb.mxu1 %v13266_v62 }
 0x725   :  { %v7948_v43 = vmax.f32 %v7660_v42, %v18211_v41  ;;  %v8036_v4 = vrot.slane %v7947_v44, 4  ;;  %v13221_v42 = vld [vmem:[#allocation4] sm:$0xff] }
 0x726   :  { %v7457_v9 = vpop.permute.xlu1 %7456  ;;  %v7764_v36 = vpop.permute.xlu0 %7763  ;;  %v8022_v61 = vrot.slane %v7953_v13, 4  ;;  %10271 = vmatpush.bf16.msra.mxu0 %v13223_v59  ;;  %v8299_v54 = vsel %vm7966_vm5, %v8298_v10, %v7942_v7  ;;  %v8025_v41 = vsel %vm7966_vm5, %v7953_v13, %v8024_v3 }
 0x727   :  { %v18289_v21 = vpop.permute.xlu2 %7697  ;;  %v7518_v50 = vrot.slane %v7457_v9, 4  ;;  %v7816_v12 = vrot.slane %v7764_v36, 4  ;;  %v7960_v48 = vmax.f32 %v7672_v53, %v7764_v36  ;;  %v18317_v46 = vperm.slane %v8299_v54, %v18010_v63 }
 0x728   :  { %v8033_v36 = vperm.slane %v8025_v41, %v18010_v63  ;;  %10334 = vmatpush.bf16.msrb.mxu1 %v13265_v16 }
 0x729   :  { %v7863_v18 = vsel %vm2178_vm8, %v7815_v8, %v7816_v12  ;;  %v7567_v33 = vsel %vm2178_vm8, %v7518_v50, %v7519_v39  ;;  %v8304_v47 = vrot.slane %v7960_v48, 4  ;;  %v13264_v12 = vld [vmem:[#allocation4 + $0x158] sm:$0xff] }
 0x72a   :  { %v7864_v22 = vsel %vm3917_vm3, %v19649_v11, %v7863_v18  ;;  %v18299_v56 = vsel %vm7533_vm4, %v7457_v9, %v7567_v33  ;;  %v8023_v9 = vsel %vm7966_vm5, %v8022_v61, %v7941_v20  ;;  %10272 = vmatpush.bf16.msra.mxu0 %v13222_v57  ;;  %v7513_v61 = vrot.slane %v18248_v60, 4  ;;  %v13262_v57 = vld [vmem:[#allocation4 + $0x148] sm:$0xff] }
 0x72b   :  { %v7959_v23 = vmax.f32 %v7671_v49, %v7864_v22  ;;  %v8305_v8 = vsel %vm7966_vm5, %v8304_v47, %v7948_v43  ;;  %v18328_v59 = vperm.slane %v8023_v9, %v18010_v63  ;;  %v13263_v49 = vld [vmem:[#allocation4 + $0x150] sm:$0xff]  ;;  %v19657_v9 = vld [vmem:[#allocation31_spill] sm:$0xff] }
 0x72c   :  { %v18306_v30 = vperm.slane %v8305_v8, %v18010_v63  ;;  %10335 = vmatpush.bf16.msrb.mxu1 %v13264_v12  ;;  %v7517_v8 = vrot.slane %v18019_v6, 4 }
 0x72d   :  { %v8034_v52 = vrot.slane %v7959_v23, 4  ;;  %v8037_v11 = vsel %vm7966_vm5, %v7959_v23, %v8036_v4 }
 0x72e   :  { %v18308_v53 = vpop.permute.xlu1 %7398  ;;  %v8045_v39 = vperm.slane %v8037_v11, %v18010_v63  ;;  %v18311_v37 = vpop.permute.xlu0 %7410  ;;  %v8310_v55 = vrot.slane %v18306_v30, 4  ;;  %10273 = vmatpush.bf16.msra.mxu0 %v13221_v42 }
 0x72f   :  { %v18313_v34 = vpop.permute.xlu2 %7747  ;;  %v8035_v19 = vsel %vm7966_vm5, %v8034_v52, %v7947_v44  ;;  %v7489_v3 = vrot.slane %v18308_v53, 4  ;;  %v8016_v52 = vrot.slane %v18163_v14, 4 }
 0x730   :  { %v18323_v50 = vperm.slane %v8035_v19, %v18010_v63  ;;  %v8058_v13 = vrot.slane %v8045_v39, 4  ;;  %v8311_v20 = vsel %vm7966_vm5, %v8310_v55, %v18317_v46  ;;  %10336 = vmatpush.bf16.msrb.mxu1 %v13263_v49  ;;  %v7516_v19 = vrot.slane %v19657_v9, 4  ;;  %v19658_v55 = vld [vmem:[#allocation12_spill] sm:$0xff] }
 0x731   :  { %v18333_v48 = vperm.slane %v8311_v20, %v18102_v35  ;;  %v7805_v42 = vrot.slane %v19658_v55, 4 }
 0x732   :  { %v8046_v44 = vrot.slane %v18323_v50, 4  ;;  %v8059_v10 = vsel %vm7966_vm5, %v8058_v13, %v8033_v36  ;;  %v8060_v13 = vrot.slane %v8033_v36, 4  ;;  %v7565_v6 = vsel %vm2178_vm8, %v7516_v19, %v7517_v8  ;;  %v19660_v19 = vld [vmem:[#allocation59_spill] sm:$0xff] }
 0x733   :  { %v8065_v62 = vperm.slane %v8059_v10, %v18102_v35  ;;  %8432 = vst [vmem:[#allocation1 + $0x11] ss:$2 sm:$0xff] %v18333_v48  ;;  %v7808_v10 = vrot.slane %v18313_v34, 4  ;;  %v7523_v8 = vrot.slane %v18230_v40, 4  ;;  %v7812_v40 = vrot.slane %v18246_v0, 4 }
 0x734   :  { %v8047_v28 = vsel %vm7966_vm5, %v8046_v44, %v18328_v59  ;;  %10337 = vmatpush.bf16.msrb.mxu1 %v13262_v57  ;;  %v7806_v44 = vrot.slane %v18075_v51, 4  ;;  %v8061_v36 = vsel %vm7966_vm5, %v8045_v39, %v8060_v13  ;;  %v19659_v51 = vld [vmem:[#allocation39_spill] sm:$0xff]  ;;  %v7522_v13 = vrot.slane %v19660_v19, 4 }
 0x735   :  { %v8053_v7 = vperm.slane %v8047_v28, %v18102_v35  ;;  %v8070_v18 = vrot.slane %v8065_v62, 4 }
 0x736   :  { %v7445_v33 = vpop.permute.xlu1 %7444  ;;  %v7397_v43 = vpop.permute.xlu0 %7396 }
 0x737   :  { %v18340_v22 = vpop.permute.xlu2 %7767  ;;  %v8071_v47 = vsel %vm7966_vm5, %v8070_v18, %v8053_v7  ;;  %v7488_v4 = vrot.slane %v7397_v43, 4  ;;  %v7512_v23 = vrot.slane %v7445_v33, 4  ;;  %v8072_v12 = vrot.slane %v8053_v7, 4 }
 0x738   :  { %8428 = vst [vmem:[#allocation1 + $0x1] ss:$2 sm:$0xff] %v8071_v47  ;;  %v8017_v18 = vsel %vm7966_vm5, %v18148_v31, %v8016_v52  ;;  %v8048_v47 = vrot.slane %v18328_v59, 4  ;;  %v18380_v59 = vperm.slane %v8061_v36, %v18102_v35  ;;  %v7853_v52 = vsel %vm2178_vm8, %v7805_v42, %v7806_v44 }
 0x739   :  { %v7537_v54 = vsel %vm2178_vm8, %v7488_v4, %v7489_v3  ;;  %v7561_v41 = vsel %vm2178_vm8, %v7512_v23, %v7513_v61  ;;  %v7663_v3 = vmax.f32 %v19659_v51, %v18299_v56  ;;  %v8073_v57 = vsel %vm7966_vm5, %v8065_v62, %v8072_v12  ;;  %v13261_v56 = vld [vmem:[#allocation4 + $0x140] sm:$0xff] }
 0x73a   :  { %v18348_v16 = vsel %vm7533_vm4, %v7397_v43, %v7537_v54  ;;  %v18353_v11 = vsel %vm7533_vm4, %v7445_v33, %v7561_v41  ;;  %v7506_v33 = vrot.slane %v18232_v58, 4  ;;  %v8049_v62 = vsel %vm7966_vm5, %v18323_v50, %v8048_v47  ;;  %10338 = vmatpush.bf16.msrb.mxu1 %v13261_v56 }
 0x73b   :  { %v7566_v12 = vsel %vm7533_vm4, %v19657_v9, %v7565_v6  ;;  %v7854_v42 = vsel %vm3917_vm3, %v19658_v55, %v7853_v52  ;;  %v7571_v50 = vsel %vm2178_vm8, %v7522_v13, %v7523_v8  ;;  %v18400_v44 = vperm.slane %v8049_v62, %v18102_v35  ;;  %v19663_v55 = vld [vmem:[#allocation73_spill] sm:$0xff]  ;;  %v19665_v62 = vld [vmem:[#allocation15_spill] sm:$0xff]  ;;  %v19666_v13 = vld [vmem:[#allocation32_spill] sm:$0xff] }
 0x73c   :  { %v8074_v9 = vrot.slane %v18380_v59, 4  ;;  %v8322_v51 = vrot.slane %v18333_v48, 4 }
 0x73e   :  { %v7746_v20 = vpop.permute.xlu1 %7745  ;;  %v18360_v28 = vpop.permute.xlu0 %7434 }
 0x73f   :  { %v18362_v14 = vpop.permute.xlu2 %7468  ;;  %v7807_v49 = vrot.slane %v7746_v20, 4  ;;  %v7507_v7 = vrot.slane %v18360_v28, 4  ;;  %v8433_v43 = vld.sshfl [vmem:[#allocation1] sm:$0xff pattern:$0x75316420] }
 0x740   :  { %v8637_v61 = vpack.c.bf16 %v8433_v43, %v8433_v43  ;;  %v8434_v23 = vld.sshfl [vmem:[#allocation1 + $0x8] sm:$0xff pattern:$0x75316420]  ;;  %v7494_v43 = vrot.slane %v19663_v55, 4 }
 0x741   :  { %v7855_v4 = vsel %vm2178_vm8, %v7807_v49, %v7808_v10  ;;  %v18375_v31 = vsel %vm2178_vm8, %v7506_v33, %v7507_v7  ;;  %v8638_v39 = vpack.c.bf16 %v8434_v23, %v8434_v23  ;;  %8443 = vst [vmem:[#allocation1] ss:$2 sm:$0xff] %v8017_v18  ;;  %v7634_v49 = vmax.f32 %v17797_v24, %v18308_v53  ;;  %v19662_v33 = vld [vmem:[#allocation22_spill] sm:$0xff] }
 0x742   :  { %v7856_v54 = vsel %vm3917_vm3, %v7746_v20, %v7855_v4  ;;  %10274 = vmatmul.bf16.vlgmr.msra.gmra.mxu0 %v8637_v61  ;;  %8445 = vst [vmem:[#allocation1 + $0x1] ss:$2 sm:$0xff] %v8073_v57  ;;  %v19661_v20 = vld [vmem:[#allocation37_spill] sm:$0xff]  ;;  %v7661_v36 = vmax.f32 %v19662_v33, %v7566_v12  ;;  %v8294_v24 = vrot.slane %v18137_v45, 4  ;;  %v7495_v53 = vrot.slane %v18311_v37, 4 }
 0x743   :  { %v18382_v41 = vmax.f32 %v7663_v3, %v7856_v54  ;;  %10287 = vmatmul.bf16.vlgmr.msra.gmra.mxu1 %v8638_v39  ;;  %v7811_v10 = vrot.slane %v19661_v20, 4  ;;  %v7572_v4 = vsel %vm7533_vm4, %v19660_v19, %v7571_v50  ;;  %v8075_v45 = vsel %vm7966_vm5, %v8074_v9, %v18400_v44  ;;  %v18423_v54 = vld.sshfl [vmem:[#allocation1 + $0x10] sm:$0xff pattern:$0x75316420]  ;;  %v19664_v39 = vld [vmem:[#allocation10_spill] sm:$0xff] }
 0x744   :  { %v18416_v3 = vmax.f32 %v7661_v36, %v7854_v42  ;;  %v7528_v8 = vrot.slane %v19664_v39, 4  ;;  %v8295_v56 = vsel %vm7966_vm5, 0.0, %v8294_v24  ;;  %v7543_v52 = vsel %vm2178_vm8, %v7494_v43, %v7495_v53 }
 0x745   :  { %v7859_v47 = vsel %vm2178_vm8, %v7811_v10, %v7812_v40  ;;  %v7817_v19 = vrot.slane %v19665_v62, 4  ;;  %v7667_v12 = vmax.f32 %v19666_v13, %v7572_v4  ;;  %v8323_v40 = vsel %vm7966_vm5, 0.0, %v8322_v51  ;;  %8447 = vst [vmem:[#allocation1 + $0x10] ss:$2 sm:$0xff] %v8295_v56  ;;  %v19668_v56 = vld [vmem:[#allocation26_spill] sm:$0xff] }
 0x746   :  { %v18394_v18 = vpop.permute.xlu1 %7422  ;;  %v18403_v6 = vpop.permute.xlu0 %7480  ;;  %v7860_v48 = vsel %vm3917_vm3, %v19661_v20, %v7859_v47  ;;  %v18437_v10 = vperm.slane %v18121_v5, %v18102_v35  ;;  %v8148_v20 = vrot.slane %v18416_v3, 4  ;;  %v7640_v42 = vmax.f32 %v17718_v29, %v18311_v37  ;;  %8449 = vst [vmem:[#allocation1 + $0x11] ss:$2 sm:$0xff] %v8323_v40 }
 0x747   :  { %v18405_v0 = vpop.permute.xlu2 %7687  ;;  %v7955_v9 = vmax.f32 %v7667_v12, %v7860_v48  ;;  %v7544_v33 = vsel %vm7533_vm4, %v19663_v55, %v7543_v52  ;;  %v8312_v5 = vrot.slane %v18317_v46, 4  ;;  %v7783_v43 = vrot.slane %v18289_v21, 4 }
 0x748   :  { %v18411_v7 = vmax.f32 %v7634_v49, %v18405_v0  ;;  %v8136_v49 = vrot.slane %v18209_v38, 4  ;;  %v8076_v4 = vrot.slane %v18400_v44, 4  ;;  %v8359_v55 = vperm.slane %v18270_v25, %v18010_v63 }
 0x749   :  { %v8450_v61 = vld.sshfl [vmem:[#allocation1] sm:$0xff pattern:$0x75316420]  ;;  %v8451_v23 = vld.sshfl [vmem:[#allocation1 + $0x8] sm:$0xff pattern:$0x75316420] }
 0x74a   :  { %v13444_v57 = vpack.i.bf16 %v8451_v23, %v8450_v61  ;;  %8468 = vst [vmem:[#allocation1] ss:$2 sm:$0xff] %v18167_v1  ;;  %v7818_v1 = vrot.slane %v18340_v22, 4  ;;  %v19667_v23 = vld [vmem:[#allocation74_spill] sm:$0xff]  ;;  %v8137_v52 = vsel %vm7966_vm5, %v7955_v9, %v8136_v49  ;;  %v8134_v12 = vrot.slane %v7955_v9, 4 }
 0x74b   :  { %8470 = vst [vmem:[#allocation1 + $0x1] ss:$2 sm:$0xff] %v8075_v45 }
 0x74c   :  { %13445 = vrot.lane.b32.xlu1 %v13444_v57, %s13526_s21  ;;  %v7865_v29 = vsel %vm2178_vm8, %v7817_v19, %v7818_v1  ;;  %v8313_v57 = vsel %vm7966_vm5, %v18306_v30, %v8312_v5  ;;  %v8077_v30 = vsel %vm7966_vm5, %v18380_v59, %v8076_v4  ;;  %v18484_v59 = vsel %vm7533_vm4, %v18232_v58, %v18375_v31 }
 0x74d   :  { %v7866_v25 = vsel %vm3917_vm3, %v19665_v62, %v7865_v29  ;;  %v8452_v1 = vld.sshfl [vmem:[#allocation1 + $0x10] sm:$0xff pattern:$0x75316420]  ;;  %v8368_v62 = vrot.slane %v8359_v55, 4  ;;  %v8321_v49 = vperm.slane %v8313_v57, %v18102_v35  ;;  %v8135_v58 = vsel %vm7966_vm5, %v8134_v12, %v18209_v38 }
 0x74e   :  { %v7479_v50 = vpop.permute.xlu1 %7478  ;;  %v7700_v36 = vpop.permute.xlu0 %7699  ;;  %8472 = vst [vmem:[#allocation1 + $0x10] ss:$2 sm:$0xff] %v18437_v10  ;;  %v7501_v31 = vrot.slane %v18394_v18, 4  ;;  %v8141_v38 = vperm.slane %v8135_v58, %v18010_v63 }
 0x74f   :  { %v7529_v24 = vrot.slane %v7479_v50, 4  ;;  %v7674_v53 = vmax.f32 %v17913_v2, %v7479_v50  ;;  %v7784_v47 = vrot.slane %v7700_v36, 4  ;;  %v18448_v51 = vmax.f32 %v7640_v42, %v7700_v36  ;;  %8474 = vst [vmem:[#allocation1 + $0x11] ss:$2 sm:$0xff] %v8321_v49 }
 0x750   :  { %v7639_v2 = vmax.f32 %v19667_v23, %v7544_v33 }
 0x751   :  { %v7577_v37 = vsel %vm2178_vm8, %v7528_v8, %v7529_v24  ;;  %v7962_v61 = vmax.f32 %v7674_v53, %v18340_v22  ;;  %v7831_v46 = vsel %vm2178_vm8, %v7783_v43, %v7784_v47  ;;  %v8145_v47 = vperm.slane %v8137_v52, %v18010_v63 }
 0x752   :  { %v7578_v45 = vsel %vm7533_vm4, %v19664_v39, %v7577_v37  ;;  %v7832_v44 = vsel %vm3917_vm3, %v18289_v21, %v7831_v46  ;;  %v8475_v22 = vld.sshfl [vmem:[#allocation1] sm:$0xff pattern:$0x75316420]  ;;  %v18470_v13 = vld.sshfl [vmem:[#allocation1 + $0x8] sm:$0xff pattern:$0x75316420] }
 0x753   :  { %v7673_v8 = vmax.f32 %v19668_v56, %v7578_v45  ;;  %v8360_v48 = vrot.slane %v7962_v61, 4  ;;  %v18468_v19 = vmax.f32 %v7639_v2, %v7832_v44  ;;  %v8642_v39 = vpack.c.bf16 %v8475_v22, %v8475_v22  ;;  %8485 = vst [vmem:[#allocation1] ss:$2 sm:$0xff] %v18177_v26 }
 0x754   :  { %7711 = vrot.lane.b32.xlu1 %v17877_v27, %s13526_s21  ;;  %8487 = vst [vmem:[#allocation1 + $0x1] ss:$2 sm:$0xff] %v8077_v30  ;;  %v8296_v61 = vrot.slane %v18437_v10, 4  ;;  %v8324_v44 = vrot.slane %v8321_v49, 4 }
 0x755   :  { %v7961_v40 = vmax.f32 %v7673_v8, %v7866_v25  ;;  %v8361_v21 = vsel %vm7966_vm5, %v8360_v48, %v18090_v32  ;;  %10339 = vmatmul.bf16.vlgmr.msrb.gmra.mxu1 %v8642_v39  ;;  %v7778_v32 = vrot.slane %v18405_v0, 4  ;;  %v19669_v25 = vld [vmem:[#allocation52_spill] sm:$0xff] }
 0x756   :  { %v8365_v42 = vperm.slane %v8361_v21, %v18010_v63  ;;  %v7686_v50 = vpop.permute.xlu1 %7685  ;;  %v7421_v26 = vpop.permute.xlu0 %7420  ;;  %v8297_v12 = vsel %vm7966_vm5, 0.0, %v8296_v61 }
 0x757   :  { %v8146_v9 = vrot.slane %v7961_v40, 4  ;;  %v8149_v33 = vsel %vm7966_vm5, %v7961_v40, %v8148_v20  ;;  %v7777_v36 = vrot.slane %v7686_v50, 4  ;;  %v7500_v43 = vrot.slane %v7421_v26, 4  ;;  %v18526_v40 = vld.sshfl [vmem:[#allocation1 + $0x10] sm:$0xff pattern:$0x75316420] }
 0x758   :  { %v8157_v24 = vperm.slane %v8149_v33, %v18010_v63  ;;  %v8366_v53 = vrot.slane %v8365_v42, 4  ;;  %v18491_v5 = vsel %vm7966_vm5, %v8365_v42, %v8368_v62  ;;  %8489 = vst [vmem:[#allocation1 + $0x10] ss:$2 sm:$0xff] %v8297_v12  ;;  %v8172_v42 = vrot.slane %v8145_v47, 4  ;;  %v13244_v12 = vld [vmem:[#allocation4 + $0xb8] sm:$0xff] }
 0x759   :  { %v8147_v0 = vsel %vm7966_vm5, %v8146_v9, %v18416_v3  ;;  %v7825_v20 = vsel %vm2178_vm8, %v7777_v36, %v7778_v32  ;;  %v7549_v23 = vsel %vm2178_vm8, %v7500_v43, %v7501_v31  ;;  %v19671_v43 = vld [vmem:[#allocation50_spill] sm:$0xff]  ;;  %10292 = vmatpush.bf16.msrb.mxu2 %v13244_v12 }
 0x75a   :  { %v8153_v4 = vperm.slane %v8147_v0, %v18010_v63  ;;  %v8170_v29 = vrot.slane %v8157_v24, 4  ;;  %v8367_v37 = vsel %vm7966_vm5, %v8366_v53, %v8359_v55  ;;  %v18507_v3 = vsel %vm7533_vm4, %v7421_v26, %v7549_v23  ;;  %v19673_v23 = vld [vmem:[#allocation16_spill] sm:$0xff] }
 0x75b   :  { %v8493_v57 = vld.sshfl [vmem:[#allocation1 + $0x8] sm:$0xff pattern:$0x75316420]  ;;  %v7633_v55 = vmax.f32 %v17828_v15, %v18348_v16  ;;  %v7826_v56 = vsel %vm3917_vm3, %v7686_v50, %v7825_v20  ;;  %v8492_v8 = vld.sshfl [vmem:[#allocation1] sm:$0xff pattern:$0x75316420]  ;;  %v18530_v50 = vpop.permute.xlu2 %7733  ;;  %v8173_v26 = vsel %vm7966_vm5, %v8157_v24, %v8172_v42  ;;  %v8345_v58 = vperm.slane %v19671_v43, %v18102_v35 }
 0x75c   :  { %v8158_v2 = vrot.slane %v8153_v4, 4  ;;  %v8171_v46 = vsel %vm7966_vm5, %v8170_v29, %v8145_v47  ;;  %8457 = vrot.lane.b32.xlu1 %v8452_v1, %s13526_s21  ;;  %8497 = vrot.lane.b32.xlu0 %v8493_v57, %s13526_s21  ;;  %8510 = vst [vmem:[#allocation1] ss:$2 sm:$0xff] %v19669_v25  ;;  %v19670_v15 = vld [vmem:[#allocation13_spill] sm:$0xff]  ;;  %v8325_v1 = vsel %vm7966_vm5, 0.0, %v8324_v44  ;;  %v8373_v31 = vperm.slane %v8367_v37, %v18102_v35  ;;  %v19672_v29 = vld [vmem:[#allocation24_spill] sm:$0xff] }
 0x75d   :  { %v8177_v45 = vperm.slane %v8171_v46, %v18102_v35  ;;  %8495 = vrot.lane.b32.xlu2 %v8492_v8, %s13526_s21  ;;  %v7652_v16 = vmax.f32 %v19670_v15, %v18360_v28  ;;  %v18524_v30 = vmax.f32 %v7633_v55, %v7826_v56  ;;  %8491 = vst [vmem:[#allocation1 + $0x11] ss:$2 sm:$0xff] %v8325_v1  ;;  %v8160_v47 = vrot.slane %v8141_v38, 4  ;;  %v13252_v15 = vld [vmem:[#allocation4 + $0xf8] sm:$0xff]  ;;  %v19674_v42 = vld [vmem:[#allocation61_spill] sm:$0xff] }
 0x75e   :  { %v8159_v10 = vsel %vm7966_vm5, %v8158_v2, %v8141_v38  ;;  %v7724_v48 = vpop.permute.xlu1 %7723  ;;  %v18519_v39 = vpop.permute.xlu0 %7470  ;;  %v7651_v24 = vmax.f32 %v19673_v23, %v18484_v59  ;;  %v18552_v46 = vperm.slane %v8173_v26, %v18102_v35  ;;  %v8204_v38 = vrot.slane %v18468_v19, 4  ;;  %10305 = vmatpush.bf16.msrb.mxu3 %v13252_v15 }
 0x75f   :  { %v8165_v22 = vperm.slane %v8159_v10, %v18102_v35  ;;  %v8182_v52 = vrot.slane %v8177_v45, 4  ;;  %v7940_v62 = vmax.f32 %v7652_v16, %v7724_v48  ;;  %v7796_v36 = vrot.slane %v7724_v48, 4 }
 0x760   :  { %v8350_v44 = vrot.slane %v8345_v58, 4  ;;  %v7530_v56 = vrot.slane %v18403_v6, 4  ;;  %v8186_v48 = vrot.slane %v18552_v46, 4  ;;  %v8378_v16 = vrot.slane %v8373_v31, 4 }
 0x761   :  { %v8183_v21 = vsel %vm7966_vm5, %v8182_v52, %v8165_v22  ;;  %v8388_v49 = vrot.slane %v7940_v62, 4  ;;  %v8184_v32 = vrot.slane %v8165_v22, 4  ;;  %v13243_v62 = vld [vmem:[#allocation4 + $0xb0] sm:$0xff]  ;;  %v7525_v23 = vrot.slane %v18519_v39, 4 }
 0x762   :  { %8512 = vst [vmem:[#allocation1 + $0x1] ss:$2 sm:$0xff] %v8183_v21  ;;  %10293 = vmatpush.bf16.msrb.mxu2 %v13243_v62 }
 0x763   :  { %v18534_v28 = vsel %vm7966_vm5, %v8388_v49, %v18448_v51  ;;  %v8185_v51 = vsel %vm7966_vm5, %v8177_v45, %v8184_v32  ;;  %v8161_v45 = vsel %vm7966_vm5, %v8153_v4, %v8160_v47  ;;  %v7772_v4 = vpop.permute.xlu2 %7771  ;;  %v13251_v49 = vld [vmem:[#allocation4 + $0xf0] sm:$0xff]  ;;  %v13260_v47 = vld [vmem:[#allocation4 + $0x138] sm:$0xff] }
 0x764   :  { %v8494_v61 = vld.sshfl [vmem:[#allocation1 + $0x10] sm:$0xff pattern:$0x75316420]  ;;  %v18563_v8 = vperm.slane %v8161_v45, %v18102_v35  ;;  %10306 = vmatpush.bf16.msrb.mxu3 %v13251_v49  ;;  %10318 = vmatpush.bf16.msrb.mxu0 %v13260_v47 }
 0x765   :  { %8499 = vrot.lane.b32.xlu1 %v8494_v61, %s13526_s21  ;;  %8514 = vst [vmem:[#allocation1 + $0x10] ss:$2 sm:$0xff] %v8345_v58  ;;  %v19675_v58 = vld [vmem:[#allocation21_spill] sm:$0xff]  ;;  %v8379_v61 = vsel %vm7966_vm5, 0.0, %v8378_v16  ;;  %v13299_v16 = vld [vmem:[#allocation4 + $0x270] sm:$0xff] }
 0x766   :  { %v18536_v9 = vpop.permute.xlu1 %7769  ;;  %v7722_v33 = vpop.permute.xlu0 %7721  ;;  %8516 = vst [vmem:[#allocation1 + $0x11] ss:$2 sm:$0xff] %v8373_v31  ;;  %v13242_v45 = vld [vmem:[#allocation4 + $0xa8] sm:$0xff] }
 0x767   :  { %v7795_v53 = vrot.slane %v7722_v33, 4  ;;  %v7819_v21 = vrot.slane %v18536_v9, 4  ;;  %10294 = vmatpush.bf16.msrb.mxu2 %v13242_v45  ;;  %v19680_v47 = vld [vmem:[#allocation65_spill] sm:$0xff] }
 0x769   :  { %v18542_v0 = vld.sshfl [vmem:[#allocation1] sm:$0xff pattern:$0x75316420]  ;;  %v18544_v20 = vld.sshfl [vmem:[#allocation1 + $0x8] sm:$0xff pattern:$0x75316420]  ;;  %v7843_v2 = vsel %vm2178_vm8, %v7795_v53, %v7796_v36 }
 0x76a   :  { %8527 = vst [vmem:[#allocation1] ss:$2 sm:$0xff] %v19672_v29  ;;  %v7844_v37 = vsel %vm3917_vm3, %v7722_v33, %v7843_v2  ;;  %v8351_v36 = vsel %vm7966_vm5, 0.0, %v8350_v44  ;;  %v7820_v53 = vrot.slane %v7772_v4, 4  ;;  %v19677_v2 = vld [vmem:[#allocation62_spill] sm:$0xff]  ;;  %v7801_v44 = vrot.slane %v18530_v50, 4 }
 0x76b   :  { %8529 = vst [vmem:[#allocation1 + $0x1] ss:$2 sm:$0xff] %v8185_v51  ;;  %v7939_v57 = vmax.f32 %v7651_v24, %v7844_v37  ;;  %v19676_v51 = vld [vmem:[#allocation46_spill] sm:$0xff] }
 0x76c   :  { %v18588_v29 = vperm.slane %v19676_v51, %v18102_v35  ;;  %v18621_v51 = vperm.slane %v18491_v5, %v18102_v35 }
 0x76d   :  { %v8202_v55 = vrot.slane %v7939_v57, 4  ;;  %v18559_v59 = vsel %vm7966_vm5, %v7939_v57, %v8204_v38  ;;  %v18584_v31 = vld.sshfl [vmem:[#allocation1 + $0x10] sm:$0xff pattern:$0x75316420] }
 0x76e   :  { %v7483_v10 = vpop.permute.xlu1 %7482  ;;  %v18566_v22 = vpop.permute.xlu0 %7735  ;;  %8531 = vst [vmem:[#allocation1 + $0x10] ss:$2 sm:$0xff] %v8351_v36  ;;  %v13250_v57 = vld [vmem:[#allocation4 + $0xe8] sm:$0xff]  ;;  %v8352_v12 = vrot.slane %v18588_v29, 4 }
 0x76f   :  { %v7531_v52 = vrot.slane %v7483_v10, 4  ;;  %v18570_v25 = vsel %vm7966_vm5, %v8202_v55, %v18468_v19  ;;  %v7676_v32 = vmax.f32 %v19674_v42, %v7483_v10  ;;  %v8187_v19 = vsel %vm7966_vm5, %v8186_v48, %v18563_v8  ;;  %8533 = vst [vmem:[#allocation1 + $0x11] ss:$2 sm:$0xff] %v8379_v61  ;;  %v13259_v10 = vld [vmem:[#allocation4 + $0x130] sm:$0xff]  ;;  %10307 = vmatpush.bf16.msrb.mxu3 %v13250_v57 }
 0x770   :  { %v7802_v24 = vrot.slane %v18566_v22, 4  ;;  %v7524_v48 = vrot.slane %v18362_v14, 4  ;;  %10319 = vmatpush.bf16.msrb.mxu0 %v13259_v10 }
 0x771   :  { %v7579_v1 = vsel %vm2178_vm8, %v7530_v56, %v7531_v52  ;;  %v7964_v38 = vmax.f32 %v7676_v32, %v7772_v4  ;;  %v13300_v56 = vld [vmem:[#allocation4 + $0x278] sm:$0xff]  ;;  %v8188_v52 = vrot.slane %v18563_v8, 4  ;;  %v13241_v32 = vld [vmem:[#allocation4 + $0xa0] sm:$0xff] }
 0x772   :  { %v8534_v33 = vld.sshfl [vmem:[#allocation1] sm:$0xff pattern:$0x75316420]  ;;  %v18575_v26 = vld.sshfl [vmem:[#allocation1 + $0x8] sm:$0xff pattern:$0x75316420]  ;;  %v7580_v43 = vsel %vm7533_vm4, %v18403_v6, %v7579_v1  ;;  %v7867_v6 = vsel %vm2178_vm8, %v7819_v21, %v7820_v53  ;;  %v7849_v15 = vsel %vm2178_vm8, %v7801_v44, %v7802_v24  ;;  %10383 = vmatpush.bf16.msra.mxu1 %v13300_v56  ;;  %v7573_v62 = vsel %vm2178_vm8, %v7524_v48, %v7525_v23  ;;  %v7758_v24 = vpop.permute.xlu2 %7757 }
 0x773   :  { %8537 = vrot.lane.b32.xlu2 %v8534_v33, %s13526_s21  ;;  %8552 = vst [vmem:[#allocation1] ss:$2 sm:$0xff] %v19675_v58  ;;  %v7675_v37 = vmax.f32 %v19677_v2, %v7580_v43  ;;  %v7868_v4 = vsel %vm3917_vm3, %v18536_v9, %v7867_v6  ;;  %v19678_v21 = vld [vmem:[#allocation35_spill] sm:$0xff]  ;;  %v8408_v42 = vrot.slane %v7964_v38, 4  ;;  %v13249_v8 = vld [vmem:[#allocation4 + $0xe0] sm:$0xff]  ;;  %v13258_v33 = vld [vmem:[#allocation4 + $0x128] sm:$0xff]  ;;  %v7850_v58 = vsel %vm3917_vm3, %v18530_v50, %v7849_v15 }
 0x774   :  { %8554 = vst [vmem:[#allocation1 + $0x1] ss:$2 sm:$0xff] %v8187_v19  ;;  %v7664_v1 = vmax.f32 %v19678_v21, %v18213_v17  ;;  %v19679_v53 = vld [vmem:[#allocation44_spill] sm:$0xff]  ;;  %v8189_v17 = vsel %vm7966_vm5, %v18552_v46, %v8188_v52  ;;  %v7574_v61 = vsel %vm7533_vm4, %v18362_v14, %v7573_v62  ;;  %v13298_v46 = vld [vmem:[#allocation4 + $0x268] sm:$0xff]  ;;  %v8244_v6 = vrot.slane %v18382_v41, 4  ;;  %10295 = vmatpush.bf16.msrb.mxu2 %v13241_v32  ;;  %v13240_v14 = vld [vmem:[#allocation4 + $0x98] sm:$0xff] }
 0x775   :  { %v7963_v49 = vmax.f32 %v7675_v37, %v7868_v4  ;;  %v7657_v43 = vmax.f32 %v19679_v53, %v18353_v11  ;;  %10308 = vmatpush.bf16.msrb.mxu3 %v13249_v8  ;;  %v13248_v37 = vld [vmem:[#allocation4 + $0xd8] sm:$0xff]  ;;  %10320 = vmatpush.bf16.msrb.mxu0 %v13258_v33  ;;  %v13257_v44 = vld [vmem:[#allocation4 + $0x120] sm:$0xff]  ;;  %v7813_v10 = vrot.slane %v7758_v24, 4  ;;  %v8353_v48 = vsel %vm7966_vm5, 0.0, %v8352_v12 }
 0x776   :  { %v18596_v55 = vpop.permute.xlu0 %7709  ;;  %v7952_v9 = vmax.f32 %v7664_v1, %v18313_v34  ;;  %v19681_v34 = vld [vmem:[#allocation8_spill] sm:$0xff]  ;;  %v8536_v11 = vld.sshfl [vmem:[#allocation1 + $0x10] sm:$0xff pattern:$0x75316420]  ;;  %10384 = vmatpush.bf16.msra.mxu1 %v13299_v16  ;;  %v19683_v52 = vld [vmem:[#allocation63_spill] sm:$0xff]  ;;  %v8380_v12 = vrot.slane %v18621_v51, 4 }
 0x777   :  { %v7670_v23 = vmax.f32 %v19681_v34, %v18519_v39  ;;  %v8242_v50 = vrot.slane %v7963_v49, 4  ;;  %8556 = vst [vmem:[#allocation1 + $0x10] ss:$2 sm:$0xff] %v18588_v29  ;;  %v13449_v5 = vpack.i.bf16 %v8536_v11, %v18575_v26  ;;  %v19682_v39 = vld [vmem:[#allocation38_spill] sm:$0xff]  ;;  %v7945_v45 = vmax.f32 %v7657_v43, %v7850_v58  ;;  %v13238_v11 = vld [vmem:[#allocation4 + $0x88] sm:$0xff] }
 0x778   :  { %v8409_v2 = vsel %vm7966_vm5, %v8408_v42, %v7952_v9  ;;  %v7658_v38 = vmax.f32 %v19682_v39, %v18248_v60  ;;  %8558 = vst [vmem:[#allocation1 + $0x11] ss:$2 sm:$0xff] %v18621_v51  ;;  %v8245_v56 = vsel %vm7966_vm5, %v7963_v49, %v8244_v6  ;;  %v7669_v4 = vmax.f32 %v19683_v52, %v7574_v61  ;;  %v13297_v60 = vld [vmem:[#allocation4 + $0x260] sm:$0xff]  ;;  %v13239_v49 = vld [vmem:[#allocation4 + $0x90] sm:$0xff]  ;;  %v13256_v9 = vld [vmem:[#allocation4 + $0x118] sm:$0xff] }
 0x779   :  { %13450 = vrot.lane.b32.xlu0 %v13449_v5, %s13526_s21  ;;  %v8413_v15 = vperm.slane %v8409_v2, %v18010_v63  ;;  %v8243_v21 = vsel %vm7966_vm5, %v8242_v50, %v18382_v41  ;;  %10296 = vmatpush.bf16.msrb.mxu2 %v13240_v14  ;;  %v13247_v42 = vld [vmem:[#allocation4 + $0xd0] sm:$0xff]  ;;  %v8232_v32 = vrot.slane %v7945_v45, 4  ;;  %v8253_v8 = vperm.slane %v8245_v56, %v18010_v63  ;;  %v13296_v51 = vld [vmem:[#allocation4 + $0x258] sm:$0xff]  ;;  %v13237_v56 = vld [vmem:[#allocation4 + $0x80] sm:$0xff] }
 0x77a   :  { %10385 = vmatpush.bf16.msra.mxu1 %v13298_v46  ;;  %v7946_v16 = vmax.f32 %v7658_v38, %v18566_v22  ;;  %10309 = vmatpush.bf16.msrb.mxu3 %v13248_v37  ;;  %v13246_v46 = vld [vmem:[#allocation4 + $0xc8] sm:$0xff]  ;;  %v8381_v6 = vsel %vm7966_vm5, 0.0, %v8380_v12  ;;  %v13255_v14 = vld [vmem:[#allocation4 + $0x110] sm:$0xff]  ;;  %v13284_v52 = vld [vmem:[#allocation4 + $0x1f8] sm:$0xff] }
 0x77b   :  { %v18607_v36 = vld.sshfl [vmem:[#allocation1] sm:$0xff pattern:$0x75316420]  ;;  %v18609_v19 = vld.sshfl [vmem:[#allocation1 + $0x8] sm:$0xff pattern:$0x75316420]  ;;  %10321 = vmatpush.bf16.msrb.mxu0 %v13257_v44 }
 0x77c   :  { %8569 = vst [vmem:[#allocation1] ss:$2 sm:$0xff] %v19680_v47  ;;  %v8414_v58 = vrot.slane %v8413_v15, 4  ;;  %v8260_v50 = vrot.slane %v8253_v8, 4  ;;  %v13295_v44 = vld [vmem:[#allocation4 + $0x250] sm:$0xff]  ;;  %v13253_v12 = vld [vmem:[#allocation4 + $0x100] sm:$0xff] }
 0x77d   :  { %8571 = vst [vmem:[#allocation1 + $0x1] ss:$2 sm:$0xff] %v8189_v17  ;;  %v8249_v17 = vperm.slane %v8243_v21, %v18010_v63  ;;  %10297 = vmatpush.bf16.msrb.mxu2 %v13239_v49  ;;  %v13283_v49 = vld [vmem:[#allocation4 + $0x1f0] sm:$0xff]  ;;  %v13282_v8 = vld [vmem:[#allocation4 + $0x1e8] sm:$0xff] }
 0x77e   :  { %v7760_v57 = vpop.permute.xlu0 %7759  ;;  %10386 = vmatpush.bf16.msra.mxu1 %v13297_v60  ;;  %10310 = vmatpush.bf16.msrb.mxu3 %v13247_v42  ;;  %v13254_v60 = vld [vmem:[#allocation4 + $0x108] sm:$0xff] }
 0x77f   :  { %v7814_v29 = vrot.slane %v7760_v57, 4  ;;  %v7958_v26 = vmax.f32 %v7670_v23, %v7760_v57  ;;  %v18649_v34 = vld.sshfl [vmem:[#allocation1 + $0x10] sm:$0xff pattern:$0x75316420]  ;;  %10322 = vmatpush.bf16.msrb.mxu0 %v13256_v9  ;;  %v8254_v39 = vrot.slane %v8249_v17, 4  ;;  %v13281_v9 = vld [vmem:[#allocation4 + $0x1e0] sm:$0xff] }
 0x780   :  { %8573 = vst [vmem:[#allocation1 + $0x10] ss:$2 sm:$0xff] %v8353_v48  ;;  %v13276_v48 = vld [vmem:[#allocation4 + $0x1b8] sm:$0xff]  ;;  %v13291_v17 = vld [vmem:[#allocation4 + $0x230] sm:$0xff] }
 0x781   :  { %v7861_v1 = vsel %vm2178_vm8, %v7813_v10, %v7814_v29  ;;  %v8402_v62 = vrot.slane %v7958_v26, 4  ;;  %8575 = vst [vmem:[#allocation1 + $0x11] ss:$2 sm:$0xff] %v8381_v6  ;;  %10298 = vmatpush.bf16.msrb.mxu2 %v13238_v11  ;;  %v13245_v29 = vld [vmem:[#allocation4 + $0xc0] sm:$0xff]  ;;  %v13278_v11 = vld [vmem:[#allocation4 + $0x1c8] sm:$0xff] }
 0x782   :  { %v7862_v33 = vsel %vm3917_vm3, %v7758_v24, %v7861_v1  ;;  %10387 = vmatpush.bf16.msra.mxu1 %v13296_v51  ;;  %10311 = vmatpush.bf16.msrb.mxu3 %v13246_v46  ;;  %v13275_v1 = vld [vmem:[#allocation4 + $0x1b0] sm:$0xff]  ;;  %v13332_v51 = vld [vmem:[#allocation4 + $0x378] sm:$0xff]  ;;  %v13289_v6 = vld [vmem:[#allocation4 + $0x220] sm:$0xff] }
 0x783   :  { %v7957_v22 = vmax.f32 %v7669_v4, %v7862_v33  ;;  %v8403_v53 = vsel %vm7966_vm5, %v8402_v62, %v7946_v16  ;;  %10323 = vmatpush.bf16.msrb.mxu0 %v13255_v14  ;;  %v13273_v33 = vld [vmem:[#allocation4 + $0x1a0] sm:$0xff]  ;;  %v13331_v46 = vld [vmem:[#allocation4 + $0x370] sm:$0xff]  ;;  %v13288_v14 = vld [vmem:[#allocation4 + $0x218] sm:$0xff] }
 0x784   :  { %v8576_v41 = vld.sshfl [vmem:[#allocation1] sm:$0xff pattern:$0x75316420]  ;;  %v8577_v43 = vld.sshfl [vmem:[#allocation1 + $0x8] sm:$0xff pattern:$0x75316420]  ;;  %v8407_v47 = vperm.slane %v8403_v53, %v18010_v63 }
 0x785   :  { %v13454_v61 = vpack.i.bf16 %v8577_v43, %v8576_v41  ;;  %v8230_v23 = vrot.slane %v7957_v22, 4  ;;  %v8233_v24 = vsel %vm7966_vm5, %v7957_v22, %v8232_v32  ;;  %10299 = vmatpush.bf16.msrb.mxu2 %v13237_v56  ;;  %v13274_v32 = vld [vmem:[#allocation4 + $0x1a8] sm:$0xff]  ;;  %v13292_v22 = vld [vmem:[#allocation4 + $0x238] sm:$0xff] }
 0x786   :  { %v8241_v2 = vperm.slane %v8233_v24, %v18010_v63  ;;  %v8415_v5 = vsel %vm7966_vm5, %v8414_v58, %v8407_v47  ;;  %10388 = vmatpush.bf16.msra.mxu1 %v13295_v44  ;;  %10312 = vmatpush.bf16.msrb.mxu3 %v13245_v29  ;;  %v13272_v53 = vld [vmem:[#allocation4 + $0x198] sm:$0xff]  ;;  %v13294_v43 = vld [vmem:[#allocation4 + $0x248] sm:$0xff]  ;;  %v13293_v58 = vld [vmem:[#allocation4 + $0x240] sm:$0xff] }
 0x787   :  { %13455 = vrot.lane.b32.xlu1 %v13454_v61, %s13526_s21  ;;  %v8231_v37 = vsel %vm7966_vm5, %v8230_v23, %v7945_v45  ;;  %v18663_v15 = vperm.slane %v8415_v5, %v18102_v35  ;;  %10324 = vmatpush.bf16.msrb.mxu0 %v13254_v60  ;;  %v13280_v41 = vld [vmem:[#allocation4 + $0x1d8] sm:$0xff]  ;;  %v13271_v47 = vld [vmem:[#allocation4 + $0x190] sm:$0xff]  ;;  %v13290_v23 = vld [vmem:[#allocation4 + $0x228] sm:$0xff] }
 0x788   :  { %v8237_v38 = vperm.slane %v8231_v37, %v18010_v63  ;;  %v8261_v57 = vsel %vm7966_vm5, %v8260_v50, %v8241_v2  ;;  %v8578_v62 = vld.sshfl [vmem:[#allocation1 + $0x10] sm:$0xff pattern:$0x75316420]  ;;  %v13279_v61 = vld [vmem:[#allocation4 + $0x1d0] sm:$0xff]  ;;  %v13269_v50 = vld [vmem:[#allocation4 + $0x180] sm:$0xff] }
 0x789   :  { %v8265_v10 = vperm.slane %v8261_v57, %v18102_v35  ;;  %10344 = vmatpush.bf16.msra.mxu2 %v13276_v48  ;;  %8583 = vrot.lane.b32.xlu2 %v8578_v62, %s13526_s21  ;;  %8600 = vst [vmem:[#allocation1 + $0x11] ss:$2 sm:$0xff] %v18663_v15  ;;  %v13270_v24 = vld [vmem:[#allocation4 + $0x188] sm:$0xff]  ;;  %v13277_v2 = vld [vmem:[#allocation4 + $0x1c0] sm:$0xff]  ;;  %v13464_v37 = vld [vmem:[%s18813_s6] ss:$0 sm:$0xff] }
 0x78a   :  { %v8255_v26 = vsel %vm7966_vm5, %v8254_v39, %v8237_v38  ;;  %10357 = vmatpush.bf16.msra.mxu3 %v13284_v52  ;;  %10389 = vmatpush.bf16.msra.mxu1 %v13294_v43  ;;  %v13330_v5 = vld [vmem:[#allocation4 + $0x368] sm:$0xff]  ;;  %v13328_v62 = vld [vmem:[#allocation4 + $0x358] sm:$0xff]  ;;  %v8393_v43 = vperm.slane %v18534_v28, %v18010_v63 }
 0x78b   :  { %v8259_v45 = vperm.slane %v8255_v26, %v18102_v35  ;;  %v8266_v4 = vrot.slane %v8265_v10, 4  ;;  %10325 = vmatpush.bf16.msrb.mxu0 %v13253_v12  ;;  %v13329_v26 = vld [vmem:[#allocation4 + $0x360] sm:$0xff]  ;;  %v13307_v12 = vld [vmem:[#allocation4 + $0x2b0] sm:$0xff]  ;;  %v13326_v28 = vld [vmem:[#allocation4 + $0x348] sm:$0xff] }
 0x78d   :  { %v8267_v16 = vsel %vm7966_vm5, %v8266_v4, %v8259_v45  ;;  %v8268_v21 = vrot.slane %v8259_v45, 4  ;;  %10345 = vmatpush.bf16.msra.mxu2 %v13275_v1  ;;  %v13308_v45 = vld [vmem:[#allocation4 + $0x2b8] sm:$0xff]  ;;  %v13286_v1 = vld [vmem:[#allocation4 + $0x208] sm:$0xff] }
 0x78e   :  { %8596 = vst [vmem:[#allocation1 + $0x1] ss:$2 sm:$0xff] %v8267_v16  ;;  %10358 = vmatpush.bf16.msra.mxu3 %v13283_v49  ;;  %10390 = vmatpush.bf16.msra.mxu1 %v13293_v58  ;;  %v13316_v4 = vld [vmem:[#allocation4 + $0x2f8] sm:$0xff]  ;;  %v7646_v49 = vmax.f32 %v17877_v27, %v18394_v18  ;;  %v19684_v27 = vld [vmem:[#allocation45_spill] sm:$0xff] }
 0x78f   :  { %v18668_v42 = vsel %vm7966_vm5, %v8265_v10, %v8268_v21  ;;  %10370 = vmatpush.bf16.msra.mxu0 %v13292_v22  ;;  %v13287_v10 = vld [vmem:[#allocation4 + $0x210] sm:$0xff]  ;;  %v7645_v18 = vmax.f32 %v19684_v27, %v18507_v3  ;;  %v13310_v27 = vld [vmem:[#allocation4 + $0x2c8] sm:$0xff] }
 0x791   :  { %10346 = vmatpush.bf16.msra.mxu2 %v13274_v32  ;;  %v13315_v32 = vld [vmem:[#allocation4 + $0x2f0] sm:$0xff] }
 0x792   :  { %10359 = vmatpush.bf16.msra.mxu3 %v13282_v8  ;;  %10435 = vmatpush.bf16.msrb.mxu1 %v13332_v51  ;;  %v13285_v8 = vld [vmem:[#allocation4 + $0x200] sm:$0xff]  ;;  %v13314_v51 = vld [vmem:[#allocation4 + $0x2e8] sm:$0xff] }
 0x793   :  { %10371 = vmatpush.bf16.msra.mxu0 %v13291_v17 }
 0x795   :  { %10347 = vmatpush.bf16.msra.mxu2 %v13273_v33  ;;  %v13327_v33 = vld [vmem:[#allocation4 + $0x350] sm:$0xff] }
 0x796   :  { %10360 = vmatpush.bf16.msra.mxu3 %v13281_v9  ;;  %10436 = vmatpush.bf16.msrb.mxu1 %v13331_v46  ;;  %v7789_v9 = vrot.slane %v18596_v55, 4 }
 0x797   :  { %10372 = vmatpush.bf16.msra.mxu0 %v13290_v23  ;;  %v8213_v23 = vperm.slane %v18559_v59, %v18010_v63 }
 0x799   :  { %10348 = vmatpush.bf16.msra.mxu2 %v13272_v53 }
 0x79a   :  { %10361 = vmatpush.bf16.msra.mxu3 %v13280_v41  ;;  %10437 = vmatpush.bf16.msrb.mxu1 %v13330_v5 }
 0x79b   :  { %10373 = vmatpush.bf16.msra.mxu0 %v13289_v6  ;;  %v8394_v6 = vrot.slane %v8393_v43, 4 }
 0x79d   :  { %10349 = vmatpush.bf16.msra.mxu2 %v13271_v47 }
 0x79e   :  { %10362 = vmatpush.bf16.msra.mxu3 %v13279_v61  ;;  %10438 = vmatpush.bf16.msrb.mxu1 %v13329_v26  ;;  %v13306_v61 = vld [vmem:[#allocation4 + $0x2a8] sm:$0xff] }
 0x79f   :  { %10374 = vmatpush.bf16.msra.mxu0 %v13288_v14  ;;  %v13305_v14 = vld [vmem:[#allocation4 + $0x2a0] sm:$0xff] }
 0x7a1   :  { %10350 = vmatpush.bf16.msra.mxu2 %v13270_v24 }
 0x7a2   :  { %10363 = vmatpush.bf16.msra.mxu3 %v13278_v11  ;;  %10439 = vmatpush.bf16.msrb.mxu1 %v13328_v62  ;;  %v8192_v11 = vrot.slane %v18524_v30, 4 }
 0x7a3   :  { %10375 = vmatpush.bf16.msra.mxu0 %v13287_v10 }
 0x7a5   :  { %10351 = vmatpush.bf16.msra.mxu2 %v13269_v50  ;;  %v8209_v50 = vperm.slane %v18570_v25, %v18010_v63 }
 0x7a6   :  { %10364 = vmatpush.bf16.msra.mxu3 %v13277_v2  ;;  %10440 = vmatpush.bf16.msrb.mxu1 %v13327_v33 }
 0x7a7   :  { %10376 = vmatpush.bf16.msra.mxu0 %v13286_v1 }
 0x7aa   :  { %10441 = vmatpush.bf16.msrb.mxu1 %v13326_v28 }
 0x7ab   :  { %10377 = vmatpush.bf16.msra.mxu0 %v13285_v8  ;;  %v8420_v8 = vrot.slane %v18663_v15, 4  ;;  %v13302_v15 = vld [vmem:[#allocation4 + $0x288] sm:$0xff] }
 0x7b7   :  { %v18702_v2 = vpop.permute.xlu2 %8495 }
 0x7b8   :  { %v8633_v25 = vsel %vm3917_vm3, %v18526_v40, %v18702_v2  ;;  %v13304_v40 = vld [vmem:[#allocation4 + $0x298] sm:$0xff] }
 0x7b9   :  { %v8644_v62 = vpack.c.bf16 %v8633_v25, %v8633_v25 }
 0x7be   :  { %v18674_v39 = vpop.permute.xlu1 %13445 }
 0x7bf   :  { %v13448_v38 = vunpack.i.h.bf16 %v18674_v39  ;;  %v13447_v57 = vunpack.i.l.bf16 %v18674_v39  ;;  %v10275_v44 = vpop.f32.mrf.mxu0 }
 0x7c0   :  { %v10276_v56 = vadd.f32 %v13464_v37, %v10275_v44  ;;  %v10288_v29 = vpop.f32.mrf.mxu1  ;;  %v13313_v37 = vld [vmem:[#allocation4 + $0x2e0] sm:$0xff] }
 0x7c1   :  { %v8459_v48 = vsel %vm3917_vm3, %v13447_v57, %v13448_v38  ;;  %v8632_v52 = vsel %vm3917_vm3, %v18423_v54, %v13447_v57  ;;  %v8220_v57 = vrot.slane %v8213_v23, 4  ;;  %v13301_v23 = vld [vmem:[#allocation4 + $0x280] sm:$0xff] }
 0x7c2   :  { %v8639_v60 = vpack.c.bf16 %v8632_v52, %v8632_v52  ;;  %v8640_v16 = vpack.c.bf16 %v8459_v48, %v8459_v48  ;;  %v18683_v21 = vadd.f32 %v10288_v29, %v10276_v56  ;;  %v13325_v56 = vld [vmem:[#allocation4 + $0x340] sm:$0xff]  ;;  %v13324_v52 = vld [vmem:[#allocation4 + $0x338] sm:$0xff] }
 0x7c3   :  { %10442 = vmatpush.bf16.msrb.mxu1 %v13325_v56 }
 0x7c4   :  { %10300 = vmatmul.bf16.vlgmr.msrb.gmra.mxu2 %v8639_v60  ;;  %10313 = vmatmul.bf16.vlgmr.msrb.gmra.mxu3 %v8640_v16 }
 0x7c5   :  { %10396 = vmatpush.bf16.msrb.mxu2 %v13308_v45  ;;  %10409 = vmatpush.bf16.msrb.mxu3 %v13316_v4  ;;  %v8214_v45 = vrot.slane %v8209_v50, 4  ;;  %v13340_v50 = vld [vmem:[#allocation4 + $0x3b8] sm:$0xff] }
 0x7c6   :  { %v7712_v54 = vpop.permute.xlu1 %7711 }
 0x7c7   :  { %v7790_v22 = vrot.slane %v7712_v54, 4  ;;  %v7934_v53 = vmax.f32 %v7646_v49, %v7712_v54  ;;  %v10277_v41 = vpop.f32.mrf.mxu0 }
 0x7c8   :  { %v10290_v17 = vpop.f32.mrf.mxu1 }
 0x7c9   :  { %v7837_v58 = vsel %vm2178_vm8, %v7789_v9, %v7790_v22  ;;  %v8382_v47 = vrot.slane %v7934_v53, 4  ;;  %10397 = vmatpush.bf16.msrb.mxu2 %v13307_v12  ;;  %10410 = vmatpush.bf16.msrb.mxu3 %v13315_v32  ;;  %v13323_v32 = vld [vmem:[#allocation4 + $0x330] sm:$0xff]  ;;  %v8421_v17 = vsel %vm7966_vm5, 0.0, %v8420_v8 }
 0x7ca   :  { %v7838_v24 = vsel %vm3917_vm3, %v18596_v55, %v7837_v58  ;;  %v13303_v22 = vld [vmem:[#allocation4 + $0x290] sm:$0xff]  ;;  %v13321_v58 = vld [vmem:[#allocation4 + $0x320] sm:$0xff] }
 0x7cb   :  { %v7933_v46 = vmax.f32 %v7645_v18, %v7838_v24  ;;  %v8383_v3 = vsel %vm7966_vm5, %v8382_v47, %v18411_v7  ;;  %v13311_v53 = vld [vmem:[#allocation4 + $0x2d0] sm:$0xff] }
 0x7cc   :  { %v8387_v59 = vperm.slane %v8383_v3, %v18010_v63  ;;  %v13309_v3 = vld [vmem:[#allocation4 + $0x2c0] sm:$0xff] }
 0x7cd   :  { %v8190_v5 = vrot.slane %v7933_v46, 4  ;;  %v8193_v55 = vsel %vm7966_vm5, %v7933_v46, %v8192_v11  ;;  %10398 = vmatpush.bf16.msrb.mxu2 %v13306_v61  ;;  %10411 = vmatpush.bf16.msrb.mxu3 %v13314_v51  ;;  %v13364_v51 = vld [vmem:[#allocation4 + $0x478] sm:$0xff] }
 0x7ce   :  { %v8201_v44 = vperm.slane %v8193_v55, %v18010_v63  ;;  %v8395_v7 = vsel %vm7966_vm5, %v8394_v6, %v8387_v59  ;;  %v8458_v10 = vpop.permute.xlu1 %8457  ;;  %v8498_v47 = vpop.permute.xlu0 %8497  ;;  %v13348_v59 = vld [vmem:[#allocation4 + $0x3f8] sm:$0xff] }
 0x7cf   :  { %v8191_v29 = vsel %vm7966_vm5, %v8190_v5, %v18524_v30  ;;  %v8399_v26 = vperm.slane %v8395_v7, %v18102_v35  ;;  %v8460_v48 = vsel %vm3917_vm3, %v13448_v38, %v8458_v10  ;;  %v13312_v30 = vld [vmem:[#allocation4 + $0x2d8] sm:$0xff]  ;;  %v8643_v38 = vpack.c.bf16 %v18470_v13, %v18470_v13  ;;  %v13363_v5 = vld [vmem:[#allocation4 + $0x470] sm:$0xff]  ;;  %v13362_v7 = vld [vmem:[#allocation4 + $0x468] sm:$0xff] }
 0x7d0   :  { %v8197_v4 = vperm.slane %v8191_v29, %v18010_v63  ;;  %v8221_v60 = vsel %vm7966_vm5, %v8220_v57, %v8201_v44  ;;  %v8641_v16 = vpack.c.bf16 %v8460_v48, %v8460_v48  ;;  %v8501_v6 = vsel %vm3917_vm3, %v18702_v2, %v8498_v47  ;;  %v13347_v2 = vld [vmem:[#allocation4 + $0x3f0] sm:$0xff]  ;;  %v13361_v48 = vld [vmem:[#allocation4 + $0x460] sm:$0xff] }
 0x7d1   :  { %v8225_v1 = vperm.slane %v8221_v60, %v18102_v35  ;;  %8598 = vst [vmem:[#allocation1 + $0x10] ss:$2 sm:$0xff] %v8399_v26  ;;  %10399 = vmatpush.bf16.msrb.mxu2 %v13305_v14  ;;  %10412 = vmatpush.bf16.msrb.mxu3 %v13313_v37  ;;  %v8400_v54 = vrot.slane %v8399_v26, 4  ;;  %v13320_v14 = vld [vmem:[#allocation4 + $0x318] sm:$0xff]  ;;  %v8645_v37 = vpack.c.bf16 %v8501_v6, %v8501_v6  ;;  %v13319_v10 = vld [vmem:[#allocation4 + $0x310] sm:$0xff]  ;;  %v13346_v26 = vld [vmem:[#allocation4 + $0x3e8] sm:$0xff] }
 0x7d2   :  { %v8215_v49 = vsel %vm7966_vm5, %v8214_v45, %v8197_v4  ;;  %v18721_v39 = vpop.f32.mrf.mxu1  ;;  %10326 = vmatmul.bf16.vlgmr.msrb.gmra.mxu0 %v8641_v16  ;;  %v8647_v57 = vpack.c.bf16 %v18542_v0, %v18542_v0  ;;  %v8648_v44 = vpack.c.bf16 %v18544_v20, %v18544_v20  ;;  %v13338_v0 = vld [vmem:[#allocation4 + $0x3a8] sm:$0xff]  ;;  %v13337_v20 = vld [vmem:[#allocation4 + $0x3a0] sm:$0xff]  ;;  %v8538_v4 = vpop.permute.xlu2 %8537  ;;  %v13360_v60 = vld [vmem:[#allocation4 + $0x458] sm:$0xff] }
 0x7d3   :  { %v8219_v63 = vperm.slane %v8215_v49, %v18102_v35  ;;  %v8226_v12 = vrot.slane %v8225_v1, 4  ;;  %10422 = vmatpush.bf16.msrb.mxu0 %v13324_v52  ;;  %v13322_v35 = vld [vmem:[#allocation4 + $0x328] sm:$0xff]  ;;  %v8401_v41 = vsel %vm7966_vm5, 0.0, %v8400_v54  ;;  %v13345_v45 = vld [vmem:[#allocation4 + $0x3e0] sm:$0xff]  ;;  %v13335_v54 = vld [vmem:[#allocation4 + $0x390] sm:$0xff] }
 0x7d4   :  { %10352 = vmatmul.bf16.vlgmr.msra.gmra.mxu2 %v8643_v38  ;;  %10365 = vmatmul.bf16.vlgmr.msra.gmra.mxu3 %v8644_v62  ;;  %v13318_v52 = vld [vmem:[#allocation4 + $0x308] sm:$0xff]  ;;  %v13317_v16 = vld [vmem:[#allocation4 + $0x300] sm:$0xff]  ;;  %v13344_v62 = vld [vmem:[#allocation4 + $0x3d8] sm:$0xff] }
 0x7d5   :  { %v8227_v33 = vsel %vm7966_vm5, %v8226_v12, %v8219_v63  ;;  %v8228_v9 = vrot.slane %v8219_v63, 4  ;;  %10400 = vmatpush.bf16.msrb.mxu2 %v13304_v40  ;;  %10413 = vmatpush.bf16.msrb.mxu3 %v13312_v30  ;;  %v8634_v40 = vsel %vm3917_vm3, %v18584_v31, %v8538_v4  ;;  %v13336_v30 = vld [vmem:[#allocation4 + $0x398] sm:$0xff]  ;;  %v13359_v38 = vld [vmem:[#allocation4 + $0x450] sm:$0xff] }
 0x7d6   :  { %8594 = vst [vmem:[#allocation1] ss:$2 sm:$0xff] %v8227_v33  ;;  %v8649_v63 = vpack.c.bf16 %v8634_v40, %v8634_v40  ;;  %v13343_v33 = vld [vmem:[#allocation4 + $0x3d0] sm:$0xff]  ;;  %v13389_v40 = vld [vmem:[#allocation4 + $0x540] sm:$0xff] }
 0x7d7   :  { %v8229_v13 = vsel %vm7966_vm5, %v8225_v1, %v8228_v9  ;;  %10423 = vmatpush.bf16.msrb.mxu0 %v13323_v32  ;;  %v8500_v61 = vpop.permute.xlu1 %8499  ;;  %v13356_v1 = vld [vmem:[#allocation4 + $0x438] sm:$0xff]  ;;  %v13355_v32 = vld [vmem:[#allocation4 + $0x430] sm:$0xff]  ;;  %v13358_v9 = vld [vmem:[#allocation4 + $0x448] sm:$0xff] }
 0x7d8   :  { %v18730_v43 = vld.sshfl [vmem:[#allocation1 + $0x10] sm:$0xff pattern:$0x75316420]  ;;  %v8502_v11 = vsel %vm3917_vm3, %v8498_v47, %v8500_v61  ;;  %v13341_v47 = vld [vmem:[#allocation4 + $0x3c0] sm:$0xff]  ;;  %v13372_v61 = vld [vmem:[#allocation4 + $0x4b8] sm:$0xff] }
 0x7d9   :  { %10401 = vmatpush.bf16.msrb.mxu2 %v13303_v22  ;;  %10414 = vmatpush.bf16.msrb.mxu3 %v13311_v53  ;;  %8615 = vst [vmem:[#allocation1 + $0x10] ss:$2 sm:$0xff] %v8401_v41  ;;  %v8646_v46 = vpack.c.bf16 %v8502_v11, %v8502_v11  ;;  %v13354_v22 = vld [vmem:[#allocation4 + $0x428] sm:$0xff]  ;;  %v13395_v11 = vld [vmem:[#allocation4 + $0x570] sm:$0xff] }
 0x7da   :  { %v10342_v18 = vpop.f32.mrf.mxu1  ;;  %8617 = vst [vmem:[#allocation1 + $0x11] ss:$2 sm:$0xff] %v8421_v17  ;;  %v13334_v53 = vld [vmem:[#allocation4 + $0x388] sm:$0xff]  ;;  %v13371_v6 = vld [vmem:[#allocation4 + $0x4b0] sm:$0xff] }
 0x7db   :  { %10424 = vmatpush.bf16.msrb.mxu0 %v13322_v35  ;;  %10391 = vmatmul.bf16.vlgmr.msra.gmra.mxu1 %v8646_v46  ;;  %v13357_v35 = vld [vmem:[#allocation4 + $0x440] sm:$0xff]  ;;  %v13352_v46 = vld [vmem:[#allocation4 + $0x418] sm:$0xff] }
 0x7dc   :  { %10487 = vmatpush.bf16.msra.mxu1 %v13364_v51  ;;  %v13333_v18 = vld [vmem:[#allocation4 + $0x380] sm:$0xff]  ;;  %v13380_v51 = vld [vmem:[#allocation4 + $0x4f8] sm:$0xff] }
 0x7dd   :  { %v18733_v24 = vld.sshfl [vmem:[#allocation1] sm:$0xff pattern:$0x75316420]  ;;  %v18735_v28 = vld.sshfl [vmem:[#allocation1 + $0x8] sm:$0xff pattern:$0x75316420]  ;;  %10402 = vmatpush.bf16.msrb.mxu2 %v13302_v15  ;;  %10415 = vmatpush.bf16.msrb.mxu3 %v13310_v27 }
 0x7de   :  { %8611 = vst [vmem:[#allocation1] ss:$2 sm:$0xff] %v8229_v13  ;;  %v13342_v13 = vld [vmem:[#allocation4 + $0x3c8] sm:$0xff]  ;;  %v13396_v15 = vld [vmem:[#allocation4 + $0x578] sm:$0xff]  ;;  %v13353_v27 = vld [vmem:[#allocation4 + $0x420] sm:$0xff] }
 0x7df   :  { %8613 = vst [vmem:[#allocation1 + $0x1] ss:$2 sm:$0xff] %v18668_v42  ;;  %10425 = vmatpush.bf16.msrb.mxu0 %v13321_v58  ;;  %v13339_v42 = vld [vmem:[#allocation4 + $0x3b0] sm:$0xff] }
 0x7e0   :  { %10488 = vmatpush.bf16.msra.mxu1 %v13363_v5  ;;  %v13379_v5 = vld [vmem:[#allocation4 + $0x4f0] sm:$0xff] }
 0x7e1   :  { %10403 = vmatpush.bf16.msrb.mxu2 %v13301_v23  ;;  %v8620_v55 = vld.sshfl [vmem:[#allocation1 + $0x10] sm:$0xff pattern:$0x75316420]  ;;  %10416 = vmatpush.bf16.msrb.mxu3 %v13309_v3 }
 0x7e2   :  { %8625 = vrot.lane.b32.xlu1 %v8620_v55, %s13526_s21  ;;  %10378 = vmatmul.bf16.vlgmr.msra.gmra.mxu0 %v8645_v37  ;;  %v13394_v55 = vld [vmem:[#allocation4 + $0x568] sm:$0xff] }
 0x7e3   :  { %10426 = vmatpush.bf16.msrb.mxu0 %v13320_v14  ;;  %v13351_v14 = vld [vmem:[#allocation4 + $0x410] sm:$0xff] }
 0x7e4   :  { %10404 = vmatmul.bf16.vlgmr.msrb.gmra.mxu2 %v8647_v57  ;;  %10417 = vmatmul.bf16.vlgmr.msrb.gmra.mxu3 %v8648_v44  ;;  %v13370_v57 = vld [vmem:[#allocation4 + $0x4a8] sm:$0xff]  ;;  %v13369_v44 = vld [vmem:[#allocation4 + $0x4a0] sm:$0xff] }
 0x7e5   :  { %10448 = vmatpush.bf16.msra.mxu2 %v13340_v50  ;;  %10461 = vmatpush.bf16.msra.mxu3 %v13348_v59  ;;  %v8652_v59 = vpack.c.bf16 %v18607_v36, %v18607_v36  ;;  %v13377_v36 = vld [vmem:[#allocation4 + $0x4e0] sm:$0xff] }
 0x7e6   :  { %v8618_v56 = vld.sshfl [vmem:[#allocation1] sm:$0xff pattern:$0x75316420]  ;;  %v8619_v25 = vld.sshfl [vmem:[#allocation1 + $0x8] sm:$0xff pattern:$0x75316420]  ;;  %10489 = vmatpush.bf16.msra.mxu1 %v13362_v7 }
 0x7e7   :  { %v13459_v29 = vpack.i.bf16 %v8619_v25, %v8618_v56  ;;  %10427 = vmatpush.bf16.msrb.mxu0 %v13319_v10  ;;  %v13392_v7 = vld [vmem:[#allocation4 + $0x558] sm:$0xff]  ;;  %v13349_v10 = vld [vmem:[#allocation4 + $0x400] sm:$0xff] }
 0x7e8   :  { %v13388_v56 = vld [vmem:[#allocation4 + $0x538] sm:$0xff] }
 0x7e9   :  { %10449 = vmatpush.bf16.msra.mxu2 %v13339_v42  ;;  %10462 = vmatpush.bf16.msra.mxu3 %v13347_v2  ;;  %v13393_v42 = vld [vmem:[#allocation4 + $0x560] sm:$0xff]  ;;  %v13350_v2 = vld [vmem:[#allocation4 + $0x408] sm:$0xff]  ;;  %v13368_v25 = vld [vmem:[#allocation4 + $0x498] sm:$0xff] }
 0x7ea   :  { %13460 = vrot.lane.b32.xlu0 %v13459_v29, %s13526_s21  ;;  %10490 = vmatpush.bf16.msra.mxu1 %v13361_v48  ;;  %v13376_v29 = vld [vmem:[#allocation4 + $0x4d8] sm:$0xff]  ;;  %v13387_v48 = vld [vmem:[#allocation4 + $0x530] sm:$0xff] }
 0x7eb   :  { %10428 = vmatpush.bf16.msrb.mxu0 %v13318_v52  ;;  %v13451_v49 = vpop.permute.xlu0 %13450  ;;  %v13367_v52 = vld [vmem:[#allocation4 + $0x490] sm:$0xff] }
 0x7ec   :  { %v13452_v12 = vunpack.i.l.bf16 %v13451_v49  ;;  %v13453_v17 = vunpack.i.h.bf16 %v13451_v49  ;;  %v8584_v49 = vpop.permute.xlu2 %8583 }
 0x7ed   :  { %10450 = vmatpush.bf16.msra.mxu2 %v13338_v0  ;;  %10463 = vmatpush.bf16.msra.mxu3 %v13346_v26  ;;  %v13391_v0 = vld [vmem:[#allocation4 + $0x550] sm:$0xff]  ;;  %v8653_v26 = vpack.c.bf16 %v18609_v19, %v18609_v19  ;;  %v13385_v19 = vld [vmem:[#allocation4 + $0x520] sm:$0xff] }
 0x7ee   :  { %10491 = vmatpush.bf16.msra.mxu1 %v13360_v60  ;;  %v8543_v8 = vsel %vm3917_vm3, %v8538_v4, %v13452_v12  ;;  %v8544_v23 = vsel %vm3917_vm3, %v13452_v12, %v13453_v17  ;;  %v13386_v4 = vld [vmem:[#allocation4 + $0x528] sm:$0xff]  ;;  %v13412_v12 = vld [vmem:[#allocation4 + $0x5f8] sm:$0xff] }
 0x7ef   :  { %10429 = vmatpush.bf16.msrb.mxu0 %v13317_v16  ;;  %v8650_v31 = vpack.c.bf16 %v8543_v8, %v8543_v8  ;;  %v8651_v50 = vpack.c.bf16 %v8544_v23, %v8544_v23  ;;  %v13366_v60 = vld [vmem:[#allocation4 + $0x488] sm:$0xff]  ;;  %v13384_v8 = vld [vmem:[#allocation4 + $0x518] sm:$0xff]  ;;  %v13417_v23 = vld [vmem:[#allocation4 + $0x620] sm:$0xff] }
 0x7f0   :  { %v13374_v16 = vld [vmem:[#allocation4 + $0x4c8] sm:$0xff] }
 0x7f1   :  { %10451 = vmatpush.bf16.msra.mxu2 %v13337_v20  ;;  %10464 = vmatpush.bf16.msra.mxu3 %v13345_v45  ;;  %v13375_v20 = vld [vmem:[#allocation4 + $0x4d0] sm:$0xff]  ;;  %v13390_v45 = vld [vmem:[#allocation4 + $0x548] sm:$0xff] }
 0x7f2   :  { %10430 = vmatmul.bf16.vlgmr.msrb.gmra.mxu0 %v8649_v63  ;;  %10492 = vmatpush.bf16.msra.mxu1 %v13359_v38  ;;  %v13404_v63 = vld [vmem:[#allocation4 + $0x5b8] sm:$0xff]  ;;  %v13410_v17 = vld [vmem:[#allocation4 + $0x5e8] sm:$0xff] }
 0x7f3   :  { %10474 = vmatpush.bf16.msra.mxu0 %v13356_v1  ;;  %10443 = vmatmul.bf16.vlgmr.msrb.gmra.mxu1 %v8650_v31 }
 0x7f5   :  { %10452 = vmatpush.bf16.msra.mxu2 %v13336_v30  ;;  %10465 = vmatpush.bf16.msra.mxu3 %v13344_v62  ;;  %v13365_v30 = vld [vmem:[#allocation4 + $0x480] sm:$0xff] }
 0x7f6   :  { %10493 = vmatpush.bf16.msra.mxu1 %v13358_v9  ;;  %v13373_v62 = vld [vmem:[#allocation4 + $0x4c0] sm:$0xff]  ;;  %v13403_v9 = vld [vmem:[#allocation4 + $0x5b0] sm:$0xff] }
 0x7f7   :  { %10475 = vmatpush.bf16.msra.mxu0 %v13355_v32 }
 0x7f9   :  { %10453 = vmatpush.bf16.msra.mxu2 %v13335_v54  ;;  %10466 = vmatpush.bf16.msra.mxu3 %v13343_v33  ;;  %v18750_v41 = vpop.permute.xlu1 %13455  ;;  %v8658_v54 = vpack.c.bf16 %v18735_v28, %v18735_v28  ;;  %v13381_v28 = vld [vmem:[#allocation4 + $0x500] sm:$0xff] }
 0x7fa   :  { %v13457_v58 = vunpack.i.l.bf16 %v18750_v41  ;;  %10494 = vmatpush.bf16.msra.mxu1 %v13357_v35  ;;  %v13458_v1 = vunpack.i.h.bf16 %v18750_v41  ;;  %v13420_v35 = vld [vmem:[#allocation4 + $0x638] sm:$0xff]  ;;  %v13402_v41 = vld [vmem:[#allocation4 + $0x5a8] sm:$0xff] }
 0x7fb   :  { %10476 = vmatpush.bf16.msra.mxu0 %v13354_v22  ;;  %v13411_v22 = vld [vmem:[#allocation4 + $0x5f0] sm:$0xff] }
 0x7fc   :  { %v8635_v3 = vsel %vm3917_vm3, %v18649_v34, %v13457_v58  ;;  %v13378_v34 = vld [vmem:[#allocation4 + $0x4e8] sm:$0xff]  ;;  %v8585_v38 = vsel %vm3917_vm3, %v13457_v58, %v13458_v1  ;;  %v8586_v32 = vsel %vm3917_vm3, %v13458_v1, %v8584_v49  ;;  %v13409_v58 = vld [vmem:[#allocation4 + $0x5e0] sm:$0xff] }
 0x7fd   :  { %10454 = vmatpush.bf16.msra.mxu2 %v13334_v53  ;;  %10467 = vmatpush.bf16.msra.mxu3 %v13342_v13  ;;  %v8654_v37 = vpack.c.bf16 %v8635_v3, %v8635_v3  ;;  %v8655_v33 = vpack.c.bf16 %v8585_v38, %v8585_v38  ;;  %v8656_v31 = vpack.c.bf16 %v8586_v32, %v8586_v32  ;;  %v13383_v53 = vld [vmem:[#allocation4 + $0x510] sm:$0xff]  ;;  %v13382_v13 = vld [vmem:[#allocation4 + $0x508] sm:$0xff] }
 0x7fe   :  { %10539 = vmatpush.bf16.msrb.mxu1 %v13396_v15  ;;  %v8657_v15 = vpack.c.bf16 %v18733_v24, %v18733_v24  ;;  %v13416_v24 = vld [vmem:[#allocation4 + $0x618] sm:$0xff]  ;;  %v13415_v3 = vld [vmem:[#allocation4 + $0x610] sm:$0xff] }
 0x7ff   :  { %10477 = vmatpush.bf16.msra.mxu0 %v13353_v27  ;;  %v13419_v27 = vld [vmem:[#allocation4 + $0x630] sm:$0xff] }
 0x801   :  { %10455 = vmatpush.bf16.msra.mxu2 %v13333_v18  ;;  %10468 = vmatpush.bf16.msra.mxu3 %v13341_v47  ;;  %v13401_v18 = vld [vmem:[#allocation4 + $0x5a0] sm:$0xff]  ;;  %v13418_v47 = vld [vmem:[#allocation4 + $0x628] sm:$0xff] }
 0x802   :  { %10540 = vmatpush.bf16.msrb.mxu1 %v13395_v11  ;;  %v13399_v11 = vld [vmem:[#allocation4 + $0x590] sm:$0xff] }
 0x803   :  { %10478 = vmatpush.bf16.msra.mxu0 %v13352_v46  ;;  %10495 = vmatmul.bf16.vlgmr.msra.gmra.mxu1 %v8654_v37  ;;  %v13407_v46 = vld [vmem:[#allocation4 + $0x5d0] sm:$0xff] }
 0x804   :  { %10456 = vmatmul.bf16.vlgmr.msra.gmra.mxu2 %v8651_v50  ;;  %10469 = vmatmul.bf16.vlgmr.msra.gmra.mxu3 %v8652_v59  ;;  %v13406_v50 = vld [vmem:[#allocation4 + $0x5c8] sm:$0xff] }
 0x805   :  { %10500 = vmatpush.bf16.msrb.mxu2 %v13372_v61  ;;  %10513 = vmatpush.bf16.msrb.mxu3 %v13380_v51  ;;  %v13400_v61 = vld [vmem:[#allocation4 + $0x598] sm:$0xff]  ;;  %v13414_v59 = vld [vmem:[#allocation4 + $0x608] sm:$0xff] }
 0x806   :  { %10541 = vmatpush.bf16.msrb.mxu1 %v13394_v55  ;;  %v13408_v51 = vld [vmem:[#allocation4 + $0x5d8] sm:$0xff]  ;;  %v13405_v55 = vld [vmem:[#allocation4 + $0x5c0] sm:$0xff] }
 0x807   :  { %10479 = vmatpush.bf16.msra.mxu0 %v13351_v14  ;;  %v13413_v14 = vld [vmem:[#allocation4 + $0x600] sm:$0xff] }
 0x809   :  { %10501 = vmatpush.bf16.msrb.mxu2 %v13371_v6  ;;  %10514 = vmatpush.bf16.msrb.mxu3 %v13379_v5  ;;  %v13398_v6 = vld [vmem:[#allocation4 + $0x588] sm:$0xff]  ;;  %v13397_v5 = vld [vmem:[#allocation4 + $0x580] sm:$0xff] }
 0x80a   :  { %10542 = vmatpush.bf16.msrb.mxu1 %v13393_v42 }
 0x80b   :  { %10480 = vmatpush.bf16.msra.mxu0 %v13350_v2 }
 0x80d   :  { %10502 = vmatpush.bf16.msrb.mxu2 %v13370_v57  ;;  %10515 = vmatpush.bf16.msrb.mxu3 %v13378_v34 }
 0x80e   :  { %10543 = vmatpush.bf16.msrb.mxu1 %v13392_v7 }
 0x80f   :  { %10481 = vmatpush.bf16.msra.mxu0 %v13349_v10 }
 0x811   :  { %10503 = vmatpush.bf16.msrb.mxu2 %v13369_v44  ;;  %10516 = vmatpush.bf16.msrb.mxu3 %v13377_v36 }
 0x812   :  { %10482 = vmatmul.bf16.vlgmr.msra.gmra.mxu0 %v8653_v26  ;;  %10544 = vmatpush.bf16.msrb.mxu1 %v13391_v0 }
 0x813   :  { %10526 = vmatpush.bf16.msrb.mxu0 %v13388_v56 }
 0x815   :  { %10504 = vmatpush.bf16.msrb.mxu2 %v13368_v25  ;;  %10517 = vmatpush.bf16.msrb.mxu3 %v13376_v29 }
 0x816   :  { %10545 = vmatpush.bf16.msrb.mxu1 %v13390_v45 }
 0x817   :  { %10527 = vmatpush.bf16.msrb.mxu0 %v13387_v48 }
 0x819   :  { %10505 = vmatpush.bf16.msrb.mxu2 %v13367_v52  ;;  %10518 = vmatpush.bf16.msrb.mxu3 %v13375_v20 }
 0x81a   :  { %10546 = vmatpush.bf16.msrb.mxu1 %v13389_v40 }
 0x81b   :  { %10528 = vmatpush.bf16.msrb.mxu0 %v13386_v4 }
 0x81d   :  { %10506 = vmatpush.bf16.msrb.mxu2 %v13366_v60  ;;  %10519 = vmatpush.bf16.msrb.mxu3 %v13374_v16 }
 0x81e   :  { %10547 = vmatmul.bf16.vlgmr.msrb.gmra.mxu1 %v8658_v54 }
 0x81f   :  { %10529 = vmatpush.bf16.msrb.mxu0 %v13385_v19 }
 0x821   :  { %10507 = vmatpush.bf16.msrb.mxu2 %v13365_v30  ;;  %10520 = vmatpush.bf16.msrb.mxu3 %v13373_v62 }
 0x823   :  { %10530 = vmatpush.bf16.msrb.mxu0 %v13384_v8 }
 0x824   :  { %10508 = vmatmul.bf16.vlgmr.msrb.gmra.mxu2 %v8655_v33  ;;  %10521 = vmatmul.bf16.vlgmr.msrb.gmra.mxu3 %v8656_v31 }
 0x825   :  { %10552 = vmatpush.bf16.msra.mxu2 %v13404_v63  ;;  %10565 = vmatpush.bf16.msra.mxu3 %v13412_v12 }
 0x827   :  { %10531 = vmatpush.bf16.msrb.mxu0 %v13383_v53 }
 0x829   :  { %10553 = vmatpush.bf16.msra.mxu2 %v13403_v9  ;;  %10566 = vmatpush.bf16.msra.mxu3 %v13411_v22 }
 0x82b   :  { %10532 = vmatpush.bf16.msrb.mxu0 %v13382_v13 }
 0x82d   :  { %10554 = vmatpush.bf16.msra.mxu2 %v13402_v41  ;;  %10567 = vmatpush.bf16.msra.mxu3 %v13410_v17 }
 0x82f   :  { %10533 = vmatpush.bf16.msrb.mxu0 %v13381_v28 }
 0x831   :  { %10555 = vmatpush.bf16.msra.mxu2 %v13401_v18  ;;  %10568 = vmatpush.bf16.msra.mxu3 %v13409_v58 }
 0x832   :  { %10534 = vmatmul.bf16.vlgmr.msrb.gmra.mxu0 %v8657_v15 }
 0x833   :  { %10578 = vmatpush.bf16.msra.mxu0 %v13420_v35 }
 0x835   :  { %10556 = vmatpush.bf16.msra.mxu2 %v13400_v61  ;;  %10569 = vmatpush.bf16.msra.mxu3 %v13408_v51 }
 0x837   :  { %10579 = vmatpush.bf16.msra.mxu0 %v13419_v27 }
 0x839   :  { %10557 = vmatpush.bf16.msra.mxu2 %v13399_v11  ;;  %10570 = vmatpush.bf16.msra.mxu3 %v13407_v46  ;;  %v13428_v46 = vld [vmem:[%s18814_s7 + $0x38] sm:$0xff] }
 0x83a   :  { %10661 = vmatpush.bf16.msra.mxu1 %v13428_v46 }
 0x83b   :  { %10580 = vmatpush.bf16.msra.mxu0 %v13418_v47 }
 0x83d   :  { %10558 = vmatpush.bf16.msra.mxu2 %v13398_v6  ;;  %10571 = vmatpush.bf16.msra.mxu3 %v13406_v50  ;;  %v13426_v6 = vld [vmem:[%s18814_s7 + $0x28] sm:$0xff] }
 0x83f   :  { %10581 = vmatpush.bf16.msra.mxu0 %v13417_v23 }
 0x841   :  { %10559 = vmatpush.bf16.msra.mxu2 %v13397_v5  ;;  %10572 = vmatpush.bf16.msra.mxu3 %v13405_v55 }
 0x843   :  { %10582 = vmatpush.bf16.msra.mxu0 %v13416_v24  ;;  %v13427_v24 = vld [vmem:[%s18814_s7 + $0x30] sm:$0xff] }
 0x844   :  { %10662 = vmatpush.bf16.msra.mxu1 %v13427_v24 }
 0x847   :  { %10583 = vmatpush.bf16.msra.mxu0 %v13415_v3  ;;  %v10301_v37 = vpop.f32.mrf.mxu2  ;;  %v10314_v57 = vpop.f32.mrf.mxu3 }
 0x848   :  { %v10302_v34 = vadd.f32 %v10301_v37, %v18683_v21  ;;  %10663 = vmatpush.bf16.msra.mxu1 %v13426_v6 }
 0x84a   :  { %v10315_v42 = vadd.f32 %v10314_v57, %v10302_v34 }
 0x84b   :  { %10584 = vmatpush.bf16.msra.mxu0 %v13414_v59  ;;  %v13425_v59 = vld [vmem:[%s18814_s7 + $0x20] sm:$0xff] }
 0x84c   :  { %10664 = vmatpush.bf16.msra.mxu1 %v13425_v59 }
 0x84f   :  { %10585 = vmatpush.bf16.msra.mxu0 %v13413_v14  ;;  %v10303_v2 = vpop.f32.mrf.mxu2  ;;  %v10316_v44 = vpop.f32.mrf.mxu3 }
 0x850   :  { %v10327_v36 = vpop.f32.mrf.mxu0 }
 0x851   :  { %v10328_v7 = vadd.f32 %v10327_v36, %v10315_v42 }
 0x853   :  { %v10341_v10 = vadd.f32 %v18721_v39, %v10328_v7  ;;  %v13424_v7 = vld [vmem:[%s18814_s7 + $0x18] sm:$0xff] }
 0x854   :  { %v8626_v4 = vpop.permute.xlu1 %8625  ;;  %10665 = vmatpush.bf16.msra.mxu1 %v13424_v7 }
 0x857   :  { %v10353_v56 = vpop.f32.mrf.mxu2  ;;  %v10366_v25 = vpop.f32.mrf.mxu3 }
 0x858   :  { %v10329_v29 = vpop.f32.mrf.mxu0  ;;  %v10354_v0 = vadd.f32 %v10353_v56, %v10341_v10  ;;  %v10392_v52 = vpop.f32.mrf.mxu1  ;;  %v13423_v56 = vld [vmem:[%s18814_s7 + $0x10] sm:$0xff] }
 0x859   :  { %10666 = vmatpush.bf16.msra.mxu1 %v13423_v56  ;;  %v13421_v29 = vld [vmem:[%s18814_s7] sm:$0xff] }
 0x85a   :  { %v10367_v26 = vadd.f32 %v10366_v25, %v10354_v0  ;;  %v13422_v25 = vld [vmem:[%s18814_s7 + $0x8] sm:$0xff] }
 0x85c   :  { %v13461_v48 = vpop.permute.xlu0 %13460 }
 0x85d   :  { %v13463_v20 = vunpack.i.h.bf16 %v13461_v48  ;;  %v13462_v45 = vunpack.i.l.bf16 %v13461_v48  ;;  %10667 = vmatpush.bf16.msra.mxu1 %v13422_v25 }
 0x85f   :  { %v8627_v21 = vsel %vm3917_vm3, %v13462_v45, %v13463_v20  ;;  %v8628_v60 = vsel %vm3917_vm3, %v13463_v20, %v8626_v4  ;;  %v8636_v16 = vsel %vm3917_vm3, %v18730_v43, %v13462_v45  ;;  %v10355_v1 = vpop.f32.mrf.mxu2  ;;  %v10368_v40 = vpop.f32.mrf.mxu3 }
 0x860   :  { %v8659_v39 = vpack.c.bf16 %v8636_v16, %v8636_v16  ;;  %v8660_v19 = vpack.c.bf16 %v8627_v21, %v8627_v21  ;;  %v8661_v30 = vpack.c.bf16 %v8628_v60, %v8628_v60  ;;  %v10379_v62 = vpop.f32.mrf.mxu0  ;;  %v10394_v63 = vpop.f32.mrf.mxu1  ;;  %v13465_v40 = vld [vmem:[%s18815_s8] ss:$0 sm:$0xff] }
 0x861   :  { %v10380_v49 = vadd.f32 %v10379_v62, %v10367_v26  ;;  %10668 = vmatpush.bf16.msra.mxu1 %v13421_v29 }
 0x862   :  { %10560 = vmatmul.bf16.vlgmr.msra.gmra.mxu2 %v8659_v39  ;;  %10573 = vmatmul.bf16.vlgmr.msra.gmra.mxu3 %v8660_v19 }
 0x863   :  { %10586 = vmatmul.bf16.vlgmr.msra.gmra.mxu0 %v8661_v30  ;;  %v10393_v38 = vadd.f32 %v10392_v52, %v10380_v49 }
 0x867   :  { %v10405_v12 = vpop.f32.mrf.mxu2  ;;  %v10418_v8 = vpop.f32.mrf.mxu3 }
 0x868   :  { %v10406_v32 = vadd.f32 %v10405_v12, %v10393_v38  ;;  %v10381_v54 = vpop.f32.mrf.mxu0 }
 0x86a   :  { %v10419_v33 = vadd.f32 %v10418_v8, %v10406_v32 }
 0x86f   :  { %v10407_v31 = vpop.f32.mrf.mxu2  ;;  %v10420_v9 = vpop.f32.mrf.mxu3 }
 0x870   :  { %v10431_v43 = vpop.f32.mrf.mxu0  ;;  %v10444_v53 = vpop.f32.mrf.mxu1 }
 0x871   :  { %v10432_v22 = vadd.f32 %v10431_v43, %v10419_v33 }
 0x873   :  { %v10445_v13 = vadd.f32 %v10444_v53, %v10432_v22 }
 0x878   :  { %v10433_v28 = vpop.f32.mrf.mxu0  ;;  %v10446_v35 = vpop.f32.mrf.mxu1 }
 0x880   :  { %v10496_v41 = vpop.f32.mrf.mxu1 }
 0x887   :  { %v10457_v17 = vpop.f32.mrf.mxu2  ;;  %v10470_v15 = vpop.f32.mrf.mxu3 }
 0x888   :  { %v10458_v27 = vadd.f32 %v10457_v17, %v10445_v13  ;;  %v10498_v58 = vpop.f32.mrf.mxu1 }
 0x88a   :  { %v10471_v18 = vadd.f32 %v10470_v15, %v10458_v27 }
 0x88f   :  { %v10459_v47 = vpop.f32.mrf.mxu2  ;;  %v10472_v61 = vpop.f32.mrf.mxu3 }
 0x890   :  { %v10483_v51 = vpop.f32.mrf.mxu0 }
 0x891   :  { %v10484_v23 = vadd.f32 %v10483_v51, %v10471_v18 }
 0x893   :  { %v10497_v11 = vadd.f32 %v10496_v41, %v10484_v23 }
 0x898   :  { %v10485_v3 = vpop.f32.mrf.mxu0 }
 0x89b   :  { %v10548_v50 = vpop.f32.mrf.mxu1 }
 0x8a3   :  { %v10550_v5 = vpop.f32.mrf.mxu1 }
 0x8a7   :  { %v10509_v55 = vpop.f32.mrf.mxu2  ;;  %v10522_v14 = vpop.f32.mrf.mxu3 }
 0x8a8   :  { %v10510_v2 = vadd.f32 %v10509_v55, %v10497_v11 }
 0x8aa   :  { %v10523_v44 = vadd.f32 %v10522_v14, %v10510_v2 }
 0x8af   :  { %v10511_v37 = vpop.f32.mrf.mxu2  ;;  %v10524_v57 = vpop.f32.mrf.mxu3 }
 0x8b0   :  { %v10535_v34 = vpop.f32.mrf.mxu0 }
 0x8b1   :  { %v10536_v36 = vadd.f32 %v10535_v34, %v10523_v44 }
 0x8b3   :  { %v10549_v10 = vadd.f32 %v10548_v50, %v10536_v36 }
 0x8b8   :  { %v10537_v42 = vpop.f32.mrf.mxu0 }
 0x8e0   :  { %v10587_v0 = vpop.f32.mrf.mxu0 }
 0x8e5   :  { %v10561_v26 = vpop.f32.mrf.mxu2  ;;  %v10574_v48 = vpop.f32.mrf.mxu3 }
 0x8e6   :  { %v10562_v52 = vadd.f32 %v10561_v26, %v10549_v10 }
 0x8e8   :  { %v10575_v20 = vadd.f32 %v10574_v48, %v10562_v52  ;;  %v10589_v45 = vpop.f32.mrf.mxu0 }
 0x8ea   :  { %v10588_v4 = vadd.f32 %v10587_v0, %v10575_v20 }
 0x8ec   :  { %v10591_v21 = vmax.f32 %v10588_v4, 0.0 }
 0x8ed   :  { %v10563_v60 = vpop.f32.mrf.mxu2  ;;  %v10576_v16 = vpop.f32.mrf.mxu3 }
 0x8ee   :  { %v10592_v1 = vpack.c.bf16 %v10591_v21, %v10591_v21 }
 0x8f0   :  { %10669 = vmatmul.bf16.vlgmr.msra.gmra.mxu1 %v10592_v1 }
 0x96d   :  { %v10670_v39 = vpop.f32.mrf.mxu1 }
 0x96e   :  { %v10671_v19 = vadd.f32 %v13465_v40, %v10670_v39 }
 0x970   :  { %10674 = vmax.xlane.f32.xlu2 %v10671_v19 }
 0x975   :  { %v10672_v30 = vpop.f32.mrf.mxu1 }
 0x9e3   :  { %v10675_v62 = vpop.xlane.xlu2 %10674 }
 0x9e4   :  { %v10676_v49 = vsub.f32 %v10671_v19, %v10675_v62 }
 0x9e6   :  { %v10677_v38 = vmul.f32 1.442695, %v10676_v49 }
 0x9e8   :  { %13466 = vpow2.f32 %v10677_v38 }
 0x9ee   :  { %v13467_v63 = vpop.eup %13466 }
 0x9ef   :  { %10679 = vadd.xlane.f32.xlu0 %v13467_v63 }
 0xa62   :  { %v10680_v12 = vpop.xlane.xlu0 %10679 }
 0xa63   :  { %13468 = vlog2.f32 %v10680_v12 }
 0xa69   :  { %v13469_v32 = vpop.eup %13468 }
 0xa6a   :  { %v10682_v54 = vmul.f32 0.6931472, %v13469_v32 }
 0xa6c   :  { %v10683_v8 = vsub.f32 %v10676_v49, %v10682_v54 }
 0xa6e   :  { %10684 = vst [vmem:[%s18816_s9] sm:$0xff] %v10683_v8 }
 0xa6f   :  { %10689 = vsyncpa [#allocation3], 1 }
 0xa70   :  { %10690 = vsyncpa [#allocation5], 1 }

</bundles_post_ra>
